<compile_context>
chip_gen: v5e
topology: v5e:2x2
jax: 0.10.0
libtpu: 0.0.40
codegen_flags: <defaults>
</compile_context>

<pallas_src>
import jax
import jax.numpy as jnp
from jax.experimental import pallas as pl
from jax.experimental.pallas import tpu as pltpu


# ----------------------------------------------------------------------------
# helpers
# ----------------------------------------------------------------------------
def _round_up(x, m):
    return ((x + m - 1) // m) * m


def _vmem_capacity_bytes():
    """Per-core VMEM capacity; conservative (v7x) fallback if the query fails."""
    try:
        cap = getattr(pltpu.get_tpu_info(), "vmem_capacity_bytes", None)
        if cap:
            return int(cap)
    except Exception:
        pass
    return 64 * 1024 * 1024


def _vmem_estimate(tm, tk, d_model, x_item, out_item):
    """Rough VMEM working set: double-buffered tiles + in-kernel temporaries."""
    x_t = 2 * tm * d_model * x_item            # x tile (double buffered)
    o_t = 2 * tm * d_model * out_item          # out tile (double buffered)
    w_t = 2 * 2 * d_model * tk * 2             # w1 + w2 chunks, bf16, 2 buffers
    b_t = 2 * (tk + d_model) * 4               # bias blocks, f32
    h_t = tm * tk * 4                          # (tm, tk) f32 hidden intermediate
    acc = tm * d_model * 4                     # f32 accumulate / cast temporary
    return x_t + o_t + w_t + b_t + h_t + acc


def _pick_tk(d_ff, target):
    """Largest divisor of d_ff that is a multiple of 256 (then 128) and <= target."""
    for mult in (256, 128):
        best = 0
        t = mult
        limit = min(target, d_ff)
        while t <= limit:
            if d_ff % t == 0:
                best = t
            t += mult
        if best:
            return best
    return d_ff  # no aligned divisor; fall back to the full dimension


# ----------------------------------------------------------------------------
# kernels
# ----------------------------------------------------------------------------
def _ffn_kernel_resident(x_ref, w1_ref, b1_ref, w2_ref, b2_ref, o_ref):
    # Weights fully resident in VMEM (constant block index): single-step FFN.
    x = x_ref[...].astype(w1_ref.dtype)
    h = jnp.dot(x, w1_ref[...], preferred_element_type=jnp.float32)
    h = jnp.maximum(h + b1_ref[...], 0.0)
    acc = jnp.dot(h.astype(w2_ref.dtype), w2_ref[...],
                  preferred_element_type=jnp.float32)
    o_ref[...] = (acc + b2_ref[...]).astype(o_ref.dtype)


def _ffn_kernel_chunked_f32(x_ref, w1_ref, b1_ref, w2_ref, b2_ref, o_ref):
    # d_ff chunked; f32 output block stays VMEM-resident across the reduction,
    # so accumulate directly into o_ref (no scratch, no finalize copy).
    k = pl.program_id(1)

    @pl.when(k == 0)
    def _init():
        o_ref[...] = jnp.broadcast_to(b2_ref[...], o_ref.shape)

    x = x_ref[...].astype(w1_ref.dtype)
    h = jnp.dot(x, w1_ref[...], preferred_element_type=jnp.float32)
    h = jnp.maximum(h + b1_ref[...], 0.0)
    o_ref[...] += jnp.dot(h.astype(w2_ref.dtype), w2_ref[...],
                          preferred_element_type=jnp.float32)


def _ffn_kernel_chunked_cast(x_ref, w1_ref, b1_ref, w2_ref, b2_ref, o_ref,
                             acc_ref):
    # d_ff chunked with a non-f32 output dtype: keep an f32 accumulator and
    # cast once at the last reduction step.
    k = pl.program_id(1)

    @pl.when(k == 0)
    def _init():
        acc_ref[...] = jnp.broadcast_to(b2_ref[...], acc_ref.shape)

    x = x_ref[...].astype(w1_ref.dtype)
    h = jnp.dot(x, w1_ref[...], preferred_element_type=jnp.float32)
    h = jnp.maximum(h + b1_ref[...], 0.0)
    acc_ref[...] += jnp.dot(h.astype(w2_ref.dtype), w2_ref[...],
                            preferred_element_type=jnp.float32)

    @pl.when(k == pl.num_programs(1) - 1)
    def _finalize():
        o_ref[...] = acc_ref[...].astype(o_ref.dtype)


# ----------------------------------------------------------------------------
# params + wrapper
# ----------------------------------------------------------------------------
def init_ffn_params(w1, b1, w2, b2):
    """One-time param prep: bf16 weights (MXU), f32 (1, d) biases.

    Done at init so the per-call path carries no weight-cast HBM passes.
    w1: (d_model, d_ff), w2: (d_ff, d_model)  -> kernel computes x @ W + b
    (equivalent to PyTorch Linear's x @ W.T with W stored transposed).
    """
    d_model, d_ff = w1.shape
    return dict(
        w1=jnp.asarray(w1, jnp.bfloat16),
        b1=jnp.asarray(b1, jnp.float32).reshape(1, d_ff),
        w2=jnp.asarray(w2, jnp.bfloat16),
        b2=jnp.asarray(b2, jnp.float32).reshape(1, d_model),
    )


def position_wise_ffn(x, params, *, tm=512, tk_target=1024):
    """x: (batch, seq, d_model) -> fc2(relu(fc1(x))), same shape/dtype."""
    w1, b1, w2, b2 = params["w1"], params["b1"], params["w2"], params["b2"]
    out_dtype = x.dtype
    batch, seq, d_model = x.shape
    d_ff = w1.shape[1]
    M = batch * seq

    x_item = jnp.dtype(x.dtype).itemsize
    out_item = jnp.dtype(out_dtype).itemsize

    vmem_cap = _vmem_capacity_bytes()
    budget = int(0.55 * vmem_cap)          # working-set budget with headroom

    # --- row tile: never larger than the problem; keep >= 2 tiles so the
    # --- "parallel" axis feeds both TensorCores on v7x megacore.
    tm = max(8, min(tm, _round_up(M, 8)))
    if pl.cdiv(M, tm) < 2 and M > 8:
        tm = max(8, _round_up(pl.cdiv(M, 2), 8))

    def fit_tm(tm_, tk_):
        while tm_ > 64 and _vmem_estimate(tm_, tk_, d_model, x_item,
                                          out_item) > budget:
            tm_ = max(64, _round_up(tm_ // 2, 8))
        return tm_

    # --- d_ff tile: prefer fully resident weights (tk = d_ff, gk = 1).
    tk = d_ff
    tm_res = fit_tm(tm, tk)
    if _vmem_estimate(tm_res, tk, d_model, x_item, out_item) <= budget:
        tm = tm_res
    else:
        tk = _pick_tk(d_ff, tk_target)
        tm = fit_tm(tm, tk)

    gm = pl.cdiv(M, tm)
    gk = d_ff // tk
    M_pad = gm * tm

    x2d = x.reshape(M, d_model)
    if M_pad != M:
        x2d = jnp.pad(x2d, ((0, M_pad - M), (0, 0)))

    # --- cost estimate reflecting real HBM traffic ---
    weight_bytes = (w1.size + w2.size) * 2            # bf16
    bias_bytes = (b1.size + b2.size) * 4
    if gk > 1:                                        # weights re-streamed per row tile
        weight_bytes *= gm
        bias_bytes *= gm
    cost = pl.CostEstimate(
        flops=4 * M_pad * d_model * d_ff,             # two matmuls
        transcendentals=0,
        bytes_accessed=(M_pad * d_model * x_item + weight_bytes + bias_bytes
                        + M_pad * d_model * out_item))

    est = _vmem_estimate(tm, tk, d_model, x_item, out_item)
    vmem_limit = min(int(0.75 * vmem_cap),
                     max(32 * 1024 * 1024, int(1.5 * est)))

    if gk == 1:
        # Resident weights: 1-D parallel grid over row tiles; constant weight
        # block indices -> each weight DMA'd from HBM exactly once.
        grid = (gm,)
        in_specs = [
            pl.BlockSpec((tm, d_model), lambda i: (i, 0)),      # x rows
            pl.BlockSpec((d_model, d_ff), lambda i: (0, 0)),    # w1 (resident)
            pl.BlockSpec((1, d_ff), lambda i: (0, 0)),          # b1 (resident)
            pl.BlockSpec((d_ff, d_model), lambda i: (0, 0)),    # w2 (resident)
            pl.BlockSpec((1, d_model), lambda i: (0, 0)),       # b2 (resident)
        ]
        out_specs = pl.BlockSpec((tm, d_model), lambda i: (i, 0))
        dim_sem = ("parallel",)
        kernel = _ffn_kernel_resident
        scratch_shapes = []
    else:
        # Chunked reduction over d_ff (reduction axis last, "arbitrary").
        grid = (gm, gk)
        in_specs = [
            pl.BlockSpec((tm, d_model), lambda i, k: (i, 0)),   # x rows
            pl.BlockSpec((d_model, tk), lambda i, k: (0, k)),   # w1 chunk
            pl.BlockSpec((1, tk), lambda i, k: (0, k)),         # b1 chunk
            pl.BlockSpec((tk, d_model), lambda i, k: (k, 0)),   # w2 chunk
            pl.BlockSpec((1, d_model), lambda i, k: (0, 0)),    # b2
        ]
        out_specs = pl.BlockSpec((tm, d_model), lambda i, k: (i, 0))
        dim_sem = ("parallel", "arbitrary")
        if jnp.dtype(out_dtype) == jnp.float32:
            kernel = _ffn_kernel_chunked_f32      # accumulate straight into o_ref
            scratch_shapes = []
        else:
            kernel = _ffn_kernel_chunked_cast     # f32 scratch, cast at the end
            scratch_shapes = [pltpu.VMEM((tm, d_model), jnp.float32)]

    out2d = pl.pallas_call(
        kernel,
        out_shape=jax.ShapeDtypeStruct((M_pad, d_model), out_dtype),
        grid_spec=pltpu.PrefetchScalarGridSpec(
            num_scalar_prefetch=0,
            grid=grid,
            in_specs=in_specs,
            out_specs=out_specs,
            scratch_shapes=scratch_shapes,
        ),
        compiler_params=pltpu.CompilerParams(
            dimension_semantics=dim_sem,
            vmem_limit_bytes=vmem_limit,
        ),
        cost_estimate=cost,
    )(x2d, w1, b1, w2, b2)

    if M_pad != M:
        out2d = out2d[:M]
    return out2d.reshape(batch, seq, d_model)


# ----------------------------------------------------------------------------
# smoke test
# ----------------------------------------------------------------------------
if __name__ == "__main__":
    # Module constants from the spec; small batch/seq for the smoke test.
    batch, seq = 2, 8
    d_model, d_ff = 512, 2048

    key = jax.random.PRNGKey(0)
    kx, kw1, kb1, kw2, kb2 = jax.random.split(key, 5)

    x = jax.random.normal(kx, (batch, seq, d_model), dtype=jnp.float32)

    # PyTorch Linear-style uniform init bounds (deterministic).
    bound1 = 1.0 / (d_model ** 0.5)
    bound2 = 1.0 / (d_ff ** 0.5)
    w1 = jax.random.uniform(kw1, (d_model, d_ff), jnp.float32, -bound1, bound1)
    b1 = jax.random.uniform(kb1, (d_ff,), jnp.float32, -bound1, bound1)
    w2 = jax.random.uniform(kw2, (d_ff, d_model), jnp.float32, -bound2, bound2)
    b2 = jax.random.uniform(kb2, (d_model,), jnp.float32, -bound2, bound2)

    params = init_ffn_params(w1, b1, w2, b2)   # one-time bf16 weight prep

    out = position_wise_ffn(x, params)
    out = jax.block_until_ready(out)

    # Reference with the same bf16 rounding of x / weights / hidden, f32 accum.
    M = batch * seq
    xb = x.reshape(M, d_model).astype(jnp.bfloat16).astype(jnp.float32)
    w1b = w1.astype(jnp.bfloat16).astype(jnp.float32)
    w2b = w2.astype(jnp.bfloat16).astype(jnp.float32)
    h = jnp.maximum(xb @ w1b + b1, 0.0)
    hb = h.astype(jnp.bfloat16).astype(jnp.float32)
    ref = (hb @ w2b + b2).reshape(batch, seq, d_model)

    assert out.shape == (batch, seq, d_model)
    assert out.dtype == x.dtype
    assert jnp.allclose(out, ref, atol=1e-2, rtol=1e-2)

    print("KERNEL_OK")
</pallas_src>

<mosaic_0001>
module attributes {stable_mosaic.version = 11 : i64} {
  func.func @_ffn_kernel_resident(%arg0: i32, %arg1: memref<8x512xf32, #tpu.memory_space<vmem>>, %arg2: memref<512x2048xbf16, #tpu.memory_space<vmem>>, %arg3: memref<1x2048xf32, #tpu.memory_space<vmem>>, %arg4: memref<2048x512xbf16, #tpu.memory_space<vmem>>, %arg5: memref<1x512xf32, #tpu.memory_space<vmem>>, %arg6: memref<8x512xf32, #tpu.memory_space<vmem>>) attributes {dimension_semantics = [#tpu.dimension_semantics<parallel>], iteration_bounds = array<i64: 2>, scalar_prefetch = 0 : i64, scratch_operands = 0 : i64, tpu.core_type = #tpu.core_type<tc>, window_params = [{transform_indices = @transform_0, window_bounds = array<i64: 8, 512>}, {pipeline_mode = #tpu.pipeline_mode<synchronous>, transform_indices = @transform_1, window_bounds = array<i64: 512, 2048>}, {pipeline_mode = #tpu.pipeline_mode<synchronous>, transform_indices = @transform_2, window_bounds = array<i64: 1, 2048>}, {pipeline_mode = #tpu.pipeline_mode<synchronous>, transform_indices = @transform_3, window_bounds = array<i64: 2048, 512>}, {pipeline_mode = #tpu.pipeline_mode<synchronous>, transform_indices = @transform_4, window_bounds = array<i64: 1, 512>}, {transform_indices = @transform_5, window_bounds = array<i64: 8, 512>}]} {
    %c0 = arith.constant 0 : index
    %c0_0 = arith.constant 0 : index
    %0 = vector.load %arg1[%c0, %c0_0] : memref<8x512xf32, #tpu.memory_space<vmem>>, vector<8x512xf32>
    %1 = arith.truncf %0 : vector<8x512xf32> to vector<8x512xbf16>
    %c0_1 = arith.constant 0 : index
    %c0_2 = arith.constant 0 : index
    %2 = vector.load %arg2[%c0_1, %c0_2] : memref<512x2048xbf16, #tpu.memory_space<vmem>>, vector<512x2048xbf16>
    %cst = arith.constant dense<0.000000e+00> : vector<8x2048xf32>
    %3 = tpu.matmul %1, %2, %cst {dimension_numbers = #tpu.dot_dimension_numbers<[1], [0], [0], [1], [0, 0, 1, 1], [], []>} : vector<8x512xbf16>, vector<512x2048xbf16>, vector<8x2048xf32> -> vector<8x2048xf32>
    %c0_3 = arith.constant 0 : index
    %c0_4 = arith.constant 0 : index
    %4 = vector.load %arg3[%c0_3, %c0_4] : memref<1x2048xf32, #tpu.memory_space<vmem>>, vector<1x2048xf32>
    %5 = vector.broadcast %4 : vector<1x2048xf32> to vector<8x2048xf32>
    %6 = arith.addf %3, %5 : vector<8x2048xf32>
    %cst_5 = arith.constant 0.000000e+00 : f32
    %7 = vector.broadcast %cst_5 : f32 to vector<8x2048xf32>
    %8 = arith.maximumf %6, %7 : vector<8x2048xf32>
    %9 = arith.truncf %8 : vector<8x2048xf32> to vector<8x2048xbf16>
    %c0_6 = arith.constant 0 : index
    %c0_7 = arith.constant 0 : index
    %10 = vector.load %arg4[%c0_6, %c0_7] : memref<2048x512xbf16, #tpu.memory_space<vmem>>, vector<2048x512xbf16>
    %cst_8 = arith.constant dense<0.000000e+00> : vector<8x512xf32>
    %11 = tpu.matmul %9, %10, %cst_8 {dimension_numbers = #tpu.dot_dimension_numbers<[1], [0], [0], [1], [0, 0, 1, 1], [], []>} : vector<8x2048xbf16>, vector<2048x512xbf16>, vector<8x512xf32> -> vector<8x512xf32>
    %c0_9 = arith.constant 0 : index
    %c0_10 = arith.constant 0 : index
    %12 = vector.load %arg5[%c0_9, %c0_10] : memref<1x512xf32, #tpu.memory_space<vmem>>, vector<1x512xf32>
    %13 = vector.broadcast %12 : vector<1x512xf32> to vector<8x512xf32>
    %14 = arith.addf %11, %13 : vector<8x512xf32>
    %c0_11 = arith.constant 0 : index
    %c0_12 = arith.constant 0 : index
    %15 = vector.load %arg6[%c0_11, %c0_12] : memref<8x512xf32, #tpu.memory_space<vmem>>, vector<8x512xf32>
    tpu.vector_store %arg6[%c0_11, %c0_12], %14 {strides = array<i32>} : memref<8x512xf32, #tpu.memory_space<vmem>>, vector<8x512xf32>,
    return
  }
  func.func @transform_0(%arg0: i32) -> (i32, i32) {
    %c0_i32 = arith.constant 0 : i32
    %c0_i32_0 = arith.constant 0 : i32
    return %arg0, %c0_i32 : i32, i32
  }
  func.func @transform_1(%arg0: i32) -> (i32, i32) {
    %c0_i32 = arith.constant 0 : i32
    %c0_i32_0 = arith.constant 0 : i32
    %c0_i32_1 = arith.constant 0 : i32
    return %c0_i32, %c0_i32_0 : i32, i32
  }
  func.func @transform_2(%arg0: i32) -> (i32, i32) {
    %c0_i32 = arith.constant 0 : i32
    %c0_i32_0 = arith.constant 0 : i32
    %c0_i32_1 = arith.constant 0 : i32
    return %c0_i32, %c0_i32_0 : i32, i32
  }
  func.func @transform_3(%arg0: i32) -> (i32, i32) {
    %c0_i32 = arith.constant 0 : i32
    %c0_i32_0 = arith.constant 0 : i32
    %c0_i32_1 = arith.constant 0 : i32
    return %c0_i32, %c0_i32_0 : i32, i32
  }
  func.func @transform_4(%arg0: i32) -> (i32, i32) {
    %c0_i32 = arith.constant 0 : i32
    %c0_i32_0 = arith.constant 0 : i32
    %c0_i32_1 = arith.constant 0 : i32
    return %c0_i32, %c0_i32_0 : i32, i32
  }
  func.func @transform_5(%arg0: i32) -> (i32, i32) {
    %c0_i32 = arith.constant 0 : i32
    %c0_i32_0 = arith.constant 0 : i32
    return %arg0, %c0_i32 : i32, i32
  }
}

</mosaic_0001>

<bundles_post_ra>
// kernel: tpu_custom_call.1
= control target key start
LH: loop header
LB: loop body
LE: loop exit
PB: predicated region body
PF: predicated region fallthrough
CT: control target
= control target key end

     0   :  { %10 = vsyncpa [#allocation3], 0  ;;  %s14349_s0 = inlined_call_operand.hbm [shape: f32[16,512], index: 0, kind: input, shape index: {}]   ;;  %s14350_s1 = inlined_call_operand.hbm [shape: bf16[512,2048], index: 1, kind: input, shape index: {}]   ;;  %s14351_s2 = inlined_call_operand.hbm [shape: f32[1,2048], index: 2, kind: input, shape index: {}]   ;;  %s14352_s3 = inlined_call_operand.hbm [shape: bf16[2048,512], index: 3, kind: input, shape index: {}]   ;;  %s14353_s4 = inlined_call_operand.hbm [shape: f32[1,512], index: 4, kind: input, shape index: {}]   ;;  %s14354_s5 = inlined_call_operand.hbm [shape: f32[16,512], index: 5, kind: output, shape index: {}]  }
   0x1   :  { %12 = vsyncpa [#allocation3 + $0x1], 0 }
   0x2   :  { %13 = vsyncpa [#allocation6], 0 }
   0x3   :  { %14 = vsyncpa [#allocation9], 0 }
   0x4   :  { %15 = vsyncpa [#allocation4], 0 }
   0x5   :  { %17 = vsyncpa [#allocation4 + $0x1], 0  ;;  %s13831_s18 = smov 0   ;;  %s13833_s19 = smov 0  }
   0x6   :  { %s13835_s20 = smov 0   ;;  %s13837_s21 = smov 0  }
   0x7 LB: > { %s175_s24 = sshll.u32 %s14350_s1, 4  ;;  %s13855_s25 = sadd.s32 4294967295, %s13791_s21   ;;  %s13791_s21 = sphi %s13837_s21, %s14366_s21   ;;  %s13787_s20 = sphi %s13835_s20, %s14365_s20   ;;  %s13783_s19 = sphi %s13833_s19, %s14364_s19   ;;  %s13779_s18 = sphi %s13831_s18, %s14363_s18   ;;  %s176_s24 = int_to_ptr.hbm [resolvable:$true] %s175_s24 }
   0x8   : > { %p8329_p0 = scmp.ge.s32.totalorder %s13791_s21, 1  ;;  %p44_p1 = scmp.eq.s32.totalorder %s13855_s25, 0 }
   0x9   : > { %p164_p2 = scmp.lt.s32.totalorder %s13791_s21, 3  ;;  %s13793_s27 = smov [#allocation5]  }
   0xa   : > { %s177_s28 = sshll.u32 %s13793_s27, 4  ;;  %s201_s6 = sshll.u32 %s14352_s3, 4  ;;  %s178_s28 = int_to_ptr.vmem [resolvable:$true] %s177_s28  ;;  %s202_s6 = int_to_ptr.hbm [resolvable:$true] %s201_s6 }
   0xb   : > { %p13860_p3 = pnand %p8329_p0, %p164_p2  ;;  %s13794_s8 = smov [#allocation8]  }
   0xc   : > { %s203_s9 = sshll.u32 %s13794_s8, 4  ;;  %s13795_s10 = smov 1024   ;;  %s204_s9 = int_to_ptr.vmem [resolvable:$true] %s203_s9 }
   0xd   : > { %p13492_p4 = pneg %p13860_p3  ;;  %s13796_s11 = smov 64  }
   0xe   : > { %s13797_s12 = smov 256   ;;  %s13798_s13 = smov 16  }
   0xf   : > { %p13872_p6 = pnand %p13492_p4, %p44_p1  ;;  %s190_s16 = sshll.u32 %s14351_s2, 4  ;;  %s191_s16 = int_to_ptr.hbm [resolvable:$true] %s190_s16 }
  0x10   : > { %s13799_s17 = smov [#allocation7]   ;;  %s216_s27 = sshll.u32 %s14353_s4, 4  ;;  %s217_s27 = int_to_ptr.hbm [resolvable:$true] %s216_s27 }
  0x11   : > { %13495 = dma.hbm_to_vmem [thread:$0]  (!%p13872_p6), %s176_s24, 65536, %s178_s28, [#allocation6], %s13795_s10, %s13795_s10, %s13796_s11  }
  0x12   : > { %13501 = dma.hbm_to_vmem [thread:$0]  (!%p13872_p6), %s202_s6, 65536, %s204_s9, [#allocation9], %s13797_s12, %s13797_s12, %s13798_s13  }
  0x13   : > { %s192_s22 = sshll.u32 %s13799_s17, 4  ;;  %s13800_s28 = smov [#allocation10]   ;;  %s193_s22 = int_to_ptr.vmem [resolvable:$true] %s192_s22 }
  0x14   : > { %13498 = dma.hbm_to_vmem [thread:$0]  (!%p13872_p6), %s191_s16, 256, %s193_s22, [#allocation6]  }
  0x15   : > { %s218_s29 = sshll.u32 %s13800_s28, 4  ;;  %s8328_s30 = sadd.s32 4294967294, %s13791_s21   ;;  %s219_s29 = int_to_ptr.vmem [resolvable:$true] %s218_s29 }
  0x16   : > { %13504 = dma.hbm_to_vmem [thread:$0]  (!%p13872_p6), %s217_s27, 64, %s219_s29, [#allocation9]  }
  0x17   : > { %s13892_s6 = sadd.s32 1, %s13791_s21   ;;  %s30_s9 = sadd.s32 1, %s13787_s20 }
  0x18   : > { %s27_s8 = ssub.s32 %s13791_s21, %s13892_s6  ;;  %p37_p8 = scmp.ne.s32.totalorder %s13787_s20, %s13783_s19 }
  0x19   : > { %p28_p7 = scmp.eq.s32.totalorder %s27_s8, 0  ;;  %p38_p9 = scmp.eq.s32.totalorder %s13791_s21, 0 }
  0x1a   : > { %p43_p10 = scmp.ne.s32.totalorder %s13783_s19, %s13779_s18  ;;  %p151_p13 = scmp.eq.s32.totalorder %s13855_s25, 1 }
  0x1b   : > { %s13903_s10 = scalar_select %p28_p7, %s13787_s20, %s30_s9  }
  0x1c   : > { %p13905_p11 = por %p38_p9, %p37_p8  ;;  %p13911_p12 = por %p44_p1, %p43_p10 }
  0x1d   : > { %p157_p0 = scmp.eq.s32.totalorder %s8328_s30, 1  ;;  %p13517_p2 = scmp.lt.s32.totalorder %s13791_s21, 2 }
  0x1e   : > { %s229_s12 = sand.u32 1, %s13787_s20   ;;  %p13918_p4 = por %p151_p13, %p37_p8 }
  0x1f   : > { %p13922_p6 = por %p157_p0, %p43_p10  ;;  %s8335_s15 = sshll.u32 %s229_s12, 5 }
  0x20   : > { %s12446_s16 = sshll.u32 %s13791_s21, 5  ;;  %s233_s24 = scalar_lea.vmem [#allocation2], %s8335_s15 }
  0x21   : > { %s238_s23 = scalar_lea.hbm %s14349_s0, %s12446_s16  ;;  %s242_s27 = sshll.u32 %s233_s24, 4  ;;  %s243_s27 = int_to_ptr.vmem [resolvable:$true] %s242_s27 }
  0x22   : > { %s240_s28 = sshll.u32 %s238_s23, 4  ;;  %p13932_p7 = pnand %p13517_p2, %p13905_p11  ;;  %s241_s28 = int_to_ptr.hbm [resolvable:$true] %s240_s28 }
  0x23   : > { %s230_s30 = scalar_lea.sflag [#allocation3], %s229_s12  ;;  %s13687_s8 = sshra.s32 %s241_s28, 4  ;;  %s13688_s8 = int_to_ptr.hbm [resolvable:$true] %s13687_s8 }
  0x24   : > { %s13689_s9 = scalar_lea.hbm %s13688_s8, 32  ;;  %p13691_p9 = pneg %p13932_p7 }
  0x25   : > { %p13690_p8 = scmp.ne.s32.totalorder %s13688_s8, %s13689_s9  ;;  %s13694_s17 = scalar_lea.hbm %s14349_s0, 64 }
  0x26   : > { %p13695_p11 = scmp.lt.s32.totalorder %s13688_s8, %s14349_s0  ;;  %p13696_p0 = scmp.lt.s32.totalorder %s13694_s17, %s13689_s9 }
  0x27   : > { %p13692_p10 = pnand %p13691_p9, %p13690_p8 }
  0x28   : > { %p13697_p2 = por %p13696_p0, %p13695_p11 }
  0x29   : > { %p13693_p13 = pneg %p13692_p10 }
  0x2b   : > { %p13698_p5 = pnand %p13697_p2, %p13693_p13 }
  0x2d   : > { %13701 = shalt.err (!%p13698_p5)
}
  0x2e   : > { %13508 = dma.hbm_to_vmem [thread:$0]  (!%p13932_p7), %s241_s28, 512, %s243_s27, %s230_s30  }
  0x2f   : > { %251 = sbr.rel (%p13860_p3) target bundleno = 1276 (0x4fc), region = 40  ;;  %s13949_s12 = sand.u32 (!%p13860_p3), 1, %s13783_s19  }
  0x30   : > { %s8339_s23 = sshll.u32 (!%p13860_p3), %s13949_s12, 5  ;;  %s254_s24 = scalar_lea.sflag (!%p13860_p3), [#allocation3], %s13949_s12 }
  0x31   : > { %s13955_s8 = scalar_lea.vmem (!%p13860_p3), [#allocation2], %s8339_s23 }
  0x34   : > { %13762 = dma.done.wait (%p13911_p12), %s254_s24, 512  }
  0x35   : > { %13764 = vsyncadd (%p13911_p12), %s254_s24, 4294966784 }
  0x36   : > { %13766 = dma.done.wait (%p44_p1), [#allocation6], 65792  }
  0x37   : > { %13768 = vsyncadd (%p44_p1), [#allocation6], 4294901504 }
  0x38   : > { %13770 = dma.done.wait (%p44_p1), [#allocation9], 65600  }
  0x39   : > { %13772 = vsyncadd (%p44_p1), [#allocation9], 4294901696  ;;  %v8795_v0 = vld [vmem:[#allocation5 + $0x380] sm:$0xf]  ;;  %s14223_s26 = scalar_lea.vmem [#allocation11], %s8339_s23  ;;  %s13471_s7 = sshll.u32 %s13855_s25, 5 }
  0x3a   : > { %v12567_v1 = vld [vmem:[#allocation5 + $0x3bc] sm:$0xf0]  ;;  %s8215_s29 = scalar_lea.hbm %s14354_s5, %s13471_s7  ;;  %s8217_s30 = sshll.u32 %s14223_s26, 4  ;;  %s8218_s30 = int_to_ptr.vmem [resolvable:$true] %s8217_s30 }
  0x3b   : > { %v9307_v2 = vld [vmem:[#allocation5 + $0x780] sm:$0xf]  ;;  %v8796_v3 = vor.u32 %v12567_v1, %v8795_v0  ;;  %s8219_s9 = sshll.u32 %s8215_s29, 4  ;;  %s8204_s15 = scalar_lea.sflag [#allocation4], %s13949_s12  ;;  %s8220_s9 = int_to_ptr.hbm [resolvable:$true] %s8219_s9 }
  0x3c   : > { %v12695_v4 = vld [vmem:[#allocation5 + $0x7bc] sm:$0xf0]  ;;  %s13731_s25 = sshra.s32 %s8220_s9, 4  ;;  %s13737_s11 = scalar_lea.hbm %s14354_s5, 64  ;;  %s13732_s25 = int_to_ptr.hbm [resolvable:$true] %s13731_s25 }
  0x3d   : > { %v9819_v5 = vld [vmem:[#allocation5 + $0xb80] sm:$0xf]  ;;  %v9308_v7 = vor.u32 %v12695_v4, %v9307_v2  ;;  %3421 = vmatpush.bf16.msra.mxu0 %v8796_v3  ;;  %s13733_s16 = scalar_lea.hbm %s13732_s25, 32  ;;  %p13738_p12 = scmp.lt.s32.totalorder %s13732_s25, %s14354_s5 }
  0x3e   : > { %v12823_v6 = vld [vmem:[#allocation5 + $0xbbc] sm:$0xf0]  ;;  %p13734_p1 = scmp.ne.s32.totalorder %s13732_s25, %s13733_s16  ;;  %p13739_p7 = scmp.lt.s32.totalorder %s13737_s11, %s13733_s16 }
  0x3f   : > { %v9820_v8 = vor.u32 %v12823_v6, %v9819_v5  ;;  %v10331_v9 = vld [vmem:[#allocation5 + $0xf80] sm:$0xf]  ;;  %3434 = vmatpush.bf16.msra.mxu1 %v9308_v7 }
  0x40   : > { %v12951_v10 = vld [vmem:[#allocation5 + $0xfbc] sm:$0xf0]  ;;  %p13735_p3 = pnand %p13734_p1, %p13918_p4  ;;  %p13740_p8 = por %p13739_p7, %p13738_p12 }
  0x41   : > { %v8731_v11 = vld [vmem:[#allocation5 + $0x300] sm:$0xf]  ;;  %v10332_v12 = vor.u32 %v12951_v10, %v10331_v9  ;;  %3447 = vmatpush.bf16.msra.mxu2 %v9820_v8 }
  0x42   : > { %v12551_v13 = vld [vmem:[#allocation5 + $0x33c] sm:$0xf0]  ;;  %p13736_p5 = pneg %p13735_p3 }
  0x43   : > { %v9243_v14 = vld [vmem:[#allocation5 + $0x700] sm:$0xf]  ;;  %v8732_v16 = vor.u32 %v12551_v13, %v8731_v11  ;;  %3460 = vmatpush.bf16.msra.mxu3 %v10332_v12 }
  0x44   : > { %v12679_v15 = vld [vmem:[#allocation5 + $0x73c] sm:$0xf0]  ;;  %p13741_p9 = pnand %p13740_p8, %p13736_p5 }
  0x45   : > { %v9244_v17 = vor.u32 %v12679_v15, %v9243_v14  ;;  %v9755_v18 = vld [vmem:[#allocation5 + $0xb00] sm:$0xf]  ;;  %3422 = vmatpush.bf16.msra.mxu0 %v8732_v16 }
  0x46   : > { %v12807_v19 = vld [vmem:[#allocation5 + $0xb3c] sm:$0xf0] }
  0x47   : > { %v10267_v20 = vld [vmem:[#allocation5 + $0xf00] sm:$0xf]  ;;  %v9756_v21 = vor.u32 %v12807_v19, %v9755_v18  ;;  %3435 = vmatpush.bf16.msra.mxu1 %v9244_v17 }
  0x48   : > { %v12935_v22 = vld [vmem:[#allocation5 + $0xf3c] sm:$0xf0] }
  0x49   : > { %v8667_v23 = vld [vmem:[#allocation5 + $0x280] sm:$0xf]  ;;  %v10268_v25 = vor.u32 %v12935_v22, %v10267_v20  ;;  %3448 = vmatpush.bf16.msra.mxu2 %v9756_v21 }
  0x4a   : > { %v12535_v24 = vld [vmem:[#allocation5 + $0x2bc] sm:$0xf0] }
  0x4b   : > { %v9179_v26 = vld [vmem:[#allocation5 + $0x680] sm:$0xf]  ;;  %v8668_v29 = vor.u32 %v12535_v24, %v8667_v23  ;;  %3461 = vmatpush.bf16.msra.mxu3 %v10268_v25 }
  0x4c   : > { %v12663_v27 = vld [vmem:[#allocation5 + $0x6bc] sm:$0xf0] }
  0x4d   : > { %v9691_v28 = vld [vmem:[#allocation5 + $0xa80] sm:$0xf]  ;;  %v9180_v33 = vor.u32 %v12663_v27, %v9179_v26  ;;  %3423 = vmatpush.bf16.msra.mxu0 %v8668_v29  ;;  %v8797_v29 = vld [vmem:[#allocation5 + $0x3c0] sm:$0xf0] }
  0x4e   : > { %v12791_v30 = vld [vmem:[#allocation5 + $0xabc] sm:$0xf0] }
  0x4f   : > { %v10203_v31 = vld [vmem:[#allocation5 + $0xe80] sm:$0xf]  ;;  %v9692_v34 = vor.u32 %v12791_v30, %v9691_v28  ;;  %3436 = vmatpush.bf16.msra.mxu1 %v9180_v33  ;;  %v12559_v28 = vld [vmem:[#allocation5 + $0x384] sm:$0xf] }
  0x50   : > { %v12919_v32 = vld [vmem:[#allocation5 + $0xebc] sm:$0xf0]  ;;  %v12687_v30 = vld [vmem:[#allocation5 + $0x784] sm:$0xf] }
  0x51   : > { %v8603_v35 = vld [vmem:[#allocation5 + $0x200] sm:$0xf]  ;;  %v10204_v38 = vor.u32 %v12919_v32, %v10203_v31  ;;  %3449 = vmatpush.bf16.msra.mxu2 %v9692_v34  ;;  %v9309_v32 = vld [vmem:[#allocation5 + $0x7c0] sm:$0xf0] }
  0x52   : > { %v12519_v36 = vld [vmem:[#allocation5 + $0x23c] sm:$0xf0]  ;;  %v12815_v33 = vld [vmem:[#allocation5 + $0xb84] sm:$0xf] }
  0x53   : > { %v9115_v37 = vld [vmem:[#allocation5 + $0x600] sm:$0xf]  ;;  %v8604_v44 = vor.u32 %v12519_v36, %v8603_v35  ;;  %3462 = vmatpush.bf16.msra.mxu3 %v10204_v38  ;;  %v9821_v34 = vld [vmem:[#allocation5 + $0xbc0] sm:$0xf0] }
  0x54   : > { %v12647_v39 = vld [vmem:[#allocation5 + $0x63c] sm:$0xf0]  ;;  %v10333_v38 = vld [vmem:[#allocation5 + $0xfc0] sm:$0xf0] }
  0x55   : > { %v9627_v40 = vld [vmem:[#allocation5 + $0xa00] sm:$0xf]  ;;  %v9116_v45 = vor.u32 %v12647_v39, %v9115_v37  ;;  %3424 = vmatpush.bf16.msra.mxu0 %v8604_v44  ;;  %v12943_v37 = vld [vmem:[#allocation5 + $0xf84] sm:$0xf] }
  0x56   : > { %v12775_v41 = vld [vmem:[#allocation5 + $0xa3c] sm:$0xf0]  ;;  %v8733_v44 = vld [vmem:[#allocation5 + $0x340] sm:$0xf0] }
  0x57   : > { %v10139_v42 = vld [vmem:[#allocation5 + $0xe00] sm:$0xf]  ;;  %v9628_v46 = vor.u32 %v12775_v41, %v9627_v40  ;;  %3437 = vmatpush.bf16.msra.mxu1 %v9116_v45  ;;  %v8800_v40 = vor.u32 %v12559_v28, %v8797_v29  ;;  %v9312_v41 = vor.u32 %v12687_v30, %v9309_v32  ;;  %v12671_v45 = vld [vmem:[#allocation5 + $0x704] sm:$0xf] }
  0x58   : > { %v12903_v43 = vld [vmem:[#allocation5 + $0xe3c] sm:$0xf0]  ;;  %v12751_v28 = vld [vmem:[#allocation5 + $0x984] sm:$0xf] }
  0x59   : > { %v8539_v47 = vld [vmem:[#allocation5 + $0x180] sm:$0xf]  ;;  %v10140_v50 = vor.u32 %v12903_v43, %v10139_v42  ;;  %3450 = vmatpush.bf16.msra.mxu2 %v9628_v46  ;;  %v9824_v42 = vor.u32 %v12815_v33, %v9821_v34  ;;  %v12543_v43 = vld [vmem:[#allocation5 + $0x304] sm:$0xf]  ;;  %v10336_v46 = vor.u32 %v12943_v37, %v10333_v38 }
  0x5a   : > { %v12503_v48 = vld [vmem:[#allocation5 + $0x1bc] sm:$0xf0]  ;;  %v9565_v29 = vld [vmem:[#allocation5 + $0x9c0] sm:$0xf0] }
  0x5b   : > { %v9051_v49 = vld [vmem:[#allocation5 + $0x580] sm:$0xf]  ;;  %v8540_v56 = vor.u32 %v12503_v48, %v8539_v47  ;;  %3463 = vmatpush.bf16.msra.mxu3 %v10140_v50  ;;  %v9245_v47 = vld [vmem:[#allocation5 + $0x740] sm:$0xf0]  ;;  %v9568_v34 = vor.u32 %v12751_v28, %v9565_v29  ;;  %v9763_v28 = vld [vmem:[#allocation5 + $0xb08] sm:$0xf] }
  0x5c   : > { %v12631_v51 = vld [vmem:[#allocation5 + $0x5bc] sm:$0xf0]  ;;  %v12799_v48 = vld [vmem:[#allocation5 + $0xb04] sm:$0xf]  ;;  %v12808_v29 = vld [vmem:[#allocation5 + $0xb44] sm:$0xf0] }
  0x5d   : > { %v9563_v52 = vld [vmem:[#allocation5 + $0x980] sm:$0xf]  ;;  %v9052_v57 = vor.u32 %v12631_v51, %v9051_v49  ;;  %3425 = vmatpush.bf16.msra.mxu0 %v8540_v56  ;;  %v9757_v49 = vld [vmem:[#allocation5 + $0xb40] sm:$0xf0] }
  0x5e   : > { %v12759_v53 = vld [vmem:[#allocation5 + $0x9bc] sm:$0xf0]  ;;  %v12927_v50 = vld [vmem:[#allocation5 + $0xf04] sm:$0xf] }
  0x5f   : > { %v10075_v54 = vld [vmem:[#allocation5 + $0xd80] sm:$0xf]  ;;  %v9564_v58 = vor.u32 %v12759_v53, %v9563_v52  ;;  %3438 = vmatpush.bf16.msra.mxu1 %v9052_v57  ;;  %v10269_v51 = vld [vmem:[#allocation5 + $0xf40] sm:$0xf0]  ;;  %v8736_v52 = vor.u32 %v12543_v43, %v8733_v44 }
  0x60   : > { %v12887_v55 = vld [vmem:[#allocation5 + $0xdbc] sm:$0xf0]  ;;  %v12527_v53 = vld [vmem:[#allocation5 + $0x284] sm:$0xf] }
  0x61   : > { %v8475_v59 = vld [vmem:[#allocation5 + $0x100] sm:$0xf]  ;;  %v10076_v62 = vor.u32 %v12887_v55, %v10075_v54  ;;  %3451 = vmatpush.bf16.msra.mxu2 %v9564_v58  ;;  %v9248_v54 = vor.u32 %v12671_v45, %v9245_v47  ;;  %v9760_v55 = vor.u32 %v12799_v48, %v9757_v49  ;;  %v8669_v56 = vld [vmem:[#allocation5 + $0x2c0] sm:$0xf0] }
  0x62   : > { %v12487_v60 = vld [vmem:[#allocation5 + $0x13c] sm:$0xf0]  ;;  %v12655_v57 = vld [vmem:[#allocation5 + $0x684] sm:$0xf] }
  0x63   : > { %v8987_v61 = vld [vmem:[#allocation5 + $0x500] sm:$0xf]  ;;  %v8476_v4 = vor.u32 %v12487_v60, %v8475_v59  ;;  %3464 = vmatpush.bf16.msra.mxu3 %v10076_v62  ;;  %v9181_v58 = vld [vmem:[#allocation5 + $0x6c0] sm:$0xf0]  ;;  %v10272_v59 = vor.u32 %v12927_v50, %v10269_v51 }
  0x64   : > { %v12615_v63 = vld [vmem:[#allocation5 + $0x53c] sm:$0xf0]  ;;  %v12783_v60 = vld [vmem:[#allocation5 + $0xa84] sm:$0xf] }
  0x65   : > { %v9499_v0 = vld [vmem:[#allocation5 + $0x900] sm:$0xf]  ;;  %v8988_v5 = vor.u32 %v12615_v63, %v8987_v61  ;;  %3426 = vmatpush.bf16.msra.mxu0 %v8476_v4  ;;  %v9693_v61 = vld [vmem:[#allocation5 + $0xac0] sm:$0xf0] }
  0x66   : > { %v12743_v1 = vld [vmem:[#allocation5 + $0x93c] sm:$0xf0]  ;;  %v12911_v62 = vld [vmem:[#allocation5 + $0xe84] sm:$0xf]  ;;  %v9696_v4 = vor.u32 %v12783_v60, %v9693_v61 }
  0x67   : > { %v10011_v2 = vld [vmem:[#allocation5 + $0xd00] sm:$0xf]  ;;  %v9500_v6 = vor.u32 %v12743_v1, %v9499_v0  ;;  %3439 = vmatpush.bf16.msra.mxu1 %v8988_v5  ;;  %v10205_v63 = vld [vmem:[#allocation5 + $0xec0] sm:$0xf0]  ;;  %v8672_v0 = vor.u32 %v12527_v53, %v8669_v56  ;;  %v9184_v1 = vor.u32 %v12655_v57, %v9181_v58 }
  0x68   : > { %v12871_v3 = vld [vmem:[#allocation5 + $0xd3c] sm:$0xf0]  ;;  %v12511_v5 = vld [vmem:[#allocation5 + $0x204] sm:$0xf] }
  0x69   : > { %v8411_v7 = vld [vmem:[#allocation5 + $0x80] sm:$0xf]  ;;  %v10012_v10 = vor.u32 %v12871_v3, %v10011_v2  ;;  %3452 = vmatpush.bf16.msra.mxu2 %v9500_v6  ;;  %v307_v2 = vld [vmem:[%s13955_s8 + $0x10] sm:$0xff]  ;;  %v308_v3 = vld [vmem:[%s13955_s8 + $0x18] sm:$0xff] }
  0x6a   : > { %v12471_v8 = vld [vmem:[#allocation5 + $0xbc] sm:$0xf0]  ;;  %v8605_v6 = vld [vmem:[#allocation5 + $0x240] sm:$0xf0] }
  0x6b   : > { %v8923_v9 = vld [vmem:[#allocation5 + $0x480] sm:$0xf]  ;;  %v8412_v16 = vor.u32 %v12471_v8, %v8411_v7  ;;  %3465 = vmatpush.bf16.msra.mxu3 %v10012_v10  ;;  %v12639_v7 = vld [vmem:[#allocation5 + $0x604] sm:$0xf]  ;;  %v13971_v8 = vpack.c.bf16 %v307_v2, %v307_v2  ;;  %v10208_v10 = vor.u32 %v12911_v62, %v10205_v63 }
  0x6c   : > { %v12599_v11 = vld [vmem:[#allocation5 + $0x4bc] sm:$0xf0]  ;;  %v12879_v30 = vld [vmem:[#allocation5 + $0xd84] sm:$0xf] }
  0x6d   : > { %v9435_v12 = vld [vmem:[#allocation5 + $0x880] sm:$0xf]  ;;  %v8924_v19 = vor.u32 %v12599_v11, %v8923_v9  ;;  %3427 = vmatpush.bf16.msra.mxu0 %v8412_v16  ;;  %v13973_v9 = vpack.c.bf16 %v308_v3, %v308_v3  ;;  %v9117_v11 = vld [vmem:[#allocation5 + $0x640] sm:$0xf0] }
  0x6e   : > { %v12727_v13 = vld [vmem:[#allocation5 + $0x8bc] sm:$0xf0]  ;;  %v12607_v37 = vld [vmem:[#allocation5 + $0x504] sm:$0xf] }
  0x6f   : > { %v9947_v14 = vld [vmem:[#allocation5 + $0xc80] sm:$0xf]  ;;  %v9436_v20 = vor.u32 %v12727_v13, %v9435_v12  ;;  %3440 = vmatpush.bf16.msra.mxu1 %v8924_v19  ;;  %v12767_v12 = vld [vmem:[#allocation5 + $0xa04] sm:$0xf]  ;;  %v306_v19 = vld [vmem:[%s13955_s8 + $0x8] sm:$0xff] }
  0x70   : > { %v12855_v15 = vld [vmem:[#allocation5 + $0xcbc] sm:$0xf0]  ;;  %v9629_v13 = vld [vmem:[#allocation5 + $0xa40] sm:$0xf0] }
  0x71   : > { %v8347_v17 = vld [vmem:[#allocation5] sm:$0xf]  ;;  %v9948_v24 = vor.u32 %v12855_v15, %v9947_v14  ;;  %3453 = vmatpush.bf16.msra.mxu2 %v9436_v20  ;;  %v12895_v14 = vld [vmem:[#allocation5 + $0xe04] sm:$0xf]  ;;  %v9120_v20 = vor.u32 %v12639_v7, %v9117_v11  ;;  %v9827_v11 = vld [vmem:[#allocation5 + $0xb88] sm:$0xf] }
  0x72   : > { %v12455_v18 = vld [vmem:[#allocation5 + $0x3c] sm:$0xf0]  ;;  %v10141_v15 = vld [vmem:[#allocation5 + $0xe40] sm:$0xf0] }
  0x73   : > { %v8859_v21 = vld [vmem:[#allocation5 + $0x400] sm:$0xf]  ;;  %v8348_v31 = vor.u32 %v12455_v18, %v8347_v17  ;;  %3466 = vmatpush.bf16.msra.mxu3 %v9948_v24  ;;  %v8608_v17 = vor.u32 %v12511_v5, %v8605_v6  ;;  %v12623_v24 = vld [vmem:[#allocation5 + $0x584] sm:$0xf]  ;;  %v12568_v5 = vld [vmem:[#allocation5 + $0x3c4] sm:$0xf0] }
  0x74   : > { %v12583_v22 = vld [vmem:[#allocation5 + $0x43c] sm:$0xf0]  ;;  %v10013_v43 = vld [vmem:[#allocation5 + $0xd40] sm:$0xf0]  ;;  %v9315_v6 = vld [vmem:[#allocation5 + $0x788] sm:$0xf] }
  0x75   : > { %v9371_v23 = vld [vmem:[#allocation5 + $0x800] sm:$0xf]  ;;  %v8860_v35 = vor.u32 %v12583_v22, %v8859_v21  ;;  %3428 = vmatpush.bf16.msra.mxu0 %v8348_v31  ;;  %v9632_v21 = vor.u32 %v12767_v12, %v9629_v13  ;;  %v12495_v22 = vld [vmem:[#allocation5 + $0x184] sm:$0xf]  ;;  %v12824_v12 = vld [vmem:[#allocation5 + $0xbc4] sm:$0xf0] }
  0x76   : > { %v12711_v25 = vld [vmem:[#allocation5 + $0x83c] sm:$0xf0]  ;;  %v10077_v31 = vld [vmem:[#allocation5 + $0xdc0] sm:$0xf0] }
  0x77   : > { %v9883_v26 = vld [vmem:[#allocation5 + $0xc00] sm:$0xf]  ;;  %v9372_v36 = vor.u32 %v12711_v25, %v9371_v23  ;;  %3441 = vmatpush.bf16.msra.mxu1 %v8860_v35  ;;  %v8541_v23 = vld [vmem:[#allocation5 + $0x1c0] sm:$0xf0]  ;;  %v13981_v25 = vpack.c.bf16 %v306_v19, %v306_v19  ;;  %v10080_v38 = vor.u32 %v12879_v30, %v10077_v31  ;;  %v10275_v30 = vld [vmem:[#allocation5 + $0xf08] sm:$0xf] }
  0x78   : > { %v12839_v27 = vld [vmem:[#allocation5 + $0xc3c] sm:$0xf0]  ;;  %v8544_v32 = vor.u32 %v12495_v22, %v8541_v23  ;;  %v12479_v35 = vld [vmem:[#allocation5 + $0x104] sm:$0xf]  ;;  %v8739_v22 = vld [vmem:[#allocation5 + $0x308] sm:$0xf] }
  0x79   : > { %v9884_v39 = vor.u32 %v12839_v27, %v9883_v26  ;;  %3454 = vmatpush.bf16.msra.mxu2 %v9372_v36  ;;  %3473 = vmatpush.bf16.msrb.mxu0 %v8800_v40  ;;  %v305_v16 = vld [vmem:[%s13955_s8] sm:$0xff]  ;;  %v10144_v26 = vor.u32 %v12895_v14, %v10141_v15  ;;  %v10339_v15 = vld [vmem:[#allocation5 + $0xf88] sm:$0xf] }
  0x7a   : > { %v13978_v18 = vpack.c.bf16 %v305_v16, %v305_v16  ;;  %v9053_v27 = vld [vmem:[#allocation5 + $0x5c0] sm:$0xf0]  ;;  %3442 = vmatmul.bf16.vlgmr.msra.gmra.mxu1 %v13981_v25  ;;  %v12952_v16 = vld [vmem:[#allocation5 + $0xfc4] sm:$0xf0] }
  0x7b   : > { %3467 = vmatpush.bf16.msra.mxu3 %v9884_v39  ;;  %3486 = vmatpush.bf16.msrb.mxu1 %v9312_v41  ;;  %v9056_v33 = vor.u32 %v12623_v24, %v9053_v27  ;;  %v8477_v36 = vld [vmem:[#allocation5 + $0x140] sm:$0xf0]  ;;  %v12552_v23 = vld [vmem:[#allocation5 + $0x344] sm:$0xf0] }
  0x7c   : > { %3455 = vmatmul.bf16.vlgmr.msra.gmra.mxu2 %v13971_v8  ;;  %3429 = vmatmul.bf16.vlgmr.msra.gmra.mxu0 %v13978_v18  ;;  %v8989_v39 = vld [vmem:[#allocation5 + $0x540] sm:$0xf0]  ;;  %v8480_v44 = vor.u32 %v12479_v35, %v8477_v36  ;;  %v9251_v24 = vld [vmem:[#allocation5 + $0x708] sm:$0xf] }
  0x7d   : > { %3499 = vmatpush.bf16.msrb.mxu2 %v9824_v42  ;;  %3474 = vmatpush.bf16.msrb.mxu0 %v8736_v52  ;;  %v12735_v40 = vld [vmem:[#allocation5 + $0x904] sm:$0xf]  ;;  %v8992_v45 = vor.u32 %v12607_v37, %v8989_v39  ;;  %v12680_v27 = vld [vmem:[#allocation5 + $0x744] sm:$0xf0] }
  0x7e   : > { %3468 = vmatmul.bf16.vlgmr.msra.gmra.mxu3 %v13973_v9  ;;  %v9501_v41 = vld [vmem:[#allocation5 + $0x940] sm:$0xf0]  ;;  %v12936_v31 = vld [vmem:[#allocation5 + $0xf44] sm:$0xf0] }
  0x7f   : > { %3512 = vmatpush.bf16.msrb.mxu3 %v10336_v46  ;;  %3487 = vmatpush.bf16.msrb.mxu1 %v9248_v54  ;;  %v12863_v42 = vld [vmem:[#allocation5 + $0xd04] sm:$0xf]  ;;  %v9504_v46 = vor.u32 %v12735_v40, %v9501_v41  ;;  %v8675_v35 = vld [vmem:[#allocation5 + $0x288] sm:$0xf] }
  0x80   : > { %v12463_v47 = vld [vmem:[#allocation5 + $0x84] sm:$0xf]  ;;  %v10016_v50 = vor.u32 %v12863_v42, %v10013_v43  ;;  %v12536_v36 = vld [vmem:[#allocation5 + $0x2c4] sm:$0xf0] }
  0x81   : > { %3500 = vmatpush.bf16.msrb.mxu2 %v9760_v55  ;;  %3475 = vmatpush.bf16.msrb.mxu0 %v8672_v0  ;;  %v8413_v48 = vld [vmem:[#allocation5 + $0xc0] sm:$0xf0]  ;;  %v9187_v37 = vld [vmem:[#allocation5 + $0x688] sm:$0xf] }
  0x82   : > { %v12591_v49 = vld [vmem:[#allocation5 + $0x484] sm:$0xf]  ;;  %v8416_v56 = vor.u32 %v12463_v47, %v8413_v48  ;;  %v12664_v39 = vld [vmem:[#allocation5 + $0x6c4] sm:$0xf0] }
  0x83   : > { %3513 = vmatpush.bf16.msrb.mxu3 %v10272_v59  ;;  %3488 = vmatpush.bf16.msrb.mxu1 %v9184_v1  ;;  %v8925_v51 = vld [vmem:[#allocation5 + $0x4c0] sm:$0xf0]  ;;  %v9699_v40 = vld [vmem:[#allocation5 + $0xa88] sm:$0xf] }
  0x84   : > { %v12719_v52 = vld [vmem:[#allocation5 + $0x884] sm:$0xf]  ;;  %v8928_v59 = vor.u32 %v12591_v49, %v8925_v51  ;;  %v12792_v41 = vld [vmem:[#allocation5 + $0xac4] sm:$0xf0] }
  0x85   : > { %3501 = vmatpush.bf16.msrb.mxu2 %v9696_v4  ;;  %3476 = vmatpush.bf16.msrb.mxu0 %v8608_v17  ;;  %v9437_v53 = vld [vmem:[#allocation5 + $0x8c0] sm:$0xf0]  ;;  %v8803_v4 = vld [vmem:[#allocation5 + $0x388] sm:$0xf] }
  0x86   : > { %v12847_v54 = vld [vmem:[#allocation5 + $0xc84] sm:$0xf]  ;;  %v9440_v60 = vor.u32 %v12719_v52, %v9437_v53  ;;  %v8804_v19 = vor.u32 %v12568_v5, %v8803_v4  ;;  %v10211_v42 = vld [vmem:[#allocation5 + $0xe88] sm:$0xf] }
  0x87   : > { %3514 = vmatpush.bf16.msrb.mxu3 %v10208_v10  ;;  %3489 = vmatpush.bf16.msrb.mxu1 %v9120_v20  ;;  %v9949_v55 = vld [vmem:[#allocation5 + $0xcc0] sm:$0xf0]  ;;  %v12696_v10 = vld [vmem:[#allocation5 + $0x7c4] sm:$0xf0] }
  0x88   : > { %v12447_v57 = vld [vmem:[#allocation5 + $0x4] sm:$0xf]  ;;  %v9952_v0 = vor.u32 %v12847_v54, %v9949_v55  ;;  %v9316_v20 = vor.u32 %v12696_v10, %v9315_v6  ;;  %v12920_v43 = vld [vmem:[#allocation5 + $0xec4] sm:$0xf0] }
  0x89   : > { %3502 = vmatpush.bf16.msrb.mxu2 %v9632_v21  ;;  %3477 = vmatpush.bf16.msrb.mxu0 %v8544_v32  ;;  %v8349_v58 = vld [vmem:[#allocation5 + $0x40] sm:$0xf0]  ;;  %v9828_v21 = vor.u32 %v12824_v12, %v9827_v11  ;;  %v8740_v32 = vor.u32 %v12552_v23, %v8739_v22  ;;  %v8611_v47 = vld [vmem:[#allocation5 + $0x208] sm:$0xf] }
  0x8a   : > { %v12575_v61 = vld [vmem:[#allocation5 + $0x404] sm:$0xf]  ;;  %v8352_v7 = vor.u32 %v12447_v57, %v8349_v58  ;;  %v12520_v48 = vld [vmem:[#allocation5 + $0x244] sm:$0xf0] }
  0x8b   : > { %3515 = vmatpush.bf16.msrb.mxu3 %v10144_v26  ;;  %3490 = vmatpush.bf16.msrb.mxu1 %v9056_v33  ;;  %v8861_v62 = vld [vmem:[#allocation5 + $0x440] sm:$0xf0]  ;;  %v10340_v26 = vor.u32 %v12952_v16, %v10339_v15  ;;  %v9252_v33 = vor.u32 %v12680_v27, %v9251_v24  ;;  %v9123_v49 = vld [vmem:[#allocation5 + $0x608] sm:$0xf] }
  0x8c   : > { %v12703_v63 = vld [vmem:[#allocation5 + $0x804] sm:$0xf]  ;;  %v8864_v13 = vor.u32 %v12575_v61, %v8861_v62  ;;  %v12648_v51 = vld [vmem:[#allocation5 + $0x644] sm:$0xf0] }
  0x8d   : > { %3503 = vmatpush.bf16.msrb.mxu2 %v9568_v34  ;;  %3478 = vmatpush.bf16.msrb.mxu0 %v8480_v44  ;;  %v9373_v1 = vld [vmem:[#allocation5 + $0x840] sm:$0xf0]  ;;  %v9764_v34 = vor.u32 %v12808_v29, %v9763_v28  ;;  %v8676_v44 = vor.u32 %v12536_v36, %v8675_v35  ;;  %v9635_v52 = vld [vmem:[#allocation5 + $0xa08] sm:$0xf]  ;;  %v9124_v57 = vor.u32 %v12648_v51, %v9123_v49  ;;  %v12816_v49 = vld [vmem:[#allocation5 + $0xb8c] sm:$0xf] }
  0x8e   : > { %v12831_v2 = vld [vmem:[#allocation5 + $0xc04] sm:$0xf]  ;;  %v9376_v14 = vor.u32 %v12703_v63, %v9373_v1  ;;  %v12776_v53 = vld [vmem:[#allocation5 + $0xa44] sm:$0xf0] }
  0x8f   : > { %3516 = vmatpush.bf16.msrb.mxu3 %v10080_v38  ;;  %3491 = vmatpush.bf16.msrb.mxu1 %v8992_v45  ;;  %v9885_v3 = vld [vmem:[#allocation5 + $0xc40] sm:$0xf0]  ;;  %v10276_v38 = vor.u32 %v12936_v31, %v10275_v30  ;;  %v9188_v45 = vor.u32 %v12664_v39, %v9187_v37  ;;  %v10147_v54 = vld [vmem:[#allocation5 + $0xe08] sm:$0xf]  ;;  %v9636_v58 = vor.u32 %v12776_v53, %v9635_v52  ;;  %v12944_v53 = vld [vmem:[#allocation5 + $0xf8c] sm:$0xf] }
  0x90   : > { %v9888_v17 = vor.u32 %v12831_v2, %v9885_v3  ;;  %v12904_v55 = vld [vmem:[#allocation5 + $0xe44] sm:$0xf0] }
  0x91   : > { %3504 = vmatpush.bf16.msrb.mxu2 %v9504_v46  ;;  %3479 = vmatpush.bf16.msrb.mxu0 %v8416_v56  ;;  %v9700_v46 = vor.u32 %v12792_v41, %v9699_v40  ;;  %v8612_v56 = vor.u32 %v12520_v48, %v8611_v47  ;;  %v9059_v61 = vld [vmem:[#allocation5 + $0x588] sm:$0xf]  ;;  %v10148_v62 = vor.u32 %v12904_v55, %v10147_v54  ;;  %v9317_v48 = vld [vmem:[#allocation5 + $0x7c8] sm:$0xf0] }
  0x92   : > { %v12632_v63 = vld [vmem:[#allocation5 + $0x5c4] sm:$0xf0]  ;;  %v10341_v54 = vld [vmem:[#allocation5 + $0xfc8] sm:$0xf0] }
  0x93   : > { %3517 = vmatpush.bf16.msrb.mxu3 %v10016_v50  ;;  %3492 = vmatpush.bf16.msrb.mxu1 %v8928_v59  ;;  %v10212_v50 = vor.u32 %v12920_v43, %v10211_v42  ;;  %v8547_v59 = vld [vmem:[#allocation5 + $0x188] sm:$0xf]  ;;  %v9060_v5 = vor.u32 %v12632_v63, %v9059_v61  ;;  %v12672_v61 = vld [vmem:[#allocation5 + $0x70c] sm:$0xf] }
  0x94   : > { %v12760_v1 = vld [vmem:[#allocation5 + $0x9c4] sm:$0xf0]  ;;  %v9253_v63 = vld [vmem:[#allocation5 + $0x748] sm:$0xf0] }
  0x95   : > { %3505 = vmatpush.bf16.msrb.mxu2 %v9440_v60  ;;  %3480 = vmatpush.bf16.msrb.mxu0 %v8352_v7  ;;  %v12504_v60 = vld [vmem:[#allocation5 + $0x1c4] sm:$0xf0] }
  0x96   : > { %v10083_v2 = vld [vmem:[#allocation5 + $0xd88] sm:$0xf]  ;;  %v8548_v4 = vor.u32 %v12504_v60, %v8547_v59  ;;  %v12544_v59 = vld [vmem:[#allocation5 + $0x30c] sm:$0xf] }
  0x97   : > { %3518 = vmatpush.bf16.msrb.mxu3 %v9952_v0  ;;  %3493 = vmatpush.bf16.msrb.mxu1 %v8864_v13  ;;  %v9571_v0 = vld [vmem:[#allocation5 + $0x988] sm:$0xf]  ;;  %v8741_v60 = vld [vmem:[#allocation5 + $0x348] sm:$0xf0] }
  0x98   : > { %3481 = vmatmul.bf16.vlgmr.msrb.gmra.mxu0 %v13978_v18  ;;  %v12888_v3 = vld [vmem:[#allocation5 + $0xdc4] sm:$0xf0]  ;;  %v9572_v6 = vor.u32 %v12760_v1, %v9571_v0  ;;  %v12800_v0 = vld [vmem:[#allocation5 + $0xb0c] sm:$0xf] }
  0x99   : > { %3506 = vmatpush.bf16.msrb.mxu2 %v9376_v14  ;;  %3525 = vmatpush.bf16.msra.mxu0 %v8804_v19  ;;  %v8483_v7 = vld [vmem:[#allocation5 + $0x108] sm:$0xf]  ;;  %v10084_v12 = vor.u32 %v12888_v3, %v10083_v2  ;;  %v9765_v1 = vld [vmem:[#allocation5 + $0xb48] sm:$0xf0] }
  0x9a   : > { %3494 = vmatmul.bf16.vlgmr.msrb.gmra.mxu1 %v13981_v25  ;;  %v12488_v10 = vld [vmem:[#allocation5 + $0x144] sm:$0xf0]  ;;  %v12928_v2 = vld [vmem:[#allocation5 + $0xf0c] sm:$0xf] }
  0x9b   : > { %3519 = vmatpush.bf16.msrb.mxu3 %v9888_v17  ;;  %3538 = vmatpush.bf16.msra.mxu1 %v9316_v20  ;;  %v8995_v11 = vld [vmem:[#allocation5 + $0x508] sm:$0xf]  ;;  %v8484_v19 = vor.u32 %v12488_v10, %v8483_v7  ;;  %v10277_v3 = vld [vmem:[#allocation5 + $0xf48] sm:$0xf0] }
  0x9c   : > { %3507 = vmatmul.bf16.vlgmr.msrb.gmra.mxu2 %v13971_v8  ;;  %v12616_v13 = vld [vmem:[#allocation5 + $0x544] sm:$0xf0]  ;;  %v12528_v7 = vld [vmem:[#allocation5 + $0x28c] sm:$0xf] }
  0x9d   : > { %3551 = vmatpush.bf16.msra.mxu2 %v9828_v21  ;;  %3526 = vmatpush.bf16.msra.mxu0 %v8740_v32  ;;  %v9507_v14 = vld [vmem:[#allocation5 + $0x908] sm:$0xf]  ;;  %v8996_v20 = vor.u32 %v12616_v13, %v8995_v11  ;;  %v8677_v10 = vld [vmem:[#allocation5 + $0x2c8] sm:$0xf0] }
  0x9e   : > { %3520 = vmatmul.bf16.vlgmr.msrb.gmra.mxu3 %v13973_v9  ;;  %v12744_v15 = vld [vmem:[#allocation5 + $0x944] sm:$0xf0]  ;;  %v12656_v11 = vld [vmem:[#allocation5 + $0x68c] sm:$0xf] }
  0x9f   : > { %3564 = vmatpush.bf16.msra.mxu3 %v10340_v26  ;;  %3539 = vmatpush.bf16.msra.mxu1 %v9252_v33  ;;  %v10019_v16 = vld [vmem:[#allocation5 + $0xd08] sm:$0xf]  ;;  %v9508_v21 = vor.u32 %v12744_v15, %v9507_v14  ;;  %v9189_v13 = vld [vmem:[#allocation5 + $0x6c8] sm:$0xf0] }
  0xa0   : > { %v12872_v17 = vld [vmem:[#allocation5 + $0xd44] sm:$0xf0]  ;;  %v12784_v14 = vld [vmem:[#allocation5 + $0xa8c] sm:$0xf] }
  0xa1   : > { %3552 = vmatpush.bf16.msra.mxu2 %v9764_v34  ;;  %3527 = vmatpush.bf16.msra.mxu0 %v8676_v44  ;;  %v8419_v22 = vld [vmem:[#allocation5 + $0x88] sm:$0xf]  ;;  %v10020_v26 = vor.u32 %v12872_v17, %v10019_v16  ;;  %v12560_v44 = vld [vmem:[#allocation5 + $0x38c] sm:$0xf] }
  0xa2   : > { %v12472_v23 = vld [vmem:[#allocation5 + $0xc4] sm:$0xf0]  ;;  %v9701_v15 = vld [vmem:[#allocation5 + $0xac8] sm:$0xf0] }
  0xa3   : > { %3565 = vmatpush.bf16.msra.mxu3 %v10276_v38  ;;  %3540 = vmatpush.bf16.msra.mxu1 %v9188_v45  ;;  %v8931_v24 = vld [vmem:[#allocation5 + $0x488] sm:$0xf]  ;;  %v8420_v32 = vor.u32 %v12472_v23, %v8419_v22  ;;  %v8805_v45 = vld [vmem:[#allocation5 + $0x3c8] sm:$0xf0] }
  0xa4   : > { %v12600_v27 = vld [vmem:[#allocation5 + $0x4c4] sm:$0xf0]  ;;  %v12912_v16 = vld [vmem:[#allocation5 + $0xe8c] sm:$0xf] }
  0xa5   : > { %3553 = vmatpush.bf16.msra.mxu2 %v9700_v46  ;;  %3528 = vmatpush.bf16.msra.mxu0 %v8612_v56  ;;  %v9443_v28 = vld [vmem:[#allocation5 + $0x888] sm:$0xf]  ;;  %v8932_v35 = vor.u32 %v12600_v27, %v8931_v24  ;;  %v12688_v46 = vld [vmem:[#allocation5 + $0x78c] sm:$0xf]  ;;  %v8808_v56 = vor.u32 %v12560_v44, %v8805_v45 }
  0xa6   : > { %v12728_v29 = vld [vmem:[#allocation5 + $0x8c4] sm:$0xf0]  ;;  %v10213_v17 = vld [vmem:[#allocation5 + $0xec8] sm:$0xf0] }
  0xa7   : > { %3566 = vmatpush.bf16.msra.mxu3 %v10212_v50  ;;  %3541 = vmatpush.bf16.msra.mxu1 %v9124_v57  ;;  %v9955_v30 = vld [vmem:[#allocation5 + $0xc88] sm:$0xf]  ;;  %v9444_v36 = vor.u32 %v12728_v29, %v9443_v28  ;;  %v9829_v50 = vld [vmem:[#allocation5 + $0xbc8] sm:$0xf0]  ;;  %v9320_v57 = vor.u32 %v12688_v46, %v9317_v48 }
  0xa8   : > { %v12856_v31 = vld [vmem:[#allocation5 + $0xcc4] sm:$0xf0]  ;;  %v12512_v22 = vld [vmem:[#allocation5 + $0x20c] sm:$0xf] }
  0xa9   : > { %3554 = vmatpush.bf16.msra.mxu2 %v9636_v58  ;;  %3529 = vmatpush.bf16.msra.mxu0 %v8548_v4  ;;  %v8355_v33 = vld [vmem:[#allocation5 + $0x8] sm:$0xf]  ;;  %v9956_v40 = vor.u32 %v12856_v31, %v9955_v30  ;;  %v9832_v58 = vor.u32 %v12816_v49, %v9829_v50  ;;  %v8744_v4 = vor.u32 %v12544_v59, %v8741_v60  ;;  %v8613_v23 = vld [vmem:[#allocation5 + $0x248] sm:$0xf0] }
  0xaa   : > { %v12456_v34 = vld [vmem:[#allocation5 + $0x44] sm:$0xf0]  ;;  %v12640_v24 = vld [vmem:[#allocation5 + $0x60c] sm:$0xf] }
  0xab   : > { %3567 = vmatpush.bf16.msra.mxu3 %v10148_v62  ;;  %3542 = vmatpush.bf16.msra.mxu1 %v9060_v5  ;;  %v8867_v37 = vld [vmem:[#allocation5 + $0x408] sm:$0xf]  ;;  %v8356_v47 = vor.u32 %v12456_v34, %v8355_v33  ;;  %v10344_v62 = vor.u32 %v12944_v53, %v10341_v54  ;;  %v9256_v5 = vor.u32 %v12672_v61, %v9253_v63  ;;  %v9125_v27 = vld [vmem:[#allocation5 + $0x648] sm:$0xf0] }
  0xac   : > { %v12584_v38 = vld [vmem:[#allocation5 + $0x444] sm:$0xf0]  ;;  %v12768_v28 = vld [vmem:[#allocation5 + $0xa0c] sm:$0xf]  ;;  %v9128_v33 = vor.u32 %v12640_v24, %v9125_v27  ;;  %v9835_v24 = vld [vmem:[#allocation5 + $0xb90] sm:$0xf] }
  0xad   : > { %3555 = vmatpush.bf16.msra.mxu2 %v9572_v6  ;;  %3530 = vmatpush.bf16.msra.mxu0 %v8484_v19  ;;  %v9379_v39 = vld [vmem:[#allocation5 + $0x808] sm:$0xf]  ;;  %v8868_v51 = vor.u32 %v12584_v38, %v8867_v37  ;;  %v9768_v6 = vor.u32 %v12800_v0, %v9765_v1  ;;  %v8680_v19 = vor.u32 %v12528_v7, %v8677_v10  ;;  %v9637_v29 = vld [vmem:[#allocation5 + $0xa48] sm:$0xf0] }
  0xae   : > { %v12712_v41 = vld [vmem:[#allocation5 + $0x844] sm:$0xf0]  ;;  %v12896_v30 = vld [vmem:[#allocation5 + $0xe0c] sm:$0xf]  ;;  %v9640_v34 = vor.u32 %v12768_v28, %v9637_v29  ;;  %v10347_v29 = vld [vmem:[#allocation5 + $0xf90] sm:$0xf] }
  0xaf   : > { %3568 = vmatpush.bf16.msra.mxu3 %v10084_v12  ;;  %3543 = vmatpush.bf16.msra.mxu1 %v8996_v20  ;;  %v9891_v42 = vld [vmem:[#allocation5 + $0xc08] sm:$0xf]  ;;  %v9380_v52 = vor.u32 %v12712_v41, %v9379_v39  ;;  %v10280_v12 = vor.u32 %v12928_v2, %v10277_v3  ;;  %v9192_v20 = vor.u32 %v12656_v11, %v9189_v13  ;;  %v10149_v31 = vld [vmem:[#allocation5 + $0xe48] sm:$0xf0] }
  0xb0   : > { %v12840_v43 = vld [vmem:[#allocation5 + $0xc44] sm:$0xf0]  ;;  %v12624_v37 = vld [vmem:[#allocation5 + $0x58c] sm:$0xf]  ;;  %v10152_v38 = vor.u32 %v12896_v30, %v10149_v31  ;;  %v12953_v30 = vld [vmem:[#allocation5 + $0xfcc] sm:$0xf0] }
  0xb1   : > { %3556 = vmatpush.bf16.msra.mxu2 %v9508_v21  ;;  %3531 = vmatpush.bf16.msra.mxu0 %v8420_v32  ;;  %v9892_v55 = vor.u32 %v12840_v43, %v9891_v42  ;;  %v9704_v21 = vor.u32 %v12784_v14, %v9701_v15  ;;  %v8616_v32 = vor.u32 %v12512_v22, %v8613_v23  ;;  %v9061_v39 = vld [vmem:[#allocation5 + $0x5c8] sm:$0xf0]  ;;  %v12697_v23 = vld [vmem:[#allocation5 + $0x7cc] sm:$0xf0] }
  0xb2   : > { %v9573_v41 = vld [vmem:[#allocation5 + $0x9c8] sm:$0xf0]  ;;  %v9064_v45 = vor.u32 %v12624_v37, %v9061_v39  ;;  %v9259_v37 = vld [vmem:[#allocation5 + $0x710] sm:$0xf] }
  0xb3   : > { %3569 = vmatpush.bf16.msra.mxu3 %v10020_v26  ;;  %3544 = vmatpush.bf16.msra.mxu1 %v8932_v35  ;;  %v10216_v26 = vor.u32 %v12912_v16, %v10213_v17  ;;  %v12496_v35 = vld [vmem:[#allocation5 + $0x18c] sm:$0xf]  ;;  %v12681_v39 = vld [vmem:[#allocation5 + $0x74c] sm:$0xf0] }
  0xb4   : > { %v12880_v42 = vld [vmem:[#allocation5 + $0xd8c] sm:$0xf] }
  0xb5   : > { %3557 = vmatpush.bf16.msra.mxu2 %v9444_v36  ;;  %3532 = vmatpush.bf16.msra.mxu0 %v8356_v47  ;;  %v8549_v36 = vld [vmem:[#allocation5 + $0x1c8] sm:$0xf0] }
  0xb6   : > { %v10085_v43 = vld [vmem:[#allocation5 + $0xdc8] sm:$0xf0]  ;;  %v8552_v44 = vor.u32 %v12496_v35, %v8549_v36  ;;  %v8747_v35 = vld [vmem:[#allocation5 + $0x310] sm:$0xf] }
  0xb7   : > { %3570 = vmatpush.bf16.msra.mxu3 %v9956_v40  ;;  %3545 = vmatpush.bf16.msra.mxu1 %v8868_v51  ;;  %v12752_v40 = vld [vmem:[#allocation5 + $0x98c] sm:$0xf]  ;;  %v10088_v50 = vor.u32 %v12880_v42, %v10085_v43  ;;  %v12553_v36 = vld [vmem:[#allocation5 + $0x34c] sm:$0xf0] }
  0xb8   : > { %3533 = vmatmul.bf16.vlgmr.msra.gmra.mxu0 %v13978_v18  ;;  %v9576_v46 = vor.u32 %v12752_v40, %v9573_v41  ;;  %v12480_v47 = vld [vmem:[#allocation5 + $0x10c] sm:$0xf]  ;;  %v9771_v40 = vld [vmem:[#allocation5 + $0xb10] sm:$0xf] }
  0xb9   : > { %3558 = vmatpush.bf16.msra.mxu2 %v9380_v52  ;;  %3577 = vmatpush.bf16.msrb.mxu0 %v8808_v56  ;;  %v8485_v48 = vld [vmem:[#allocation5 + $0x148] sm:$0xf0]  ;;  %v12809_v41 = vld [vmem:[#allocation5 + $0xb4c] sm:$0xf0] }
  0xba   : > { %3546 = vmatmul.bf16.vlgmr.msra.gmra.mxu1 %v13981_v25  ;;  %v12608_v49 = vld [vmem:[#allocation5 + $0x50c] sm:$0xf]  ;;  %v8488_v56 = vor.u32 %v12480_v47, %v8485_v48  ;;  %v10283_v42 = vld [vmem:[#allocation5 + $0xf10] sm:$0xf] }
  0xbb   : > { %3571 = vmatpush.bf16.msra.mxu3 %v9892_v55  ;;  %3590 = vmatpush.bf16.msrb.mxu1 %v9320_v57  ;;  %v8997_v51 = vld [vmem:[#allocation5 + $0x548] sm:$0xf0]  ;;  %v12937_v43 = vld [vmem:[#allocation5 + $0xf4c] sm:$0xf0] }
  0xbc   : > { %3559 = vmatmul.bf16.vlgmr.msra.gmra.mxu2 %v13971_v8  ;;  %v12736_v52 = vld [vmem:[#allocation5 + $0x90c] sm:$0xf]  ;;  %v9000_v57 = vor.u32 %v12608_v49, %v8997_v51  ;;  %v8683_v47 = vld [vmem:[#allocation5 + $0x290] sm:$0xf] }
  0xbd   : > { %3603 = vmatpush.bf16.msrb.mxu2 %v9832_v58  ;;  %3578 = vmatpush.bf16.msrb.mxu0 %v8744_v4  ;;  %v9509_v53 = vld [vmem:[#allocation5 + $0x948] sm:$0xf0]  ;;  %v12537_v48 = vld [vmem:[#allocation5 + $0x2cc] sm:$0xf0] }
  0xbe   : > { %3572 = vmatmul.bf16.vlgmr.msra.gmra.mxu3 %v13973_v9  ;;  %v12864_v54 = vld [vmem:[#allocation5 + $0xd0c] sm:$0xf]  ;;  %v9512_v58 = vor.u32 %v12736_v52, %v9509_v53  ;;  %v9195_v49 = vld [vmem:[#allocation5 + $0x690] sm:$0xf] }
  0xbf   : > { %3616 = vmatpush.bf16.msrb.mxu3 %v10344_v62  ;;  %3591 = vmatpush.bf16.msrb.mxu1 %v9256_v5  ;;  %v10021_v55 = vld [vmem:[#allocation5 + $0xd48] sm:$0xf0]  ;;  %v12665_v51 = vld [vmem:[#allocation5 + $0x6cc] sm:$0xf0] }
  0xc0   : > { %v12464_v59 = vld [vmem:[#allocation5 + $0x8c] sm:$0xf]  ;;  %v10024_v62 = vor.u32 %v12864_v54, %v10021_v55  ;;  %v9707_v52 = vld [vmem:[#allocation5 + $0xa90] sm:$0xf] }
  0xc1   : > { %3604 = vmatpush.bf16.msrb.mxu2 %v9768_v6  ;;  %3579 = vmatpush.bf16.msrb.mxu0 %v8680_v19  ;;  %v8421_v60 = vld [vmem:[#allocation5 + $0xc8] sm:$0xf0]  ;;  %v8811_v19 = vld [vmem:[#allocation5 + $0x390] sm:$0xf] }
  0xc2   : > { %v12592_v61 = vld [vmem:[#allocation5 + $0x48c] sm:$0xf]  ;;  %v8424_v4 = vor.u32 %v12464_v59, %v8421_v60  ;;  %v12793_v53 = vld [vmem:[#allocation5 + $0xacc] sm:$0xf0] }
  0xc3   : > { %3617 = vmatpush.bf16.msrb.mxu3 %v10280_v12  ;;  %3592 = vmatpush.bf16.msrb.mxu1 %v9192_v20  ;;  %v8933_v63 = vld [vmem:[#allocation5 + $0x4c8] sm:$0xf0]  ;;  %v12569_v20 = vld [vmem:[#allocation5 + $0x3cc] sm:$0xf0] }
  0xc4   : > { %v12720_v0 = vld [vmem:[#allocation5 + $0x88c] sm:$0xf]  ;;  %v8936_v7 = vor.u32 %v12592_v61, %v8933_v63  ;;  %v10219_v54 = vld [vmem:[#allocation5 + $0xe90] sm:$0xf] }
  0xc5   : > { %3605 = vmatpush.bf16.msrb.mxu2 %v9704_v21  ;;  %3580 = vmatpush.bf16.msrb.mxu0 %v8616_v32  ;;  %v9445_v1 = vld [vmem:[#allocation5 + $0x8c8] sm:$0xf0]  ;;  %v9323_v21 = vld [vmem:[#allocation5 + $0x790] sm:$0xf]  ;;  %v8812_v32 = vor.u32 %v12569_v20, %v8811_v19 }
  0xc6   : > { %v12848_v2 = vld [vmem:[#allocation5 + $0xc8c] sm:$0xf]  ;;  %v9448_v10 = vor.u32 %v12720_v0, %v9445_v1  ;;  %v12921_v55 = vld [vmem:[#allocation5 + $0xecc] sm:$0xf0] }
  0xc7   : > { %3618 = vmatpush.bf16.msrb.mxu3 %v10216_v26  ;;  %3593 = vmatpush.bf16.msrb.mxu1 %v9128_v33  ;;  %v9957_v3 = vld [vmem:[#allocation5 + $0xcc8] sm:$0xf0]  ;;  %v12825_v26 = vld [vmem:[#allocation5 + $0xbcc] sm:$0xf0]  ;;  %v9324_v33 = vor.u32 %v12697_v23, %v9323_v21 }
  0xc8   : > { %v12448_v5 = vld [vmem:[#allocation5 + $0xc] sm:$0xf]  ;;  %v9960_v14 = vor.u32 %v12848_v2, %v9957_v3  ;;  %v8619_v59 = vld [vmem:[#allocation5 + $0x210] sm:$0xf] }
  0xc9   : > { %3606 = vmatpush.bf16.msrb.mxu2 %v9640_v34  ;;  %3581 = vmatpush.bf16.msrb.mxu0 %v8552_v44  ;;  %v8357_v6 = vld [vmem:[#allocation5 + $0x48] sm:$0xf0]  ;;  %v9836_v34 = vor.u32 %v12825_v26, %v9835_v24  ;;  %v8748_v44 = vor.u32 %v12553_v36, %v8747_v35  ;;  %v12521_v60 = vld [vmem:[#allocation5 + $0x24c] sm:$0xf0] }
  0xca   : > { %v12576_v11 = vld [vmem:[#allocation5 + $0x40c] sm:$0xf]  ;;  %v8360_v22 = vor.u32 %v12448_v5, %v8357_v6  ;;  %v9131_v61 = vld [vmem:[#allocation5 + $0x610] sm:$0xf] }
  0xcb   : > { %3619 = vmatpush.bf16.msrb.mxu3 %v10152_v38  ;;  %3594 = vmatpush.bf16.msrb.mxu1 %v9064_v45  ;;  %v8869_v12 = vld [vmem:[#allocation5 + $0x448] sm:$0xf0]  ;;  %v10348_v38 = vor.u32 %v12953_v30, %v10347_v29  ;;  %v9260_v45 = vor.u32 %v12681_v39, %v9259_v37  ;;  %v12649_v63 = vld [vmem:[#allocation5 + $0x64c] sm:$0xf0] }
  0xcc   : > { %v12704_v13 = vld [vmem:[#allocation5 + $0x80c] sm:$0xf]  ;;  %v8872_v27 = vor.u32 %v12576_v11, %v8869_v12  ;;  %v9643_v0 = vld [vmem:[#allocation5 + $0xa10] sm:$0xf]  ;;  %v9132_v5 = vor.u32 %v12649_v63, %v9131_v61  ;;  %v12817_v61 = vld [vmem:[#allocation5 + $0xb94] sm:$0xf] }
  0xcd   : > { %3607 = vmatpush.bf16.msrb.mxu2 %v9576_v46  ;;  %3582 = vmatpush.bf16.msrb.mxu0 %v8488_v56  ;;  %v9381_v15 = vld [vmem:[#allocation5 + $0x848] sm:$0xf0]  ;;  %v9772_v46 = vor.u32 %v12809_v41, %v9771_v40  ;;  %v8684_v56 = vor.u32 %v12537_v48, %v8683_v47  ;;  %v12777_v1 = vld [vmem:[#allocation5 + $0xa4c] sm:$0xf0] }
  0xce   : > { %v12832_v16 = vld [vmem:[#allocation5 + $0xc0c] sm:$0xf]  ;;  %v9384_v28 = vor.u32 %v12704_v13, %v9381_v15  ;;  %v10155_v2 = vld [vmem:[#allocation5 + $0xe10] sm:$0xf]  ;;  %v9644_v6 = vor.u32 %v12777_v1, %v9643_v0  ;;  %v12945_v1 = vld [vmem:[#allocation5 + $0xf94] sm:$0xf] }
  0xcf   : > { %3620 = vmatpush.bf16.msrb.mxu3 %v10088_v50  ;;  %3595 = vmatpush.bf16.msrb.mxu1 %v9000_v57  ;;  %v9893_v17 = vld [vmem:[#allocation5 + $0xc48] sm:$0xf0]  ;;  %v10284_v50 = vor.u32 %v12937_v43, %v10283_v42  ;;  %v9196_v57 = vor.u32 %v12665_v51, %v9195_v49  ;;  %v12905_v3 = vld [vmem:[#allocation5 + $0xe4c] sm:$0xf0] }
  0xd0   : > { %v9896_v31 = vor.u32 %v12832_v16, %v9893_v17  ;;  %v9067_v11 = vld [vmem:[#allocation5 + $0x590] sm:$0xf]  ;;  %v10156_v12 = vor.u32 %v12905_v3, %v10155_v2  ;;  %v10349_v2 = vld [vmem:[#allocation5 + $0xfd0] sm:$0xf0] }
  0xd1   : > { %3608 = vmatpush.bf16.msrb.mxu2 %v9512_v58  ;;  %3583 = vmatpush.bf16.msrb.mxu0 %v8424_v4  ;;  %v9708_v58 = vor.u32 %v12793_v53, %v9707_v52  ;;  %v8620_v4 = vor.u32 %v12521_v60, %v8619_v59  ;;  %v12633_v13 = vld [vmem:[#allocation5 + $0x5cc] sm:$0xf0]  ;;  %v9325_v60 = vld [vmem:[#allocation5 + $0x7d0] sm:$0xf0] }
  0xd2   : > { %v12761_v15 = vld [vmem:[#allocation5 + $0x9cc] sm:$0xf0]  ;;  %v9068_v20 = vor.u32 %v12633_v13, %v9067_v11  ;;  %v12673_v11 = vld [vmem:[#allocation5 + $0x714] sm:$0xf] }
  0xd3   : > { %3621 = vmatpush.bf16.msrb.mxu3 %v10024_v62  ;;  %3596 = vmatpush.bf16.msrb.mxu1 %v8936_v7  ;;  %v10220_v62 = vor.u32 %v12921_v55, %v10219_v54  ;;  %v8555_v7 = vld [vmem:[#allocation5 + $0x190] sm:$0xf]  ;;  %v9261_v13 = vld [vmem:[#allocation5 + $0x750] sm:$0xf0] }
  0xd4   : > { %v10091_v16 = vld [vmem:[#allocation5 + $0xd90] sm:$0xf] }
  0xd5   : > { %3609 = vmatpush.bf16.msrb.mxu2 %v9448_v10  ;;  %3584 = vmatpush.bf16.msrb.mxu0 %v8360_v22  ;;  %v12505_v10 = vld [vmem:[#allocation5 + $0x1cc] sm:$0xf0] }
  0xd6   : > { %v12889_v17 = vld [vmem:[#allocation5 + $0xdcc] sm:$0xf0]  ;;  %v8556_v19 = vor.u32 %v12505_v10, %v8555_v7  ;;  %v12545_v7 = vld [vmem:[#allocation5 + $0x314] sm:$0xf] }
  0xd7   : > { %3622 = vmatpush.bf16.msrb.mxu3 %v9960_v14  ;;  %3597 = vmatpush.bf16.msrb.mxu1 %v8872_v27  ;;  %v9579_v14 = vld [vmem:[#allocation5 + $0x990] sm:$0xf]  ;;  %v10092_v26 = vor.u32 %v12889_v17, %v10091_v16  ;;  %v8749_v10 = vld [vmem:[#allocation5 + $0x350] sm:$0xf0] }
  0xd8   : > { %3585 = vmatmul.bf16.vlgmr.msrb.gmra.mxu0 %v13978_v18  ;;  %v9580_v21 = vor.u32 %v12761_v15, %v9579_v14  ;;  %v8491_v22 = vld [vmem:[#allocation5 + $0x110] sm:$0xf]  ;;  %v12801_v14 = vld [vmem:[#allocation5 + $0xb14] sm:$0xf] }
  0xd9   : > { %3610 = vmatpush.bf16.msrb.mxu2 %v9384_v28  ;;  %3629 = vmatpush.bf16.msra.mxu0 %v8812_v32  ;;  %v12489_v23 = vld [vmem:[#allocation5 + $0x14c] sm:$0xf0]  ;;  %v9773_v15 = vld [vmem:[#allocation5 + $0xb50] sm:$0xf0] }
  0xda   : > { %3598 = vmatmul.bf16.vlgmr.msrb.gmra.mxu1 %v13981_v25  ;;  %v9003_v24 = vld [vmem:[#allocation5 + $0x510] sm:$0xf]  ;;  %v8492_v32 = vor.u32 %v12489_v23, %v8491_v22  ;;  %v12929_v16 = vld [vmem:[#allocation5 + $0xf14] sm:$0xf] }
  0xdb   : > { %3623 = vmatpush.bf16.msrb.mxu3 %v9896_v31  ;;  %3642 = vmatpush.bf16.msra.mxu1 %v9324_v33  ;;  %v12617_v27 = vld [vmem:[#allocation5 + $0x54c] sm:$0xf0]  ;;  %v10285_v17 = vld [vmem:[#allocation5 + $0xf50] sm:$0xf0] }
  0xdc   : > { %3611 = vmatmul.bf16.vlgmr.msrb.gmra.mxu2 %v13971_v8  ;;  %v9515_v28 = vld [vmem:[#allocation5 + $0x910] sm:$0xf]  ;;  %v9004_v33 = vor.u32 %v12617_v27, %v9003_v24  ;;  %v12529_v22 = vld [vmem:[#allocation5 + $0x294] sm:$0xf] }
  0xdd   : > { %3655 = vmatpush.bf16.msra.mxu2 %v9836_v34  ;;  %3630 = vmatpush.bf16.msra.mxu0 %v8748_v44  ;;  %v12745_v29 = vld [vmem:[#allocation5 + $0x94c] sm:$0xf0]  ;;  %v8685_v23 = vld [vmem:[#allocation5 + $0x2d0] sm:$0xf0] }
  0xde   : > { %3624 = vmatmul.bf16.vlgmr.msrb.gmra.mxu3 %v13973_v9  ;;  %v10027_v30 = vld [vmem:[#allocation5 + $0xd10] sm:$0xf]  ;;  %v9516_v34 = vor.u32 %v12745_v29, %v9515_v28  ;;  %v12657_v24 = vld [vmem:[#allocation5 + $0x694] sm:$0xf] }
  0xdf   : > { %3668 = vmatpush.bf16.msra.mxu3 %v10348_v38  ;;  %3643 = vmatpush.bf16.msra.mxu1 %v9260_v45  ;;  %v12873_v31 = vld [vmem:[#allocation5 + $0xd4c] sm:$0xf0]  ;;  %v9197_v27 = vld [vmem:[#allocation5 + $0x6d0] sm:$0xf0] }
  0xe0   : > { %v8427_v35 = vld [vmem:[#allocation5 + $0x90] sm:$0xf]  ;;  %v10028_v38 = vor.u32 %v12873_v31, %v10027_v30  ;;  %v12785_v28 = vld [vmem:[#allocation5 + $0xa94] sm:$0xf] }
  0xe1   : > { %3656 = vmatpush.bf16.msra.mxu2 %v9772_v46  ;;  %3631 = vmatpush.bf16.msra.mxu0 %v8684_v56  ;;  %v12473_v36 = vld [vmem:[#allocation5 + $0xcc] sm:$0xf0]  ;;  %v12561_v56 = vld [vmem:[#allocation5 + $0x394] sm:$0xf] }
  0xe2   : > { %v8939_v37 = vld [vmem:[#allocation5 + $0x490] sm:$0xf]  ;;  %v8428_v44 = vor.u32 %v12473_v36, %v8427_v35  ;;  %v9709_v29 = vld [vmem:[#allocation5 + $0xad0] sm:$0xf0] }
  0xe3   : > { %3669 = vmatpush.bf16.msra.mxu3 %v10284_v50  ;;  %3644 = vmatpush.bf16.msra.mxu1 %v9196_v57  ;;  %v12601_v39 = vld [vmem:[#allocation5 + $0x4cc] sm:$0xf0]  ;;  %v8813_v57 = vld [vmem:[#allocation5 + $0x3d0] sm:$0xf0] }
  0xe4   : > { %v9451_v40 = vld [vmem:[#allocation5 + $0x890] sm:$0xf]  ;;  %v8940_v47 = vor.u32 %v12601_v39, %v8939_v37  ;;  %v12913_v30 = vld [vmem:[#allocation5 + $0xe94] sm:$0xf] }
  0xe5   : > { %3657 = vmatpush.bf16.msra.mxu2 %v9708_v58  ;;  %3632 = vmatpush.bf16.msra.mxu0 %v8620_v4  ;;  %v12729_v41 = vld [vmem:[#allocation5 + $0x8cc] sm:$0xf0]  ;;  %v12689_v58 = vld [vmem:[#allocation5 + $0x794] sm:$0xf]  ;;  %v8816_v4 = vor.u32 %v12561_v56, %v8813_v57 }
  0xe6   : > { %v9963_v42 = vld [vmem:[#allocation5 + $0xc90] sm:$0xf]  ;;  %v9452_v48 = vor.u32 %v12729_v41, %v9451_v40  ;;  %v10221_v31 = vld [vmem:[#allocation5 + $0xed0] sm:$0xf0] }
  0xe7   : > { %3670 = vmatpush.bf16.msra.mxu3 %v10220_v62  ;;  %3645 = vmatpush.bf16.msra.mxu1 %v9132_v5  ;;  %v12857_v43 = vld [vmem:[#allocation5 + $0xccc] sm:$0xf0]  ;;  %v9837_v62 = vld [vmem:[#allocation5 + $0xbd0] sm:$0xf0]  ;;  %v9328_v5 = vor.u32 %v12689_v58, %v9325_v60 }
  0xe8   : > { %v8363_v45 = vld [vmem:[#allocation5 + $0x10] sm:$0xf]  ;;  %v9964_v52 = vor.u32 %v12857_v43, %v9963_v42  ;;  %v12513_v35 = vld [vmem:[#allocation5 + $0x214] sm:$0xf] }
  0xe9   : > { %3658 = vmatpush.bf16.msra.mxu2 %v9644_v6  ;;  %3633 = vmatpush.bf16.msra.mxu0 %v8556_v19  ;;  %v12457_v46 = vld [vmem:[#allocation5 + $0x4c] sm:$0xf0]  ;;  %v9840_v6 = vor.u32 %v12817_v61, %v9837_v62  ;;  %v8752_v19 = vor.u32 %v12545_v7, %v8749_v10  ;;  %v8621_v36 = vld [vmem:[#allocation5 + $0x250] sm:$0xf0] }
  0xea   : > { %v8875_v49 = vld [vmem:[#allocation5 + $0x410] sm:$0xf]  ;;  %v8364_v59 = vor.u32 %v12457_v46, %v8363_v45  ;;  %v12641_v37 = vld [vmem:[#allocation5 + $0x614] sm:$0xf] }
  0xeb   : > { %3671 = vmatpush.bf16.msra.mxu3 %v10156_v12  ;;  %3646 = vmatpush.bf16.msra.mxu1 %v9068_v20  ;;  %v12585_v50 = vld [vmem:[#allocation5 + $0x44c] sm:$0xf0]  ;;  %v10352_v12 = vor.u32 %v12945_v1, %v10349_v2  ;;  %v9264_v20 = vor.u32 %v12673_v11, %v9261_v13  ;;  %v9133_v39 = vld [vmem:[#allocation5 + $0x650] sm:$0xf0] }
  0xec   : > { %v9387_v51 = vld [vmem:[#allocation5 + $0x810] sm:$0xf]  ;;  %v8876_v63 = vor.u32 %v12585_v50, %v8875_v49  ;;  %v12769_v40 = vld [vmem:[#allocation5 + $0xa14] sm:$0xf]  ;;  %v9136_v46 = vor.u32 %v12641_v37, %v9133_v39  ;;  %v14001_v50 = vld [vmem:[#allocation7] sm:$0xff] }
  0xed   : > { %3659 = vmatpush.bf16.msra.mxu2 %v9580_v21  ;;  %3634 = vmatpush.bf16.msra.mxu0 %v8492_v32  ;;  %v12713_v53 = vld [vmem:[#allocation5 + $0x84c] sm:$0xf0]  ;;  %v9776_v21 = vor.u32 %v12801_v14, %v9773_v15  ;;  %v8688_v32 = vor.u32 %v12529_v22, %v8685_v23  ;;  %v9645_v41 = vld [vmem:[#allocation5 + $0xa50] sm:$0xf0]  ;;  %v829_v58 = vperm.slane %v14001_v50, 0 }
  0xee   : > { %v9899_v54 = vld [vmem:[#allocation5 + $0xc10] sm:$0xf]  ;;  %v9388_v0 = vor.u32 %v12713_v53, %v9387_v51  ;;  %v12897_v42 = vld [vmem:[#allocation5 + $0xe14] sm:$0xf] }
  0xef   : > { %3672 = vmatpush.bf16.msra.mxu3 %v10092_v26  ;;  %3647 = vmatpush.bf16.msra.mxu1 %v9004_v33  ;;  %v12841_v55 = vld [vmem:[#allocation5 + $0xc4c] sm:$0xf0]  ;;  %v10288_v26 = vor.u32 %v12929_v16, %v10285_v17  ;;  %v9200_v33 = vor.u32 %v12657_v24, %v9197_v27  ;;  %v10157_v43 = vld [vmem:[#allocation5 + $0xe50] sm:$0xf0] }
  0xf0   : > { %v9900_v3 = vor.u32 %v12841_v55, %v9899_v54  ;;  %v12497_v45 = vld [vmem:[#allocation5 + $0x194] sm:$0xf]  ;;  %v10160_v51 = vor.u32 %v12897_v42, %v10157_v43  ;;  %v8819_v42 = vld [vmem:[#allocation5 + $0x398] sm:$0xf] }
  0xf1   : > { %3660 = vmatpush.bf16.msra.mxu2 %v9516_v34  ;;  %3635 = vmatpush.bf16.msra.mxu0 %v8428_v44  ;;  %v9712_v34 = vor.u32 %v12785_v28, %v9709_v29  ;;  %v8624_v44 = vor.u32 %v12513_v35, %v8621_v36  ;;  %v12625_v49 = vld [vmem:[#allocation5 + $0x594] sm:$0xf]  ;;  %v12570_v43 = vld [vmem:[#allocation5 + $0x3d4] sm:$0xf0] }
  0xf2   : > { %v12753_v53 = vld [vmem:[#allocation5 + $0x994] sm:$0xf] }
  0xf3   : > { %3673 = vmatpush.bf16.msra.mxu3 %v10028_v38  ;;  %3648 = vmatpush.bf16.msra.mxu1 %v8940_v47  ;;  %v10224_v38 = vor.u32 %v12913_v30, %v10221_v31  ;;  %v9648_v47 = vor.u32 %v12769_v40, %v9645_v41  ;;  %v9581_v54 = vld [vmem:[#allocation5 + $0x9d0] sm:$0xf0] }
  0xf4   : > { %v12881_v55 = vld [vmem:[#allocation5 + $0xd94] sm:$0xf]  ;;  %v9584_v60 = vor.u32 %v12753_v53, %v9581_v54  ;;  %v10355_v54 = vld [vmem:[#allocation5 + $0xf98] sm:$0xf] }
  0xf5   : > { %3661 = vmatpush.bf16.msra.mxu2 %v9452_v48  ;;  %3636 = vmatpush.bf16.msra.mxu0 %v8364_v59  ;;  %v8557_v48 = vld [vmem:[#allocation5 + $0x1d0] sm:$0xf0] }
  0xf6   : > { %v10093_v56 = vld [vmem:[#allocation5 + $0xdd0] sm:$0xf0]  ;;  %v8560_v57 = vor.u32 %v12497_v45, %v8557_v48  ;;  %v9843_v48 = vld [vmem:[#allocation5 + $0xb98] sm:$0xf] }
  0xf7   : > { %3674 = vmatpush.bf16.msra.mxu3 %v9964_v52  ;;  %3649 = vmatpush.bf16.msra.mxu1 %v8876_v63  ;;  %v9069_v52 = vld [vmem:[#allocation5 + $0x5d0] sm:$0xf0]  ;;  %v3443_v11 = vpop.f32.mrf.mxu1 }
  0xf8   : > { %3637 = vmatmul.bf16.vlgmr.msra.gmra.mxu0 %v13978_v18  ;;  %v9072_v59 = vor.u32 %v12625_v49, %v9069_v52  ;;  %v12481_v61 = vld [vmem:[#allocation5 + $0x114] sm:$0xf]  ;;  %v12826_v49 = vld [vmem:[#allocation5 + $0xbd4] sm:$0xf0] }
  0xf9   : > { %3662 = vmatpush.bf16.msra.mxu2 %v9388_v0  ;;  %3681 = vmatpush.bf16.msrb.mxu0 %v8816_v4  ;;  %v8493_v62 = vld [vmem:[#allocation5 + $0x150] sm:$0xf0]  ;;  %v10096_v0 = vor.u32 %v12881_v55, %v10093_v56  ;;  %v12954_v55 = vld [vmem:[#allocation5 + $0xfd4] sm:$0xf0] }
  0xfa   : > { %3650 = vmatmul.bf16.vlgmr.msra.gmra.mxu1 %v13981_v25  ;;  %v12609_v63 = vld [vmem:[#allocation5 + $0x514] sm:$0xf]  ;;  %v8496_v7 = vor.u32 %v12481_v61, %v8493_v62  ;;  %v9844_v61 = vor.u32 %v12826_v49, %v9843_v48  ;;  %v8755_v62 = vld [vmem:[#allocation5 + $0x318] sm:$0xf] }
  0xfb   : > { %3675 = vmatpush.bf16.msra.mxu3 %v9900_v3  ;;  %3694 = vmatpush.bf16.msrb.mxu1 %v9328_v5  ;;  %v9005_v1 = vld [vmem:[#allocation5 + $0x550] sm:$0xf0]  ;;  %v9587_v48 = vld [vmem:[#allocation5 + $0x998] sm:$0xf] }
  0xfc   : > { %3663 = vmatmul.bf16.vlgmr.msra.gmra.mxu2 %v13971_v8  ;;  %v12737_v2 = vld [vmem:[#allocation5 + $0x914] sm:$0xf]  ;;  %v12762_v49 = vld [vmem:[#allocation5 + $0x9d4] sm:$0xf0] }
  0xfd   : > { %3707 = vmatpush.bf16.msrb.mxu2 %v9840_v6  ;;  %3682 = vmatpush.bf16.msrb.mxu0 %v8752_v19  ;;  %v9517_v3 = vld [vmem:[#allocation5 + $0x950] sm:$0xf0]  ;;  %v3430_v6 = vpop.f32.mrf.mxu0 }
  0xfe   : > { %3676 = vmatmul.bf16.vlgmr.msra.gmra.mxu3 %v13973_v9  ;;  %v12865_v4 = vld [vmem:[#allocation5 + $0xd14] sm:$0xf]  ;;  %v3431_v10 = vadd.f32 %v3430_v6, %v829_v58  ;;  %v9520_v13 = vor.u32 %v12737_v2, %v9517_v3  ;;  %v12682_v2 = vld [vmem:[#allocation5 + $0x754] sm:$0xf0] }
  0xff   : > { %3720 = vmatpush.bf16.msrb.mxu3 %v10352_v12  ;;  %3695 = vmatpush.bf16.msrb.mxu1 %v9264_v20  ;;  %v10029_v5 = vld [vmem:[#allocation5 + $0xd50] sm:$0xf0]  ;;  %v9008_v12 = vor.u32 %v12609_v63, %v9005_v1  ;;  %v3456_v23 = vpop.f32.mrf.mxu2  ;;  %v12554_v63 = vld [vmem:[#allocation5 + $0x354] sm:$0xf0]  ;;  %v10356_v1 = vor.u32 %v12954_v55, %v10355_v54 }
 0x100   : > { %v12465_v14 = vld [vmem:[#allocation5 + $0x94] sm:$0xf]  ;;  %v10032_v17 = vor.u32 %v12865_v4, %v10029_v5  ;;  %v3444_v22 = vadd.f32 %v3443_v11, %v3431_v10  ;;  %v9779_v3 = vld [vmem:[#allocation5 + $0xb18] sm:$0xf] }
 0x101   : > { %3708 = vmatpush.bf16.msrb.mxu2 %v9776_v21  ;;  %3683 = vmatpush.bf16.msrb.mxu0 %v8688_v32  ;;  %v8429_v15 = vld [vmem:[#allocation5 + $0xd0] sm:$0xf0]  ;;  %v3469_v24 = vpop.f32.mrf.mxu3  ;;  %v12810_v4 = vld [vmem:[#allocation5 + $0xb54] sm:$0xf0] }
 0x102   : > { %v12593_v16 = vld [vmem:[#allocation5 + $0x494] sm:$0xf]  ;;  %v8432_v28 = vor.u32 %v12465_v14, %v8429_v15  ;;  %v3457_v31 = vadd.f32 %v3456_v23, %v3444_v22  ;;  %v10291_v5 = vld [vmem:[#allocation5 + $0xf18] sm:$0xf]  ;;  %v9780_v11 = vor.u32 %v12810_v4, %v9779_v3 }
 0x103   : > { %3721 = vmatpush.bf16.msrb.mxu3 %v10288_v26  ;;  %3696 = vmatpush.bf16.msrb.mxu1 %v9200_v33  ;;  %v8941_v19 = vld [vmem:[#allocation5 + $0x4d0] sm:$0xf0]  ;;  %v12938_v6 = vld [vmem:[#allocation5 + $0xf54] sm:$0xf0] }
 0x104   : > { %v12721_v20 = vld [vmem:[#allocation5 + $0x894] sm:$0xf]  ;;  %v8944_v32 = vor.u32 %v12593_v16, %v8941_v19  ;;  %v14004_v41 = vadd.f32 %v3469_v24, %v3457_v31  ;;  %v9203_v14 = vld [vmem:[#allocation5 + $0x698] sm:$0xf]  ;;  %v10292_v15 = vor.u32 %v12938_v6, %v10291_v5 }
 0x105   : > { %3709 = vmatpush.bf16.msrb.mxu2 %v9712_v34  ;;  %3684 = vmatpush.bf16.msrb.mxu0 %v8624_v44  ;;  %v9453_v21 = vld [vmem:[#allocation5 + $0x8d0] sm:$0xf0]  ;;  %v9331_v44 = vld [vmem:[#allocation5 + $0x798] sm:$0xf]  ;;  %v3432_v45 = vpop.f32.mrf.mxu0 }
 0x106   : > { %v12849_v26 = vld [vmem:[#allocation5 + $0xc94] sm:$0xf]  ;;  %v9456_v33 = vor.u32 %v12721_v20, %v9453_v21  ;;  %v12666_v16 = vld [vmem:[#allocation5 + $0x6d4] sm:$0xf0] }
 0x107   : > { %3722 = vmatpush.bf16.msrb.mxu3 %v10224_v38  ;;  %3697 = vmatpush.bf16.msrb.mxu1 %v9136_v46  ;;  %v9965_v27 = vld [vmem:[#allocation5 + $0xcd0] sm:$0xf0]  ;;  %v3458_v58 = vpop.f32.mrf.mxu2  ;;  %v12794_v19 = vld [vmem:[#allocation5 + $0xad4] sm:$0xf0]  ;;  %v9204_v24 = vor.u32 %v12666_v16, %v9203_v14 }
 0x108   : > { %v12449_v29 = vld [vmem:[#allocation5 + $0x14] sm:$0xf]  ;;  %v9968_v37 = vor.u32 %v12849_v26, %v9965_v27  ;;  %v10227_v20 = vld [vmem:[#allocation5 + $0xe98] sm:$0xf] }
 0x109   : > { %3710 = vmatpush.bf16.msrb.mxu2 %v9648_v47  ;;  %3685 = vmatpush.bf16.msrb.mxu0 %v8560_v57  ;;  %v8365_v30 = vld [vmem:[#allocation5 + $0x50] sm:$0xf0]  ;;  %v12698_v47 = vld [vmem:[#allocation5 + $0x7d4] sm:$0xf0]  ;;  %v8820_v57 = vor.u32 %v12570_v43, %v8819_v42 }
 0x10a   : > { %v12577_v34 = vld [vmem:[#allocation5 + $0x414] sm:$0xf]  ;;  %v8368_v46 = vor.u32 %v12449_v29, %v8365_v30  ;;  %v12922_v21 = vld [vmem:[#allocation5 + $0xed4] sm:$0xf0]  ;;  %v830_v29 = vperm.slane %v14001_v50, 1 }
 0x10b   : > { %3723 = vmatpush.bf16.msrb.mxu3 %v10160_v51  ;;  %3698 = vmatpush.bf16.msrb.mxu1 %v9072_v59  ;;  %v8877_v35 = vld [vmem:[#allocation5 + $0x450] sm:$0xf0]  ;;  %v3445_v51 = vpop.f32.mrf.mxu1  ;;  %v3471_v59 = vpop.f32.mrf.mxu3  ;;  %v8627_v23 = vld [vmem:[#allocation5 + $0x218] sm:$0xf]  ;;  %v10228_v30 = vor.u32 %v12922_v21, %v10227_v20 }
 0x10c   : > { %v12705_v36 = vld [vmem:[#allocation5 + $0x814] sm:$0xf]  ;;  %v8880_v52 = vor.u32 %v12577_v34, %v8877_v35  ;;  %v12522_v27 = vld [vmem:[#allocation5 + $0x254] sm:$0xf0] }
 0x10d   : > { %3711 = vmatpush.bf16.msrb.mxu2 %v9584_v60  ;;  %3686 = vmatpush.bf16.msrb.mxu0 %v8496_v7  ;;  %v9389_v38 = vld [vmem:[#allocation5 + $0x850] sm:$0xf0]  ;;  %v9332_v60 = vor.u32 %v12698_v47, %v9331_v44  ;;  %v8756_v7 = vor.u32 %v12554_v63, %v8755_v62  ;;  %v12650_v31 = vld [vmem:[#allocation5 + $0x654] sm:$0xf0] }
 0x10e   : > { %v12833_v39 = vld [vmem:[#allocation5 + $0xc14] sm:$0xf]  ;;  %v9392_v53 = vor.u32 %v12705_v36, %v9389_v38  ;;  %v10163_v34 = vld [vmem:[#allocation5 + $0xe18] sm:$0xf]  ;;  %v8628_v36 = vor.u32 %v12522_v27, %v8627_v23 }
 0x10f   : > { %3724 = vmatpush.bf16.msrb.mxu3 %v10096_v0  ;;  %3699 = vmatpush.bf16.msrb.mxu1 %v9008_v12  ;;  %v9901_v40 = vld [vmem:[#allocation5 + $0xc50] sm:$0xf0]  ;;  %v9267_v0 = vld [vmem:[#allocation5 + $0x718] sm:$0xf] }
 0x110   : > { %v9904_v56 = vor.u32 %v12833_v39, %v9901_v40  ;;  %v9268_v10 = vor.u32 %v12682_v2, %v9267_v0  ;;  %v8691_v12 = vld [vmem:[#allocation5 + $0x298] sm:$0xf] }
 0x111   : > { %3712 = vmatpush.bf16.msrb.mxu2 %v9520_v13  ;;  %3687 = vmatpush.bf16.msrb.mxu0 %v8432_v28  ;;  %v12538_v13 = vld [vmem:[#allocation5 + $0x2d4] sm:$0xf0] }
 0x112   : > { %v8692_v22 = vor.u32 %v12538_v13, %v8691_v12  ;;  %v9139_v28 = vld [vmem:[#allocation5 + $0x618] sm:$0xf] }
 0x113   : > { %3725 = vmatpush.bf16.msrb.mxu3 %v10032_v17  ;;  %3700 = vmatpush.bf16.msrb.mxu1 %v8944_v32  ;;  %v9715_v17 = vld [vmem:[#allocation5 + $0xa98] sm:$0xf]  ;;  %v9140_v38 = vor.u32 %v12650_v31, %v9139_v28 }
 0x114   : > { %v9716_v26 = vor.u32 %v12794_v19, %v9715_v17  ;;  %v9651_v32 = vld [vmem:[#allocation5 + $0xa18] sm:$0xf] }
 0x115   : > { %3713 = vmatpush.bf16.msrb.mxu2 %v9456_v33  ;;  %3688 = vmatpush.bf16.msrb.mxu0 %v8368_v46  ;;  %v12778_v33 = vld [vmem:[#allocation5 + $0xa54] sm:$0xf0] }
 0x116   : > { %v12906_v35 = vld [vmem:[#allocation5 + $0xe54] sm:$0xf0]  ;;  %v9652_v39 = vor.u32 %v12778_v33, %v9651_v32 }
 0x117   : > { %3726 = vmatpush.bf16.msrb.mxu3 %v9968_v37  ;;  %3701 = vmatpush.bf16.msrb.mxu1 %v8880_v52  ;;  %v3482_v37 = vpop.f32.mrf.mxu0  ;;  %v8563_v40 = vld [vmem:[#allocation5 + $0x198] sm:$0xf]  ;;  %v3495_v45 = vpop.f32.mrf.mxu1  ;;  %v10164_v46 = vor.u32 %v12906_v35, %v10163_v34 }
 0x118   : > { %3689 = vmatmul.bf16.vlgmr.msrb.gmra.mxu0 %v13978_v18  ;;  %v12506_v42 = vld [vmem:[#allocation5 + $0x1d4] sm:$0xf0]  ;;  %v3483_v44 = vadd.f32 %v3482_v37, %v830_v29 }
 0x119   : > { %3714 = vmatpush.bf16.msrb.mxu2 %v9392_v53  ;;  %3733 = vmatpush.bf16.msra.mxu0 %v8820_v57  ;;  %v9075_v43 = vld [vmem:[#allocation5 + $0x598] sm:$0xf]  ;;  %v8564_v54 = vor.u32 %v12506_v42, %v8563_v40  ;;  %v12690_v40 = vld [vmem:[#allocation5 + $0x79c] sm:$0xf] }
 0x11a   : > { %3702 = vmatmul.bf16.vlgmr.msrb.gmra.mxu1 %v13981_v25  ;;  %v12634_v47 = vld [vmem:[#allocation5 + $0x5d4] sm:$0xf0]  ;;  %v3496_v53 = vadd.f32 %v3495_v45, %v3483_v44  ;;  %v12818_v44 = vld [vmem:[#allocation5 + $0xb9c] sm:$0xf] }
 0x11b   : > { %3727 = vmatpush.bf16.msrb.mxu3 %v9904_v56  ;;  %3746 = vmatpush.bf16.msra.mxu1 %v9332_v60  ;;  %v10099_v51 = vld [vmem:[#allocation5 + $0xd98] sm:$0xf]  ;;  %v9076_v55 = vor.u32 %v12634_v47, %v9075_v43  ;;  %v9588_v56 = vor.u32 %v12762_v49, %v9587_v48  ;;  %v9333_v43 = vld [vmem:[#allocation5 + $0x7d8] sm:$0xf0] }
 0x11c   : > { %3715 = vmatmul.bf16.vlgmr.msrb.gmra.mxu2 %v13971_v8  ;;  %v12890_v52 = vld [vmem:[#allocation5 + $0xdd4] sm:$0xf0]  ;;  %v9845_v45 = vld [vmem:[#allocation5 + $0xbd8] sm:$0xf0] }
 0x11d   : > { %3759 = vmatpush.bf16.msra.mxu2 %v9844_v61  ;;  %3734 = vmatpush.bf16.msra.mxu0 %v8756_v7  ;;  %v8499_v57 = vld [vmem:[#allocation5 + $0x118] sm:$0xf]  ;;  %v10100_v61 = vor.u32 %v12890_v52, %v10099_v51  ;;  %v12946_v48 = vld [vmem:[#allocation5 + $0xf9c] sm:$0xf] }
 0x11e   : > { %3728 = vmatmul.bf16.vlgmr.msrb.gmra.mxu3 %v13973_v9  ;;  %v12490_v58 = vld [vmem:[#allocation5 + $0x154] sm:$0xf0]  ;;  %v10357_v49 = vld [vmem:[#allocation5 + $0xfd8] sm:$0xf0] }
 0x11f   : > { %3772 = vmatpush.bf16.msra.mxu3 %v10356_v1  ;;  %3747 = vmatpush.bf16.msra.mxu1 %v9268_v10  ;;  %v9011_v59 = vld [vmem:[#allocation5 + $0x518] sm:$0xf]  ;;  %v3508_v60 = vpop.f32.mrf.mxu2  ;;  %v8500_v5 = vor.u32 %v12490_v58, %v8499_v57  ;;  %v3484_v7 = vpop.f32.mrf.mxu0  ;;  %v12674_v57 = vld [vmem:[#allocation5 + $0x71c] sm:$0xf]  ;;  %v10360_v58 = vor.u32 %v12946_v48, %v10357_v49 }
 0x120   : > { %v12618_v62 = vld [vmem:[#allocation5 + $0x554] sm:$0xf0]  ;;  %v3509_v1 = vadd.f32 %v3508_v60, %v3496_v53  ;;  %v9336_v53 = vor.u32 %v12690_v40, %v9333_v43  ;;  %v12802_v60 = vld [vmem:[#allocation5 + $0xb1c] sm:$0xf] }
 0x121   : > { %3760 = vmatpush.bf16.msra.mxu2 %v9780_v11  ;;  %3735 = vmatpush.bf16.msra.mxu0 %v8692_v22  ;;  %v9523_v63 = vld [vmem:[#allocation5 + $0x918] sm:$0xf]  ;;  %v3521_v2 = vpop.f32.mrf.mxu3  ;;  %v9012_v10 = vor.u32 %v12618_v62, %v9011_v59  ;;  %v9269_v59 = vld [vmem:[#allocation5 + $0x758] sm:$0xf0] }
 0x122   : > { %v12746_v0 = vld [vmem:[#allocation5 + $0x954] sm:$0xf0]  ;;  %v14011_v6 = vadd.f32 %v3521_v2, %v3509_v1  ;;  %v12930_v62 = vld [vmem:[#allocation5 + $0xf1c] sm:$0xf]  ;;  %v9272_v1 = vor.u32 %v12674_v57, %v9269_v59 }
 0x123   : > { %3773 = vmatpush.bf16.msra.mxu3 %v10292_v15  ;;  %3748 = vmatpush.bf16.msra.mxu1 %v9204_v24  ;;  %v10035_v3 = vld [vmem:[#allocation5 + $0xd18] sm:$0xf]  ;;  %v9524_v11 = vor.u32 %v12746_v0, %v9523_v63  ;;  %v3497_v15 = vpop.f32.mrf.mxu1  ;;  %v10293_v63 = vld [vmem:[#allocation5 + $0xf58] sm:$0xf0] }
 0x124   : > { %v12874_v4 = vld [vmem:[#allocation5 + $0xd54] sm:$0xf0]  ;;  %v10296_v7 = vor.u32 %v12930_v62, %v10293_v63  ;;  %v9077_v40 = vld [vmem:[#allocation5 + $0x5d8] sm:$0xf0] }
 0x125   : > { %3761 = vmatpush.bf16.msra.mxu2 %v9716_v26  ;;  %3736 = vmatpush.bf16.msra.mxu0 %v8628_v36  ;;  %v8435_v12 = vld [vmem:[#allocation5 + $0x98] sm:$0xf]  ;;  %v10036_v16 = vor.u32 %v12874_v4, %v10035_v3  ;;  %v12530_v3 = vld [vmem:[#allocation5 + $0x29c] sm:$0xf] }
 0x126   : > { %v12474_v13 = vld [vmem:[#allocation5 + $0xd4] sm:$0xf0]  ;;  %v8693_v4 = vld [vmem:[#allocation5 + $0x2d8] sm:$0xf0] }
 0x127   : > { %3774 = vmatpush.bf16.msra.mxu3 %v10228_v30  ;;  %3749 = vmatpush.bf16.msra.mxu1 %v9140_v38  ;;  %v8947_v14 = vld [vmem:[#allocation5 + $0x498] sm:$0xf]  ;;  %v8436_v23 = vor.u32 %v12474_v13, %v8435_v12  ;;  %v3510_v32 = vpop.f32.mrf.mxu2  ;;  %v12562_v38 = vld [vmem:[#allocation5 + $0x39c] sm:$0xf]  ;;  %v8696_v15 = vor.u32 %v12530_v3, %v8693_v4 }
 0x128   : > { %v12602_v17 = vld [vmem:[#allocation5 + $0x4d4] sm:$0xf0]  ;;  %v9717_v12 = vld [vmem:[#allocation5 + $0xad8] sm:$0xf0] }
 0x129   : > { %3762 = vmatpush.bf16.msra.mxu2 %v9652_v39  ;;  %3737 = vmatpush.bf16.msra.mxu0 %v8564_v54  ;;  %v9459_v19 = vld [vmem:[#allocation5 + $0x898] sm:$0xf]  ;;  %v8948_v27 = vor.u32 %v12602_v17, %v8947_v14  ;;  %v3523_v37 = vpop.f32.mrf.mxu3  ;;  %v8821_v39 = vld [vmem:[#allocation5 + $0x3d8] sm:$0xf0]  ;;  %v9848_v54 = vor.u32 %v12818_v44, %v9845_v45 }
 0x12a   : > { %v12730_v20 = vld [vmem:[#allocation5 + $0x8d4] sm:$0xf0]  ;;  %v8824_v52 = vor.u32 %v12562_v38, %v8821_v39  ;;  %v12914_v13 = vld [vmem:[#allocation5 + $0xe9c] sm:$0xf] }
 0x12b   : > { %3775 = vmatpush.bf16.msra.mxu3 %v10164_v46  ;;  %3750 = vmatpush.bf16.msra.mxu1 %v9076_v55  ;;  %v9971_v21 = vld [vmem:[#allocation5 + $0xc98] sm:$0xf]  ;;  %v9460_v28 = vor.u32 %v12730_v20, %v9459_v19  ;;  %v12546_v55 = vld [vmem:[#allocation5 + $0x31c] sm:$0xf] }
 0x12c   : > { %v12858_v22 = vld [vmem:[#allocation5 + $0xcd4] sm:$0xf0]  ;;  %v10229_v14 = vld [vmem:[#allocation5 + $0xed8] sm:$0xf0] }
 0x12d   : > { %3763 = vmatpush.bf16.msra.mxu2 %v9588_v56  ;;  %3738 = vmatpush.bf16.msra.mxu0 %v8500_v5  ;;  %v8371_v24 = vld [vmem:[#allocation5 + $0x18] sm:$0xf]  ;;  %v9972_v33 = vor.u32 %v12858_v22, %v9971_v21  ;;  %v8757_v56 = vld [vmem:[#allocation5 + $0x358] sm:$0xf0]  ;;  %v831_v22 = vperm.slane %v14001_v50, 2 }
 0x12e   : > { %v12458_v26 = vld [vmem:[#allocation5 + $0x54] sm:$0xf0]  ;;  %v8760_v0 = vor.u32 %v12546_v55, %v8757_v56  ;;  %v12658_v5 = vld [vmem:[#allocation5 + $0x69c] sm:$0xf] }
 0x12f   : > { %3776 = vmatpush.bf16.msra.mxu3 %v10100_v61  ;;  %3751 = vmatpush.bf16.msra.mxu1 %v9012_v10  ;;  %v8883_v29 = vld [vmem:[#allocation5 + $0x418] sm:$0xf]  ;;  %v8372_v42 = vor.u32 %v12458_v26, %v8371_v24  ;;  %v9781_v61 = vld [vmem:[#allocation5 + $0xb58] sm:$0xf0] }
 0x130   : > { %v12586_v30 = vld [vmem:[#allocation5 + $0x454] sm:$0xf0]  ;;  %v9784_v2 = vor.u32 %v12802_v60, %v9781_v61  ;;  %v9205_v10 = vld [vmem:[#allocation5 + $0x6d8] sm:$0xf0] }
 0x131   : > { %3764 = vmatpush.bf16.msra.mxu2 %v9524_v11  ;;  %v9395_v31 = vld [vmem:[#allocation5 + $0x818] sm:$0xf]  ;;  %3739 = vmatpush.bf16.msra.mxu0 %v8436_v23  ;;  %v8884_v46 = vor.u32 %v12586_v30, %v8883_v29  ;;  %v12786_v11 = vld [vmem:[#allocation5 + $0xa9c] sm:$0xf]  ;;  %v9208_v17 = vor.u32 %v12658_v5, %v9205_v10  ;;  %v10232_v23 = vor.u32 %v12914_v13, %v10229_v14 }
 0x132   : > { %v12714_v34 = vld [vmem:[#allocation5 + $0x854] sm:$0xf0]  ;;  %v9720_v19 = vor.u32 %v12786_v11, %v9717_v12  ;;  %v8629_v20 = vld [vmem:[#allocation5 + $0x258] sm:$0xf0] }
 0x133   : > { %3777 = vmatpush.bf16.msra.mxu3 %v10036_v16  ;;  %v9907_v35 = vld [vmem:[#allocation5 + $0xc18] sm:$0xf]  ;;  %3752 = vmatpush.bf16.msra.mxu1 %v8948_v27  ;;  %v9396_v47 = vor.u32 %v12714_v34, %v9395_v31  ;;  %v12514_v16 = vld [vmem:[#allocation5 + $0x21c] sm:$0xf] }
 0x134   : > { %v12842_v36 = vld [vmem:[#allocation5 + $0xc54] sm:$0xf0]  ;;  %v12642_v21 = vld [vmem:[#allocation5 + $0x61c] sm:$0xf]  ;;  %v8632_v30 = vor.u32 %v12514_v16, %v8629_v20 }
 0x135   : > { %3765 = vmatpush.bf16.msra.mxu2 %v9460_v28  ;;  %v9908_v51 = vor.u32 %v12842_v36, %v9907_v35  ;;  %3740 = vmatpush.bf16.msra.mxu0 %v8372_v42  ;;  %v9141_v24 = vld [vmem:[#allocation5 + $0x658] sm:$0xf0]  ;;  %v3534_v31 = vpop.f32.mrf.mxu0 }
 0x136   : > { %v12770_v26 = vld [vmem:[#allocation5 + $0xa1c] sm:$0xf]  ;;  %v9144_v32 = vor.u32 %v12642_v21, %v9141_v24  ;;  %v3535_v37 = vadd.f32 %v3534_v31, %v831_v22 }
 0x137   : > { %3778 = vmatpush.bf16.msra.mxu3 %v9972_v33  ;;  %3753 = vmatpush.bf16.msra.mxu1 %v8884_v46  ;;  %v9653_v27 = vld [vmem:[#allocation5 + $0xa58] sm:$0xf0]  ;;  %v3547_v38 = vpop.f32.mrf.mxu1 }
 0x138   : > { %3741 = vmatmul.bf16.vlgmr.msra.gmra.mxu0 %v13978_v18  ;;  %v12898_v28 = vld [vmem:[#allocation5 + $0xe1c] sm:$0xf]  ;;  %v9656_v33 = vor.u32 %v12770_v26, %v9653_v27  ;;  %v3548_v46 = vadd.f32 %v3547_v38, %v3535_v37  ;;  %v12699_v37 = vld [vmem:[#allocation5 + $0x7dc] sm:$0xf0] }
 0x139   : > { %3766 = vmatpush.bf16.msra.mxu2 %v9396_v47  ;;  %3785 = vmatpush.bf16.msrb.mxu0 %v8824_v52  ;;  %v10165_v29 = vld [vmem:[#allocation5 + $0xe58] sm:$0xf0]  ;;  %v9851_v38 = vld [vmem:[#allocation5 + $0xba0] sm:$0xf] }
 0x13a   : > { %3754 = vmatmul.bf16.vlgmr.msra.gmra.mxu1 %v13981_v25  ;;  %v12498_v34 = vld [vmem:[#allocation5 + $0x19c] sm:$0xf]  ;;  %v10168_v39 = vor.u32 %v12898_v28, %v10165_v29 }
 0x13b   : > { %3779 = vmatpush.bf16.msra.mxu3 %v9908_v51  ;;  %3798 = vmatpush.bf16.msrb.mxu1 %v9336_v53  ;;  %v8565_v35 = vld [vmem:[#allocation5 + $0x1d8] sm:$0xf0] }
 0x13c   : > { %3767 = vmatmul.bf16.vlgmr.msra.gmra.mxu2 %v13971_v8  ;;  %v12626_v36 = vld [vmem:[#allocation5 + $0x59c] sm:$0xf]  ;;  %v8568_v47 = vor.u32 %v12498_v34, %v8565_v35  ;;  %v12571_v34 = vld [vmem:[#allocation5 + $0x3dc] sm:$0xf0] }
 0x13d   : > { %3811 = vmatpush.bf16.msrb.mxu2 %v9848_v54  ;;  %3786 = vmatpush.bf16.msrb.mxu0 %v8760_v0  ;;  %v12754_v42 = vld [vmem:[#allocation5 + $0x99c] sm:$0xf]  ;;  %v9080_v48 = vor.u32 %v12626_v36, %v9077_v40  ;;  %v9339_v35 = vld [vmem:[#allocation5 + $0x7a0] sm:$0xf] }
 0x13e   : > { %3780 = vmatmul.bf16.vlgmr.msra.gmra.mxu3 %v13973_v9  ;;  %v9589_v43 = vld [vmem:[#allocation5 + $0x9d8] sm:$0xf0] }
 0x13f   : > { %3824 = vmatpush.bf16.msrb.mxu3 %v10360_v58  ;;  %3799 = vmatpush.bf16.msrb.mxu1 %v9272_v1  ;;  %v12882_v44 = vld [vmem:[#allocation5 + $0xd9c] sm:$0xf]  ;;  %v9592_v49 = vor.u32 %v12754_v42, %v9589_v43  ;;  %v3560_v54 = vpop.f32.mrf.mxu2  ;;  %v3536_v1 = vpop.f32.mrf.mxu0  ;;  %v10363_v43 = vld [vmem:[#allocation5 + $0xfa0] sm:$0xf] }
 0x140   : > { %v10101_v45 = vld [vmem:[#allocation5 + $0xdd8] sm:$0xf0]  ;;  %v3561_v59 = vadd.f32 %v3560_v54, %v3548_v46  ;;  %v3549_v10 = vpop.f32.mrf.mxu1  ;;  %v12683_v54 = vld [vmem:[#allocation5 + $0x75c] sm:$0xf0] }
 0x141   : > { %3812 = vmatpush.bf16.msrb.mxu2 %v9784_v2  ;;  %3787 = vmatpush.bf16.msrb.mxu0 %v8696_v15  ;;  %v12482_v51 = vld [vmem:[#allocation5 + $0x11c] sm:$0xf]  ;;  %v10104_v55 = vor.u32 %v12882_v44, %v10101_v45  ;;  %v3573_v60 = vpop.f32.mrf.mxu3  ;;  %v12955_v44 = vld [vmem:[#allocation5 + $0xfdc] sm:$0xf0] }
 0x142   : > { %v8501_v52 = vld [vmem:[#allocation5 + $0x158] sm:$0xf0]  ;;  %v14018_v0 = vadd.f32 %v3573_v60, %v3561_v59  ;;  %v9211_v1 = vld [vmem:[#allocation5 + $0x6a0] sm:$0xf] }
 0x143   : > { %3825 = vmatpush.bf16.msrb.mxu3 %v10296_v7  ;;  %3800 = vmatpush.bf16.msrb.mxu1 %v9208_v17  ;;  %v12610_v53 = vld [vmem:[#allocation5 + $0x51c] sm:$0xf]  ;;  %v8504_v63 = vor.u32 %v12482_v51, %v8501_v52  ;;  %v12555_v51 = vld [vmem:[#allocation5 + $0x35c] sm:$0xf0] }
 0x144   : > { %v9013_v56 = vld [vmem:[#allocation5 + $0x558] sm:$0xf0]  ;;  %v9275_v52 = vld [vmem:[#allocation5 + $0x720] sm:$0xf] }
 0x145   : > { %3813 = vmatpush.bf16.msrb.mxu2 %v9720_v19  ;;  %3788 = vmatpush.bf16.msrb.mxu0 %v8632_v30  ;;  %v12738_v57 = vld [vmem:[#allocation5 + $0x91c] sm:$0xf]  ;;  %v9016_v2 = vor.u32 %v12610_v53, %v9013_v56  ;;  %v10364_v53 = vor.u32 %v12955_v44, %v10363_v43  ;;  %v12811_v56 = vld [vmem:[#allocation5 + $0xb5c] sm:$0xf0]  ;;  %v9276_v60 = vor.u32 %v12683_v54, %v9275_v52 }
 0x146   : > { %v9525_v58 = vld [vmem:[#allocation5 + $0x958] sm:$0xf0]  ;;  %v12923_v10 = vld [vmem:[#allocation5 + $0xedc] sm:$0xf0] }
 0x147   : > { %3826 = vmatpush.bf16.msrb.mxu3 %v10232_v23  ;;  %3801 = vmatpush.bf16.msrb.mxu1 %v9144_v32  ;;  %v12866_v61 = vld [vmem:[#allocation5 + $0xd1c] sm:$0xf]  ;;  %v9528_v3 = vor.u32 %v12738_v57, %v9525_v58  ;;  %v3562_v27 = vpop.f32.mrf.mxu2  ;;  %v10299_v57 = vld [vmem:[#allocation5 + $0xf20] sm:$0xf] }
 0x148   : > { %v10037_v62 = vld [vmem:[#allocation5 + $0xd58] sm:$0xf0]  ;;  %v12939_v58 = vld [vmem:[#allocation5 + $0xf5c] sm:$0xf0] }
 0x149   : > { %3814 = vmatpush.bf16.msrb.mxu2 %v9656_v33  ;;  %3789 = vmatpush.bf16.msrb.mxu0 %v8568_v47  ;;  %v12466_v4 = vld [vmem:[#allocation5 + $0x9c] sm:$0xf]  ;;  %v10040_v11 = vor.u32 %v12866_v61, %v10037_v62  ;;  %v3575_v32 = vpop.f32.mrf.mxu3  ;;  %v8827_v33 = vld [vmem:[#allocation5 + $0x3a0] sm:$0xf]  ;;  %v9340_v47 = vor.u32 %v12699_v37, %v9339_v35 }
 0x14a   : > { %v8437_v5 = vld [vmem:[#allocation5 + $0xd8] sm:$0xf0]  ;;  %v8828_v46 = vor.u32 %v12571_v34, %v8827_v33  ;;  %v8699_v62 = vld [vmem:[#allocation5 + $0x2a0] sm:$0xf] }
 0x14b   : > { %3827 = vmatpush.bf16.msrb.mxu3 %v10168_v39  ;;  %3802 = vmatpush.bf16.msrb.mxu1 %v9080_v48  ;;  %v12594_v7 = vld [vmem:[#allocation5 + $0x49c] sm:$0xf]  ;;  %v8440_v17 = vor.u32 %v12466_v4, %v8437_v5  ;;  %v12827_v39 = vld [vmem:[#allocation5 + $0xbdc] sm:$0xf0] }
 0x14c   : > { %v8949_v12 = vld [vmem:[#allocation5 + $0x4d8] sm:$0xf0]  ;;  %v9852_v48 = vor.u32 %v12827_v39, %v9851_v38  ;;  %v9723_v4 = vld [vmem:[#allocation5 + $0xaa0] sm:$0xf] }
 0x14d   : > { %3815 = vmatpush.bf16.msrb.mxu2 %v9592_v49  ;;  %v12722_v13 = vld [vmem:[#allocation5 + $0x89c] sm:$0xf]  ;;  %3790 = vmatpush.bf16.msrb.mxu0 %v8504_v63  ;;  %v8952_v21 = vor.u32 %v12594_v7, %v8949_v12  ;;  %v8763_v49 = vld [vmem:[#allocation5 + $0x320] sm:$0xf] }
 0x14e   : > { %v9461_v14 = vld [vmem:[#allocation5 + $0x8d8] sm:$0xf0]  ;;  %v8764_v59 = vor.u32 %v12555_v51, %v8763_v49  ;;  %v12539_v63 = vld [vmem:[#allocation5 + $0x2dc] sm:$0xf0] }
 0x14f   : > { %3828 = vmatpush.bf16.msrb.mxu3 %v10104_v55  ;;  %v12850_v15 = vld [vmem:[#allocation5 + $0xc9c] sm:$0xf]  ;;  %3803 = vmatpush.bf16.msrb.mxu1 %v9016_v2  ;;  %v9464_v22 = vor.u32 %v12722_v13, %v9461_v14  ;;  %v9787_v55 = vld [vmem:[#allocation5 + $0xb20] sm:$0xf]  ;;  %v10300_v2 = vor.u32 %v12939_v58, %v10299_v57 }
 0x150   : > { %v9973_v16 = vld [vmem:[#allocation5 + $0xcd8] sm:$0xf0]  ;;  %v9788_v61 = vor.u32 %v12811_v56, %v9787_v55  ;;  %v12795_v5 = vld [vmem:[#allocation5 + $0xadc] sm:$0xf0] }
 0x151   : > { %v12450_v19 = vld [vmem:[#allocation5 + $0x1c] sm:$0xf]  ;;  %3816 = vmatpush.bf16.msrb.mxu2 %v9528_v3  ;;  %v9976_v28 = vor.u32 %v12850_v15, %v9973_v16  ;;  %3791 = vmatpush.bf16.msrb.mxu0 %v8440_v17  ;;  %v12667_v3 = vld [vmem:[#allocation5 + $0x6dc] sm:$0xf0]  ;;  %v9724_v14 = vor.u32 %v12795_v5, %v9723_v4  ;;  %v832_v17 = vperm.slane %v14001_v50, 3 }
 0x152   : > { %v8373_v20 = vld [vmem:[#allocation5 + $0x58] sm:$0xf0]  ;;  %v10235_v7 = vld [vmem:[#allocation5 + $0xea0] sm:$0xf]  ;;  %v9212_v13 = vor.u32 %v12667_v3, %v9211_v1 }
 0x153   : > { %v12578_v23 = vld [vmem:[#allocation5 + $0x41c] sm:$0xf]  ;;  %3829 = vmatpush.bf16.msrb.mxu3 %v10040_v11  ;;  %v8376_v36 = vor.u32 %v12450_v19, %v8373_v20  ;;  %3804 = vmatpush.bf16.msrb.mxu1 %v8952_v21  ;;  %v8700_v11 = vor.u32 %v12539_v63, %v8699_v62  ;;  %v8635_v12 = vld [vmem:[#allocation5 + $0x220] sm:$0xf]  ;;  %v10236_v19 = vor.u32 %v12923_v10, %v10235_v7 }
 0x154   : > { %v8885_v24 = vld [vmem:[#allocation5 + $0x458] sm:$0xf0]  ;;  %v12523_v15 = vld [vmem:[#allocation5 + $0x25c] sm:$0xf0] }
 0x155   : > { %v12706_v26 = vld [vmem:[#allocation5 + $0x81c] sm:$0xf]  ;;  %3817 = vmatpush.bf16.msrb.mxu2 %v9464_v22  ;;  %v8888_v40 = vor.u32 %v12578_v23, %v8885_v24  ;;  %3792 = vmatpush.bf16.msrb.mxu0 %v8376_v36  ;;  %v9147_v16 = vld [vmem:[#allocation5 + $0x620] sm:$0xf]  ;;  %v3586_v27 = vpop.f32.mrf.mxu0 }
 0x156   : > { %v9397_v29 = vld [vmem:[#allocation5 + $0x858] sm:$0xf0]  ;;  %v12651_v20 = vld [vmem:[#allocation5 + $0x65c] sm:$0xf0]  ;;  %v3587_v33 = vadd.f32 %v3586_v27, %v832_v17 }
 0x157   : > { %v12834_v30 = vld [vmem:[#allocation5 + $0xc1c] sm:$0xf]  ;;  %v9400_v42 = vor.u32 %v12706_v26, %v9397_v29  ;;  %3830 = vmatpush.bf16.msrb.mxu3 %v9976_v28  ;;  %3805 = vmatpush.bf16.msrb.mxu1 %v8888_v40  ;;  %v9659_v21 = vld [vmem:[#allocation5 + $0xa20] sm:$0xf]  ;;  %v8636_v26 = vor.u32 %v12523_v15, %v8635_v12  ;;  %v9148_v28 = vor.u32 %v12651_v20, %v9147_v16  ;;  %v3599_v34 = vpop.f32.mrf.mxu1 }
 0x158   : > { %v9909_v31 = vld [vmem:[#allocation5 + $0xc58] sm:$0xf0]  ;;  %3793 = vmatmul.bf16.vlgmr.msrb.gmra.mxu0 %v13978_v18  ;;  %v12779_v22 = vld [vmem:[#allocation5 + $0xa5c] sm:$0xf0]  ;;  %v3600_v40 = vadd.f32 %v3599_v34, %v3587_v33  ;;  %v9341_v33 = vld [vmem:[#allocation5 + $0x7e0] sm:$0xf0] }
 0x159   : > { %v9912_v45 = vor.u32 %v12834_v30, %v9909_v31  ;;  %3818 = vmatpush.bf16.msrb.mxu2 %v9400_v42  ;;  %3837 = vmatpush.bf16.msra.mxu0 %v8828_v46  ;;  %v10171_v23 = vld [vmem:[#allocation5 + $0xe20] sm:$0xf]  ;;  %v9660_v29 = vor.u32 %v12779_v22, %v9659_v21  ;;  %v12819_v34 = vld [vmem:[#allocation5 + $0xba4] sm:$0xf] }
 0x15a   : > { %3806 = vmatmul.bf16.vlgmr.msrb.gmra.mxu1 %v13981_v25  ;;  %v12907_v24 = vld [vmem:[#allocation5 + $0xe5c] sm:$0xf0] }
 0x15b   : > { %3831 = vmatpush.bf16.msrb.mxu3 %v9912_v45  ;;  %3850 = vmatpush.bf16.msra.mxu1 %v9340_v47  ;;  %v8571_v30 = vld [vmem:[#allocation5 + $0x1a0] sm:$0xf]  ;;  %v10172_v50 = vor.u32 %v12907_v24, %v10171_v23 }
 0x15c   : > { %3819 = vmatmul.bf16.vlgmr.msrb.gmra.mxu2 %v13971_v8  ;;  %v12507_v31 = vld [vmem:[#allocation5 + $0x1dc] sm:$0xf0] }
 0x15d   : > { %3863 = vmatpush.bf16.msra.mxu2 %v9852_v48  ;;  %3838 = vmatpush.bf16.msra.mxu0 %v8764_v59  ;;  %v9083_v32 = vld [vmem:[#allocation5 + $0x5a0] sm:$0xf]  ;;  %v8572_v42 = vor.u32 %v12507_v31, %v8571_v30  ;;  %v8829_v30 = vld [vmem:[#allocation5 + $0x3e0] sm:$0xf0] }
 0x15e   : > { %3832 = vmatmul.bf16.vlgmr.msrb.gmra.mxu3 %v13973_v9  ;;  %v12635_v35 = vld [vmem:[#allocation5 + $0x5dc] sm:$0xf0]  ;;  %v12691_v31 = vld [vmem:[#allocation5 + $0x7a4] sm:$0xf] }
 0x15f   : > { %3876 = vmatpush.bf16.msra.mxu3 %v10364_v53  ;;  %3851 = vmatpush.bf16.msra.mxu1 %v9276_v60  ;;  %v9595_v36 = vld [vmem:[#allocation5 + $0x9a0] sm:$0xf]  ;;  %v9084_v43 = vor.u32 %v12635_v35, %v9083_v32  ;;  %v3612_v48 = vpop.f32.mrf.mxu2  ;;  %v3588_v60 = vpop.f32.mrf.mxu0 }
 0x160   : > { %v12763_v37 = vld [vmem:[#allocation5 + $0x9dc] sm:$0xf0]  ;;  %v3613_v54 = vadd.f32 %v3612_v48, %v3600_v40  ;;  %v3601_v3 = vpop.f32.mrf.mxu1  ;;  %v9277_v48 = vld [vmem:[#allocation5 + $0x760] sm:$0xf0] }
 0x161   : > { %3864 = vmatpush.bf16.msra.mxu2 %v9788_v61  ;;  %3839 = vmatpush.bf16.msra.mxu0 %v8700_v11  ;;  %v10107_v38 = vld [vmem:[#allocation5 + $0xda0] sm:$0xf]  ;;  %v9596_v44 = vor.u32 %v12763_v37, %v9595_v36  ;;  %v3625_v55 = vpop.f32.mrf.mxu3  ;;  %v12947_v37 = vld [vmem:[#allocation5 + $0xfa4] sm:$0xf] }
 0x162   : > { %v12891_v39 = vld [vmem:[#allocation5 + $0xddc] sm:$0xf0]  ;;  %v14025_v59 = vadd.f32 %v3625_v55, %v3613_v54  ;;  %v12659_v60 = vld [vmem:[#allocation5 + $0x6a4] sm:$0xf] }
 0x163   : > { %3877 = vmatpush.bf16.msra.mxu3 %v10300_v2  ;;  %3852 = vmatpush.bf16.msra.mxu1 %v9212_v13  ;;  %v8507_v45 = vld [vmem:[#allocation5 + $0x120] sm:$0xf]  ;;  %v10108_v49 = vor.u32 %v12891_v39, %v10107_v38  ;;  %v10365_v38 = vld [vmem:[#allocation5 + $0xfe0] sm:$0xf0] }
 0x164   : > { %v12491_v46 = vld [vmem:[#allocation5 + $0x15c] sm:$0xf0]  ;;  %v10237_v3 = vld [vmem:[#allocation5 + $0xee0] sm:$0xf0] }
 0x165   : > { %3865 = vmatpush.bf16.msra.mxu2 %v9724_v14  ;;  %3840 = vmatpush.bf16.msra.mxu0 %v8636_v26  ;;  %v9019_v47 = vld [vmem:[#allocation5 + $0x520] sm:$0xf]  ;;  %v8508_v58 = vor.u32 %v12491_v46, %v8507_v45  ;;  %v8765_v45 = vld [vmem:[#allocation5 + $0x360] sm:$0xf0] }
 0x166   : > { %v12619_v51 = vld [vmem:[#allocation5 + $0x55c] sm:$0xf0]  ;;  %v12675_v46 = vld [vmem:[#allocation5 + $0x724] sm:$0xf] }
 0x167   : > { %3878 = vmatpush.bf16.msra.mxu3 %v10236_v19  ;;  %3853 = vmatpush.bf16.msra.mxu1 %v9148_v28  ;;  %v9531_v52 = vld [vmem:[#allocation5 + $0x920] sm:$0xf]  ;;  %v9020_v61 = vor.u32 %v12619_v51, %v9019_v47  ;;  %v3614_v22 = vpop.f32.mrf.mxu2  ;;  %v10368_v47 = vor.u32 %v12947_v37, %v10365_v38  ;;  %v9789_v51 = vld [vmem:[#allocation5 + $0xb60] sm:$0xf0]  ;;  %v9280_v55 = vor.u32 %v12675_v46, %v9277_v48 }
 0x168   : > { %v12747_v53 = vld [vmem:[#allocation5 + $0x95c] sm:$0xf0]  ;;  %v12739_v48 = vld [vmem:[#allocation5 + $0x924] sm:$0xf] }
 0x169   : > { %3866 = vmatpush.bf16.msra.mxu2 %v9660_v29  ;;  %v10043_v56 = vld [vmem:[#allocation5 + $0xd20] sm:$0xf]  ;;  %3841 = vmatpush.bf16.msra.mxu0 %v8572_v42  ;;  %v9532_v62 = vor.u32 %v12747_v53, %v9531_v52  ;;  %v3627_v28 = vpop.f32.mrf.mxu3  ;;  %v12563_v29 = vld [vmem:[#allocation5 + $0x3a4] sm:$0xf]  ;;  %v9344_v42 = vor.u32 %v12691_v31, %v9341_v33 }
 0x16a   : > { %v12875_v57 = vld [vmem:[#allocation5 + $0xd5c] sm:$0xf0]  ;;  %v8832_v40 = vor.u32 %v12563_v29, %v8829_v30  ;;  %v12931_v52 = vld [vmem:[#allocation5 + $0xf24] sm:$0xf] }
 0x16b   : > { %3879 = vmatpush.bf16.msra.mxu3 %v10172_v50  ;;  %3854 = vmatpush.bf16.msra.mxu1 %v9084_v43  ;;  %v8443_v63 = vld [vmem:[#allocation5 + $0xa0] sm:$0xf]  ;;  %v10044_v4 = vor.u32 %v12875_v57, %v10043_v56  ;;  %v9853_v50 = vld [vmem:[#allocation5 + $0xbe0] sm:$0xf0] }
 0x16c   : > { %v12475_v1 = vld [vmem:[#allocation5 + $0xdc] sm:$0xf0]  ;;  %v9856_v43 = vor.u32 %v12819_v34, %v9853_v50  ;;  %v10301_v53 = vld [vmem:[#allocation5 + $0xf60] sm:$0xf0] }
 0x16d   : > { %3867 = vmatpush.bf16.msra.mxu2 %v9596_v44  ;;  %v8955_v2 = vld [vmem:[#allocation5 + $0x4a0] sm:$0xf]  ;;  %3842 = vmatpush.bf16.msra.mxu0 %v8508_v58  ;;  %v8444_v13 = vor.u32 %v12475_v1, %v8443_v63  ;;  %v12547_v44 = vld [vmem:[#allocation5 + $0x324] sm:$0xf] }
 0x16e   : > { %v12603_v5 = vld [vmem:[#allocation5 + $0x4dc] sm:$0xf0]  ;;  %v8768_v54 = vor.u32 %v12547_v44, %v8765_v45  ;;  %v12531_v57 = vld [vmem:[#allocation5 + $0x2a4] sm:$0xf] }
 0x16f   : > { %3880 = vmatpush.bf16.msra.mxu3 %v10108_v49  ;;  %v9467_v7 = vld [vmem:[#allocation5 + $0x8a0] sm:$0xf]  ;;  %3855 = vmatpush.bf16.msra.mxu1 %v9020_v61  ;;  %v8956_v16 = vor.u32 %v12603_v5, %v8955_v2  ;;  %v12803_v49 = vld [vmem:[#allocation5 + $0xb24] sm:$0xf]  ;;  %v10304_v61 = vor.u32 %v12931_v52, %v10301_v53 }
 0x170   : > { %v12731_v10 = vld [vmem:[#allocation5 + $0x8dc] sm:$0xf0]  ;;  %v9792_v56 = vor.u32 %v12803_v49, %v9789_v51  ;;  %v8701_v58 = vld [vmem:[#allocation5 + $0x2e0] sm:$0xf0] }
 0x171   : > { %v9979_v11 = vld [vmem:[#allocation5 + $0xca0] sm:$0xf]  ;;  %3868 = vmatpush.bf16.msra.mxu2 %v9532_v62  ;;  %v9468_v17 = vor.u32 %v12731_v10, %v9467_v7  ;;  %3843 = vmatpush.bf16.msra.mxu0 %v8444_v13  ;;  %v9213_v62 = vld [vmem:[#allocation5 + $0x6e0] sm:$0xf0] }
 0x172   : > { %v12859_v12 = vld [vmem:[#allocation5 + $0xcdc] sm:$0xf0]  ;;  %v12787_v63 = vld [vmem:[#allocation5 + $0xaa4] sm:$0xf]  ;;  %v9216_v7 = vor.u32 %v12659_v60, %v9213_v62 }
 0x173   : > { %v8379_v14 = vld [vmem:[#allocation5 + $0x20] sm:$0xf]  ;;  %3881 = vmatpush.bf16.msra.mxu3 %v10044_v4  ;;  %v9980_v23 = vor.u32 %v12859_v12, %v9979_v11  ;;  %3856 = vmatpush.bf16.msra.mxu1 %v8956_v16  ;;  %v9725_v1 = vld [vmem:[#allocation5 + $0xae0] sm:$0xf0]  ;;  %v8704_v4 = vor.u32 %v12531_v57, %v8701_v58 }
 0x174   : > { %v12459_v15 = vld [vmem:[#allocation5 + $0x5c] sm:$0xf0]  ;;  %v12915_v2 = vld [vmem:[#allocation5 + $0xea4] sm:$0xf]  ;;  %v9728_v10 = vor.u32 %v12787_v63, %v9725_v1 }
 0x175   : > { %v8891_v19 = vld [vmem:[#allocation5 + $0x420] sm:$0xf]  ;;  %v8380_v32 = vor.u32 %v12459_v15, %v8379_v14  ;;  %3869 = vmatpush.bf16.msra.mxu2 %v9468_v17  ;;  %v12515_v5 = vld [vmem:[#allocation5 + $0x224] sm:$0xf]  ;;  %v10240_v15 = vor.u32 %v12915_v2, %v10237_v3 }
 0x176   : > { %v12587_v20 = vld [vmem:[#allocation5 + $0x45c] sm:$0xf0]  ;;  %v8637_v11 = vld [vmem:[#allocation5 + $0x260] sm:$0xf0] }
 0x177   : > { %v9403_v21 = vld [vmem:[#allocation5 + $0x820] sm:$0xf]  ;;  %v8892_v35 = vor.u32 %v12587_v20, %v8891_v19  ;;  %3882 = vmatpush.bf16.msra.mxu3 %v9980_v23  ;;  %3844 = vmatpush.bf16.msra.mxu0 %v8380_v32  ;;  %v12643_v12 = vld [vmem:[#allocation5 + $0x624] sm:$0xf]  ;;  %v8640_v22 = vor.u32 %v12515_v5, %v8637_v11  ;;  %v3638_v23 = vpop.f32.mrf.mxu0  ;;  %v3651_v31 = vpop.f32.mrf.mxu1 }
 0x178   : > { %v12715_v24 = vld [vmem:[#allocation5 + $0x85c] sm:$0xf0]  ;;  %v9149_v16 = vld [vmem:[#allocation5 + $0x660] sm:$0xf0] }
 0x179   : > { %v9915_v26 = vld [vmem:[#allocation5 + $0xc20] sm:$0xf]  ;;  %v9404_v36 = vor.u32 %v12715_v24, %v9403_v21  ;;  %3857 = vmatpush.bf16.msra.mxu1 %v8892_v35  ;;  %v12771_v17 = vld [vmem:[#allocation5 + $0xa24] sm:$0xf]  ;;  %v9152_v24 = vor.u32 %v12643_v12, %v9149_v16 }
 0x17a   : > { %v12843_v27 = vld [vmem:[#allocation5 + $0xc5c] sm:$0xf0]  ;;  %3845 = vmatmul.bf16.vlgmr.msra.gmra.mxu0 %v13978_v18  ;;  %v9661_v19 = vld [vmem:[#allocation5 + $0xa60] sm:$0xf0] }
 0x17b   : > { %v9916_v39 = vor.u32 %v12843_v27, %v9915_v26  ;;  %3870 = vmatpush.bf16.msra.mxu2 %v9404_v36  ;;  %3889 = vmatpush.bf16.msrb.mxu0 %v8832_v40  ;;  %v14031_v13 = vld [vmem:[#allocation7] sm:$0xff]  ;;  %v9664_v26 = vor.u32 %v12771_v17, %v9661_v19 }
 0x17c   : > { %3858 = vmatmul.bf16.vlgmr.msra.gmra.mxu1 %v13981_v25  ;;  %v833_v14 = vperm.slane %v14031_v13, 4  ;;  %v12899_v20 = vld [vmem:[#allocation5 + $0xe24] sm:$0xf] }
 0x17d   : > { %3883 = vmatpush.bf16.msra.mxu3 %v9916_v39  ;;  %3902 = vmatpush.bf16.msrb.mxu1 %v9344_v42  ;;  %v10173_v21 = vld [vmem:[#allocation5 + $0xe60] sm:$0xf0] }
 0x17e   : > { %3871 = vmatmul.bf16.vlgmr.msra.gmra.mxu2 %v13971_v8  ;;  %v12499_v27 = vld [vmem:[#allocation5 + $0x1a4] sm:$0xf]  ;;  %v3639_v30 = vadd.f32 %v3638_v23, %v833_v14  ;;  %v10176_v32 = vor.u32 %v12899_v20, %v10173_v21 }
 0x17f   : > { %3915 = vmatpush.bf16.msrb.mxu2 %v9856_v43  ;;  %3890 = vmatpush.bf16.msrb.mxu0 %v8768_v54  ;;  %v8573_v28 = vld [vmem:[#allocation5 + $0x1e0] sm:$0xf0]  ;;  %v3664_v45 = vpop.f32.mrf.mxu2  ;;  %v3640_v57 = vpop.f32.mrf.mxu0 }
 0x180   : > { %3884 = vmatmul.bf16.vlgmr.msra.gmra.mxu3 %v13973_v9  ;;  %v12627_v29 = vld [vmem:[#allocation5 + $0x5a4] sm:$0xf]  ;;  %v3652_v37 = vadd.f32 %v3651_v31, %v3639_v30  ;;  %v8576_v38 = vor.u32 %v12499_v27, %v8573_v28  ;;  %v3653_v1 = vpop.f32.mrf.mxu1  ;;  %v8835_v28 = vld [vmem:[#allocation5 + $0x3a8] sm:$0xf] }
 0x181   : > { %3928 = vmatpush.bf16.msrb.mxu3 %v10368_v47  ;;  %3903 = vmatpush.bf16.msrb.mxu1 %v9280_v55  ;;  %v9085_v33 = vld [vmem:[#allocation5 + $0x5e0] sm:$0xf0]  ;;  %v3677_v52 = vpop.f32.mrf.mxu3  ;;  %v9347_v30 = vld [vmem:[#allocation5 + $0x7a8] sm:$0xf] }
 0x182   : > { %v12755_v34 = vld [vmem:[#allocation5 + $0x9a4] sm:$0xf]  ;;  %v9088_v39 = vor.u32 %v12627_v29, %v9085_v33  ;;  %v3665_v51 = vadd.f32 %v3664_v45, %v3652_v37  ;;  %v12572_v29 = vld [vmem:[#allocation5 + $0x3e4] sm:$0xf0] }
 0x183   : > { %3916 = vmatpush.bf16.msrb.mxu2 %v9792_v56  ;;  %3891 = vmatpush.bf16.msrb.mxu0 %v8704_v4  ;;  %v9597_v50 = vld [vmem:[#allocation5 + $0x9e0] sm:$0xf0]  ;;  %v9859_v33 = vld [vmem:[#allocation5 + $0xba8] sm:$0xf] }
 0x184   : > { %v12883_v35 = vld [vmem:[#allocation5 + $0xda4] sm:$0xf]  ;;  %v9600_v40 = vor.u32 %v12755_v34, %v9597_v50  ;;  %v14034_v56 = vadd.f32 %v3677_v52, %v3665_v51  ;;  %v12828_v34 = vld [vmem:[#allocation5 + $0xbe4] sm:$0xf0] }
 0x185   : > { %3929 = vmatpush.bf16.msrb.mxu3 %v10304_v61  ;;  %3904 = vmatpush.bf16.msrb.mxu1 %v9216_v7  ;;  %v10109_v36 = vld [vmem:[#allocation5 + $0xde0] sm:$0xf0]  ;;  %v12956_v37 = vld [vmem:[#allocation5 + $0xfe4] sm:$0xf0] }
 0x186   : > { %v12483_v42 = vld [vmem:[#allocation5 + $0x124] sm:$0xf]  ;;  %v10112_v46 = vor.u32 %v12883_v35, %v10109_v36  ;;  %v10371_v36 = vld [vmem:[#allocation5 + $0xfa8] sm:$0xf] }
 0x187   : > { %3917 = vmatpush.bf16.msrb.mxu2 %v9728_v10  ;;  %3892 = vmatpush.bf16.msrb.mxu0 %v8640_v22  ;;  %v8509_v43 = vld [vmem:[#allocation5 + $0x160] sm:$0xf0]  ;;  %v3666_v21 = vpop.f32.mrf.mxu2  ;;  %v9283_v45 = vld [vmem:[#allocation5 + $0x728] sm:$0xf] }
 0x188   : > { %v12611_v44 = vld [vmem:[#allocation5 + $0x524] sm:$0xf]  ;;  %v8512_v55 = vor.u32 %v12483_v42, %v8509_v43  ;;  %v9860_v42 = vor.u32 %v12828_v34, %v9859_v33  ;;  %v8771_v43 = vld [vmem:[#allocation5 + $0x328] sm:$0xf] }
 0x189   : > { %3930 = vmatpush.bf16.msrb.mxu3 %v10240_v15  ;;  %3905 = vmatpush.bf16.msrb.mxu1 %v9152_v24  ;;  %v9021_v47 = vld [vmem:[#allocation5 + $0x560] sm:$0xf0]  ;;  %v3679_v27 = vpop.f32.mrf.mxu3  ;;  %v10307_v51 = vld [vmem:[#allocation5 + $0xf28] sm:$0xf] }
 0x18a   : > { %v9533_v49 = vld [vmem:[#allocation5 + $0x960] sm:$0xf0]  ;;  %v9024_v58 = vor.u32 %v12611_v44, %v9021_v47  ;;  %v12556_v44 = vld [vmem:[#allocation5 + $0x364] sm:$0xf0] }
 0x18b   : > { %3918 = vmatpush.bf16.msrb.mxu2 %v9664_v26  ;;  %v12867_v53 = vld [vmem:[#allocation5 + $0xd24] sm:$0xf]  ;;  %3893 = vmatpush.bf16.msrb.mxu0 %v8576_v38  ;;  %v9536_v60 = vor.u32 %v12739_v48, %v9533_v49  ;;  %v12684_v47 = vld [vmem:[#allocation5 + $0x764] sm:$0xf0] }
 0x18c   : > { %v10045_v54 = vld [vmem:[#allocation5 + $0xd60] sm:$0xf0]  ;;  %v9795_v48 = vld [vmem:[#allocation5 + $0xb28] sm:$0xf] }
 0x18d   : > { %3931 = vmatpush.bf16.msrb.mxu3 %v10176_v32  ;;  %3906 = vmatpush.bf16.msrb.mxu1 %v9088_v39  ;;  %v12467_v61 = vld [vmem:[#allocation5 + $0xa4] sm:$0xf]  ;;  %v10048_v2 = vor.u32 %v12867_v53, %v10045_v54  ;;  %v12700_v32 = vld [vmem:[#allocation5 + $0x7e4] sm:$0xf0]  ;;  %v8836_v39 = vor.u32 %v12572_v29, %v8835_v28  ;;  %v8772_v53 = vor.u32 %v12556_v44, %v8771_v43 }
 0x18e   : > { %v8445_v62 = vld [vmem:[#allocation5 + $0xe0] sm:$0xf0]  ;;  %v12812_v49 = vld [vmem:[#allocation5 + $0xb64] sm:$0xf0]  ;;  %v9284_v54 = vor.u32 %v12684_v47, %v9283_v45 }
 0x18f   : > { %3919 = vmatpush.bf16.msrb.mxu2 %v9600_v40  ;;  %v12595_v63 = vld [vmem:[#allocation5 + $0x4a4] sm:$0xf]  ;;  %3894 = vmatpush.bf16.msrb.mxu0 %v8512_v55  ;;  %v8448_v11 = vor.u32 %v12467_v61, %v8445_v62  ;;  %v9348_v40 = vor.u32 %v12700_v32, %v9347_v30  ;;  %v12940_v52 = vld [vmem:[#allocation5 + $0xf64] sm:$0xf0]  ;;  %v9796_v55 = vor.u32 %v12812_v49, %v9795_v48 }
 0x190   : > { %v8957_v3 = vld [vmem:[#allocation5 + $0x4e0] sm:$0xf0]  ;;  %v8707_v57 = vld [vmem:[#allocation5 + $0x2a8] sm:$0xf]  ;;  %v10308_v61 = vor.u32 %v12940_v52, %v10307_v51 }
 0x191   : > { %3932 = vmatpush.bf16.msrb.mxu3 %v10112_v46  ;;  %v12723_v4 = vld [vmem:[#allocation5 + $0x8a4] sm:$0xf]  ;;  %3907 = vmatpush.bf16.msrb.mxu1 %v9024_v58  ;;  %v8960_v15 = vor.u32 %v12595_v63, %v8957_v3  ;;  %v10372_v46 = vor.u32 %v12956_v37, %v10371_v36  ;;  %v12540_v58 = vld [vmem:[#allocation5 + $0x2e4] sm:$0xf0] }
 0x192   : > { %v9469_v5 = vld [vmem:[#allocation5 + $0x8e0] sm:$0xf0]  ;;  %v12668_v62 = vld [vmem:[#allocation5 + $0x6e4] sm:$0xf0] }
 0x193   : > { %v12851_v7 = vld [vmem:[#allocation5 + $0xca4] sm:$0xf]  ;;  %3920 = vmatpush.bf16.msrb.mxu2 %v9536_v60  ;;  %v9472_v16 = vor.u32 %v12723_v4, %v9469_v5  ;;  %3895 = vmatpush.bf16.msrb.mxu0 %v8448_v11  ;;  %v9219_v60 = vld [vmem:[#allocation5 + $0x6a8] sm:$0xf]  ;;  %v8708_v4 = vor.u32 %v12540_v58, %v8707_v57 }
 0x194   : > { %v9981_v10 = vld [vmem:[#allocation5 + $0xce0] sm:$0xf0]  ;;  %v9731_v63 = vld [vmem:[#allocation5 + $0xaa8] sm:$0xf] }
 0x195   : > { %v12451_v12 = vld [vmem:[#allocation5 + $0x24] sm:$0xf]  ;;  %3933 = vmatpush.bf16.msrb.mxu3 %v10048_v2  ;;  %v9984_v22 = vor.u32 %v12851_v7, %v9981_v10  ;;  %3908 = vmatpush.bf16.msrb.mxu1 %v8960_v15  ;;  %v12796_v1 = vld [vmem:[#allocation5 + $0xae4] sm:$0xf0]  ;;  %v9220_v7 = vor.u32 %v12668_v62, %v9219_v60 }
 0x196   : > { %v8381_v14 = vld [vmem:[#allocation5 + $0x60] sm:$0xf0]  ;;  %v10243_v2 = vld [vmem:[#allocation5 + $0xea8] sm:$0xf]  ;;  %v9732_v10 = vor.u32 %v12796_v1, %v9731_v63 }
 0x197   : > { %v12579_v17 = vld [vmem:[#allocation5 + $0x424] sm:$0xf]  ;;  %v8384_v31 = vor.u32 %v12451_v12, %v8381_v14  ;;  %3921 = vmatpush.bf16.msrb.mxu2 %v9472_v16  ;;  %v12924_v3 = vld [vmem:[#allocation5 + $0xee4] sm:$0xf0]  ;;  %v834_v14 = vperm.slane %v14031_v13, 5 }
 0x198   : > { %v8893_v19 = vld [vmem:[#allocation5 + $0x460] sm:$0xf0]  ;;  %v8643_v5 = vld [vmem:[#allocation5 + $0x228] sm:$0xf]  ;;  %v10244_v15 = vor.u32 %v12924_v3, %v10243_v2 }
 0x199   : > { %v12707_v20 = vld [vmem:[#allocation5 + $0x824] sm:$0xf]  ;;  %v8896_v50 = vor.u32 %v12579_v17, %v8893_v19  ;;  %3934 = vmatpush.bf16.msrb.mxu3 %v9984_v22  ;;  %3896 = vmatpush.bf16.msrb.mxu0 %v8384_v31  ;;  %v12524_v11 = vld [vmem:[#allocation5 + $0x264] sm:$0xf0]  ;;  %v3703_v31 = vpop.f32.mrf.mxu1 }
 0x19a   : > { %v9405_v23 = vld [vmem:[#allocation5 + $0x860] sm:$0xf0]  ;;  %v9155_v12 = vld [vmem:[#allocation5 + $0x628] sm:$0xf]  ;;  %v8644_v22 = vor.u32 %v12524_v11, %v8643_v5 }
 0x19b   : > { %v12835_v24 = vld [vmem:[#allocation5 + $0xc24] sm:$0xf]  ;;  %v9408_v35 = vor.u32 %v12707_v20, %v9405_v23  ;;  %3909 = vmatpush.bf16.msrb.mxu1 %v8896_v50  ;;  %v12652_v16 = vld [vmem:[#allocation5 + $0x664] sm:$0xf0]  ;;  %v3690_v23 = vpop.f32.mrf.mxu0 }
 0x19c   : > { %v9917_v26 = vld [vmem:[#allocation5 + $0xc60] sm:$0xf0]  ;;  %3897 = vmatmul.bf16.vlgmr.msrb.gmra.mxu0 %v13978_v18  ;;  %v9667_v17 = vld [vmem:[#allocation5 + $0xa28] sm:$0xf]  ;;  %v3691_v30 = vadd.f32 %v3690_v23, %v834_v14 }
 0x19d   : > { %v9920_v38 = vor.u32 %v12835_v24, %v9917_v26  ;;  %3922 = vmatpush.bf16.msrb.mxu2 %v9408_v35  ;;  %3941 = vmatpush.bf16.msra.mxu0 %v8836_v39  ;;  %v12780_v19 = vld [vmem:[#allocation5 + $0xa64] sm:$0xf0]  ;;  %v9156_v24 = vor.u32 %v12652_v16, %v9155_v12 }
 0x19e   : > { %3910 = vmatmul.bf16.vlgmr.msrb.gmra.mxu1 %v13981_v25  ;;  %v10179_v20 = vld [vmem:[#allocation5 + $0xe28] sm:$0xf]  ;;  %v9668_v26 = vor.u32 %v12780_v19, %v9667_v17  ;;  %v3704_v37 = vadd.f32 %v3703_v31, %v3691_v30  ;;  %v8837_v30 = vld [vmem:[#allocation5 + $0x3e8] sm:$0xf0] }
 0x19f   : > { %3935 = vmatpush.bf16.msrb.mxu3 %v9920_v38  ;;  %3954 = vmatpush.bf16.msra.mxu1 %v9348_v40  ;;  %v12908_v21 = vld [vmem:[#allocation5 + $0xe64] sm:$0xf0]  ;;  %v3716_v45 = vpop.f32.mrf.mxu2  ;;  %v12692_v31 = vld [vmem:[#allocation5 + $0x7ac] sm:$0xf] }
 0x1a0   : > { %3923 = vmatmul.bf16.vlgmr.msrb.gmra.mxu2 %v13971_v8  ;;  %v8579_v27 = vld [vmem:[#allocation5 + $0x1a8] sm:$0xf]  ;;  %v10180_v32 = vor.u32 %v12908_v21, %v10179_v20  ;;  %v3717_v51 = vadd.f32 %v3716_v45, %v3704_v37  ;;  %v12948_v37 = vld [vmem:[#allocation5 + $0xfac] sm:$0xf] }
 0x1a1   : > { %3967 = vmatpush.bf16.msra.mxu2 %v9860_v42  ;;  %3942 = vmatpush.bf16.msra.mxu0 %v8772_v53  ;;  %v12508_v28 = vld [vmem:[#allocation5 + $0x1e4] sm:$0xf0]  ;;  %v3729_v52 = vpop.f32.mrf.mxu3  ;;  %v3705_v2 = vpop.f32.mrf.mxu1  ;;  %v8773_v45 = vld [vmem:[#allocation5 + $0x368] sm:$0xf0] }
 0x1a2   : > { %3936 = vmatmul.bf16.vlgmr.msrb.gmra.mxu3 %v13973_v9  ;;  %v9091_v29 = vld [vmem:[#allocation5 + $0x5a8] sm:$0xf]  ;;  %v8580_v38 = vor.u32 %v12508_v28, %v8579_v27  ;;  %v14041_v57 = vadd.f32 %v3729_v52, %v3717_v51  ;;  %v9797_v51 = vld [vmem:[#allocation5 + $0xb68] sm:$0xf0] }
 0x1a3   : > { %3980 = vmatpush.bf16.msra.mxu3 %v10372_v46  ;;  %3955 = vmatpush.bf16.msra.mxu1 %v9284_v54  ;;  %v12636_v33 = vld [vmem:[#allocation5 + $0x5e4] sm:$0xf0]  ;;  %v3692_v58 = vpop.f32.mrf.mxu0  ;;  %v12932_v52 = vld [vmem:[#allocation5 + $0xf2c] sm:$0xf] }
 0x1a4   : > { %v9603_v34 = vld [vmem:[#allocation5 + $0x9a8] sm:$0xf]  ;;  %v9092_v39 = vor.u32 %v12636_v33, %v9091_v29  ;;  %v12564_v29 = vld [vmem:[#allocation5 + $0x3ac] sm:$0xf] }
 0x1a5   : > { %3968 = vmatpush.bf16.msra.mxu2 %v9796_v55  ;;  %3943 = vmatpush.bf16.msra.mxu0 %v8708_v4  ;;  %v12764_v50 = vld [vmem:[#allocation5 + $0x9e4] sm:$0xf0]  ;;  %v9349_v33 = vld [vmem:[#allocation5 + $0x7e8] sm:$0xf0] }
 0x1a6   : > { %v10115_v35 = vld [vmem:[#allocation5 + $0xda8] sm:$0xf]  ;;  %v9604_v40 = vor.u32 %v12764_v50, %v9603_v34  ;;  %v12820_v34 = vld [vmem:[#allocation5 + $0xbac] sm:$0xf] }
 0x1a7   : > { %3981 = vmatpush.bf16.msra.mxu3 %v10308_v61  ;;  %3956 = vmatpush.bf16.msra.mxu1 %v9220_v7  ;;  %v12892_v36 = vld [vmem:[#allocation5 + $0xde4] sm:$0xf0]  ;;  %v9861_v50 = vld [vmem:[#allocation5 + $0xbe8] sm:$0xf0] }
 0x1a8   : > { %v8515_v42 = vld [vmem:[#allocation5 + $0x128] sm:$0xf]  ;;  %v10116_v46 = vor.u32 %v12892_v36, %v10115_v35  ;;  %v12788_v2 = vld [vmem:[#allocation5 + $0xaac] sm:$0xf] }
 0x1a9   : > { %3969 = vmatpush.bf16.msra.mxu2 %v9732_v10  ;;  %3944 = vmatpush.bf16.msra.mxu0 %v8644_v22  ;;  %v12492_v43 = vld [vmem:[#allocation5 + $0x164] sm:$0xf0]  ;;  %v3718_v22 = vpop.f32.mrf.mxu2  ;;  %v3731_v28 = vpop.f32.mrf.mxu3 }
 0x1aa   : > { %v9027_v44 = vld [vmem:[#allocation5 + $0x528] sm:$0xf]  ;;  %v8516_v55 = vor.u32 %v12492_v43, %v8515_v42  ;;  %v9352_v42 = vor.u32 %v12692_v31, %v9349_v33  ;;  %v9864_v43 = vor.u32 %v12820_v34, %v9861_v50  ;;  %v12900_v22 = vld [vmem:[#allocation5 + $0xe2c] sm:$0xf] }
 0x1ab   : > { %3982 = vmatpush.bf16.msra.mxu3 %v10244_v15  ;;  %3957 = vmatpush.bf16.msra.mxu1 %v9156_v24  ;;  %v12620_v47 = vld [vmem:[#allocation5 + $0x564] sm:$0xf0]  ;;  %v12628_v31 = vld [vmem:[#allocation5 + $0x5ac] sm:$0xf] }
 0x1ac   : > { %v9539_v48 = vld [vmem:[#allocation5 + $0x928] sm:$0xf]  ;;  %v9028_v60 = vor.u32 %v12620_v47, %v9027_v44  ;;  %v12548_v44 = vld [vmem:[#allocation5 + $0x32c] sm:$0xf] }
 0x1ad   : > { %3970 = vmatpush.bf16.msra.mxu2 %v9668_v26  ;;  %v12748_v49 = vld [vmem:[#allocation5 + $0x964] sm:$0xf0]  ;;  %3945 = vmatpush.bf16.msra.mxu0 %v8580_v38  ;;  %v10373_v38 = vld [vmem:[#allocation5 + $0xfe8] sm:$0xf0] }
 0x1ae   : > { %v10051_v53 = vld [vmem:[#allocation5 + $0xd28] sm:$0xf]  ;;  %v9540_v61 = vor.u32 %v12748_v49, %v9539_v48  ;;  %v10376_v47 = vor.u32 %v12948_v37, %v10373_v38  ;;  %v9285_v48 = vld [vmem:[#allocation5 + $0x768] sm:$0xf0] }
 0x1af   : > { %3983 = vmatpush.bf16.msra.mxu3 %v10180_v32  ;;  %v12876_v54 = vld [vmem:[#allocation5 + $0xd64] sm:$0xf0]  ;;  %3958 = vmatpush.bf16.msra.mxu1 %v9092_v39  ;;  %v12804_v49 = vld [vmem:[#allocation5 + $0xb2c] sm:$0xf] }
 0x1b0   : > { %v8451_v62 = vld [vmem:[#allocation5 + $0xa8] sm:$0xf]  ;;  %v10052_v3 = vor.u32 %v12876_v54, %v10051_v53  ;;  %v10309_v53 = vld [vmem:[#allocation5 + $0xf68] sm:$0xf0]  ;;  %v8776_v54 = vor.u32 %v12548_v44, %v8773_v45  ;;  %v9800_v58 = vor.u32 %v12804_v49, %v9797_v51 }
 0x1b1   : > { %3971 = vmatpush.bf16.msra.mxu2 %v9604_v40  ;;  %v12476_v63 = vld [vmem:[#allocation5 + $0xe4] sm:$0xf0]  ;;  %3946 = vmatpush.bf16.msra.mxu0 %v8516_v55  ;;  %v8840_v40 = vor.u32 %v12564_v29, %v8837_v30  ;;  %v12500_v29 = vld [vmem:[#allocation5 + $0x1ac] sm:$0xf] }
 0x1b2   : > { %v8963_v1 = vld [vmem:[#allocation5 + $0x4a8] sm:$0xf]  ;;  %v8452_v12 = vor.u32 %v12476_v63, %v8451_v62  ;;  %v12660_v62 = vld [vmem:[#allocation5 + $0x6ac] sm:$0xf]  ;;  %v10312_v63 = vor.u32 %v12932_v52, %v10309_v53 }
 0x1b3   : > { %3984 = vmatpush.bf16.msra.mxu3 %v10116_v46  ;;  %v12604_v4 = vld [vmem:[#allocation5 + $0x4e4] sm:$0xf0]  ;;  %3959 = vmatpush.bf16.msra.mxu1 %v9028_v60  ;;  %v12676_v46 = vld [vmem:[#allocation5 + $0x72c] sm:$0xf] }
 0x1b4   : > { %v9475_v5 = vld [vmem:[#allocation5 + $0x8a8] sm:$0xf]  ;;  %v8964_v16 = vor.u32 %v12604_v4, %v8963_v1  ;;  %v9288_v55 = vor.u32 %v12676_v46, %v9285_v48  ;;  %v12532_v60 = vld [vmem:[#allocation5 + $0x2ac] sm:$0xf] }
 0x1b5   : > { %v12732_v7 = vld [vmem:[#allocation5 + $0x8e4] sm:$0xf0]  ;;  %3972 = vmatpush.bf16.msra.mxu2 %v9540_v61  ;;  %3947 = vmatpush.bf16.msra.mxu0 %v8452_v12  ;;  %v8709_v61 = vld [vmem:[#allocation5 + $0x2e8] sm:$0xf0] }
 0x1b6   : > { %v9987_v10 = vld [vmem:[#allocation5 + $0xca8] sm:$0xf]  ;;  %v9476_v17 = vor.u32 %v12732_v7, %v9475_v5  ;;  %v9221_v1 = vld [vmem:[#allocation5 + $0x6e8] sm:$0xf0]  ;;  %v8712_v7 = vor.u32 %v12532_v60, %v8709_v61 }
 0x1b7   : > { %v12860_v11 = vld [vmem:[#allocation5 + $0xce4] sm:$0xf0]  ;;  %3985 = vmatpush.bf16.msra.mxu3 %v10052_v3  ;;  %3960 = vmatpush.bf16.msra.mxu1 %v8964_v16  ;;  %v9733_v3 = vld [vmem:[#allocation5 + $0xae8] sm:$0xf0]  ;;  %v835_v16 = vperm.slane %v14031_v13, 6  ;;  %v3755_v33 = vpop.f32.mrf.mxu1 }
 0x1b8   : > { %v8387_v14 = vld [vmem:[#allocation5 + $0x28] sm:$0xf]  ;;  %v9988_v23 = vor.u32 %v12860_v11, %v9987_v10  ;;  %v12916_v4 = vld [vmem:[#allocation5 + $0xeac] sm:$0xf]  ;;  %v9224_v11 = vor.u32 %v12660_v62, %v9221_v1  ;;  %v9736_v12 = vor.u32 %v12788_v2, %v9733_v3 }
 0x1b9   : > { %v12460_v15 = vld [vmem:[#allocation5 + $0x64] sm:$0xf0]  ;;  %3973 = vmatpush.bf16.msra.mxu2 %v9476_v17  ;;  %v10245_v5 = vld [vmem:[#allocation5 + $0xee8] sm:$0xf0] }
 0x1ba   : > { %v8899_v19 = vld [vmem:[#allocation5 + $0x428] sm:$0xf]  ;;  %v8388_v32 = vor.u32 %v12460_v15, %v8387_v14  ;;  %v12516_v10 = vld [vmem:[#allocation5 + $0x22c] sm:$0xf]  ;;  %v10248_v17 = vor.u32 %v12916_v4, %v10245_v5 }
 0x1bb   : > { %v12588_v20 = vld [vmem:[#allocation5 + $0x464] sm:$0xf0]  ;;  %3986 = vmatpush.bf16.msra.mxu3 %v9988_v23  ;;  %v8645_v14 = vld [vmem:[#allocation5 + $0x268] sm:$0xf0] }
 0x1bc   : > { %v9411_v21 = vld [vmem:[#allocation5 + $0x828] sm:$0xf]  ;;  %v8900_v35 = vor.u32 %v12588_v20, %v8899_v19  ;;  %3948 = vmatpush.bf16.msra.mxu0 %v8388_v32  ;;  %v12644_v15 = vld [vmem:[#allocation5 + $0x62c] sm:$0xf] }
 0x1bd   : > { %v12716_v24 = vld [vmem:[#allocation5 + $0x864] sm:$0xf0]  ;;  %v9157_v19 = vld [vmem:[#allocation5 + $0x668] sm:$0xf0] }
 0x1be   : > { %v9923_v26 = vld [vmem:[#allocation5 + $0xc28] sm:$0xf]  ;;  %v9412_v36 = vor.u32 %v12716_v24, %v9411_v21  ;;  %3961 = vmatpush.bf16.msra.mxu1 %v8900_v35  ;;  %v12772_v20 = vld [vmem:[#allocation5 + $0xa2c] sm:$0xf]  ;;  %v8648_v24 = vor.u32 %v12516_v10, %v8645_v14 }
 0x1bf   : > { %v12844_v27 = vld [vmem:[#allocation5 + $0xc64] sm:$0xf0]  ;;  %3949 = vmatmul.bf16.vlgmr.msra.gmra.mxu0 %v13978_v18  ;;  %v9669_v21 = vld [vmem:[#allocation5 + $0xa68] sm:$0xf0]  ;;  %v3757_v5 = vpop.f32.mrf.mxu1 }
 0x1c0   : > { %v9924_v39 = vor.u32 %v12844_v27, %v9923_v26  ;;  %3974 = vmatpush.bf16.msra.mxu2 %v9412_v36  ;;  %3993 = vmatpush.bf16.msrb.mxu0 %v8840_v40  ;;  %v10181_v23 = vld [vmem:[#allocation5 + $0xe68] sm:$0xf0]  ;;  %v3742_v26 = vpop.f32.mrf.mxu0  ;;  %v9160_v27 = vor.u32 %v12644_v15, %v9157_v19  ;;  %v9672_v28 = vor.u32 %v12772_v20, %v9669_v21  ;;  %v12669_v5 = vld [vmem:[#allocation5 + $0x6ec] sm:$0xf0] }
 0x1c1   : > { %3962 = vmatmul.bf16.vlgmr.msra.gmra.mxu1 %v13981_v25  ;;  %v8581_v30 = vld [vmem:[#allocation5 + $0x1e8] sm:$0xf0]  ;;  %v3743_v32 = vadd.f32 %v3742_v26, %v835_v16  ;;  %v10184_v34 = vor.u32 %v12900_v22, %v10181_v23 }
 0x1c2   : > { %3987 = vmatpush.bf16.msra.mxu3 %v9924_v39  ;;  %4006 = vmatpush.bf16.msrb.mxu1 %v9352_v42  ;;  %v9093_v50 = vld [vmem:[#allocation5 + $0x5e8] sm:$0xf0]  ;;  %v8584_v40 = vor.u32 %v12500_v29, %v8581_v30 }
 0x1c3   : > { %3975 = vmatmul.bf16.vlgmr.msra.gmra.mxu2 %v13971_v8  ;;  %v12756_v35 = vld [vmem:[#allocation5 + $0x9ac] sm:$0xf]  ;;  %v3756_v39 = vadd.f32 %v3755_v33, %v3743_v32  ;;  %v9096_v42 = vor.u32 %v12628_v31, %v9093_v50  ;;  %v8843_v32 = vld [vmem:[#allocation5 + $0x3b0] sm:$0xf] }
 0x1c4   : > { %4019 = vmatpush.bf16.msrb.mxu2 %v9864_v43  ;;  %3994 = vmatpush.bf16.msrb.mxu0 %v8776_v54  ;;  %v9605_v36 = vld [vmem:[#allocation5 + $0x9e8] sm:$0xf0]  ;;  %v3781_v54 = vpop.f32.mrf.mxu3  ;;  %v12573_v33 = vld [vmem:[#allocation5 + $0x3ec] sm:$0xf0] }
 0x1c5   : > { %3988 = vmatmul.bf16.vlgmr.msra.gmra.mxu3 %v13973_v9  ;;  %v12884_v37 = vld [vmem:[#allocation5 + $0xdac] sm:$0xf]  ;;  %v9608_v43 = vor.u32 %v12756_v35, %v9605_v36  ;;  %v12701_v35 = vld [vmem:[#allocation5 + $0x7ec] sm:$0xf0] }
 0x1c6   : > { %4032 = vmatpush.bf16.msrb.mxu3 %v10376_v47  ;;  %4007 = vmatpush.bf16.msrb.mxu1 %v9288_v55  ;;  %v10117_v38 = vld [vmem:[#allocation5 + $0xde8] sm:$0xf0]  ;;  %v3768_v47 = vpop.f32.mrf.mxu2  ;;  %v9867_v36 = vld [vmem:[#allocation5 + $0xbb0] sm:$0xf] }
 0x1c7   : > { %v12484_v44 = vld [vmem:[#allocation5 + $0x12c] sm:$0xf]  ;;  %v10120_v48 = vor.u32 %v12884_v37, %v10117_v38  ;;  %v3769_v53 = vadd.f32 %v3768_v47, %v3756_v39  ;;  %v12829_v37 = vld [vmem:[#allocation5 + $0xbec] sm:$0xf0] }
 0x1c8   : > { %4020 = vmatpush.bf16.msrb.mxu2 %v9800_v58  ;;  %3995 = vmatpush.bf16.msrb.mxu0 %v8712_v7  ;;  %v8517_v45 = vld [vmem:[#allocation5 + $0x168] sm:$0xf0]  ;;  %v3744_v62 = vpop.f32.mrf.mxu0  ;;  %v8779_v47 = vld [vmem:[#allocation5 + $0x330] sm:$0xf] }
 0x1c9   : > { %v12612_v46 = vld [vmem:[#allocation5 + $0x52c] sm:$0xf]  ;;  %v8520_v60 = vor.u32 %v12484_v44, %v8517_v45  ;;  %v14048_v61 = vadd.f32 %v3781_v54, %v3769_v53  ;;  %v8844_v44 = vor.u32 %v12573_v33, %v8843_v32  ;;  %v9803_v53 = vld [vmem:[#allocation5 + $0xb30] sm:$0xf] }
 0x1ca   : > { %4033 = vmatpush.bf16.msrb.mxu3 %v10312_v63  ;;  %4008 = vmatpush.bf16.msrb.mxu1 %v9224_v11  ;;  %v9029_v49 = vld [vmem:[#allocation5 + $0x568] sm:$0xf0]  ;;  %v12813_v54 = vld [vmem:[#allocation5 + $0xb6c] sm:$0xf0] }
 0x1cb   : > { %v12740_v51 = vld [vmem:[#allocation5 + $0x92c] sm:$0xf]  ;;  %v9032_v63 = vor.u32 %v12612_v46, %v9029_v49  ;;  %v9868_v46 = vor.u32 %v12829_v37, %v9867_v36  ;;  %v9291_v49 = vld [vmem:[#allocation5 + $0x730] sm:$0xf] }
 0x1cc   : > { %4021 = vmatpush.bf16.msrb.mxu2 %v9736_v12  ;;  %3996 = vmatpush.bf16.msrb.mxu0 %v8648_v24  ;;  %v9541_v52 = vld [vmem:[#allocation5 + $0x968] sm:$0xf0]  ;;  %v3783_v31 = vpop.f32.mrf.mxu3  ;;  %v8587_v33 = vld [vmem:[#allocation5 + $0x1b0] sm:$0xf] }
 0x1cd   : > { %v12868_v55 = vld [vmem:[#allocation5 + $0xd2c] sm:$0xf]  ;;  %v9544_v1 = vor.u32 %v12740_v51, %v9541_v52  ;;  %v12685_v52 = vld [vmem:[#allocation5 + $0x76c] sm:$0xf0] }
 0x1ce   : > { %4034 = vmatpush.bf16.msrb.mxu3 %v10248_v17  ;;  %4009 = vmatpush.bf16.msrb.mxu1 %v9160_v27  ;;  %v10053_v58 = vld [vmem:[#allocation5 + $0xd68] sm:$0xf0]  ;;  %v3770_v26 = vpop.f32.mrf.mxu2  ;;  %v9292_v62 = vor.u32 %v12685_v52, %v9291_v49  ;;  %v12637_v37 = vld [vmem:[#allocation5 + $0x5ec] sm:$0xf0] }
 0x1cf   : > { %v12468_v2 = vld [vmem:[#allocation5 + $0xac] sm:$0xf]  ;;  %v10056_v7 = vor.u32 %v12868_v55, %v10053_v58  ;;  %v10315_v55 = vld [vmem:[#allocation5 + $0xf30] sm:$0xf] }
 0x1d0   : > { %4022 = vmatpush.bf16.msrb.mxu2 %v9672_v28  ;;  %3997 = vmatpush.bf16.msrb.mxu0 %v8584_v40  ;;  %v8453_v3 = vld [vmem:[#allocation5 + $0xe8] sm:$0xf0]  ;;  %v10379_v40 = vld [vmem:[#allocation5 + $0xfb0] sm:$0xf] }
 0x1d1   : > { %v12596_v4 = vld [vmem:[#allocation5 + $0x4ac] sm:$0xf]  ;;  %v8456_v16 = vor.u32 %v12468_v2, %v8453_v3  ;;  %v12941_v58 = vld [vmem:[#allocation5 + $0xf6c] sm:$0xf0] }
 0x1d2   : > { %4035 = vmatpush.bf16.msrb.mxu3 %v10184_v34  ;;  %4010 = vmatpush.bf16.msrb.mxu1 %v9096_v42  ;;  %v8965_v10 = vld [vmem:[#allocation5 + $0x4e8] sm:$0xf0]  ;;  %v9355_v34 = vld [vmem:[#allocation5 + $0x7b0] sm:$0xf] }
 0x1d3   : > { %v12724_v11 = vld [vmem:[#allocation5 + $0x8ac] sm:$0xf]  ;;  %v8968_v20 = vor.u32 %v12596_v4, %v8965_v10  ;;  %v12957_v42 = vld [vmem:[#allocation5 + $0xfec] sm:$0xf0]  ;;  %v9356_v45 = vor.u32 %v12701_v35, %v9355_v34  ;;  %v10316_v4 = vor.u32 %v12941_v58, %v10315_v55 }
 0x1d4   : > { %4023 = vmatpush.bf16.msrb.mxu2 %v9608_v43  ;;  %v9477_v12 = vld [vmem:[#allocation5 + $0x8e8] sm:$0xf0]  ;;  %3998 = vmatpush.bf16.msrb.mxu0 %v8520_v60  ;;  %v10380_v51 = vor.u32 %v12957_v42, %v10379_v40  ;;  %v12541_v2 = vld [vmem:[#allocation5 + $0x2ec] sm:$0xf0] }
 0x1d5   : > { %v12852_v14 = vld [vmem:[#allocation5 + $0xcac] sm:$0xf]  ;;  %v9480_v21 = vor.u32 %v12724_v11, %v9477_v12  ;;  %v9227_v3 = vld [vmem:[#allocation5 + $0x6b0] sm:$0xf] }
 0x1d6   : > { %4036 = vmatpush.bf16.msrb.mxu3 %v10120_v48  ;;  %v9989_v15 = vld [vmem:[#allocation5 + $0xce8] sm:$0xf0]  ;;  %4011 = vmatpush.bf16.msrb.mxu1 %v9032_v63  ;;  %v12557_v48 = vld [vmem:[#allocation5 + $0x36c] sm:$0xf0]  ;;  %v9804_v63 = vor.u32 %v12813_v54, %v9803_v53 }
 0x1d7   : > { %v12452_v17 = vld [vmem:[#allocation5 + $0x2c] sm:$0xf]  ;;  %v9992_v27 = vor.u32 %v12852_v14, %v9989_v15  ;;  %v8780_v60 = vor.u32 %v12557_v48, %v8779_v47  ;;  %v12797_v10 = vld [vmem:[#allocation5 + $0xaec] sm:$0xf0]  ;;  %v3807_v36 = vpop.f32.mrf.mxu1 }
 0x1d8   : > { %v8389_v19 = vld [vmem:[#allocation5 + $0x68] sm:$0xf0]  ;;  %4024 = vmatpush.bf16.msrb.mxu2 %v9544_v1  ;;  %3999 = vmatpush.bf16.msrb.mxu0 %v8456_v16  ;;  %v8715_v1 = vld [vmem:[#allocation5 + $0x2b0] sm:$0xf]  ;;  %v9228_v16 = vor.u32 %v12669_v5, %v9227_v3 }
 0x1d9   : > { %v12580_v22 = vld [vmem:[#allocation5 + $0x42c] sm:$0xf]  ;;  %v8392_v50 = vor.u32 %v12452_v17, %v8389_v19  ;;  %v10251_v11 = vld [vmem:[#allocation5 + $0xeb0] sm:$0xf]  ;;  %v8716_v14 = vor.u32 %v12541_v2, %v8715_v1 }
 0x1da   : > { %v8901_v23 = vld [vmem:[#allocation5 + $0x468] sm:$0xf0]  ;;  %4037 = vmatpush.bf16.msrb.mxu3 %v10056_v7  ;;  %4012 = vmatpush.bf16.msrb.mxu1 %v8968_v20  ;;  %v9739_v7 = vld [vmem:[#allocation5 + $0xab0] sm:$0xf] }
 0x1db   : > { %v12708_v24 = vld [vmem:[#allocation5 + $0x82c] sm:$0xf]  ;;  %v8904_v38 = vor.u32 %v12580_v22, %v8901_v23  ;;  %v12925_v12 = vld [vmem:[#allocation5 + $0xeec] sm:$0xf0]  ;;  %v9740_v17 = vor.u32 %v12797_v10, %v9739_v7 }
 0x1dc   : > { %v9413_v28 = vld [vmem:[#allocation5 + $0x868] sm:$0xf0]  ;;  %4025 = vmatpush.bf16.msrb.mxu2 %v9480_v21  ;;  %4000 = vmatpush.bf16.msrb.mxu0 %v8392_v50  ;;  %v8651_v15 = vld [vmem:[#allocation5 + $0x230] sm:$0xf]  ;;  %v836_v21 = vperm.slane %v14031_v13, 7  ;;  %v10252_v22 = vor.u32 %v12925_v12, %v10251_v11 }
 0x1dd   : > { %v12836_v29 = vld [vmem:[#allocation5 + $0xc2c] sm:$0xf]  ;;  %v9416_v39 = vor.u32 %v12708_v24, %v9413_v28  ;;  %v12525_v19 = vld [vmem:[#allocation5 + $0x26c] sm:$0xf0] }
 0x1de   : > { %v9925_v30 = vld [vmem:[#allocation5 + $0xc68] sm:$0xf0]  ;;  %4038 = vmatpush.bf16.msrb.mxu3 %v9992_v27  ;;  %4013 = vmatpush.bf16.msrb.mxu1 %v8904_v38  ;;  %v9163_v20 = vld [vmem:[#allocation5 + $0x630] sm:$0xf] }
 0x1df   : > { %v9928_v43 = vor.u32 %v12836_v29, %v9925_v30  ;;  %4001 = vmatmul.bf16.vlgmr.msrb.gmra.mxu0 %v13978_v18  ;;  %v12653_v23 = vld [vmem:[#allocation5 + $0x66c] sm:$0xf0]  ;;  %v8652_v29 = vor.u32 %v12525_v19, %v8651_v15  ;;  %v3794_v30 = vpop.f32.mrf.mxu0  ;;  %v3809_v12 = vpop.f32.mrf.mxu1 }
 0x1e0   : > { %4026 = vmatpush.bf16.msrb.mxu2 %v9416_v39  ;;  %4045 = vmatpush.bf16.msra.mxu0 %v8844_v44  ;;  %v9675_v24 = vld [vmem:[#allocation5 + $0xa30] sm:$0xf]  ;;  %v9164_v31 = vor.u32 %v12653_v23, %v9163_v20  ;;  %v3795_v35 = vadd.f32 %v3794_v30, %v836_v21  ;;  %v9229_v12 = vld [vmem:[#allocation5 + $0x6f0] sm:$0xf0] }
 0x1e1   : > { %4014 = vmatmul.bf16.vlgmr.msrb.gmra.mxu1 %v13981_v25  ;;  %v12781_v26 = vld [vmem:[#allocation5 + $0xa6c] sm:$0xf0] }
 0x1e2   : > { %4039 = vmatpush.bf16.msrb.mxu3 %v9928_v43  ;;  %4058 = vmatpush.bf16.msra.mxu1 %v9356_v45  ;;  %v10187_v27 = vld [vmem:[#allocation5 + $0xe30] sm:$0xf]  ;;  %v9676_v32 = vor.u32 %v12781_v26, %v9675_v24  ;;  %v3808_v43 = vadd.f32 %v3807_v36, %v3795_v35  ;;  %v12565_v35 = vld [vmem:[#allocation5 + $0x3b4] sm:$0xf] }
 0x1e3   : > { %4027 = vmatmul.bf16.vlgmr.msrb.gmra.mxu2 %v13971_v8  ;;  %v12909_v28 = vld [vmem:[#allocation5 + $0xe6c] sm:$0xf0]  ;;  %v8845_v36 = vld [vmem:[#allocation5 + $0x3f0] sm:$0xf0] }
 0x1e4   : > { %4071 = vmatpush.bf16.msra.mxu2 %v9868_v46  ;;  %4046 = vmatpush.bf16.msra.mxu0 %v8780_v60  ;;  %v12509_v34 = vld [vmem:[#allocation5 + $0x1ec] sm:$0xf0]  ;;  %v10188_v13 = vor.u32 %v12909_v28, %v10187_v27  ;;  %v3833_v60 = vpop.f32.mrf.mxu3 }
 0x1e5   : > { %4040 = vmatmul.bf16.vlgmr.msrb.gmra.mxu3 %v13973_v9  ;;  %v9099_v50 = vld [vmem:[#allocation5 + $0x5b0] sm:$0xf]  ;;  %v8588_v44 = vor.u32 %v12509_v34, %v8587_v33 }
 0x1e6   : > { %4084 = vmatpush.bf16.msra.mxu3 %v10380_v51  ;;  %4059 = vmatpush.bf16.msra.mxu1 %v9292_v62  ;;  %v9611_v38 = vld [vmem:[#allocation5 + $0x9b0] sm:$0xf]  ;;  %v9100_v45 = vor.u32 %v12637_v37, %v9099_v50  ;;  %v3820_v51 = vpop.f32.mrf.mxu2 }
 0x1e7   : > { %v12765_v39 = vld [vmem:[#allocation5 + $0x9ec] sm:$0xf0]  ;;  %v3821_v58 = vadd.f32 %v3820_v51, %v3808_v43  ;;  %v3796_v3 = vpop.f32.mrf.mxu0  ;;  %v12549_v51 = vld [vmem:[#allocation5 + $0x334] sm:$0xf] }
 0x1e8   : > { %4072 = vmatpush.bf16.msra.mxu2 %v9804_v63  ;;  %4047 = vmatpush.bf16.msra.mxu0 %v8716_v14  ;;  %v10123_v40 = vld [vmem:[#allocation5 + $0xdb0] sm:$0xf]  ;;  %v9612_v46 = vor.u32 %v12765_v39, %v9611_v38  ;;  %v9357_v38 = vld [vmem:[#allocation5 + $0x7f0] sm:$0xf0] }
 0x1e9   : > { %v12893_v42 = vld [vmem:[#allocation5 + $0xdec] sm:$0xf0]  ;;  %v14055_v2 = vadd.f32 %v3833_v60, %v3821_v58  ;;  %v12821_v39 = vld [vmem:[#allocation5 + $0xbb4] sm:$0xf] }
 0x1ea   : > { %4085 = vmatpush.bf16.msra.mxu3 %v10316_v4  ;;  %4060 = vmatpush.bf16.msra.mxu1 %v9228_v16  ;;  %v8523_v47 = vld [vmem:[#allocation5 + $0x130] sm:$0xf]  ;;  %v10124_v52 = vor.u32 %v12893_v42, %v10123_v40  ;;  %v9869_v40 = vld [vmem:[#allocation5 + $0xbf0] sm:$0xf0] }
 0x1eb   : > { %v12493_v48 = vld [vmem:[#allocation5 + $0x16c] sm:$0xf0]  ;;  %v12805_v58 = vld [vmem:[#allocation5 + $0xb34] sm:$0xf] }
 0x1ec   : > { %4073 = vmatpush.bf16.msra.mxu2 %v9740_v17  ;;  %4048 = vmatpush.bf16.msra.mxu0 %v8652_v29  ;;  %v9035_v49 = vld [vmem:[#allocation5 + $0x530] sm:$0xf]  ;;  %v8524_v1 = vor.u32 %v12493_v48, %v8523_v47  ;;  %v3835_v50 = vpop.f32.mrf.mxu3  ;;  %v8848_v47 = vor.u32 %v12565_v35, %v8845_v36  ;;  %v9805_v60 = vld [vmem:[#allocation5 + $0xb70] sm:$0xf0] }
 0x1ed   : > { %v12621_v53 = vld [vmem:[#allocation5 + $0x56c] sm:$0xf0] }
 0x1ee   : > { %4086 = vmatpush.bf16.msra.mxu3 %v10252_v22  ;;  %4061 = vmatpush.bf16.msra.mxu1 %v9164_v31  ;;  %v9547_v54 = vld [vmem:[#allocation5 + $0x930] sm:$0xf]  ;;  %v9036_v4 = vor.u32 %v12621_v53, %v9035_v49  ;;  %v3822_v30 = vpop.f32.mrf.mxu2  ;;  %v9872_v49 = vor.u32 %v12821_v39, %v9869_v40  ;;  %v12677_v53 = vld [vmem:[#allocation5 + $0x734] sm:$0xf] }
 0x1ef   : > { %v12749_v55 = vld [vmem:[#allocation5 + $0x96c] sm:$0xf0]  ;;  %v12773_v30 = vld [vmem:[#allocation5 + $0xa34] sm:$0xf] }
 0x1f0   : > { %4074 = vmatpush.bf16.msra.mxu2 %v9676_v32  ;;  %v10059_v62 = vld [vmem:[#allocation5 + $0xd30] sm:$0xf]  ;;  %4049 = vmatpush.bf16.msra.mxu0 %v8588_v44  ;;  %v9548_v5 = vor.u32 %v12749_v55, %v9547_v54  ;;  %v12949_v44 = vld [vmem:[#allocation5 + $0xfb4] sm:$0xf] }
 0x1f1   : > { %v12877_v63 = vld [vmem:[#allocation5 + $0xd6c] sm:$0xf0]  ;;  %v9293_v55 = vld [vmem:[#allocation5 + $0x770] sm:$0xf0] }
 0x1f2   : > { %4087 = vmatpush.bf16.msra.mxu3 %v10188_v13  ;;  %4062 = vmatpush.bf16.msra.mxu1 %v9100_v45  ;;  %v8459_v7 = vld [vmem:[#allocation5 + $0xb0] sm:$0xf]  ;;  %v10060_v14 = vor.u32 %v12877_v63, %v10059_v62  ;;  %v12693_v13 = vld [vmem:[#allocation5 + $0x7b4] sm:$0xf]  ;;  %v9296_v3 = vor.u32 %v12677_v53, %v9293_v55 }
 0x1f3   : > { %v12477_v10 = vld [vmem:[#allocation5 + $0xec] sm:$0xf0]  ;;  %v10381_v45 = vld [vmem:[#allocation5 + $0xff0] sm:$0xf0]  ;;  %v9360_v48 = vor.u32 %v12693_v13, %v9357_v38 }
 0x1f4   : > { %4075 = vmatpush.bf16.msra.mxu2 %v9612_v46  ;;  %v8971_v11 = vld [vmem:[#allocation5 + $0x4b0] sm:$0xf]  ;;  %4050 = vmatpush.bf16.msra.mxu0 %v8524_v1  ;;  %v8460_v21 = vor.u32 %v12477_v10, %v8459_v7  ;;  %v10384_v54 = vor.u32 %v12949_v44, %v10381_v45  ;;  %v12933_v62 = vld [vmem:[#allocation5 + $0xf34] sm:$0xf] }
 0x1f5   : > { %v12605_v15 = vld [vmem:[#allocation5 + $0x4ec] sm:$0xf0]  ;;  %v10317_v63 = vld [vmem:[#allocation5 + $0xf70] sm:$0xf0] }
 0x1f6   : > { %4088 = vmatpush.bf16.msra.mxu3 %v10124_v52  ;;  %v9483_v16 = vld [vmem:[#allocation5 + $0x8b0] sm:$0xf]  ;;  %4063 = vmatpush.bf16.msra.mxu1 %v9036_v4  ;;  %v8972_v24 = vor.u32 %v12605_v15, %v8971_v11  ;;  %v8781_v52 = vld [vmem:[#allocation5 + $0x370] sm:$0xf0]  ;;  %v9808_v4 = vor.u32 %v12805_v58, %v9805_v60  ;;  %v10320_v11 = vor.u32 %v12933_v62, %v10317_v63 }
 0x1f7   : > { %v12733_v17 = vld [vmem:[#allocation5 + $0x8ec] sm:$0xf0]  ;;  %v8784_v1 = vor.u32 %v12549_v51, %v8781_v52  ;;  %v8717_v7 = vld [vmem:[#allocation5 + $0x2f0] sm:$0xf0]  ;;  %v3846_v50 = vpop.f32.mrf.mxu0 }
 0x1f8   : > { %v9995_v19 = vld [vmem:[#allocation5 + $0xcb0] sm:$0xf]  ;;  %4076 = vmatpush.bf16.msra.mxu2 %v9548_v5  ;;  %v9484_v26 = vor.u32 %v12733_v17, %v9483_v16  ;;  %4051 = vmatpush.bf16.msra.mxu0 %v8460_v21  ;;  %v12533_v5 = vld [vmem:[#allocation5 + $0x2b4] sm:$0xf]  ;;  %v14061_v21 = vld [vmem:[#allocation7 + $0x8] sm:$0xff] }
 0x1f9   : > { %v12861_v20 = vld [vmem:[#allocation5 + $0xcec] sm:$0xf0]  ;;  %v12661_v10 = vld [vmem:[#allocation5 + $0x6b4] sm:$0xf]  ;;  %v3859_v40 = vpop.f32.mrf.mxu1 }
 0x1fa   : > { %v8395_v22 = vld [vmem:[#allocation5 + $0x30] sm:$0xf]  ;;  %4089 = vmatpush.bf16.msra.mxu3 %v10060_v14  ;;  %v9996_v31 = vor.u32 %v12861_v20, %v9995_v19  ;;  %4064 = vmatpush.bf16.msra.mxu1 %v8972_v24  ;;  %v12789_v14 = vld [vmem:[#allocation5 + $0xab4] sm:$0xf]  ;;  %v8720_v19 = vor.u32 %v12533_v5, %v8717_v7 }
 0x1fb   : > { %v12461_v23 = vld [vmem:[#allocation5 + $0x6c] sm:$0xf0]  ;;  %v9741_v15 = vld [vmem:[#allocation5 + $0xaf0] sm:$0xf0] }
 0x1fc   : > { %v8907_v27 = vld [vmem:[#allocation5 + $0x430] sm:$0xf]  ;;  %v8396_v37 = vor.u32 %v12461_v23, %v8395_v22  ;;  %4077 = vmatpush.bf16.msra.mxu2 %v9484_v26  ;;  %v12917_v16 = vld [vmem:[#allocation5 + $0xeb4] sm:$0xf]  ;;  %v9232_v22 = vor.u32 %v12661_v10, %v9229_v12  ;;  %v9744_v23 = vor.u32 %v12789_v14, %v9741_v15 }
 0x1fd   : > { %v12589_v28 = vld [vmem:[#allocation5 + $0x46c] sm:$0xf0]  ;;  %v10253_v17 = vld [vmem:[#allocation5 + $0xef0] sm:$0xf0] }
 0x1fe   : > { %v9419_v29 = vld [vmem:[#allocation5 + $0x830] sm:$0xf]  ;;  %v8908_v42 = vor.u32 %v12589_v28, %v8907_v27  ;;  %4090 = vmatpush.bf16.msra.mxu3 %v9996_v31  ;;  %4052 = vmatpush.bf16.msra.mxu0 %v8396_v37  ;;  %v12517_v20 = vld [vmem:[#allocation5 + $0x234] sm:$0xf]  ;;  %v837_v27 = vperm.slane %v14061_v21, 0  ;;  %v10256_v28 = vor.u32 %v12917_v16, %v10253_v17 }
 0x1ff   : > { %v12717_v32 = vld [vmem:[#allocation5 + $0x86c] sm:$0xf0]  ;;  %v8653_v24 = vld [vmem:[#allocation5 + $0x270] sm:$0xf0]  ;;  %v3848_v12 = vpop.f32.mrf.mxu0 }
 0x200   : > { %v9931_v33 = vld [vmem:[#allocation5 + $0xc30] sm:$0xf]  ;;  %v9420_v43 = vor.u32 %v12717_v32, %v9419_v29  ;;  %4065 = vmatpush.bf16.msra.mxu1 %v8908_v42  ;;  %v12645_v26 = vld [vmem:[#allocation5 + $0x634] sm:$0xf]  ;;  %v3847_v39 = vadd.f32 %v3846_v50, %v837_v27  ;;  %v12942_v12 = vld [vmem:[#allocation5 + $0xf74] sm:$0xf0] }
 0x201   : > { %v12845_v34 = vld [vmem:[#allocation5 + $0xc6c] sm:$0xf0]  ;;  %4053 = vmatmul.bf16.vlgmr.msra.gmra.mxu0 %v13978_v18  ;;  %v9165_v29 = vld [vmem:[#allocation5 + $0x670] sm:$0xf0]  ;;  %v3872_v58 = vpop.f32.mrf.mxu2 }
 0x202   : > { %v9932_v46 = vor.u32 %v12845_v34, %v9931_v33  ;;  %4078 = vmatpush.bf16.msra.mxu2 %v9420_v43  ;;  %4097 = vmatpush.bf16.msrb.mxu0 %v8848_v47  ;;  %v9677_v31 = vld [vmem:[#allocation5 + $0xa70] sm:$0xf0]  ;;  %v8656_v34 = vor.u32 %v12517_v20, %v8653_v24  ;;  %v9168_v35 = vor.u32 %v12645_v26, %v9165_v29  ;;  %v3861_v20 = vpop.f32.mrf.mxu1 }
 0x203   : > { %4066 = vmatmul.bf16.vlgmr.msra.gmra.mxu1 %v13981_v25  ;;  %v12901_v32 = vld [vmem:[#allocation5 + $0xe34] sm:$0xf]  ;;  %v9680_v36 = vor.u32 %v12773_v30, %v9677_v31  ;;  %v9235_v20 = vld [vmem:[#allocation5 + $0x6b8] sm:$0xf] }
 0x204   : > { %4091 = vmatpush.bf16.msra.mxu3 %v9932_v46  ;;  %4110 = vmatpush.bf16.msrb.mxu1 %v9360_v48  ;;  %v10189_v33 = vld [vmem:[#allocation5 + $0xe70] sm:$0xf0]  ;;  %v3860_v48 = vadd.f32 %v3859_v40, %v3847_v39 }
 0x205   : > { %4079 = vmatmul.bf16.vlgmr.msra.gmra.mxu2 %v13971_v8  ;;  %v12501_v13 = vld [vmem:[#allocation5 + $0x1b4] sm:$0xf]  ;;  %v10192_v42 = vor.u32 %v12901_v32, %v10189_v33 }
 0x206   : > { %4123 = vmatpush.bf16.msrb.mxu2 %v9872_v49  ;;  %4098 = vmatpush.bf16.msrb.mxu0 %v8784_v1  ;;  %v8589_v37 = vld [vmem:[#allocation5 + $0x1f0] sm:$0xf0] }
 0x207   : > { %4092 = vmatmul.bf16.vlgmr.msra.gmra.mxu3 %v13973_v9  ;;  %v12629_v38 = vld [vmem:[#allocation5 + $0x5b4] sm:$0xf]  ;;  %v8592_v49 = vor.u32 %v12501_v13, %v8589_v37 }
 0x208   : > { %4136 = vmatpush.bf16.msrb.mxu3 %v10384_v54  ;;  %4111 = vmatpush.bf16.msrb.mxu1 %v9296_v3  ;;  %v9101_v43 = vld [vmem:[#allocation5 + $0x5f0] sm:$0xf0]  ;;  %v3873_v3 = vadd.f32 %v3872_v58, %v3860_v48  ;;  %v12830_v48 = vld [vmem:[#allocation5 + $0xbf4] sm:$0xf0] }
 0x209   : > { %v12757_v44 = vld [vmem:[#allocation5 + $0x9b4] sm:$0xf]  ;;  %v9104_v51 = vor.u32 %v12629_v38, %v9101_v43  ;;  %v12574_v43 = vld [vmem:[#allocation5 + $0x3f4] sm:$0xf0] }
 0x20a   : > { %4124 = vmatpush.bf16.msrb.mxu2 %v9808_v4  ;;  %4099 = vmatpush.bf16.msrb.mxu0 %v8720_v19  ;;  %v9613_v45 = vld [vmem:[#allocation5 + $0x9f0] sm:$0xf0]  ;;  %v3885_v4 = vpop.f32.mrf.mxu3 }
 0x20b   : > { %v12885_v46 = vld [vmem:[#allocation5 + $0xdb4] sm:$0xf]  ;;  %v9616_v52 = vor.u32 %v12757_v44, %v9613_v45  ;;  %v9363_v44 = vld [vmem:[#allocation5 + $0x7b8] sm:$0xf] }
 0x20c   : > { %4137 = vmatpush.bf16.msrb.mxu3 %v10320_v11  ;;  %4112 = vmatpush.bf16.msrb.mxu1 %v9232_v22  ;;  %v10125_v47 = vld [vmem:[#allocation5 + $0xdf0] sm:$0xf0]  ;;  %v14064_v11 = vadd.f32 %v3885_v4, %v3873_v3  ;;  %v12686_v4 = vld [vmem:[#allocation5 + $0x774] sm:$0xf0] }
 0x20d   : > { %v12485_v53 = vld [vmem:[#allocation5 + $0x134] sm:$0xf]  ;;  %v10128_v60 = vor.u32 %v12885_v46, %v10125_v47  ;;  %v12702_v46 = vld [vmem:[#allocation5 + $0x7f4] sm:$0xf0] }
 0x20e   : > { %4125 = vmatpush.bf16.msrb.mxu2 %v9744_v23  ;;  %4100 = vmatpush.bf16.msrb.mxu0 %v8656_v34  ;;  %v8525_v54 = vld [vmem:[#allocation5 + $0x170] sm:$0xf0]  ;;  %v9875_v47 = vld [vmem:[#allocation5 + $0xbb8] sm:$0xf]  ;;  %v9364_v58 = vor.u32 %v12702_v46, %v9363_v44 }
 0x20f   : > { %v12613_v55 = vld [vmem:[#allocation5 + $0x534] sm:$0xf]  ;;  %v8528_v10 = vor.u32 %v12485_v53, %v8525_v54  ;;  %v12958_v53 = vld [vmem:[#allocation5 + $0xff4] sm:$0xf0] }
 0x210   : > { %4138 = vmatpush.bf16.msrb.mxu3 %v10256_v28  ;;  %4113 = vmatpush.bf16.msrb.mxu1 %v9168_v35  ;;  %v9037_v62 = vld [vmem:[#allocation5 + $0x570] sm:$0xf0]  ;;  %v12510_v46 = vld [vmem:[#allocation5 + $0x1f4] sm:$0xf0] }
 0x211   : > { %v12741_v63 = vld [vmem:[#allocation5 + $0x934] sm:$0xf]  ;;  %v9040_v14 = vor.u32 %v12613_v55, %v9037_v62  ;;  %v8787_v62 = vld [vmem:[#allocation5 + $0x338] sm:$0xf] }
 0x212   : > { %4126 = vmatpush.bf16.msrb.mxu2 %v9680_v36  ;;  %v9549_v1 = vld [vmem:[#allocation5 + $0x970] sm:$0xf0]  ;;  %4101 = vmatpush.bf16.msrb.mxu0 %v8592_v49  ;;  %v3874_v36 = vpop.f32.mrf.mxu2  ;;  %v3887_v40 = vpop.f32.mrf.mxu3 }
 0x213   : > { %v12869_v5 = vld [vmem:[#allocation5 + $0xd34] sm:$0xf]  ;;  %v9552_v15 = vor.u32 %v12741_v63, %v9549_v1  ;;  %v12558_v63 = vld [vmem:[#allocation5 + $0x374] sm:$0xf0] }
 0x214   : > { %4139 = vmatpush.bf16.msrb.mxu3 %v10192_v42  ;;  %v10061_v7 = vld [vmem:[#allocation5 + $0xd70] sm:$0xf0]  ;;  %4114 = vmatpush.bf16.msrb.mxu1 %v9104_v51  ;;  %v8851_v42 = vld [vmem:[#allocation5 + $0x3b8] sm:$0xf] }
 0x215   : > { %v12469_v16 = vld [vmem:[#allocation5 + $0xb4] sm:$0xf]  ;;  %v10064_v22 = vor.u32 %v12869_v5, %v10061_v7  ;;  %v8852_v55 = vor.u32 %v12574_v43, %v8851_v42  ;;  %v9299_v1 = vld [vmem:[#allocation5 + $0x738] sm:$0xf] }
 0x216   : > { %4127 = vmatpush.bf16.msrb.mxu2 %v9616_v52  ;;  %v8461_v17 = vld [vmem:[#allocation5 + $0xf0] sm:$0xf0]  ;;  %4102 = vmatpush.bf16.msrb.mxu0 %v8528_v10  ;;  %v10387_v52 = vld [vmem:[#allocation5 + $0xfb8] sm:$0xf] }
 0x217   : > { %v12597_v19 = vld [vmem:[#allocation5 + $0x4b4] sm:$0xf]  ;;  %v8464_v29 = vor.u32 %v12469_v16, %v8461_v17  ;;  %v10388_v3 = vor.u32 %v12958_v53, %v10387_v52  ;;  %v9811_v5 = vld [vmem:[#allocation5 + $0xb38] sm:$0xf] }
 0x218   : > { %4140 = vmatpush.bf16.msrb.mxu3 %v10128_v60  ;;  %v8973_v23 = vld [vmem:[#allocation5 + $0x4f0] sm:$0xf0]  ;;  %4115 = vmatpush.bf16.msrb.mxu1 %v9040_v14  ;;  %v9876_v60 = vor.u32 %v12830_v48, %v9875_v47  ;;  %v12814_v7 = vld [vmem:[#allocation5 + $0xb74] sm:$0xf0]  ;;  %v8788_v14 = vor.u32 %v12558_v63, %v8787_v62 }
 0x219   : > { %v12725_v24 = vld [vmem:[#allocation5 + $0x8b4] sm:$0xf]  ;;  %v8976_v32 = vor.u32 %v12597_v19, %v8973_v23  ;;  %v10323_v10 = vld [vmem:[#allocation5 + $0xf38] sm:$0xf]  ;;  %v9812_v16 = vor.u32 %v12814_v7, %v9811_v5  ;;  %v3898_v42 = vpop.f32.mrf.mxu0 }
 0x21a   : > { %v9485_v26 = vld [vmem:[#allocation5 + $0x8f0] sm:$0xf0]  ;;  %4128 = vmatpush.bf16.msrb.mxu2 %v9552_v15  ;;  %4103 = vmatpush.bf16.msrb.mxu0 %v8464_v29  ;;  %v9300_v15 = vor.u32 %v12686_v4, %v9299_v1  ;;  %v8723_v17 = vld [vmem:[#allocation5 + $0x2b8] sm:$0xf] }
 0x21b   : > { %v12853_v27 = vld [vmem:[#allocation5 + $0xcb4] sm:$0xf]  ;;  %v9488_v33 = vor.u32 %v12725_v24, %v9485_v26  ;;  %v12542_v19 = vld [vmem:[#allocation5 + $0x2f4] sm:$0xf0] }
 0x21c   : > { %v9997_v28 = vld [vmem:[#allocation5 + $0xcf0] sm:$0xf0]  ;;  %4141 = vmatpush.bf16.msrb.mxu3 %v10064_v22  ;;  %4116 = vmatpush.bf16.msrb.mxu1 %v8976_v32  ;;  %v10324_v22 = vor.u32 %v12942_v12, %v10323_v10  ;;  %v12670_v23 = vld [vmem:[#allocation5 + $0x6f4] sm:$0xf0]  ;;  %v8724_v29 = vor.u32 %v12542_v19, %v8723_v17 }
 0x21d   : > { %v12453_v30 = vld [vmem:[#allocation5 + $0x34] sm:$0xf]  ;;  %v10000_v13 = vor.u32 %v12853_v27, %v9997_v28  ;;  %v9747_v24 = vld [vmem:[#allocation5 + $0xab8] sm:$0xf] }
 0x21e   : > { %v8397_v31 = vld [vmem:[#allocation5 + $0x70] sm:$0xf0]  ;;  %4129 = vmatpush.bf16.msrb.mxu2 %v9488_v33  ;;  %v12798_v26 = vld [vmem:[#allocation5 + $0xaf4] sm:$0xf0] }
 0x21f   : > { %v12581_v34 = vld [vmem:[#allocation5 + $0x434] sm:$0xf]  ;;  %v8400_v45 = vor.u32 %v12453_v30, %v8397_v31  ;;  %v10259_v27 = vld [vmem:[#allocation5 + $0xeb8] sm:$0xf]  ;;  %v9236_v31 = vor.u32 %v12670_v23, %v9235_v20  ;;  %v9748_v32 = vor.u32 %v12798_v26, %v9747_v24 }
 0x220   : > { %v8909_v50 = vld [vmem:[#allocation5 + $0x470] sm:$0xf0]  ;;  %4142 = vmatpush.bf16.msrb.mxu3 %v10000_v13  ;;  %v12926_v28 = vld [vmem:[#allocation5 + $0xef4] sm:$0xf0] }
 0x221   : > { %v12709_v35 = vld [vmem:[#allocation5 + $0x834] sm:$0xf]  ;;  %v8912_v49 = vor.u32 %v12581_v34, %v8909_v50  ;;  %4104 = vmatpush.bf16.msrb.mxu0 %v8400_v45  ;;  %v8659_v30 = vld [vmem:[#allocation5 + $0x238] sm:$0xf]  ;;  %v838_v50 = vperm.slane %v14061_v21, 1  ;;  %v3900_v24 = vpop.f32.mrf.mxu0 }
 0x222   : > { %v9421_v37 = vld [vmem:[#allocation5 + $0x870] sm:$0xf0]  ;;  %v12526_v33 = vld [vmem:[#allocation5 + $0x274] sm:$0xf0]  ;;  %v12934_v24 = vld [vmem:[#allocation5 + $0xf3c] sm:$0xf] }
 0x223   : > { %v12837_v38 = vld [vmem:[#allocation5 + $0xc34] sm:$0xf]  ;;  %v9424_v51 = vor.u32 %v12709_v35, %v9421_v37  ;;  %4117 = vmatpush.bf16.msrb.mxu1 %v8912_v49  ;;  %v9171_v34 = vld [vmem:[#allocation5 + $0x638] sm:$0xf]  ;;  %v10260_v35 = vor.u32 %v12926_v28, %v10259_v27  ;;  %v8660_v40 = vor.u32 %v12526_v33, %v8659_v30  ;;  %v3899_v48 = vadd.f32 %v3898_v42, %v838_v50  ;;  %v3911_v49 = vpop.f32.mrf.mxu1  ;;  %v3924_v7 = vpop.f32.mrf.mxu2 }
 0x224   : > { %v9933_v39 = vld [vmem:[#allocation5 + $0xc70] sm:$0xf0]  ;;  %4105 = vmatmul.bf16.vlgmr.msrb.gmra.mxu0 %v13978_v18  ;;  %v12654_v36 = vld [vmem:[#allocation5 + $0x674] sm:$0xf0] }
 0x225   : > { %v9936_v54 = vor.u32 %v12837_v38, %v9933_v39  ;;  %4130 = vmatpush.bf16.msrb.mxu2 %v9424_v51  ;;  %4149 = vmatpush.bf16.msra.mxu0 %v8852_v55  ;;  %v9683_v13 = vld [vmem:[#allocation5 + $0xa38] sm:$0xf]  ;;  %v9172_v43 = vor.u32 %v12654_v36, %v9171_v34  ;;  %v3937_v17 = vpop.f32.mrf.mxu3 }
 0x226   : > { %4118 = vmatmul.bf16.vlgmr.msrb.gmra.mxu1 %v13981_v25  ;;  %v12782_v37 = vld [vmem:[#allocation5 + $0xa74] sm:$0xf0] }
 0x227   : > { %4143 = vmatpush.bf16.msrb.mxu3 %v9936_v54  ;;  %4162 = vmatpush.bf16.msra.mxu1 %v9364_v58  ;;  %v10195_v38 = vld [vmem:[#allocation5 + $0xe38] sm:$0xf]  ;;  %v9684_v44 = vor.u32 %v12782_v37, %v9683_v13 }
 0x228   : > { %4131 = vmatmul.bf16.vlgmr.msrb.gmra.mxu2 %v13971_v8  ;;  %v12910_v39 = vld [vmem:[#allocation5 + $0xe74] sm:$0xf0] }
 0x229   : > { %4175 = vmatpush.bf16.msra.mxu2 %v9876_v60  ;;  %4150 = vmatpush.bf16.msra.mxu0 %v8788_v14  ;;  %v8595_v45 = vld [vmem:[#allocation5 + $0x1b8] sm:$0xf]  ;;  %v10196_v51 = vor.u32 %v12910_v39, %v10195_v38  ;;  %v3912_v60 = vadd.f32 %v3911_v49, %v3899_v48 }
 0x22a   : > { %4144 = vmatmul.bf16.vlgmr.msrb.gmra.mxu3 %v13973_v9  ;;  %v9107_v47 = vld [vmem:[#allocation5 + $0x5b8] sm:$0xf]  ;;  %v8596_v62 = vor.u32 %v12510_v46, %v8595_v45 }
 0x22b   : > { %4188 = vmatpush.bf16.msra.mxu3 %v10388_v3  ;;  %4163 = vmatpush.bf16.msra.mxu1 %v9300_v15  ;;  %v12638_v52 = vld [vmem:[#allocation5 + $0x5f4] sm:$0xf0]  ;;  %v3926_v45 = vpop.f32.mrf.mxu2 }
 0x22c   : > { %v9619_v53 = vld [vmem:[#allocation5 + $0x9b8] sm:$0xf]  ;;  %v9108_v63 = vor.u32 %v12638_v52, %v9107_v47  ;;  %v12566_v52 = vld [vmem:[#allocation5 + $0x3bc] sm:$0xf] }
 0x22d   : > { %4176 = vmatpush.bf16.msra.mxu2 %v9812_v16  ;;  %4151 = vmatpush.bf16.msra.mxu0 %v8724_v29  ;;  %v12766_v54 = vld [vmem:[#allocation5 + $0x9f4] sm:$0xf0]  ;;  %v3925_v16 = vadd.f32 %v3924_v7, %v3912_v60  ;;  %v12822_v60 = vld [vmem:[#allocation5 + $0xbbc] sm:$0xf] }
 0x22e   : > { %v10131_v55 = vld [vmem:[#allocation5 + $0xdb8] sm:$0xf]  ;;  %v9620_v1 = vor.u32 %v12766_v54, %v9619_v53  ;;  %v8853_v53 = vld [vmem:[#allocation5 + $0x3f8] sm:$0xf0] }
 0x22f   : > { %4189 = vmatpush.bf16.msra.mxu3 %v10324_v22  ;;  %4164 = vmatpush.bf16.msra.mxu1 %v9236_v31  ;;  %v12894_v58 = vld [vmem:[#allocation5 + $0xdf4] sm:$0xf0]  ;;  %v14071_v23 = vadd.f32 %v3937_v17, %v3925_v16  ;;  %v3913_v31 = vpop.f32.mrf.mxu1  ;;  %v12694_v54 = vld [vmem:[#allocation5 + $0x7bc] sm:$0xf]  ;;  %v8856_v7 = vor.u32 %v12566_v52, %v8853_v53 }
 0x230   : > { %v8531_v3 = vld [vmem:[#allocation5 + $0x138] sm:$0xf]  ;;  %v10132_v10 = vor.u32 %v12894_v58, %v10131_v55  ;;  %v9365_v58 = vld [vmem:[#allocation5 + $0x7f8] sm:$0xf0] }
 0x231   : > { %4177 = vmatpush.bf16.msra.mxu2 %v9748_v32  ;;  %4152 = vmatpush.bf16.msra.mxu0 %v8660_v40  ;;  %v12494_v4 = vld [vmem:[#allocation5 + $0x174] sm:$0xf0]  ;;  %v12678_v16 = vld [vmem:[#allocation5 + $0x73c] sm:$0xf] }
 0x232   : > { %v9043_v5 = vld [vmem:[#allocation5 + $0x538] sm:$0xf]  ;;  %v8532_v22 = vor.u32 %v12494_v4, %v8531_v3  ;;  %v12950_v3 = vld [vmem:[#allocation5 + $0xfbc] sm:$0xf] }
 0x233   : > { %4190 = vmatpush.bf16.msra.mxu3 %v10260_v35  ;;  %4165 = vmatpush.bf16.msra.mxu1 %v9172_v43  ;;  %v12622_v12 = vld [vmem:[#allocation5 + $0x574] sm:$0xf0]  ;;  %v10389_v4 = vld [vmem:[#allocation5 + $0xff8] sm:$0xf0] }
 0x234   : > { %v9555_v14 = vld [vmem:[#allocation5 + $0x938] sm:$0xf]  ;;  %v9044_v26 = vor.u32 %v12622_v12, %v9043_v5  ;;  %v10392_v17 = vor.u32 %v12950_v3, %v10389_v4  ;;  %v8725_v31 = vld [vmem:[#allocation5 + $0x2f8] sm:$0xf0] }
 0x235   : > { %4178 = vmatpush.bf16.msra.mxu2 %v9684_v44  ;;  %v12750_v15 = vld [vmem:[#allocation5 + $0x974] sm:$0xf0]  ;;  %4153 = vmatpush.bf16.msra.mxu0 %v8596_v62  ;;  %v9877_v62 = vld [vmem:[#allocation5 + $0xbf8] sm:$0xf0] }
 0x236   : > { %v10067_v19 = vld [vmem:[#allocation5 + $0xd38] sm:$0xf]  ;;  %v9556_v27 = vor.u32 %v12750_v15, %v9555_v14  ;;  %v9880_v12 = vor.u32 %v12822_v60, %v9877_v62  ;;  %v12550_v14 = vld [vmem:[#allocation5 + $0x33c] sm:$0xf] }
 0x237   : > { %4191 = vmatpush.bf16.msra.mxu3 %v10196_v51  ;;  %v12878_v20 = vld [vmem:[#allocation5 + $0xd74] sm:$0xf0]  ;;  %4166 = vmatpush.bf16.msra.mxu1 %v9108_v63  ;;  %v3939_v51 = vpop.f32.mrf.mxu3  ;;  %v8789_v15 = vld [vmem:[#allocation5 + $0x378] sm:$0xf0] }
 0x238   : > { %v8467_v28 = vld [vmem:[#allocation5 + $0xb8] sm:$0xf]  ;;  %v10068_v32 = vor.u32 %v12878_v20, %v10067_v19  ;;  %v9301_v19 = vld [vmem:[#allocation5 + $0x778] sm:$0xf0] }
 0x239   : > { %4179 = vmatpush.bf16.msra.mxu2 %v9620_v1  ;;  %v12478_v29 = vld [vmem:[#allocation5 + $0xf4] sm:$0xf0]  ;;  %4154 = vmatpush.bf16.msra.mxu0 %v8532_v22  ;;  %v12806_v20 = vld [vmem:[#allocation5 + $0xb3c] sm:$0xf] }
 0x23a   : > { %v8979_v30 = vld [vmem:[#allocation5 + $0x4b8] sm:$0xf]  ;;  %v8468_v13 = vor.u32 %v12478_v29, %v8467_v28  ;;  %v9813_v22 = vld [vmem:[#allocation5 + $0xb78] sm:$0xf0]  ;;  %v9304_v28 = vor.u32 %v12678_v16, %v9301_v19 }
 0x23b   : > { %4192 = vmatpush.bf16.msra.mxu3 %v10132_v10  ;;  %v12606_v33 = vld [vmem:[#allocation5 + $0x4f4] sm:$0xf0]  ;;  %4167 = vmatpush.bf16.msra.mxu1 %v9044_v26  ;;  %v9368_v10 = vor.u32 %v12694_v54, %v9365_v58  ;;  %v10325_v26 = vld [vmem:[#allocation5 + $0xf78] sm:$0xf0]  ;;  %v9816_v29 = vor.u32 %v12806_v20, %v9813_v22 }
 0x23c   : > { %v9491_v34 = vld [vmem:[#allocation5 + $0x8b8] sm:$0xf]  ;;  %v8980_v39 = vor.u32 %v12606_v33, %v8979_v30  ;;  %v12534_v30 = vld [vmem:[#allocation5 + $0x2bc] sm:$0xf]  ;;  %v10328_v33 = vor.u32 %v12934_v24, %v10325_v26  ;;  %v3950_v53 = vpop.f32.mrf.mxu0 }
 0x23d   : > { %v12734_v50 = vld [vmem:[#allocation5 + $0x8f4] sm:$0xf0]  ;;  %4180 = vmatpush.bf16.msra.mxu2 %v9556_v27  ;;  %4155 = vmatpush.bf16.msra.mxu0 %v8468_v13  ;;  %v8792_v27 = vor.u32 %v12550_v14, %v8789_v15  ;;  %v10261_v13 = vld [vmem:[#allocation5 + $0xef8] sm:$0xf0] }
 0x23e   : > { %v10003_v35 = vld [vmem:[#allocation5 + $0xcb8] sm:$0xf]  ;;  %v9492_v40 = vor.u32 %v12734_v50, %v9491_v34  ;;  %v9237_v34 = vld [vmem:[#allocation5 + $0x6f8] sm:$0xf0] }
 0x23f   : > { %v12862_v36 = vld [vmem:[#allocation5 + $0xcf4] sm:$0xf0]  ;;  %4193 = vmatpush.bf16.msra.mxu3 %v10068_v32  ;;  %4168 = vmatpush.bf16.msra.mxu1 %v8980_v39  ;;  %v12662_v32 = vld [vmem:[#allocation5 + $0x6bc] sm:$0xf] }
 0x240   : > { %v8403_v37 = vld [vmem:[#allocation5 + $0x38] sm:$0xf]  ;;  %v10004_v46 = vor.u32 %v12862_v36, %v10003_v35  ;;  %v12790_v50 = vld [vmem:[#allocation5 + $0xabc] sm:$0xf]  ;;  %v9240_v39 = vor.u32 %v12662_v32, %v9237_v34 }
 0x241   : > { %v12462_v38 = vld [vmem:[#allocation5 + $0x74] sm:$0xf0]  ;;  %4181 = vmatpush.bf16.msra.mxu2 %v9492_v40  ;;  %v9749_v35 = vld [vmem:[#allocation5 + $0xaf8] sm:$0xf0] }
 0x242   : > { %v8915_v42 = vld [vmem:[#allocation5 + $0x438] sm:$0xf]  ;;  %v8404_v55 = vor.u32 %v12462_v38, %v8403_v37  ;;  %v12918_v36 = vld [vmem:[#allocation5 + $0xebc] sm:$0xf]  ;;  %v8728_v37 = vor.u32 %v12534_v30, %v8725_v31  ;;  %v9752_v40 = vor.u32 %v12790_v50, %v9749_v35 }
 0x243   : > { %v12590_v43 = vld [vmem:[#allocation5 + $0x474] sm:$0xf0]  ;;  %4194 = vmatpush.bf16.msra.mxu3 %v10004_v46  ;;  %v12518_v38 = vld [vmem:[#allocation5 + $0x23c] sm:$0xf]  ;;  %v10264_v45 = vor.u32 %v12918_v36, %v10261_v13 }
 0x244   : > { %v9427_v44 = vld [vmem:[#allocation5 + $0x838] sm:$0xf]  ;;  %v8916_v63 = vor.u32 %v12590_v43, %v8915_v42  ;;  %4156 = vmatpush.bf16.msra.mxu0 %v8404_v55  ;;  %v8661_v42 = vld [vmem:[#allocation5 + $0x278] sm:$0xf0]  ;;  %v3952_v35 = vpop.f32.mrf.mxu0 }
 0x245   : > { %v12718_v47 = vld [vmem:[#allocation5 + $0x874] sm:$0xf0]  ;;  %v12646_v43 = vld [vmem:[#allocation5 + $0x63c] sm:$0xf]  ;;  %v8664_v52 = vor.u32 %v12518_v38, %v8661_v42  ;;  %v13049_v35 = vld [vmem:[#allocation8 + $0x2cc] sm:$0xf0] }
 0x246   : > { %v9939_v48 = vld [vmem:[#allocation5 + $0xc38] sm:$0xf]  ;;  %v9428_v1 = vor.u32 %v12718_v47, %v9427_v44  ;;  %4169 = vmatpush.bf16.msra.mxu1 %v8916_v63  ;;  %v839_v44 = vperm.slane %v14061_v21, 2  ;;  %v9173_v46 = vld [vmem:[#allocation5 + $0x678] sm:$0xf0]  ;;  %v3976_v24 = vpop.f32.mrf.mxu2 }
 0x247   : > { %v12846_v49 = vld [vmem:[#allocation5 + $0xc74] sm:$0xf0]  ;;  %4157 = vmatmul.bf16.vlgmr.msra.gmra.mxu0 %v13978_v18  ;;  %v12774_v47 = vld [vmem:[#allocation5 + $0xa3c] sm:$0xf]  ;;  %v9176_v54 = vor.u32 %v12646_v43, %v9173_v46 }
 0x248   : > { %v9940_v5 = vor.u32 %v12846_v49, %v9939_v48  ;;  %4182 = vmatpush.bf16.msra.mxu2 %v9428_v1  ;;  %4201 = vmatpush.bf16.msrb.mxu0 %v8856_v7  ;;  %v9685_v48 = vld [vmem:[#allocation5 + $0xa78] sm:$0xf0]  ;;  %v3951_v63 = vadd.f32 %v3950_v53, %v839_v44  ;;  %v3963_v1 = vpop.f32.mrf.mxu1  ;;  %v3989_v31 = vpop.f32.mrf.mxu3 }
 0x249   : > { %4170 = vmatmul.bf16.vlgmr.msra.gmra.mxu1 %v13981_v25  ;;  %v12902_v49 = vld [vmem:[#allocation5 + $0xe3c] sm:$0xf]  ;;  %v9688_v55 = vor.u32 %v12774_v47, %v9685_v48 }
 0x24a   : > { %4195 = vmatpush.bf16.msra.mxu3 %v9940_v5  ;;  %4214 = vmatpush.bf16.msrb.mxu1 %v9368_v10  ;;  %v10197_v51 = vld [vmem:[#allocation5 + $0xe78] sm:$0xf0]  ;;  %v3964_v14 = vadd.f32 %v3963_v1, %v3951_v63 }
 0x24b   : > { %4183 = vmatmul.bf16.vlgmr.msra.gmra.mxu2 %v13971_v8  ;;  %v12502_v58 = vld [vmem:[#allocation5 + $0x1bc] sm:$0xf]  ;;  %v10200_v3 = vor.u32 %v12902_v49, %v10197_v51 }
 0x24c   : > { %4227 = vmatpush.bf16.msrb.mxu2 %v9880_v12  ;;  %4202 = vmatpush.bf16.msrb.mxu0 %v8792_v27  ;;  %v8597_v60 = vld [vmem:[#allocation5 + $0x1f8] sm:$0xf0]  ;;  %v3977_v30 = vadd.f32 %v3976_v24, %v3964_v14  ;;  %v13021_v14 = vld [vmem:[#allocation8 + $0x1ec] sm:$0xf0] }
 0x24d   : > { %4196 = vmatmul.bf16.vlgmr.msra.gmra.mxu3 %v13973_v9  ;;  %v12630_v62 = vld [vmem:[#allocation5 + $0x5bc] sm:$0xf]  ;;  %v8600_v15 = vor.u32 %v12502_v58, %v8597_v60 }
 0x24e   : > { %4240 = vmatpush.bf16.msrb.mxu3 %v10392_v17  ;;  %4215 = vmatpush.bf16.msrb.mxu1 %v9304_v28  ;;  %v9109_v4 = vld [vmem:[#allocation5 + $0x5f8] sm:$0xf0]  ;;  %v14078_v50 = vadd.f32 %v3989_v31, %v3977_v30  ;;  %v3978_v60 = vpop.f32.mrf.mxu2  ;;  %v12985_v30 = vld [vmem:[#allocation8 + $0xcc] sm:$0xf0]  ;;  %v10619_v31 = vld [vmem:[#allocation8 + $0x1c0] sm:$0xf] }
 0x24f   : > { %v12758_v5 = vld [vmem:[#allocation5 + $0x9bc] sm:$0xf]  ;;  %v9112_v16 = vor.u32 %v12630_v62, %v9109_v4 }
 0x250   : > { %4228 = vmatpush.bf16.msrb.mxu2 %v9816_v29  ;;  %4203 = vmatpush.bf16.msrb.mxu0 %v8728_v37  ;;  %v9621_v7 = vld [vmem:[#allocation5 + $0x9f8] sm:$0xf0]  ;;  %v3991_v4 = vpop.f32.mrf.mxu3 }
 0x251   : > { %v12886_v10 = vld [vmem:[#allocation5 + $0xdbc] sm:$0xf]  ;;  %v9624_v17 = vor.u32 %v12758_v5, %v9621_v7  ;;  %v10507_v5 = vld [vmem:[#allocation8 + $0xe0] sm:$0xf]  ;;  %v12989_v7 = vld [vmem:[#allocation8 + $0xec] sm:$0xf0] }
 0x252   : > { %4241 = vmatpush.bf16.msrb.mxu3 %v10328_v33  ;;  %4216 = vmatpush.bf16.msrb.mxu1 %v9240_v39  ;;  %v10133_v12 = vld [vmem:[#allocation5 + $0xdf8] sm:$0xf0] }
 0x253   : > { %v12486_v19 = vld [vmem:[#allocation5 + $0x13c] sm:$0xf]  ;;  %v10136_v26 = vor.u32 %v12886_v10, %v10133_v12  ;;  %v10635_v10 = vld [vmem:[#allocation8 + $0x1e0] sm:$0xf] }
 0x254   : > { %4229 = vmatpush.bf16.msrb.mxu2 %v9752_v40  ;;  %4204 = vmatpush.bf16.msrb.mxu0 %v8664_v52  ;;  %v8533_v20 = vld [vmem:[#allocation5 + $0x178] sm:$0xf0]  ;;  %v3965_v40 = vpop.f32.mrf.mxu1 }
 0x255   : > { %v12614_v22 = vld [vmem:[#allocation5 + $0x53c] sm:$0xf]  ;;  %v8536_v34 = vor.u32 %v12486_v19, %v8533_v20  ;;  %v10891_v20 = vld [vmem:[#allocation8 + $0x3e0] sm:$0xf] }
 0x256   : > { %4242 = vmatpush.bf16.msrb.mxu3 %v10264_v45  ;;  %4217 = vmatpush.bf16.msrb.mxu1 %v9176_v54  ;;  %v9045_v27 = vld [vmem:[#allocation5 + $0x578] sm:$0xf0]  ;;  %v10475_v40 = vld [vmem:[#allocation8 + $0xa0] sm:$0xf] }
 0x257   : > { %v12742_v28 = vld [vmem:[#allocation5 + $0x93c] sm:$0xf]  ;;  %v9048_v36 = vor.u32 %v12614_v22, %v9045_v27  ;;  %v13085_v22 = vld [vmem:[#allocation8 + $0x3ec] sm:$0xf0]  ;;  %v10636_v27 = vor.u32 %v13021_v14, %v10635_v10 }
 0x258   : > { %4230 = vmatpush.bf16.msrb.mxu2 %v9688_v55  ;;  %v9557_v29 = vld [vmem:[#allocation5 + $0x978] sm:$0xf0]  ;;  %4205 = vmatpush.bf16.msrb.mxu0 %v8600_v15  ;;  %v10763_v15 = vld [vmem:[#allocation8 + $0x2e0] sm:$0xf]  ;;  %v12973_v10 = vld [vmem:[#allocation8 + $0x6c] sm:$0xf0] }
 0x259   : > { %v12870_v32 = vld [vmem:[#allocation5 + $0xd3c] sm:$0xf]  ;;  %v9560_v13 = vor.u32 %v12742_v28, %v9557_v29  ;;  %v10491_v29 = vld [vmem:[#allocation8 + $0xc0] sm:$0xf] }
 0x25a   : > { %4243 = vmatpush.bf16.msrb.mxu3 %v10200_v3  ;;  %v10069_v33 = vld [vmem:[#allocation5 + $0xd78] sm:$0xf0]  ;;  %4218 = vmatpush.bf16.msrb.mxu1 %v9112_v16  ;;  %v13053_v16 = vld [vmem:[#allocation8 + $0x2ec] sm:$0xf0] }
 0x25b   : > { %v12470_v37 = vld [vmem:[#allocation5 + $0xbc] sm:$0xf]  ;;  %v10072_v42 = vor.u32 %v12870_v32, %v10069_v33  ;;  %v10764_v28 = vor.u32 %v13053_v16, %v10763_v15  ;;  %v10892_v32 = vor.u32 %v13085_v22, %v10891_v20  ;;  %v13017_v33 = vld [vmem:[#allocation8 + $0x1cc] sm:$0xf0]  ;;  %v10827_v20 = vld [vmem:[#allocation8 + $0x360] sm:$0xf] }
 0x25c   : > { %4231 = vmatpush.bf16.msrb.mxu2 %v9624_v17  ;;  %v8469_v38 = vld [vmem:[#allocation5 + $0xf8] sm:$0xf0]  ;;  %4206 = vmatpush.bf16.msrb.mxu0 %v8536_v34  ;;  %v10747_v34 = vld [vmem:[#allocation8 + $0x2c0] sm:$0xf]  ;;  %v13005_v16 = vld [vmem:[#allocation8 + $0x16c] sm:$0xf0] }
 0x25d   : > { %v12598_v39 = vld [vmem:[#allocation5 + $0x4bc] sm:$0xf]  ;;  %v8472_v48 = vor.u32 %v12470_v37, %v8469_v38  ;;  %v10492_v37 = vor.u32 %v12985_v30, %v10491_v29  ;;  %v10620_v38 = vor.u32 %v13017_v33, %v10619_v31  ;;  %v13069_v22 = vld [vmem:[#allocation8 + $0x36c] sm:$0xf0]  ;;  %v10427_v29 = vld [vmem:[#allocation8 + $0x40] sm:$0xf] }
 0x25e   : > { %4244 = vmatpush.bf16.msrb.mxu3 %v10136_v26  ;;  %v8981_v43 = vld [vmem:[#allocation5 + $0x4f8] sm:$0xf0]  ;;  %4219 = vmatpush.bf16.msrb.mxu1 %v9048_v36  ;;  %v10508_v26 = vor.u32 %v12989_v7, %v10507_v5  ;;  %v10875_v36 = vld [vmem:[#allocation8 + $0x3c0] sm:$0xf]  ;;  %v4015_v15 = vpop.f32.mrf.mxu1  ;;  %v12969_v30 = vld [vmem:[#allocation8 + $0x4c] sm:$0xf0]  ;;  %v10828_v33 = vor.u32 %v13069_v22, %v10827_v20 }
 0x25f   : > { %v12726_v44 = vld [vmem:[#allocation5 + $0x8bc] sm:$0xf]  ;;  %v8984_v52 = vor.u32 %v12598_v39, %v8981_v43  ;;  %v10748_v39 = vor.u32 %v13049_v35, %v10747_v34  ;;  %v10603_v43 = vld [vmem:[#allocation8 + $0x1a0] sm:$0xf]  ;;  %v13001_v34 = vld [vmem:[#allocation8 + $0x14c] sm:$0xf0] }
 0x260   : > { %v9493_v45 = vld [vmem:[#allocation5 + $0x8f8] sm:$0xf0]  ;;  %4232 = vmatpush.bf16.msrb.mxu2 %v9560_v13  ;;  %4207 = vmatpush.bf16.msrb.mxu0 %v8472_v48  ;;  %v13081_v13 = vld [vmem:[#allocation8 + $0x3cc] sm:$0xf0]  ;;  %v10859_v48 = vld [vmem:[#allocation8 + $0x3a0] sm:$0xf] }
 0x261   : > { %v12854_v46 = vld [vmem:[#allocation5 + $0xcbc] sm:$0xf]  ;;  %v9496_v53 = vor.u32 %v12726_v44, %v9493_v45  ;;  %v10876_v44 = vor.u32 %v13081_v13, %v10875_v36  ;;  %v13013_v45 = vld [vmem:[#allocation8 + $0x1ac] sm:$0xf0]  ;;  %v10443_v7 = vld [vmem:[#allocation8 + $0x60] sm:$0xf] }
 0x262   : > { %v10005_v47 = vld [vmem:[#allocation5 + $0xcf8] sm:$0xf0]  ;;  %4245 = vmatpush.bf16.msrb.mxu3 %v10072_v42  ;;  %4220 = vmatpush.bf16.msrb.mxu1 %v8984_v52  ;;  %v12981_v42 = vld [vmem:[#allocation8 + $0xac] sm:$0xf0]  ;;  %v10459_v52 = vld [vmem:[#allocation8 + $0x80] sm:$0xf] }
 0x263   : > { %v12454_v49 = vld [vmem:[#allocation5 + $0x3c] sm:$0xf]  ;;  %v10008_v62 = vor.u32 %v12854_v46, %v10005_v47  ;;  %v10731_v46 = vld [vmem:[#allocation8 + $0x2a0] sm:$0xf]  ;;  %v13045_v47 = vld [vmem:[#allocation8 + $0x2ac] sm:$0xf0] }
 0x264   : > { %v8405_v51 = vld [vmem:[#allocation5 + $0x78] sm:$0xf0]  ;;  %4233 = vmatpush.bf16.msrb.mxu2 %v9496_v53  ;;  %v10604_v53 = vor.u32 %v13013_v45, %v10603_v43  ;;  %v10555_v31 = vld [vmem:[#allocation8 + $0x140] sm:$0xf]  ;;  %v13033_v36 = vld [vmem:[#allocation8 + $0x24c] sm:$0xf0] }
 0x265   : > { %v12582_v54 = vld [vmem:[#allocation5 + $0x43c] sm:$0xf]  ;;  %v8408_v12 = vor.u32 %v12454_v49, %v8405_v51  ;;  %v13077_v49 = vld [vmem:[#allocation8 + $0x3ac] sm:$0xf0]  ;;  %v10476_v51 = vor.u32 %v12981_v42, %v10475_v40  ;;  %v10683_v35 = vld [vmem:[#allocation8 + $0x240] sm:$0xf]  ;;  %v10428_v40 = vor.u32 %v12969_v30, %v10427_v29 }
 0x266   : > { %v8917_v55 = vld [vmem:[#allocation5 + $0x478] sm:$0xf0]  ;;  %4246 = vmatpush.bf16.msrb.mxu3 %v10008_v62  ;;  %v10860_v60 = vor.u32 %v13077_v49, %v10859_v48  ;;  %v10715_v62 = vld [vmem:[#allocation8 + $0x280] sm:$0xf]  ;;  %v10684_v45 = vor.u32 %v13033_v36, %v10683_v35  ;;  %v4017_v49 = vpop.f32.mrf.mxu1  ;;  %v13181_v20 = vld [vmem:[#allocation8 + $0x6ec] sm:$0xf0] }
 0x267   : > { %v12710_v58 = vld [vmem:[#allocation5 + $0x83c] sm:$0xf]  ;;  %v8920_v17 = vor.u32 %v12582_v54, %v8917_v55  ;;  %4208 = vmatpush.bf16.msrb.mxu0 %v8408_v12  ;;  %v10732_v54 = vor.u32 %v13045_v47, %v10731_v46  ;;  %v10587_v55 = vld [vmem:[#allocation8 + $0x180] sm:$0xf]  ;;  %v12965_v47 = vld [vmem:[#allocation8 + $0x2c] sm:$0xf0] }
 0x268   : > { %v9429_v63 = vld [vmem:[#allocation5 + $0x878] sm:$0xf0]  ;;  %v10571_v12 = vld [vmem:[#allocation8 + $0x160] sm:$0xf]  ;;  %v4253_v22 = vmax.f32 %v14004_v41, 0.0  ;;  %v4255_v30 = vmax.f32 %v14018_v0, 0.0 }
 0x269   : > { %v12838_v1 = vld [vmem:[#allocation5 + $0xc3c] sm:$0xf]  ;;  %v9432_v19 = vor.u32 %v12710_v58, %v9429_v63  ;;  %4221 = vmatpush.bf16.msrb.mxu1 %v8920_v17  ;;  %v840_v58 = vperm.slane %v14061_v21, 3  ;;  %v10843_v63 = vld [vmem:[#allocation8 + $0x380] sm:$0xf] }
 0x26a   : > { %v9941_v3 = vld [vmem:[#allocation5 + $0xc78] sm:$0xf0]  ;;  %4209 = vmatmul.bf16.vlgmr.msrb.gmra.mxu0 %v13978_v18  ;;  %v12977_v18 = vld [vmem:[#allocation8 + $0x8c] sm:$0xf0]  ;;  %v10699_v17 = vld [vmem:[#allocation8 + $0x260] sm:$0xf]  ;;  %v14091_v0 = vpack.c.bf16 %v4253_v22, %v4253_v22 }
 0x26b   : > { %v9944_v24 = vor.u32 %v12838_v1, %v9941_v3  ;;  %4234 = vmatpush.bf16.msrb.mxu2 %v9432_v19  ;;  %7367 = vmatpush.bf16.msra.mxu0 %v10508_v26  ;;  %v13073_v1 = vld [vmem:[#allocation8 + $0x38c] sm:$0xf0]  ;;  %v4002_v3 = vpop.f32.mrf.mxu0  ;;  %v10444_v26 = vor.u32 %v12973_v10, %v10443_v7  ;;  %v10411_v46 = vld [vmem:[#allocation8 + $0x20] sm:$0xf] }
 0x26c   : > { %4222 = vmatmul.bf16.vlgmr.msrb.gmra.mxu1 %v13981_v25  ;;  %v13009_v25 = vld [vmem:[#allocation8 + $0x18c] sm:$0xf0]  ;;  %v4003_v14 = vadd.f32 %v4002_v3, %v840_v58  ;;  %v10844_v21 = vor.u32 %v13073_v1, %v10843_v63  ;;  %v10539_v48 = vld [vmem:[#allocation8 + $0x120] sm:$0xf]  ;;  %v10412_v58 = vor.u32 %v12965_v47, %v10411_v46 }
 0x26d   : > { %4247 = vmatpush.bf16.msrb.mxu3 %v9944_v24  ;;  %7380 = vmatpush.bf16.msra.mxu1 %v10636_v27  ;;  %v10588_v4 = vor.u32 %v13009_v25, %v10587_v55  ;;  %v13037_v19 = vld [vmem:[#allocation8 + $0x26c] sm:$0xf0]  ;;  %v10572_v27 = vor.u32 %v13005_v16, %v10571_v12  ;;  %v10523_v63 = vld [vmem:[#allocation8 + $0x100] sm:$0xf] }
 0x26e   : > { %4235 = vmatmul.bf16.vlgmr.msrb.gmra.mxu2 %v13971_v8  ;;  %v13041_v8 = vld [vmem:[#allocation8 + $0x28c] sm:$0xf0]  ;;  %v4016_v24 = vadd.f32 %v4015_v15, %v4003_v14  ;;  %v10779_v7 = vld [vmem:[#allocation8 + $0x300] sm:$0xf] }
 0x26f   : > { %7393 = vmatpush.bf16.msra.mxu2 %v10764_v28  ;;  %7368 = vmatpush.bf16.msra.mxu0 %v10492_v37  ;;  %v10716_v5 = vor.u32 %v13041_v8, %v10715_v62  ;;  %v10700_v28 = vor.u32 %v13037_v19, %v10699_v17  ;;  %v4041_v37 = vpop.f32.mrf.mxu3  ;;  %v13061_v55 = vld [vmem:[#allocation8 + $0x32c] sm:$0xf0]  ;;  %v11019_v14 = vld [vmem:[#allocation8 + $0x4e0] sm:$0xf] }
 0x270   : > { %4248 = vmatmul.bf16.vlgmr.msrb.gmra.mxu3 %v13973_v9  ;;  %v10460_v9 = vor.u32 %v12977_v18, %v10459_v52  ;;  %v12997_v52 = vld [vmem:[#allocation8 + $0x12c] sm:$0xf0]  ;;  %v10795_v18 = vld [vmem:[#allocation8 + $0x320] sm:$0xf] }
 0x271   : > { %7406 = vmatpush.bf16.msra.mxu3 %v10892_v32  ;;  %7381 = vmatpush.bf16.msra.mxu1 %v10620_v38  ;;  %v4028_v32 = vpop.f32.mrf.mxu2  ;;  %v10811_v38 = vld [vmem:[#allocation8 + $0x340] sm:$0xf]  ;;  %v12961_v25 = vld [vmem:[#allocation8 + $0xc] sm:$0xf0]  ;;  %v10540_v62 = vor.u32 %v12997_v52, %v10539_v48 }
 0x272   : > { %v4029_v13 = vadd.f32 %v4028_v32, %v4016_v24  ;;  %v12993_v1 = vld [vmem:[#allocation8 + $0x10c] sm:$0xf0]  ;;  %v11275_v19 = vld [vmem:[#allocation8 + $0x6e0] sm:$0xf]  ;;  %v4254_v24 = vmax.f32 %v14011_v6, 0.0 }
 0x273   : > { %7394 = vmatpush.bf16.msra.mxu2 %v10748_v39  ;;  %7369 = vmatpush.bf16.msra.mxu0 %v10476_v51  ;;  %v13065_v39 = vld [vmem:[#allocation8 + $0x34c] sm:$0xf0]  ;;  %v4004_v43 = vpop.f32.mrf.mxu0  ;;  %v11276_v35 = vor.u32 %v13181_v20, %v11275_v19  ;;  %v11003_v36 = vld [vmem:[#allocation8 + $0x4c0] sm:$0xf] }
 0x274   : > { %v14085_v42 = vadd.f32 %v4041_v37, %v4029_v13  ;;  %v10812_v51 = vor.u32 %v13065_v39, %v10811_v38  ;;  %v13057_v10 = vld [vmem:[#allocation8 + $0x30c] sm:$0xf0]  ;;  %v11131_v41 = vld [vmem:[#allocation8 + $0x5c0] sm:$0xf] }
 0x275   : > { %7407 = vmatpush.bf16.msra.mxu3 %v10876_v44  ;;  %7382 = vmatpush.bf16.msra.mxu1 %v10604_v53  ;;  %v10556_v44 = vor.u32 %v13001_v34, %v10555_v31  ;;  %v10667_v53 = vld [vmem:[#allocation8 + $0x220] sm:$0xf]  ;;  %v13117_v15 = vld [vmem:[#allocation8 + $0x4ec] sm:$0xf0]  ;;  %v4256_v31 = vmax.f32 %v14025_v59, 0.0  ;;  %v10780_v32 = vor.u32 %v13057_v10, %v10779_v7  ;;  %v14093_v59 = vpack.c.bf16 %v4254_v24, %v4254_v24 }
 0x276   : > { %v13149_v17 = vld [vmem:[#allocation8 + $0x5ec] sm:$0xf0]  ;;  %v11259_v38 = vld [vmem:[#allocation8 + $0x6c0] sm:$0xf] }
 0x277   : > { %7395 = vmatpush.bf16.msra.mxu2 %v10732_v54  ;;  %7370 = vmatpush.bf16.msra.mxu0 %v10460_v9  ;;  %v13029_v54 = vld [vmem:[#allocation8 + $0x22c] sm:$0xf0]  ;;  %v10651_v9 = vld [vmem:[#allocation8 + $0x200] sm:$0xf]  ;;  %v4043_v12 = vpop.f32.mrf.mxu3  ;;  %v14097_v52 = vpack.c.bf16 %v4256_v31, %v4256_v31 }
 0x278   : > { %v10668_v8 = vor.u32 %v13029_v54, %v10667_v53  ;;  %v13213_v29 = vld [vmem:[#allocation8 + $0x7ec] sm:$0xf0]  ;;  %v10987_v48 = vld [vmem:[#allocation8 + $0x4a0] sm:$0xf] }
 0x279   : > { %7408 = vmatpush.bf16.msra.mxu3 %v10860_v60  ;;  %7383 = vmatpush.bf16.msra.mxu1 %v10588_v4  ;;  %v10395_v60 = vld [vmem:[#allocation8] sm:$0xf]  ;;  %v4030_v3 = vpop.f32.mrf.mxu2  ;;  %v10796_v4 = vor.u32 %v13061_v55, %v10795_v18  ;;  %v13113_v13 = vld [vmem:[#allocation8 + $0x4cc] sm:$0xf0] }
 0x27a   : > { %v10396_v16 = vor.u32 %v12961_v25, %v10395_v60  ;;  %v13145_v37 = vld [vmem:[#allocation8 + $0x5cc] sm:$0xf0]  ;;  %v11243_v18 = vld [vmem:[#allocation8 + $0x6a0] sm:$0xf]  ;;  %v14103_v3 = vld [vmem:[#allocation7 + $0x8] sm:$0xff] }
 0x27b   : > { %7396 = vmatpush.bf16.msra.mxu2 %v10716_v5  ;;  %7371 = vmatpush.bf16.msra.mxu0 %v10444_v26  ;;  %v13025_v5 = vld [vmem:[#allocation8 + $0x20c] sm:$0xf0]  ;;  %v10524_v26 = vor.u32 %v12993_v1, %v10523_v63  ;;  %v11132_v46 = vor.u32 %v13145_v37, %v11131_v41  ;;  %v11227_v10 = vld [vmem:[#allocation8 + $0x680] sm:$0xf] }
 0x27c   : > { %v13177_v39 = vld [vmem:[#allocation8 + $0x6cc] sm:$0xf0]  ;;  %v10955_v20 = vld [vmem:[#allocation8 + $0x460] sm:$0xf] }
 0x27d   : > { %7409 = vmatpush.bf16.msra.mxu3 %v10844_v21  ;;  %7384 = vmatpush.bf16.msra.mxu1 %v10572_v27  ;;  %v11147_v21 = vld [vmem:[#allocation8 + $0x5e0] sm:$0xf]  ;;  %v10652_v27 = vor.u32 %v13025_v5, %v10651_v9  ;;  %v13209_v43 = vld [vmem:[#allocation8 + $0x7cc] sm:$0xf0]  ;;  %v11260_v47 = vor.u32 %v13177_v39, %v11259_v38 }
 0x27e   : > { %v11148_v34 = vor.u32 %v13149_v17, %v11147_v21  ;;  %v13109_v49 = vld [vmem:[#allocation8 + $0x4ac] sm:$0xf0]  ;;  %v11099_v9 = vld [vmem:[#allocation8 + $0x580] sm:$0xf] }
 0x27f   : > { %7397 = vmatpush.bf16.msra.mxu2 %v10700_v28  ;;  %7372 = vmatpush.bf16.msra.mxu0 %v10428_v40  ;;  %v11403_v28 = vld [vmem:[#allocation8 + $0x7e0] sm:$0xf]  ;;  %v13141_v54 = vld [vmem:[#allocation8 + $0x5ac] sm:$0xf0]  ;;  %v10988_v25 = vor.u32 %v13109_v49, %v10987_v48 }
 0x280   : > { %v11404_v6 = vor.u32 %v13213_v29, %v11403_v28  ;;  %v11387_v40 = vld [vmem:[#allocation8 + $0x7c0] sm:$0xf]  ;;  %v13173_v55 = vld [vmem:[#allocation8 + $0x6ac] sm:$0xf0] }
 0x281   : > { %7410 = vmatpush.bf16.msra.mxu3 %v10828_v33  ;;  %7385 = vmatpush.bf16.msra.mxu1 %v10556_v44  ;;  %v11020_v33 = vor.u32 %v13117_v15, %v11019_v14  ;;  %v11004_v44 = vor.u32 %v13113_v13, %v11003_v36  ;;  %v11388_v53 = vor.u32 %v13209_v43, %v11387_v40  ;;  %v13205_v60 = vld [vmem:[#allocation8 + $0x7ac] sm:$0xf0]  ;;  %v11355_v14 = vld [vmem:[#allocation8 + $0x780] sm:$0xf] }
 0x282   : > { %v11244_v63 = vor.u32 %v13173_v55, %v11243_v18  ;;  %v13105_v1 = vld [vmem:[#allocation8 + $0x48c] sm:$0xf0]  ;;  %v11083_v24 = vld [vmem:[#allocation8 + $0x560] sm:$0xf] }
 0x283   : > { %7398 = vmatpush.bf16.msra.mxu2 %v10684_v45  ;;  %7373 = vmatpush.bf16.msra.mxu0 %v10412_v58  ;;  %v14095_v45 = vpack.c.bf16 %v4255_v30, %v4255_v30  ;;  %v11371_v58 = vld [vmem:[#allocation8 + $0x7a0] sm:$0xf]  ;;  %v13137_v7 = vld [vmem:[#allocation8 + $0x58c] sm:$0xf0] }
 0x284   : > { %v11372_v5 = vor.u32 %v13205_v60, %v11371_v58  ;;  %v13169_v12 = vld [vmem:[#allocation8 + $0x68c] sm:$0xf0]  ;;  %v11100_v17 = vor.u32 %v13137_v7, %v11099_v9  ;;  %v11211_v30 = vld [vmem:[#allocation8 + $0x660] sm:$0xf] }
 0x285   : > { %7411 = vmatpush.bf16.msra.mxu3 %v10812_v51  ;;  %7386 = vmatpush.bf16.msra.mxu1 %v10540_v62  ;;  %v11115_v51 = vld [vmem:[#allocation8 + $0x5a0] sm:$0xf]  ;;  %v13201_v15 = vld [vmem:[#allocation8 + $0x78c] sm:$0xf0]  ;;  %v11228_v19 = vor.u32 %v13169_v12, %v11227_v10 }
 0x286   : > { %v10971_v62 = vld [vmem:[#allocation8 + $0x480] sm:$0xf]  ;;  %v13101_v22 = vld [vmem:[#allocation8 + $0x46c] sm:$0xf0]  ;;  %v11356_v28 = vor.u32 %v13201_v15, %v11355_v14 }
 0x287   : > { %7399 = vmatpush.bf16.msra.mxu2 %v10668_v8  ;;  %7374 = vmatpush.bf16.msra.mxu0 %v10396_v16  ;;  %v11116_v8 = vor.u32 %v13141_v54, %v11115_v51  ;;  %v10972_v21 = vor.u32 %v13105_v1, %v10971_v62  ;;  %v4054_v16 = vpop.f32.mrf.mxu0  ;;  %v13133_v29 = vld [vmem:[#allocation8 + $0x56c] sm:$0xf0]  ;;  %v10939_v41 = vld [vmem:[#allocation8 + $0x440] sm:$0xf] }
 0x288   : > { %v13165_v31 = vld [vmem:[#allocation8 + $0x66c] sm:$0xf0]  ;;  %v11084_v36 = vor.u32 %v13133_v29, %v11083_v24  ;;  %v11067_v37 = vld [vmem:[#allocation8 + $0x540] sm:$0xf]  ;;  %v4080_v38 = vpop.f32.mrf.mxu2 }
 0x289   : > { %7412 = vmatpush.bf16.msra.mxu3 %v10796_v4  ;;  %7387 = vmatpush.bf16.msra.mxu1 %v10524_v26  ;;  %v841_v4 = vperm.slane %v14103_v3, 4  ;;  %v11212_v13 = vor.u32 %v13165_v31, %v11211_v30  ;;  %v13129_v40 = vld [vmem:[#allocation8 + $0x54c] sm:$0xf0]  ;;  %v11195_v43 = vld [vmem:[#allocation8 + $0x640] sm:$0xf] }
 0x28a   : > { %7375 = vmatmul.bf16.vlgmr.msra.gmra.mxu0 %v14091_v0  ;;  %v11323_v48 = vld [vmem:[#allocation8 + $0x740] sm:$0xf]  ;;  %v13193_v49 = vld [vmem:[#allocation8 + $0x74c] sm:$0xf0]  ;;  %v11068_v18 = vor.u32 %v13129_v40, %v11067_v37 }
 0x28b   : > { %7400 = vmatpush.bf16.msra.mxu2 %v10652_v27  ;;  %7419 = vmatpush.bf16.msrb.mxu0 %v11020_v33  ;;  %v4055_v26 = vadd.f32 %v4054_v16, %v841_v4  ;;  %v4067_v27 = vpop.f32.mrf.mxu1  ;;  %v13197_v33 = vld [vmem:[#allocation8 + $0x76c] sm:$0xf0]  ;;  %v10923_v58 = vld [vmem:[#allocation8 + $0x420] sm:$0xf] }
 0x28c   : > { %7388 = vmatmul.bf16.vlgmr.msra.gmra.mxu1 %v14093_v59  ;;  %v13093_v60 = vld [vmem:[#allocation8 + $0x42c] sm:$0xf0]  ;;  %v11179_v1 = vld [vmem:[#allocation8 + $0x620] sm:$0xf] }
 0x28d   : > { %7413 = vmatpush.bf16.msra.mxu3 %v10780_v32  ;;  %7432 = vmatpush.bf16.msrb.mxu1 %v11148_v34  ;;  %v11339_v32 = vld [vmem:[#allocation8 + $0x760] sm:$0xf]  ;;  %v4068_v34 = vadd.f32 %v4067_v27, %v4055_v26  ;;  %v13157_v9 = vld [vmem:[#allocation8 + $0x62c] sm:$0xf0]  ;;  %v10924_v7 = vor.u32 %v13093_v60, %v10923_v58 }
 0x28e   : > { %7401 = vmatmul.bf16.vlgmr.msra.gmra.mxu2 %v14095_v45  ;;  %v11340_v39 = vor.u32 %v13197_v33, %v11339_v32  ;;  %v11307_v4 = vld [vmem:[#allocation8 + $0x720] sm:$0xf]  ;;  %v13089_v12 = vld [vmem:[#allocation8 + $0x40c] sm:$0xf0]  ;;  %v11180_v15 = vor.u32 %v13157_v9, %v11179_v1 }
 0x28f   : > { %7445 = vmatpush.bf16.msrb.mxu2 %v11276_v35  ;;  %7420 = vmatpush.bf16.msrb.mxu0 %v11004_v44  ;;  %v10956_v35 = vor.u32 %v13101_v22, %v10955_v20  ;;  %v13161_v44 = vld [vmem:[#allocation8 + $0x64c] sm:$0xf0]  ;;  %v4056_v54 = vpop.f32.mrf.mxu0  ;;  %v10907_v10 = vld [vmem:[#allocation8 + $0x400] sm:$0xf] }
 0x290   : > { %7414 = vmatmul.bf16.vlgmr.msra.gmra.mxu3 %v14097_v52  ;;  %v11196_v55 = vor.u32 %v13161_v44, %v11195_v43  ;;  %v13121_v16 = vld [vmem:[#allocation8 + $0x50c] sm:$0xf0]  ;;  %v11291_v24 = vld [vmem:[#allocation8 + $0x700] sm:$0xf]  ;;  %v10908_v31 = vor.u32 %v13089_v12, %v10907_v10 }
 0x291   : > { %7458 = vmatpush.bf16.msrb.mxu3 %v11404_v6  ;;  %7433 = vmatpush.bf16.msrb.mxu1 %v11132_v46  ;;  %v13097_v6 = vld [vmem:[#allocation8 + $0x44c] sm:$0xf0]  ;;  %v4081_v46 = vadd.f32 %v4080_v38, %v4068_v34  ;;  %v11659_v30 = vld [vmem:[#allocation8 + $0x9e0] sm:$0xf]  ;;  %v4259_v38 = vmax.f32 %v14048_v61, 0.0 }
 0x292   : > { %v10940_v51 = vor.u32 %v13097_v6, %v10939_v41  ;;  %v13153_v22 = vld [vmem:[#allocation8 + $0x60c] sm:$0xf0]  ;;  %v11787_v33 = vld [vmem:[#allocation8 + $0xae0] sm:$0xf] }
 0x293   : > { %7446 = vmatpush.bf16.msrb.mxu2 %v11260_v47  ;;  %7421 = vmatpush.bf16.msrb.mxu0 %v10988_v25  ;;  %v4093_v47 = vpop.f32.mrf.mxu3  ;;  %v11051_v25 = vld [vmem:[#allocation8 + $0x520] sm:$0xf]  ;;  %v4069_v62 = vpop.f32.mrf.mxu1  ;;  %v13185_v26 = vld [vmem:[#allocation8 + $0x70c] sm:$0xf0]  ;;  %v14116_v60 = vpack.c.bf16 %v4259_v38, %v4259_v38 }
 0x294   : > { %v13245_v29 = vld [vmem:[#allocation8 + $0x8ec] sm:$0xf0]  ;;  %v11915_v6 = vld [vmem:[#allocation8 + $0xbe0] sm:$0xf]  ;;  %v11292_v40 = vor.u32 %v13185_v26, %v11291_v24 }
 0x295   : > { %7459 = vmatpush.bf16.msrb.mxu3 %v11388_v53  ;;  %7434 = vmatpush.bf16.msrb.mxu1 %v11116_v8  ;;  %v14106_v53 = vadd.f32 %v4093_v47, %v4081_v46  ;;  %v11324_v8 = vor.u32 %v13193_v49, %v11323_v48  ;;  %v13277_v32 = vld [vmem:[#allocation8 + $0x9ec] sm:$0xf0]  ;;  %v11515_v47 = vld [vmem:[#allocation8 + $0x8c0] sm:$0xf] }
 0x296   : > { %v13309_v34 = vld [vmem:[#allocation8 + $0xaec] sm:$0xf0]  ;;  %v11660_v44 = vor.u32 %v13277_v32, %v11659_v30  ;;  %v11627_v1 = vld [vmem:[#allocation8 + $0x9a0] sm:$0xf] }
 0x297   : > { %7447 = vmatpush.bf16.msrb.mxu2 %v11244_v63  ;;  %7422 = vmatpush.bf16.msrb.mxu0 %v10972_v21  ;;  %v13125_v63 = vld [vmem:[#allocation8 + $0x52c] sm:$0xf0]  ;;  %v11035_v21 = vld [vmem:[#allocation8 + $0x500] sm:$0xf]  ;;  %v11788_v46 = vor.u32 %v13309_v34, %v11787_v33 }
 0x298   : > { %v11052_v14 = vor.u32 %v13125_v63, %v11051_v25  ;;  %v13341_v37 = vld [vmem:[#allocation8 + $0xbec] sm:$0xf0]  ;;  %v11883_v12 = vld [vmem:[#allocation8 + $0xba0] sm:$0xf] }
 0x299   : > { %7460 = vmatpush.bf16.msrb.mxu3 %v11372_v5  ;;  %7435 = vmatpush.bf16.msrb.mxu1 %v11100_v17  ;;  %v13189_v5 = vld [vmem:[#allocation8 + $0x72c] sm:$0xf0]  ;;  %v11163_v17 = vld [vmem:[#allocation8 + $0x600] sm:$0xf] }
 0x29a   : > { %v11308_v20 = vor.u32 %v13189_v5, %v11307_v4  ;;  %v11164_v41 = vor.u32 %v13153_v22, %v11163_v17  ;;  %v13241_v48 = vld [vmem:[#allocation8 + $0x8cc] sm:$0xf0]  ;;  %v11483_v17 = vld [vmem:[#allocation8 + $0x880] sm:$0xf] }
 0x29b   : > { %7448 = vmatpush.bf16.msrb.mxu2 %v11228_v19  ;;  %7423 = vmatpush.bf16.msrb.mxu0 %v10956_v35  ;;  %v4082_v19 = vpop.f32.mrf.mxu2  ;;  %v4095_v27 = vpop.f32.mrf.mxu3  ;;  %v4257_v35 = vmax.f32 %v14034_v56, 0.0  ;;  %v11643_v56 = vld [vmem:[#allocation8 + $0x9c0] sm:$0xf]  ;;  %v13273_v49 = vld [vmem:[#allocation8 + $0x9cc] sm:$0xf0]  ;;  %v11516_v58 = vor.u32 %v13241_v48, %v11515_v47 }
 0x29c   : > { %v13305_v54 = vld [vmem:[#allocation8 + $0xacc] sm:$0xf0]  ;;  %v11644_v25 = vor.u32 %v13273_v49, %v11643_v56  ;;  %v11739_v26 = vld [vmem:[#allocation8 + $0xa80] sm:$0xf] }
 0x29d   : > { %7461 = vmatpush.bf16.msrb.mxu3 %v11356_v28  ;;  %7436 = vmatpush.bf16.msrb.mxu1 %v11084_v36  ;;  %v11531_v28 = vld [vmem:[#allocation8 + $0x8e0] sm:$0xf]  ;;  %v4258_v36 = vmax.f32 %v14041_v57, 0.0  ;;  %v11916_v57 = vor.u32 %v13341_v37, %v11915_v6  ;;  %v14112_v61 = vpack.c.bf16 %v4257_v35, %v4257_v35  ;;  %v13237_v63 = vld [vmem:[#allocation8 + $0x8ac] sm:$0xf0] }
 0x29e   : > { %v11532_v43 = vor.u32 %v13245_v29, %v11531_v28  ;;  %v13269_v5 = vld [vmem:[#allocation8 + $0x9ac] sm:$0xf0]  ;;  %v11867_v28 = vld [vmem:[#allocation8 + $0xb80] sm:$0xf] }
 0x29f   : > { %7449 = vmatpush.bf16.msrb.mxu2 %v11212_v13  ;;  %7424 = vmatpush.bf16.msrb.mxu0 %v10940_v51  ;;  %v11036_v13 = vor.u32 %v13121_v16, %v11035_v21  ;;  %v11771_v51 = vld [vmem:[#allocation8 + $0xac0] sm:$0xf]  ;;  %v13301_v10 = vld [vmem:[#allocation8 + $0xaac] sm:$0xf0]  ;;  %v11628_v21 = vor.u32 %v13269_v5, %v11627_v1 }
 0x2a0   : > { %v11772_v62 = vor.u32 %v13305_v54, %v11771_v51  ;;  %v13233_v19 = vld [vmem:[#allocation8 + $0x88c] sm:$0xf0]  ;;  %v11467_v34 = vld [vmem:[#allocation8 + $0x860] sm:$0xf] }
 0x2a1   : > { %7462 = vmatpush.bf16.msrb.mxu3 %v11340_v39  ;;  %7437 = vmatpush.bf16.msrb.mxu1 %v11068_v18  ;;  %v4260_v39 = vmax.f32 %v14055_v2, 0.0  ;;  %v11899_v18 = vld [vmem:[#allocation8 + $0xbc0] sm:$0xf]  ;;  %v14114_v2 = vpack.c.bf16 %v4258_v36, %v4258_v36  ;;  %v13265_v24 = vld [vmem:[#allocation8 + $0x98c] sm:$0xf0]  ;;  %v11484_v30 = vor.u32 %v13233_v19, %v11483_v17 }
 0x2a2   : > { %v13297_v27 = vld [vmem:[#allocation8 + $0xa8c] sm:$0xf0]  ;;  %v11595_v36 = vld [vmem:[#allocation8 + $0x960] sm:$0xf] }
 0x2a3   : > { %7450 = vmatpush.bf16.msrb.mxu2 %v11196_v55  ;;  %7425 = vmatpush.bf16.msrb.mxu0 %v10924_v7  ;;  %v13337_v55 = vld [vmem:[#allocation8 + $0xbcc] sm:$0xf0]  ;;  %v14118_v9 = vpack.c.bf16 %v4260_v39, %v4260_v39  ;;  %v11755_v7 = vld [vmem:[#allocation8 + $0xaa0] sm:$0xf]  ;;  %v11740_v33 = vor.u32 %v13297_v27, %v11739_v26 }
 0x2a4   : > { %v11900_v4 = vor.u32 %v13337_v55, %v11899_v18  ;;  %v11756_v16 = vor.u32 %v13301_v10, %v11755_v7  ;;  %v13329_v29 = vld [vmem:[#allocation8 + $0xb8c] sm:$0xf0]  ;;  %v11723_v37 = vld [vmem:[#allocation8 + $0xa60] sm:$0xf] }
 0x2a5   : > { %7463 = vmatpush.bf16.msrb.mxu3 %v11324_v8  ;;  %7438 = vmatpush.bf16.msrb.mxu1 %v11052_v14  ;;  %v11499_v8 = vld [vmem:[#allocation8 + $0x8a0] sm:$0xf]  ;;  %v13333_v14 = vld [vmem:[#allocation8 + $0xbac] sm:$0xf0] }
 0x2a6   : > { %v11884_v22 = vor.u32 %v13333_v14, %v11883_v12  ;;  %v13229_v35 = vld [vmem:[#allocation8 + $0x86c] sm:$0xf0]  ;;  %v11851_v39 = vld [vmem:[#allocation8 + $0xb60] sm:$0xf] }
 0x2a7   : > { %7451 = vmatpush.bf16.msrb.mxu2 %v11180_v15  ;;  %7426 = vmatpush.bf16.msrb.mxu0 %v10908_v31  ;;  %v11500_v15 = vor.u32 %v13237_v63, %v11499_v8  ;;  %v14124_v31 = vpop.f32.mrf.mxu0  ;;  %v13261_v6 = vld [vmem:[#allocation8 + $0x96c] sm:$0xf0]  ;;  %v11451_v47 = vld [vmem:[#allocation8 + $0x840] sm:$0xf] }
 0x2a8   : > { %v13293_v38 = vld [vmem:[#allocation8 + $0xa6c] sm:$0xf0]  ;;  %v11579_v56 = vld [vmem:[#allocation8 + $0x940] sm:$0xf] }
 0x2a9   : > { %7464 = vmatpush.bf16.msrb.mxu3 %v11308_v20  ;;  %7439 = vmatpush.bf16.msrb.mxu1 %v11036_v13  ;;  %v11611_v20 = vld [vmem:[#allocation8 + $0x980] sm:$0xf]  ;;  %v14126_v13 = vpop.f32.mrf.mxu1  ;;  %v13225_v48 = vld [vmem:[#allocation8 + $0x84c] sm:$0xf0] }
 0x2aa   : > { %7427 = vmatmul.bf16.vlgmr.msrb.gmra.mxu0 %v14112_v61  ;;  %v11612_v32 = vor.u32 %v13265_v24, %v11611_v20  ;;  %v13257_v51 = vld [vmem:[#allocation8 + $0x94c] sm:$0xf0]  ;;  %v11707_v54 = vld [vmem:[#allocation8 + $0xa40] sm:$0xf] }
 0x2ab   : > { %7452 = vmatpush.bf16.msrb.mxu2 %v11164_v41  ;;  %7471 = vmatpush.bf16.msra.mxu0 %v11532_v43  ;;  %v11868_v41 = vor.u32 %v13329_v29, %v11867_v28  ;;  %v11468_v43 = vor.u32 %v13229_v35, %v11467_v34  ;;  %v13289_v18 = vld [vmem:[#allocation8 + $0xa4c] sm:$0xf0]  ;;  %v11580_v63 = vor.u32 %v13257_v51, %v11579_v56  ;;  %v11563_v7 = vld [vmem:[#allocation8 + $0x920] sm:$0xf]  ;;  %v4263_v51 = vmax.f32 %v14078_v50, 0.0 }
 0x2ac   : > { %7440 = vmatmul.bf16.vlgmr.msrb.gmra.mxu1 %v14114_v2  ;;  %v11708_v1 = vor.u32 %v13289_v18, %v11707_v54  ;;  %v13221_v5 = vld [vmem:[#allocation8 + $0x82c] sm:$0xf0]  ;;  %v11419_v20 = vld [vmem:[#allocation8 + $0x800] sm:$0xf]  ;;  %v4264_v54 = vmax.f32 %v14085_v42, 0.0 }
 0x2ad   : > { %7465 = vmatpush.bf16.msrb.mxu3 %v11292_v40  ;;  %7484 = vmatpush.bf16.msra.mxu1 %v11660_v44  ;;  %v13325_v40 = vld [vmem:[#allocation8 + $0xb6c] sm:$0xf0]  ;;  %v11596_v44 = vor.u32 %v13261_v6, %v11595_v36  ;;  %v14130_v55 = vpop.f32.mrf.mxu3  ;;  %v11547_v27 = vld [vmem:[#allocation8 + $0x900] sm:$0xf] }
 0x2ae   : > { %7453 = vmatmul.bf16.vlgmr.msrb.gmra.mxu2 %v14116_v60  ;;  %v11852_v49 = vor.u32 %v13325_v40, %v11851_v39  ;;  %v13253_v14 = vld [vmem:[#allocation8 + $0x92c] sm:$0xf0]  ;;  %v11675_v29 = vld [vmem:[#allocation8 + $0xa00] sm:$0xf] }
 0x2af   : > { %7497 = vmatpush.bf16.msra.mxu2 %v11788_v46  ;;  %7472 = vmatpush.bf16.msra.mxu0 %v11516_v58  ;;  %v11724_v46 = vor.u32 %v13293_v38, %v11723_v37  ;;  %v11835_v58 = vld [vmem:[#allocation8 + $0xb40] sm:$0xf]  ;;  %v4108_v8 = vpop.f32.mrf.mxu0  ;;  %v13317_v17 = vld [vmem:[#allocation8 + $0xb2c] sm:$0xf0]  ;;  %v11564_v24 = vor.u32 %v13253_v14, %v11563_v7  ;;  %v14140_v14 = vpack.c.bf16 %v4263_v51, %v4263_v51 }
 0x2b0   : > { %7466 = vmatmul.bf16.vlgmr.msrb.gmra.mxu3 %v14118_v9  ;;  %v13249_v28 = vld [vmem:[#allocation8 + $0x90c] sm:$0xf0]  ;;  %v11803_v34 = vld [vmem:[#allocation8 + $0xb00] sm:$0xf] }
 0x2b1   : > { %7510 = vmatpush.bf16.msra.mxu3 %v11916_v57  ;;  %7485 = vmatpush.bf16.msra.mxu1 %v11644_v25  ;;  %v14128_v57 = vpop.f32.mrf.mxu2  ;;  %v13321_v25 = vld [vmem:[#allocation8 + $0xb4c] sm:$0xf0]  ;;  %v4121_v10 = vpop.f32.mrf.mxu1  ;;  %v12171_v37 = vld [vmem:[#allocation8 + $0xde0] sm:$0xf] }
 0x2b2   : > { %v11836_v12 = vor.u32 %v13321_v25, %v11835_v58  ;;  %v13313_v35 = vld [vmem:[#allocation8 + $0xb0c] sm:$0xf0]  ;;  %v12299_v40 = vld [vmem:[#allocation8 + $0xee0] sm:$0xf] }
 0x2b3   : > { %7498 = vmatpush.bf16.msra.mxu2 %v11772_v62  ;;  %7473 = vmatpush.bf16.msra.mxu0 %v11500_v15  ;;  %v11452_v62 = vor.u32 %v13225_v48, %v11451_v47  ;;  %v11691_v15 = vld [vmem:[#allocation8 + $0xa20] sm:$0xf]  ;;  %v13373_v6 = vld [vmem:[#allocation8 + $0xcec] sm:$0xf0]  ;;  %v11548_v47 = vor.u32 %v13249_v28, %v11547_v27  ;;  %v11804_v18 = vor.u32 %v13313_v35, %v11803_v34 }
 0x2b4   : > { %v13405_v39 = vld [vmem:[#allocation8 + $0xdec] sm:$0xf0]  ;;  %v12427_v56 = vld [vmem:[#allocation8 + $0xfe0] sm:$0xf] }
 0x2b5   : > { %7511 = vmatpush.bf16.msra.mxu3 %v11900_v4  ;;  %7486 = vmatpush.bf16.msra.mxu1 %v11628_v21  ;;  %v11435_v4 = vld [vmem:[#allocation8 + $0x820] sm:$0xf]  ;;  %v13285_v21 = vld [vmem:[#allocation8 + $0xa2c] sm:$0xf0]  ;;  %v4147_v36 = vpop.f32.mrf.mxu3  ;;  %v12172_v25 = vor.u32 %v13405_v39, %v12171_v37 }
 0x2b6   : > { %v11436_v19 = vor.u32 %v13221_v5, %v11435_v4  ;;  %v11692_v26 = vor.u32 %v13285_v21, %v11691_v15  ;;  %v12027_v8 = vld [vmem:[#allocation8 + $0xcc0] sm:$0xf]  ;;  %v13433_v5 = vld [vmem:[#allocation8 + $0xecc] sm:$0xf0] }
 0x2b7   : > { %7499 = vmatpush.bf16.msra.mxu2 %v11756_v16  ;;  %7474 = vmatpush.bf16.msra.mxu0 %v11484_v30  ;;  %v11819_v16 = vld [vmem:[#allocation8 + $0xb20] sm:$0xf]  ;;  %v13465_v10 = vld [vmem:[#allocation8 + $0xfcc] sm:$0xf0] }
 0x2b8   : > { %v12283_v4 = vld [vmem:[#allocation8 + $0xec0] sm:$0xf]  ;;  %v13429_v27 = vld [vmem:[#allocation8 + $0xeac] sm:$0xf0] }
 0x2b9   : > { %7512 = vmatpush.bf16.msra.mxu3 %v11884_v22  ;;  %7487 = vmatpush.bf16.msra.mxu1 %v11612_v32  ;;  %v13217_v22 = vld [vmem:[#allocation8 + $0x80c] sm:$0xf0]  ;;  %v4134_v30 = vpop.f32.mrf.mxu2  ;;  %v11820_v32 = vor.u32 %v13317_v17, %v11819_v16  ;;  %v12411_v7 = vld [vmem:[#allocation8 + $0xfc0] sm:$0xf]  ;;  %v12284_v21 = vor.u32 %v13433_v5, %v12283_v4 }
 0x2ba   : > { %v11420_v38 = vor.u32 %v13217_v22, %v11419_v20  ;;  %v12011_v16 = vld [vmem:[#allocation8 + $0xca0] sm:$0xf]  ;;  %v13365_v17 = vld [vmem:[#allocation8 + $0xcac] sm:$0xf0]  ;;  %v14142_v20 = vpack.c.bf16 %v4264_v54, %v4264_v54  ;;  %v12412_v22 = vor.u32 %v13465_v10, %v12411_v7 }
 0x2bb   : > { %7500 = vmatpush.bf16.msra.mxu2 %v11740_v33  ;;  %7475 = vmatpush.bf16.msra.mxu0 %v11468_v43  ;;  %v13281_v33 = vld [vmem:[#allocation8 + $0xa0c] sm:$0xf0]  ;;  %v12395_v28 = vld [vmem:[#allocation8 + $0xfa0] sm:$0xf]  ;;  %v12012_v30 = vor.u32 %v13365_v17, %v12011_v16 }
 0x2bc   : > { %v13437_v43 = vld [vmem:[#allocation8 + $0xeec] sm:$0xf0]  ;;  %v11676_v48 = vor.u32 %v13281_v33, %v11675_v29  ;;  %v842_v33 = vperm.slane %v14103_v3, 5  ;;  %v12251_v39 = vld [vmem:[#allocation8 + $0xe80] sm:$0xf] }
 0x2bd   : > { %7513 = vmatpush.bf16.msra.mxu3 %v11868_v41  ;;  %7488 = vmatpush.bf16.msra.mxu1 %v11596_v44  ;;  %v12043_v41 = vld [vmem:[#allocation8 + $0xce0] sm:$0xf]  ;;  %v4261_v44 = vmax.f32 %v14064_v11, 0.0  ;;  %v13461_v29 = vld [vmem:[#allocation8 + $0xfac] sm:$0xf0] }
 0x2be   : > { %v12044_v58 = vor.u32 %v13373_v6, %v12043_v41  ;;  %v12155_v11 = vld [vmem:[#allocation8 + $0xdc0] sm:$0xf]  ;;  %v13361_v36 = vld [vmem:[#allocation8 + $0xc8c] sm:$0xf0]  ;;  %v843_v6 = vperm.slane %v14103_v3, 6  ;;  %v12396_v37 = vor.u32 %v13461_v29, %v12395_v28 }
 0x2bf   : > { %7501 = vmatpush.bf16.msra.mxu2 %v11724_v46  ;;  %7476 = vmatpush.bf16.msra.mxu0 %v11452_v62  ;;  %v4262_v46 = vmax.f32 %v14071_v23, 0.0  ;;  %v12300_v62 = vor.u32 %v13437_v43, %v12299_v40  ;;  %v14136_v50 = vpack.c.bf16 %v4261_v44, %v4261_v44  ;;  %v12123_v41 = vld [vmem:[#allocation8 + $0xd80] sm:$0xf]  ;;  %v13425_v40 = vld [vmem:[#allocation8 + $0xe8c] sm:$0xf0] }
 0x2c0   : > { %v12379_v43 = vld [vmem:[#allocation8 + $0xf80] sm:$0xf]  ;;  %v13457_v44 = vld [vmem:[#allocation8 + $0xf8c] sm:$0xf0] }
 0x2c1   : > { %7514 = vmatpush.bf16.msra.mxu3 %v11852_v49  ;;  %7489 = vmatpush.bf16.msra.mxu1 %v11580_v63  ;;  %v13469_v49 = vld [vmem:[#allocation8 + $0xfec] sm:$0xf0]  ;;  %v14138_v42 = vpack.c.bf16 %v4262_v46, %v4262_v46  ;;  %v12107_v54 = vld [vmem:[#allocation8 + $0xd60] sm:$0xf] }
 0x2c2   : > { %v13369_v63 = vld [vmem:[#allocation8 + $0xccc] sm:$0xf0]  ;;  %v12428_v23 = vor.u32 %v13469_v49, %v12427_v56  ;;  %v12252_v56 = vor.u32 %v13425_v40, %v12251_v39  ;;  %v11979_v49 = vld [vmem:[#allocation8 + $0xc60] sm:$0xf] }
 0x2c3   : > { %7502 = vmatpush.bf16.msra.mxu2 %v11708_v1  ;;  %7477 = vmatpush.bf16.msra.mxu0 %v11436_v19  ;;  %v13401_v1 = vld [vmem:[#allocation8 + $0xdcc] sm:$0xf0]  ;;  %v12139_v19 = vld [vmem:[#allocation8 + $0xda0] sm:$0xf] }
 0x2c4   : > { %v12156_v15 = vor.u32 %v13401_v1, %v12155_v11  ;;  %v13357_v51 = vld [vmem:[#allocation8 + $0xc6c] sm:$0xf0]  ;;  %v12203_v39 = vld [vmem:[#allocation8 + $0xe20] sm:$0xf] }
 0x2c5   : > { %7515 = vmatpush.bf16.msra.mxu3 %v11836_v12  ;;  %7490 = vmatpush.bf16.msra.mxu1 %v11564_v24  ;;  %v12028_v12 = vor.u32 %v13369_v63, %v12027_v8  ;;  %v13397_v24 = vld [vmem:[#allocation8 + $0xdac] sm:$0xf0]  ;;  %v12235_v63 = vld [vmem:[#allocation8 + $0xe60] sm:$0xf]  ;;  %v11980_v4 = vor.u32 %v13357_v51, %v11979_v49 }
 0x2c6   : > { %v12140_v34 = vor.u32 %v13397_v24, %v12139_v19  ;;  %v13389_v8 = vld [vmem:[#allocation8 + $0xd6c] sm:$0xf0] }
 0x2c7   : > { %7503 = vmatpush.bf16.msra.mxu2 %v11692_v26  ;;  %7478 = vmatpush.bf16.msra.mxu0 %v11420_v38  ;;  %v12267_v26 = vld [vmem:[#allocation8 + $0xea0] sm:$0xf]  ;;  %v13393_v38 = vld [vmem:[#allocation8 + $0xd8c] sm:$0xf0]  ;;  %v12108_v5 = vor.u32 %v13389_v8, %v12107_v54 }
 0x2c8   : > { %v12268_v35 = vor.u32 %v13429_v27, %v12267_v26  ;;  %v13421_v11 = vld [vmem:[#allocation8 + $0xe6c] sm:$0xf0]  ;;  %v12347_v27 = vld [vmem:[#allocation8 + $0xf40] sm:$0xf] }
 0x2c9   : > { %7516 = vmatpush.bf16.msra.mxu3 %v11820_v32  ;;  %7491 = vmatpush.bf16.msra.mxu1 %v11548_v47  ;;  %v11995_v32 = vld [vmem:[#allocation8 + $0xc80] sm:$0xf]  ;;  %v4158_v47 = vpop.f32.mrf.mxu0  ;;  %v13453_v1 = vld [vmem:[#allocation8 + $0xf6c] sm:$0xf0]  ;;  %v12236_v7 = vor.u32 %v13421_v11, %v12235_v63 }
 0x2ca   : > { %7479 = vmatmul.bf16.vlgmr.msra.gmra.mxu0 %v14136_v50  ;;  %v11996_v46 = vor.u32 %v13361_v36, %v11995_v32  ;;  %v13385_v19 = vld [vmem:[#allocation8 + $0xd4c] sm:$0xf0]  ;;  %v12059_v54 = vld [vmem:[#allocation8 + $0xd00] sm:$0xf] }
 0x2cb   : > { %7504 = vmatpush.bf16.msra.mxu2 %v11676_v48  ;;  %7523 = vmatpush.bf16.msrb.mxu0 %v12044_v58  ;;  %v12124_v48 = vor.u32 %v13393_v38, %v12123_v41  ;;  %v4171_v58 = vpop.f32.mrf.mxu1  ;;  %v13417_v24 = vld [vmem:[#allocation8 + $0xe4c] sm:$0xf0]  ;;  %v12075_v41 = vld [vmem:[#allocation8 + $0xd20] sm:$0xf] }
 0x2cc   : > { %7492 = vmatmul.bf16.vlgmr.msra.gmra.mxu1 %v14138_v42  ;;  %v13449_v28 = vld [vmem:[#allocation8 + $0xf4c] sm:$0xf0]  ;;  %v12315_v63 = vld [vmem:[#allocation8 + $0xf00] sm:$0xf] }
 0x2cd   : > { %7517 = vmatpush.bf16.msra.mxu3 %v11804_v18  ;;  %7536 = vmatpush.bf16.msrb.mxu1 %v12172_v25  ;;  %v4159_v18 = vadd.f32 %v4158_v47, %v843_v6  ;;  %v4107_v25 = vadd.f32 %v14124_v31, %v842_v33  ;;  %v13349_v36 = vld [vmem:[#allocation8 + $0xc2c] sm:$0xf0]  ;;  %v11931_v47 = vld [vmem:[#allocation8 + $0xc00] sm:$0xf] }
 0x2ce   : > { %7505 = vmatmul.bf16.vlgmr.msra.gmra.mxu2 %v14140_v14  ;;  %v4184_v16 = vpop.f32.mrf.mxu2  ;;  %v13381_v38 = vld [vmem:[#allocation8 + $0xd2c] sm:$0xf0] }
 0x2cf   : > { %7549 = vmatpush.bf16.msrb.mxu2 %v12300_v62  ;;  %7524 = vmatpush.bf16.msrb.mxu0 %v12028_v12  ;;  %v12380_v62 = vor.u32 %v13457_v44, %v12379_v43  ;;  %v4172_v10 = vadd.f32 %v4171_v58, %v4159_v18  ;;  %v11963_v12 = vld [vmem:[#allocation8 + $0xc40] sm:$0xf]  ;;  %v4120_v31 = vadd.f32 %v14126_v13, %v4107_v25  ;;  %v13413_v40 = vld [vmem:[#allocation8 + $0xe2c] sm:$0xf0] }
 0x2d0   : > { %7518 = vmatmul.bf16.vlgmr.msra.gmra.mxu3 %v14142_v20  ;;  %v4197_v26 = vpop.f32.mrf.mxu3  ;;  %v12331_v43 = vld [vmem:[#allocation8 + $0xf20] sm:$0xf]  ;;  %v13445_v44 = vld [vmem:[#allocation8 + $0xf2c] sm:$0xf0]  ;;  %v12076_v49 = vor.u32 %v13381_v38, %v12075_v41  ;;  %v12204_v51 = vor.u32 %v13413_v40, %v12203_v39 }
 0x2d1   : > { %7562 = vmatpush.bf16.msrb.mxu3 %v12428_v23  ;;  %7537 = vmatpush.bf16.msrb.mxu1 %v12156_v15  ;;  %v12363_v23 = vld [vmem:[#allocation8 + $0xf60] sm:$0xf]  ;;  %v13353_v15 = vld [vmem:[#allocation8 + $0xc4c] sm:$0xf0]  ;;  %v4133_v6 = vadd.f32 %v14128_v57, %v4120_v31 }
 0x2d2   : > { %v12364_v17 = vor.u32 %v13453_v1, %v12363_v23  ;;  %v11964_v29 = vor.u32 %v13353_v15, %v11963_v12  ;;  %v13377_v18 = vld [vmem:[#allocation8 + $0xd0c] sm:$0xf0]  ;;  %v12187_v58 = vld [vmem:[#allocation8 + $0xe00] sm:$0xf]  ;;  %v12987_v1 = vld [vmem:[#allocation8 + $0xe4] sm:$0xf] }
 0x2d3   : > { %7550 = vmatpush.bf16.msrb.mxu2 %v12284_v21  ;;  %7525 = vmatpush.bf16.msrb.mxu0 %v12012_v30  ;;  %v12091_v21 = vld [vmem:[#allocation8 + $0xd40] sm:$0xf]  ;;  %v4160_v30 = vpop.f32.mrf.mxu0  ;;  %v4173_v13 = vpop.f32.mrf.mxu1  ;;  %v4146_v25 = vadd.f32 %v14130_v55, %v4133_v6  ;;  %v13409_v8 = vld [vmem:[#allocation8 + $0xe0c] sm:$0xf0]  ;;  %v13051_v12 = vld [vmem:[#allocation8 + $0x2e4] sm:$0xf] }
 0x2d4   : > { %v12092_v32 = vor.u32 %v13385_v19, %v12091_v21  ;;  %v13441_v11 = vld [vmem:[#allocation8 + $0xf0c] sm:$0xf0]  ;;  %v10765_v15 = vld [vmem:[#allocation8 + $0x2f0] sm:$0xf0]  ;;  %v12188_v31 = vor.u32 %v13409_v8, %v12187_v58  ;;  %v13083_v55 = vld [vmem:[#allocation8 + $0x3e4] sm:$0xf] }
 0x2d5   : > { %7563 = vmatpush.bf16.msrb.mxu3 %v12412_v22  ;;  %7538 = vmatpush.bf16.msrb.mxu1 %v12140_v34  ;;  %v12219_v22 = vld [vmem:[#allocation8 + $0xe40] sm:$0xf]  ;;  %v4185_v34 = vadd.f32 %v4184_v16, %v4172_v10  ;;  %v10637_v10 = vld [vmem:[#allocation8 + $0x1f0] sm:$0xf0]  ;;  %v12060_v16 = vor.u32 %v13377_v18, %v12059_v54  ;;  %v4265_v19 = vmax.f32 %v14106_v53, 0.0  ;;  %v844_v58 = vperm.slane %v14103_v3, 7 }
 0x2d6   : > { %v12220_v33 = vor.u32 %v13417_v24, %v12219_v22  ;;  %v4186_v57 = vpop.f32.mrf.mxu2  ;;  %v4266_v22 = vmax.f32 %v4146_v25, 0.0  ;;  %v12316_v24 = vor.u32 %v13441_v11, %v12315_v63  ;;  %v10493_v30 = vld [vmem:[#allocation8 + $0xd0] sm:$0xf0]  ;;  %v13079_v13 = vld [vmem:[#allocation8 + $0x3c4] sm:$0xf] }
 0x2d7   : > { %7551 = vmatpush.bf16.msrb.mxu2 %v12268_v35  ;;  %7526 = vmatpush.bf16.msrb.mxu0 %v11996_v46  ;;  %v11947_v35 = vld [vmem:[#allocation8 + $0xc20] sm:$0xf]  ;;  %v10877_v53 = vld [vmem:[#allocation8 + $0x3d0] sm:$0xf0]  ;;  %v14157_v6 = vpack.c.bf16 %v4265_v19, %v4265_v19  ;;  %v13007_v63 = vld [vmem:[#allocation8 + $0x184] sm:$0xf] }
 0x2d8   : > { %v11948_v46 = vor.u32 %v13349_v36, %v11947_v35  ;;  %v4199_v23 = vpop.f32.mrf.mxu3  ;;  %v13047_v35 = vld [vmem:[#allocation8 + $0x2c4] sm:$0xf]  ;;  %v10749_v36 = vld [vmem:[#allocation8 + $0x2d0] sm:$0xf0]  ;;  %v14159_v38 = vpack.c.bf16 %v4266_v22, %v4266_v22 }
 0x2d9   : > { %7564 = vmatpush.bf16.msrb.mxu3 %v12396_v37  ;;  %7539 = vmatpush.bf16.msrb.mxu1 %v12124_v48  ;;  %v12348_v37 = vor.u32 %v13449_v28, %v12347_v27  ;;  %v13345_v48 = vld [vmem:[#allocation8 + $0xc0c] sm:$0xf0]  ;;  %v10768_v28 = vor.u32 %v13051_v12, %v10765_v15  ;;  %v10752_v40 = vor.u32 %v13047_v35, %v10749_v36  ;;  %v10861_v54 = vld [vmem:[#allocation8 + $0x3b0] sm:$0xf0]  ;;  %v12999_v36 = vld [vmem:[#allocation8 + $0x144] sm:$0xf] }
 0x2da   : > { %v10461_v8 = vld [vmem:[#allocation8 + $0x90] sm:$0xf0] }
 0x2db   : > { %7552 = vmatpush.bf16.msrb.mxu2 %v12252_v56  ;;  %7527 = vmatpush.bf16.msrb.mxu0 %v11980_v4  ;;  %v4198_v56 = vadd.f32 %v4197_v26, %v4185_v34  ;;  %v10509_v4 = vld [vmem:[#allocation8 + $0xf0] sm:$0xf0] }
 0x2dc   : > { %v10512_v26 = vor.u32 %v12987_v1, %v10509_v4  ;;  %v10621_v34 = vld [vmem:[#allocation8 + $0x1d0] sm:$0xf0]  ;;  %v13039_v1 = vld [vmem:[#allocation8 + $0x284] sm:$0xf] }
 0x2dd   : > { %7565 = vmatpush.bf16.msrb.mxu3 %v12380_v62  ;;  %7540 = vmatpush.bf16.msrb.mxu1 %v12108_v5  ;;  %v12332_v62 = vor.u32 %v13445_v44, %v12331_v43  ;;  %v13019_v5 = vld [vmem:[#allocation8 + $0x1e4] sm:$0xf]  ;;  %v4267_v21 = vmax.f32 %v4198_v56, 0.0  ;;  %v10477_v44 = vld [vmem:[#allocation8 + $0xb0] sm:$0xf0] }
 0x2de   : > { %v10640_v27 = vor.u32 %v13019_v5, %v10637_v10  ;;  %v12979_v43 = vld [vmem:[#allocation8 + $0xa4] sm:$0xf]  ;;  %v10589_v23 = vld [vmem:[#allocation8 + $0x190] sm:$0xf0] }
 0x2df   : > { %7553 = vmatpush.bf16.msrb.mxu2 %v12236_v7  ;;  %7528 = vmatpush.bf16.msrb.mxu0 %v11964_v29  ;;  %v11932_v7 = vor.u32 %v13345_v48, %v11931_v47  ;;  %v12983_v29 = vld [vmem:[#allocation8 + $0xc4] sm:$0xf]  ;;  %v14155_v41 = vpack.c.bf16 %v4267_v21, %v4267_v21  ;;  %v10880_v47 = vor.u32 %v13079_v13, %v10877_v53  ;;  %v10605_v48 = vld [vmem:[#allocation8 + $0x1b0] sm:$0xf0] }
 0x2e0   : > { %v13043_v56 = vld [vmem:[#allocation8 + $0x2a4] sm:$0xf]  ;;  %v10480_v18 = vor.u32 %v12979_v43, %v10477_v44  ;;  %v10717_v4 = vld [vmem:[#allocation8 + $0x290] sm:$0xf0]  ;;  %v10592_v3 = vor.u32 %v13007_v63, %v10589_v23 }
 0x2e1   : > { %7566 = vmatpush.bf16.msrb.mxu3 %v12364_v17  ;;  %7541 = vmatpush.bf16.msrb.mxu1 %v12092_v32  ;;  %v10893_v17 = vld [vmem:[#allocation8 + $0x3f0] sm:$0xf0]  ;;  %v13015_v32 = vld [vmem:[#allocation8 + $0x1c4] sm:$0xf] }
 0x2e2   : > { %v10624_v39 = vor.u32 %v13015_v32, %v10621_v34  ;;  %v10845_v10 = vld [vmem:[#allocation8 + $0x390] sm:$0xf0]  ;;  %v12967_v34 = vld [vmem:[#allocation8 + $0x44] sm:$0xf] }
 0x2e3   : > { %7554 = vmatpush.bf16.msrb.mxu2 %v12220_v33  ;;  %7529 = vmatpush.bf16.msrb.mxu0 %v11948_v46  ;;  %v10896_v33 = vor.u32 %v13083_v55, %v10893_v17  ;;  %v13011_v46 = vld [vmem:[#allocation8 + $0x1a4] sm:$0xf]  ;;  %v10445_v55 = vld [vmem:[#allocation8 + $0x70] sm:$0xf0] }
 0x2e4   : > { %v10608_v57 = vor.u32 %v13011_v46, %v10605_v48  ;;  %v13003_v17 = vld [vmem:[#allocation8 + $0x164] sm:$0xf]  ;;  %v10573_v22 = vld [vmem:[#allocation8 + $0x170] sm:$0xf0] }
 0x2e5   : > { %7567 = vmatpush.bf16.msrb.mxu3 %v12348_v37  ;;  %7542 = vmatpush.bf16.msrb.mxu1 %v12076_v49  ;;  %v10496_v37 = vor.u32 %v12983_v29, %v10493_v30  ;;  %v10733_v49 = vld [vmem:[#allocation8 + $0x2b0] sm:$0xf0]  ;;  %v10576_v32 = vor.u32 %v13003_v17, %v10573_v22  ;;  %v13027_v63 = vld [vmem:[#allocation8 + $0x224] sm:$0xf] }
 0x2e6   : > { %v10736_v25 = vor.u32 %v13043_v56, %v10733_v49  ;;  %v10829_v29 = vld [vmem:[#allocation8 + $0x370] sm:$0xf0]  ;;  %v13055_v22 = vld [vmem:[#allocation8 + $0x304] sm:$0xf] }
 0x2e7   : > { %7555 = vmatpush.bf16.msrb.mxu2 %v12204_v51  ;;  %7530 = vmatpush.bf16.msrb.mxu0 %v11932_v7  ;;  %v13075_v51 = vld [vmem:[#allocation8 + $0x3a4] sm:$0xf]  ;;  %v4210_v5 = vpop.f32.mrf.mxu0  ;;  %v10429_v35 = vld [vmem:[#allocation8 + $0x50] sm:$0xf0] }
 0x2e8   : > { %v10864_v11 = vor.u32 %v13075_v51, %v10861_v54  ;;  %v13071_v7 = vld [vmem:[#allocation8 + $0x384] sm:$0xf]  ;;  %v4211_v12 = vadd.f32 %v4210_v5, %v844_v58  ;;  %v10813_v48 = vld [vmem:[#allocation8 + $0x350] sm:$0xf0]  ;;  %v10432_v49 = vor.u32 %v12967_v34, %v10429_v35 }
 0x2e9   : > { %7568 = vmatpush.bf16.msrb.mxu3 %v12332_v62  ;;  %7543 = vmatpush.bf16.msrb.mxu1 %v12060_v16  ;;  %v12975_v62 = vld [vmem:[#allocation8 + $0x84] sm:$0xf]  ;;  %v4223_v15 = vpop.f32.mrf.mxu1  ;;  %v10720_v16 = vor.u32 %v13039_v1, %v10717_v4  ;;  %v10848_v19 = vor.u32 %v13071_v7, %v10845_v10  ;;  %v10797_v4 = vld [vmem:[#allocation8 + $0x330] sm:$0xf0] }
 0x2ea   : > { %7531 = vmatmul.bf16.vlgmr.msrb.gmra.mxu0 %v14157_v6  ;;  %v10464_v21 = vor.u32 %v12975_v62, %v10461_v8  ;;  %v12963_v58 = vld [vmem:[#allocation8 + $0x24] sm:$0xf]  ;;  %v10541_v8 = vld [vmem:[#allocation8 + $0x130] sm:$0xf0] }
 0x2eb   : > { %7556 = vmatpush.bf16.msrb.mxu2 %v12188_v31  ;;  %7575 = vmatpush.bf16.msra.mxu0 %v10512_v26  ;;  %v12971_v31 = vld [vmem:[#allocation8 + $0x64] sm:$0xf]  ;;  %v10701_v26 = vld [vmem:[#allocation8 + $0x270] sm:$0xf0] }
 0x2ec   : > { %7544 = vmatmul.bf16.vlgmr.msrb.gmra.mxu1 %v14159_v38  ;;  %v10448_v30 = vor.u32 %v12971_v31, %v10445_v55  ;;  %v13059_v1 = vld [vmem:[#allocation8 + $0x324] sm:$0xf]  ;;  %v10397_v10 = vld [vmem:[#allocation8 + $0x10] sm:$0xf0] }
 0x2ed   : > { %7569 = vmatpush.bf16.msrb.mxu3 %v12316_v24  ;;  %7588 = vmatpush.bf16.msra.mxu1 %v10640_v27  ;;  %v13035_v24 = vld [vmem:[#allocation8 + $0x264] sm:$0xf]  ;;  %v4224_v27 = vadd.f32 %v4223_v15, %v4211_v12  ;;  %v10800_v55 = vor.u32 %v13059_v1, %v10797_v4  ;;  %v11277_v34 = vld [vmem:[#allocation8 + $0x6f0] sm:$0xf0] }
 0x2ee   : > { %7557 = vmatmul.bf16.vlgmr.msrb.gmra.mxu2 %v14155_v41  ;;  %v12959_v7 = vld [vmem:[#allocation8 + $0x4] sm:$0xf]  ;;  %v11117_v1 = vld [vmem:[#allocation8 + $0x5b0] sm:$0xf0] }
 0x2ef   : > { %7601 = vmatpush.bf16.msra.mxu2 %v10768_v28  ;;  %7576 = vmatpush.bf16.msra.mxu0 %v10496_v37  ;;  %v13067_v28 = vld [vmem:[#allocation8 + $0x364] sm:$0xf]  ;;  %v10557_v37 = vld [vmem:[#allocation8 + $0x150] sm:$0xf0]  ;;  %v4212_v46 = vpop.f32.mrf.mxu0 }
 0x2f0   : > { %v10832_v13 = vor.u32 %v13067_v28, %v10829_v29  ;;  %v10560_v54 = vor.u32 %v12999_v36, %v10557_v37  ;;  %v13023_v31 = vld [vmem:[#allocation8 + $0x204] sm:$0xf]  ;;  %v11021_v28 = vld [vmem:[#allocation8 + $0x4f0] sm:$0xf0] }
 0x2f1   : > { %7614 = vmatpush.bf16.msra.mxu3 %v10896_v33  ;;  %7589 = vmatpush.bf16.msra.mxu1 %v10624_v39  ;;  %v10704_v33 = vor.u32 %v13035_v24, %v10701_v26  ;;  %v4236_v53 = vpop.f32.mrf.mxu2  ;;  %v13031_v39 = vld [vmem:[#allocation8 + $0x244] sm:$0xf]  ;;  %v4225_v56 = vpop.f32.mrf.mxu1  ;;  %v10781_v24 = vld [vmem:[#allocation8 + $0x310] sm:$0xf0] }
 0x2f2   : > { %v4237_v43 = vadd.f32 %v4236_v53, %v4224_v27  ;;  %v13115_v27 = vld [vmem:[#allocation8 + $0x4e4] sm:$0xf]  ;;  %v11405_v53 = vld [vmem:[#allocation8 + $0x7f0] sm:$0xf0]  ;;  %v10784_v37 = vor.u32 %v13055_v22, %v10781_v24 }
 0x2f3   : > { %7602 = vmatpush.bf16.msra.mxu2 %v10752_v40  ;;  %7577 = vmatpush.bf16.msra.mxu0 %v10480_v18  ;;  %v10685_v40 = vld [vmem:[#allocation8 + $0x250] sm:$0xf0]  ;;  %v4249_v44 = vpop.f32.mrf.mxu3  ;;  %v13147_v29 = vld [vmem:[#allocation8 + $0x5e4] sm:$0xf] }
 0x2f4   : > { %v4250_v51 = vadd.f32 %v4249_v44, %v4237_v43  ;;  %v10688_v18 = vor.u32 %v13031_v39, %v10685_v40  ;;  %v11024_v39 = vor.u32 %v13115_v27, %v11021_v28  ;;  %v13111_v44 = vld [vmem:[#allocation8 + $0x4c4] sm:$0xf]  ;;  %v11005_v46 = vld [vmem:[#allocation8 + $0x4d0] sm:$0xf0] }
 0x2f5   : > { %7615 = vmatpush.bf16.msra.mxu3 %v10880_v47  ;;  %7590 = vmatpush.bf16.msra.mxu1 %v10608_v57  ;;  %v13063_v47 = vld [vmem:[#allocation8 + $0x344] sm:$0xf]  ;;  %v10413_v57 = vld [vmem:[#allocation8 + $0x30] sm:$0xf0] }
 0x2f6   : > { %v10816_v62 = vor.u32 %v13063_v47, %v10813_v48  ;;  %v4268_v23 = vmax.f32 %v4250_v51, 0.0  ;;  %v10416_v5 = vor.u32 %v12963_v58, %v10413_v57  ;;  %v13143_v47 = vld [vmem:[#allocation8 + $0x5c4] sm:$0xf]  ;;  %v11133_v56 = vld [vmem:[#allocation8 + $0x5d0] sm:$0xf0]  ;;  %v11008_v58 = vor.u32 %v13111_v44, %v11005_v46 }
 0x2f7   : > { %7603 = vmatpush.bf16.msra.mxu2 %v10736_v25  ;;  %7578 = vmatpush.bf16.msra.mxu0 %v10464_v21  ;;  %v12995_v25 = vld [vmem:[#allocation8 + $0x124] sm:$0xf]  ;;  %v11261_v51 = vld [vmem:[#allocation8 + $0x6d0] sm:$0xf0] }
 0x2f8   : > { %v14165_v12 = vpack.c.bf16 %v4268_v23, %v4268_v23  ;;  %v10544_v15 = vor.u32 %v12995_v25, %v10541_v8  ;;  %v13107_v57 = vld [vmem:[#allocation8 + $0x4a4] sm:$0xf]  ;;  %v11136_v25 = vor.u32 %v13143_v47, %v11133_v56  ;;  %v10989_v8 = vld [vmem:[#allocation8 + $0x4b0] sm:$0xf0] }
 0x2f9   : > { %7616 = vmatpush.bf16.msra.mxu3 %v10864_v11  ;;  %7591 = vmatpush.bf16.msra.mxu1 %v10592_v3  ;;  %v10669_v11 = vld [vmem:[#allocation8 + $0x230] sm:$0xf0]  ;;  %v12991_v3 = vld [vmem:[#allocation8 + $0x104] sm:$0xf]  ;;  %v4238_v17 = vpop.f32.mrf.mxu2 }
 0x2fa   : > { %v10672_v21 = vor.u32 %v13027_v63, %v10669_v11  ;;  %7570 = vmatmul.bf16.vlgmr.msrb.gmra.mxu3 %v14165_v12  ;;  %v13139_v63 = vld [vmem:[#allocation8 + $0x5a4] sm:$0xf]  ;;  %v4797_v11 = vld [vmem:[#allocation10] sm:$0xf]  ;;  %v11101_v22 = vld [vmem:[#allocation8 + $0x590] sm:$0xf0] }
 0x2fb   : > { %7604 = vmatpush.bf16.msra.mxu2 %v10720_v16  ;;  %7579 = vmatpush.bf16.msra.mxu0 %v10448_v30  ;;  %v10525_v16 = vld [vmem:[#allocation8 + $0x110] sm:$0xf0]  ;;  %v4251_v26 = vpop.f32.mrf.mxu3  ;;  %v10400_v30 = vor.u32 %v12959_v7, %v10397_v10  ;;  %v13171_v4 = vld [vmem:[#allocation8 + $0x6a4] sm:$0xf] }
 0x2fc   : > { %v10528_v35 = vor.u32 %v12991_v3, %v10525_v16  ;;  %v13203_v7 = vld [vmem:[#allocation8 + $0x7a4] sm:$0xf]  ;;  %v11373_v10 = vld [vmem:[#allocation8 + $0x7b0] sm:$0xf0]  ;;  %v11120_v3 = vor.u32 %v13139_v63, %v11117_v1 }
 0x2fd   : > { %7617 = vmatpush.bf16.msra.mxu3 %v10848_v19  ;;  %7592 = vmatpush.bf16.msra.mxu1 %v10576_v32  ;;  %v10653_v19 = vld [vmem:[#allocation8 + $0x210] sm:$0xf0]  ;;  %v13135_v17 = vld [vmem:[#allocation8 + $0x584] sm:$0xf] }
 0x2fe   : > { %v11149_v32 = vld [vmem:[#allocation8 + $0x5f0] sm:$0xf0]  ;;  %v10656_v36 = vor.u32 %v13023_v31, %v10653_v19  ;;  %v13103_v31 = vld [vmem:[#allocation8 + $0x484] sm:$0xf]  ;;  %v11376_v19 = vor.u32 %v13203_v7, %v11373_v10 }
 0x2ff   : > { %7605 = vmatpush.bf16.msra.mxu2 %v10704_v33  ;;  %7580 = vmatpush.bf16.msra.mxu0 %v10432_v49  ;;  %v13179_v33 = vld [vmem:[#allocation8 + $0x6e4] sm:$0xf]  ;;  %v11152_v40 = vor.u32 %v13147_v29, %v11149_v32  ;;  %v11229_v26 = vld [vmem:[#allocation8 + $0x690] sm:$0xf0] }
 0x300   : > { %v11280_v43 = vor.u32 %v13179_v33, %v11277_v34  ;;  %v13175_v49 = vld [vmem:[#allocation8 + $0x6c4] sm:$0xf]  ;;  %v11357_v29 = vld [vmem:[#allocation8 + $0x790] sm:$0xf0]  ;;  %v11104_v34 = vor.u32 %v13135_v17, %v11101_v22 }
 0x301   : > { %7618 = vmatpush.bf16.msra.mxu3 %v10832_v13  ;;  %7593 = vmatpush.bf16.msra.mxu1 %v10560_v54  ;;  %v13211_v13 = vld [vmem:[#allocation8 + $0x7e4] sm:$0xf]  ;;  %v11213_v44 = vld [vmem:[#allocation8 + $0x670] sm:$0xf0] }
 0x302   : > { %v11408_v48 = vor.u32 %v13211_v13, %v11405_v53  ;;  %v13207_v54 = vld [vmem:[#allocation8 + $0x7c4] sm:$0xf]  ;;  %v10957_v13 = vld [vmem:[#allocation8 + $0x470] sm:$0xf0] }
 0x303   : > { %7606 = vmatpush.bf16.msra.mxu2 %v10688_v18  ;;  %7581 = vmatpush.bf16.msra.mxu0 %v10416_v5  ;;  %v11389_v18 = vld [vmem:[#allocation8 + $0x7d0] sm:$0xf0]  ;;  %v13167_v24 = vld [vmem:[#allocation8 + $0x684] sm:$0xf] }
 0x304   : > { %v11392_v23 = vor.u32 %v13207_v54, %v11389_v18  ;;  %v11245_v5 = vld [vmem:[#allocation8 + $0x6b0] sm:$0xf0]  ;;  %v13199_v28 = vld [vmem:[#allocation8 + $0x784] sm:$0xf] }
 0x305   : > { %7619 = vmatpush.bf16.msra.mxu3 %v10816_v62  ;;  %7594 = vmatpush.bf16.msra.mxu1 %v10544_v15  ;;  %v11264_v62 = vor.u32 %v13175_v49, %v11261_v51  ;;  %v10992_v15 = vor.u32 %v13107_v57, %v10989_v8  ;;  %v11248_v16 = vor.u32 %v13171_v4, %v11245_v5  ;;  %v13131_v53 = vld [vmem:[#allocation8 + $0x564] sm:$0xf]  ;;  %v11341_v47 = vld [vmem:[#allocation8 + $0x770] sm:$0xf0] }
 0x306   : > { %v13195_v46 = vld [vmem:[#allocation8 + $0x764] sm:$0xf]  ;;  %v10941_v54 = vld [vmem:[#allocation8 + $0x450] sm:$0xf0] }
 0x307   : > { %7607 = vmatpush.bf16.msra.mxu2 %v10672_v21  ;;  %7582 = vmatpush.bf16.msra.mxu0 %v10400_v30  ;;  %v4799_v21 = vperm.slane %v4797_v11, 0  ;;  %v7376_v27 = vpop.f32.mrf.mxu0  ;;  %v13095_v51 = vld [vmem:[#allocation8 + $0x444] sm:$0xf]  ;;  %v11197_v8 = vld [vmem:[#allocation8 + $0x650] sm:$0xf0] }
 0x308   : > { %v13127_v18 = vld [vmem:[#allocation8 + $0x544] sm:$0xf]  ;;  %v11325_v4 = vld [vmem:[#allocation8 + $0x750] sm:$0xf0]  ;;  %v10944_v7 = vor.u32 %v13095_v51, %v10941_v54 }
 0x309   : > { %7620 = vmatpush.bf16.msra.mxu3 %v10800_v55  ;;  %7595 = vmatpush.bf16.msra.mxu1 %v10528_v35  ;;  %v10973_v55 = vld [vmem:[#allocation8 + $0x490] sm:$0xf0]  ;;  %v7377_v30 = vadd.f32 %v7376_v27, %v4799_v21  ;;  %v7389_v32 = vpop.f32.mrf.mxu1  ;;  %v11232_v35 = vor.u32 %v13167_v24, %v11229_v26  ;;  %v13191_v1 = vld [vmem:[#allocation8 + $0x744] sm:$0xf] }
 0x30a   : > { %7583 = vmatmul.bf16.vlgmr.msra.gmra.mxu0 %v14091_v0  ;;  %v10976_v33 = vor.u32 %v13103_v31, %v10973_v55  ;;  %v13123_v31 = vld [vmem:[#allocation8 + $0x524] sm:$0xf]  ;;  %v11328_v55 = vor.u32 %v13191_v1, %v11325_v4  ;;  %v11053_v17 = vld [vmem:[#allocation8 + $0x530] sm:$0xf0] }
 0x30b   : > { %7608 = vmatpush.bf16.msra.mxu2 %v10656_v36  ;;  %7627 = vmatpush.bf16.msrb.mxu0 %v11024_v39  ;;  %v13099_v36 = vld [vmem:[#allocation8 + $0x464] sm:$0xf]  ;;  %v11360_v39 = vor.u32 %v13199_v28, %v11357_v29  ;;  %v11181_v22 = vld [vmem:[#allocation8 + $0x630] sm:$0xf0] }
 0x30c   : > { %7596 = vmatmul.bf16.vlgmr.msra.gmra.mxu1 %v14093_v59  ;;  %v13187_v24 = vld [vmem:[#allocation8 + $0x724] sm:$0xf]  ;;  %v11309_v26 = vld [vmem:[#allocation8 + $0x730] sm:$0xf0] }
 0x30d   : > { %7621 = vmatpush.bf16.msra.mxu3 %v10784_v37  ;;  %7640 = vmatpush.bf16.msrb.mxu1 %v11152_v40  ;;  %v7390_v37 = vadd.f32 %v7389_v32, %v7377_v30  ;;  %v11085_v40 = vld [vmem:[#allocation8 + $0x570] sm:$0xf0]  ;;  %v13087_v28 = vld [vmem:[#allocation8 + $0x404] sm:$0xf]  ;;  %v11056_v30 = vor.u32 %v13123_v31, %v11053_v17 }
 0x30e   : > { %7609 = vmatmul.bf16.vlgmr.msra.gmra.mxu2 %v14095_v45  ;;  %v11088_v56 = vor.u32 %v13131_v53, %v11085_v40  ;;  %v10909_v29 = vld [vmem:[#allocation8 + $0x410] sm:$0xf0] }
 0x30f   : > { %7653 = vmatpush.bf16.msrb.mxu2 %v11280_v43  ;;  %7628 = vmatpush.bf16.msrb.mxu0 %v11008_v58  ;;  %v13163_v43 = vld [vmem:[#allocation8 + $0x664] sm:$0xf]  ;;  %v11344_v58 = vor.u32 %v13195_v46, %v11341_v47  ;;  %v11165_v53 = vld [vmem:[#allocation8 + $0x610] sm:$0xf0]  ;;  %v10912_v47 = vor.u32 %v13087_v28, %v10909_v29 }
 0x310   : > { %7622 = vmatmul.bf16.vlgmr.msra.gmra.mxu3 %v14097_v52  ;;  %v11216_v49 = vor.u32 %v13163_v43, %v11213_v44  ;;  %v13243_v43 = vld [vmem:[#allocation8 + $0x8e4] sm:$0xf]  ;;  %v11533_v44 = vld [vmem:[#allocation8 + $0x8f0] sm:$0xf0] }
 0x311   : > { %7666 = vmatpush.bf16.msrb.mxu3 %v11408_v48  ;;  %7641 = vmatpush.bf16.msrb.mxu1 %v11136_v25  ;;  %v10960_v48 = vor.u32 %v13099_v36, %v10957_v13  ;;  %v7402_v57 = vpop.f32.mrf.mxu2  ;;  %v11069_v25 = vld [vmem:[#allocation8 + $0x550] sm:$0xf0]  ;;  %v7391_v5 = vpop.f32.mrf.mxu1  ;;  %v11312_v36 = vor.u32 %v13187_v24, %v11309_v26  ;;  %v13275_v46 = vld [vmem:[#allocation8 + $0x9e4] sm:$0xf] }
 0x312   : > { %v7403_v63 = vadd.f32 %v7402_v57, %v7390_v37  ;;  %v13183_v37 = vld [vmem:[#allocation8 + $0x704] sm:$0xf]  ;;  %v11645_v4 = vld [vmem:[#allocation8 + $0x9d0] sm:$0xf0] }
 0x313   : > { %7654 = vmatpush.bf16.msrb.mxu2 %v11264_v62  ;;  %7629 = vmatpush.bf16.msrb.mxu0 %v10992_v15  ;;  %v13159_v62 = vld [vmem:[#allocation8 + $0x644] sm:$0xf]  ;;  %v7415_v11 = vpop.f32.mrf.mxu3  ;;  %v11072_v15 = vor.u32 %v13127_v18, %v11069_v25  ;;  %v11536_v25 = vor.u32 %v13243_v43, %v11533_v44  ;;  %v11501_v17 = vld [vmem:[#allocation8 + $0x8b0] sm:$0xf0] }
 0x314   : > { %v14172_v10 = vadd.f32 %v7415_v11, %v7403_v63  ;;  %v11200_v21 = vor.u32 %v13159_v62, %v11197_v8  ;;  %v13339_v18 = vld [vmem:[#allocation8 + $0xbe4] sm:$0xf]  ;;  %v11517_v11 = vld [vmem:[#allocation8 + $0x8d0] sm:$0xf0] }
 0x315   : > { %7667 = vmatpush.bf16.msrb.mxu3 %v11392_v23  ;;  %7642 = vmatpush.bf16.msrb.mxu1 %v11120_v3  ;;  %v7378_v23 = vpop.f32.mrf.mxu0  ;;  %v13091_v3 = vld [vmem:[#allocation8 + $0x424] sm:$0xf]  ;;  %v11629_v24 = vld [vmem:[#allocation8 + $0x9b0] sm:$0xf0] }
 0x316   : > { %v13239_v63 = vld [vmem:[#allocation8 + $0x8c4] sm:$0xf]  ;;  %v11885_v29 = vld [vmem:[#allocation8 + $0xbb0] sm:$0xf0] }
 0x317   : > { %7655 = vmatpush.bf16.msrb.mxu2 %v11248_v16  ;;  %7630 = vmatpush.bf16.msrb.mxu0 %v10976_v33  ;;  %v10925_v16 = vld [vmem:[#allocation8 + $0x430] sm:$0xf0]  ;;  %v13119_v33 = vld [vmem:[#allocation8 + $0x504] sm:$0xf] }
 0x318   : > { %v10928_v27 = vor.u32 %v13091_v3, %v10925_v16  ;;  %v13271_v23 = vld [vmem:[#allocation8 + $0x9c4] sm:$0xf]  ;;  %v11520_v3 = vor.u32 %v13239_v63, %v11517_v11  ;;  %v11869_v44 = vld [vmem:[#allocation8 + $0xb90] sm:$0xf0] }
 0x319   : > { %7668 = vmatpush.bf16.msrb.mxu3 %v11376_v19  ;;  %7643 = vmatpush.bf16.msrb.mxu1 %v11104_v34  ;;  %v13155_v19 = vld [vmem:[#allocation8 + $0x624] sm:$0xf]  ;;  %v11037_v34 = vld [vmem:[#allocation8 + $0x510] sm:$0xf0]  ;;  %v7404_v13 = vpop.f32.mrf.mxu2  ;;  %v11648_v16 = vor.u32 %v13271_v23, %v11645_v4 }
 0x31a   : > { %v11184_v32 = vor.u32 %v13155_v19, %v11181_v22  ;;  %v11040_v51 = vor.u32 %v13119_v33, %v11037_v34  ;;  %v13303_v5 = vld [vmem:[#allocation8 + $0xac4] sm:$0xf]  ;;  %v11853_v11 = vld [vmem:[#allocation8 + $0xb70] sm:$0xf0] }
 0x31b   : > { %7656 = vmatpush.bf16.msrb.mxu2 %v11232_v35  ;;  %7631 = vmatpush.bf16.msrb.mxu0 %v10960_v48  ;;  %v13151_v35 = vld [vmem:[#allocation8 + $0x604] sm:$0xf]  ;;  %v7417_v40 = vpop.f32.mrf.mxu3  ;;  %v11661_v48 = vld [vmem:[#allocation8 + $0x9f0] sm:$0xf0] }
 0x31c   : > { %v11168_v54 = vor.u32 %v13151_v35, %v11165_v53  ;;  %v11664_v62 = vor.u32 %v13275_v46, %v11661_v48  ;;  %v13267_v19 = vld [vmem:[#allocation8 + $0x9a4] sm:$0xf]  ;;  %v11485_v35 = vld [vmem:[#allocation8 + $0x890] sm:$0xf0] }
 0x31d   : > { %7669 = vmatpush.bf16.msrb.mxu3 %v11360_v39  ;;  %7644 = vmatpush.bf16.msrb.mxu1 %v11088_v56  ;;  %v11293_v39 = vld [vmem:[#allocation8 + $0x710] sm:$0xf0]  ;;  %v13307_v56 = vld [vmem:[#allocation8 + $0xae4] sm:$0xf] }
 0x31e   : > { %v11296_v57 = vor.u32 %v13183_v37, %v11293_v39  ;;  %v13299_v26 = vld [vmem:[#allocation8 + $0xaa4] sm:$0xf]  ;;  %v11613_v53 = vld [vmem:[#allocation8 + $0x990] sm:$0xf0] }
 0x31f   : > { %7657 = vmatpush.bf16.msrb.mxu2 %v11216_v49  ;;  %7632 = vmatpush.bf16.msrb.mxu0 %v10944_v7  ;;  %v11789_v49 = vld [vmem:[#allocation8 + $0xaf0] sm:$0xf0]  ;;  %v13331_v28 = vld [vmem:[#allocation8 + $0xba4] sm:$0xf] }
 0x320   : > { %v11792_v8 = vor.u32 %v13307_v56, %v11789_v49  ;;  %v11773_v7 = vld [vmem:[#allocation8 + $0xad0] sm:$0xf0]  ;;  %v13231_v34 = vld [vmem:[#allocation8 + $0x884] sm:$0xf]  ;;  %v11888_v13 = vor.u32 %v13331_v28, %v11885_v29 }
 0x321   : > { %7670 = vmatpush.bf16.msrb.mxu3 %v11344_v58  ;;  %7645 = vmatpush.bf16.msrb.mxu1 %v11072_v15  ;;  %v11917_v58 = vld [vmem:[#allocation8 + $0xbf0] sm:$0xf0]  ;;  %v13335_v15 = vld [vmem:[#allocation8 + $0xbc4] sm:$0xf]  ;;  %v11776_v31 = vor.u32 %v13303_v5, %v11773_v7  ;;  %v11488_v48 = vor.u32 %v13231_v34, %v11485_v35 }
 0x322   : > { %v11920_v1 = vor.u32 %v13339_v18, %v11917_v58  ;;  %v13295_v37 = vld [vmem:[#allocation8 + $0xa84] sm:$0xf]  ;;  %v11741_v39 = vld [vmem:[#allocation8 + $0xa90] sm:$0xf0] }
 0x323   : > { %7658 = vmatpush.bf16.msrb.mxu2 %v11200_v21  ;;  %7633 = vmatpush.bf16.msrb.mxu0 %v10928_v27  ;;  %v11901_v21 = vld [vmem:[#allocation8 + $0xbd0] sm:$0xf0]  ;;  %v13327_v43 = vld [vmem:[#allocation8 + $0xb84] sm:$0xf]  ;;  %v11744_v49 = vor.u32 %v13295_v37, %v11741_v39 }
 0x324   : > { %v11904_v22 = vor.u32 %v13335_v15, %v11901_v21  ;;  %v11757_v27 = vld [vmem:[#allocation8 + $0xab0] sm:$0xf0]  ;;  %v13259_v18 = vld [vmem:[#allocation8 + $0x964] sm:$0xf] }
 0x325   : > { %7671 = vmatpush.bf16.msrb.mxu3 %v11328_v55  ;;  %7646 = vmatpush.bf16.msrb.mxu1 %v11056_v30  ;;  %v13235_v55 = vld [vmem:[#allocation8 + $0x8a4] sm:$0xf]  ;;  %v11760_v33 = vor.u32 %v13299_v26, %v11757_v27  ;;  %v11453_v5 = vld [vmem:[#allocation8 + $0x850] sm:$0xf0] }
 0x326   : > { %v11504_v30 = vor.u32 %v13235_v55, %v11501_v17  ;;  %v13323_v63 = vld [vmem:[#allocation8 + $0xb64] sm:$0xf]  ;;  %v11565_v34 = vld [vmem:[#allocation8 + $0x930] sm:$0xf0] }
 0x327   : > { %7659 = vmatpush.bf16.msrb.mxu2 %v11184_v32  ;;  %7634 = vmatpush.bf16.msrb.mxu0 %v10912_v47  ;;  %v11632_v32 = vor.u32 %v13267_v19, %v11629_v24  ;;  %v7428_v40 = vpop.f32.mrf.mxu0  ;;  %v13223_v4 = vld [vmem:[#allocation8 + $0x844] sm:$0xf]  ;;  %v11856_v15 = vor.u32 %v13323_v63, %v11853_v11  ;;  %v12173_v11 = vld [vmem:[#allocation8 + $0xdf0] sm:$0xf0] }
 0x328   : > { %v7429_v46 = vadd.f32 %v7428_v40, %v14172_v10  ;;  %v13255_v7 = vld [vmem:[#allocation8 + $0x944] sm:$0xf]  ;;  %v11456_v26 = vor.u32 %v13223_v4, %v11453_v5  ;;  %v11421_v40 = vld [vmem:[#allocation8 + $0x810] sm:$0xf0] }
 0x329   : > { %7672 = vmatpush.bf16.msrb.mxu3 %v11312_v36  ;;  %7647 = vmatpush.bf16.msrb.mxu1 %v11040_v51  ;;  %v13263_v36 = vld [vmem:[#allocation8 + $0x984] sm:$0xf]  ;;  %v7441_v47 = vpop.f32.mrf.mxu1 }
 0x32a   : > { %7635 = vmatmul.bf16.vlgmr.msrb.gmra.mxu0 %v14112_v61  ;;  %v11616_v56 = vor.u32 %v13263_v36, %v11613_v53  ;;  %v13227_v51 = vld [vmem:[#allocation8 + $0x864] sm:$0xf]  ;;  %v14179_v58 = vadd.f32 %v7441_v47, %v7429_v46  ;;  %v11693_v36 = vld [vmem:[#allocation8 + $0xa30] sm:$0xf0] }
 0x32b   : > { %7660 = vmatpush.bf16.msrb.mxu2 %v11168_v54  ;;  %7679 = vmatpush.bf16.msra.mxu0 %v11536_v25  ;;  %v11469_v54 = vld [vmem:[#allocation8 + $0x870] sm:$0xf0]  ;;  %v13319_v19 = vld [vmem:[#allocation8 + $0xb44] sm:$0xf] }
 0x32c   : > { %7648 = vmatmul.bf16.vlgmr.msrb.gmra.mxu1 %v14114_v2  ;;  %v11597_v25 = vld [vmem:[#allocation8 + $0x970] sm:$0xf0]  ;;  %v11472_v10 = vor.u32 %v13227_v51, %v11469_v54  ;;  %v13219_v29 = vld [vmem:[#allocation8 + $0x824] sm:$0xf] }
 0x32d   : > { %7673 = vmatpush.bf16.msrb.mxu3 %v11296_v57  ;;  %7692 = vmatpush.bf16.msra.mxu1 %v11664_v62  ;;  %v11872_v57 = vor.u32 %v13327_v43, %v11869_v44  ;;  %v13291_v62 = vld [vmem:[#allocation8 + $0xa64] sm:$0xf]  ;;  %v11600_v23 = vor.u32 %v13259_v18, %v11597_v25  ;;  %v11821_v53 = vld [vmem:[#allocation8 + $0xb30] sm:$0xf0] }
 0x32e   : > { %7661 = vmatmul.bf16.vlgmr.msrb.gmra.mxu2 %v14116_v60  ;;  %v13283_v35 = vld [vmem:[#allocation8 + $0xa24] sm:$0xf]  ;;  %v11549_v47 = vld [vmem:[#allocation8 + $0x910] sm:$0xf0] }
 0x32f   : > { %7705 = vmatpush.bf16.msra.mxu2 %v11792_v8  ;;  %7680 = vmatpush.bf16.msra.mxu0 %v11520_v3  ;;  %v11725_v8 = vld [vmem:[#allocation8 + $0xa70] sm:$0xf0]  ;;  %v7430_v17 = vpop.f32.mrf.mxu0  ;;  %v13215_v39 = vld [vmem:[#allocation8 + $0x804] sm:$0xf]  ;;  %v11696_v44 = vor.u32 %v13283_v35, %v11693_v36 }
 0x330   : > { %7674 = vmatmul.bf16.vlgmr.msrb.gmra.mxu3 %v14118_v9  ;;  %v11581_v3 = vld [vmem:[#allocation8 + $0x950] sm:$0xf0]  ;;  %v13247_v46 = vld [vmem:[#allocation8 + $0x904] sm:$0xf]  ;;  %v11424_v63 = vor.u32 %v13215_v39, %v11421_v40 }
 0x331   : > { %7718 = vmatpush.bf16.msra.mxu3 %v11920_v1  ;;  %7693 = vmatpush.bf16.msra.mxu1 %v11648_v16  ;;  %v11728_v1 = vor.u32 %v13291_v62, %v11725_v8  ;;  %v14181_v21 = vpop.f32.mrf.mxu2  ;;  %v13287_v16 = vld [vmem:[#allocation8 + $0xa44] sm:$0xf]  ;;  %v7443_v24 = vpop.f32.mrf.mxu1  ;;  %v11584_v27 = vor.u32 %v13255_v7, %v11581_v3  ;;  %v11677_v51 = vld [vmem:[#allocation8 + $0xa10] sm:$0xf0] }
 0x332   : > { %v13311_v54 = vld [vmem:[#allocation8 + $0xb04] sm:$0xf]  ;;  %v11805_v18 = vld [vmem:[#allocation8 + $0xb10] sm:$0xf0] }
 0x333   : > { %7706 = vmatpush.bf16.msra.mxu2 %v11776_v31  ;;  %7681 = vmatpush.bf16.msra.mxu0 %v11504_v30  ;;  %v11709_v31 = vld [vmem:[#allocation8 + $0xa50] sm:$0xf0]  ;;  %v14183_v55 = vpop.f32.mrf.mxu3  ;;  %v13371_v25 = vld [vmem:[#allocation8 + $0xce4] sm:$0xf] }
 0x334   : > { %v11712_v28 = vor.u32 %v13287_v16, %v11709_v31  ;;  %v11437_v30 = vld [vmem:[#allocation8 + $0x830] sm:$0xf0]  ;;  %v13403_v8 = vld [vmem:[#allocation8 + $0xde4] sm:$0xf] }
 0x335   : > { %7719 = vmatpush.bf16.msra.mxu3 %v11904_v22  ;;  %7694 = vmatpush.bf16.msra.mxu1 %v11632_v32  ;;  %v11837_v22 = vld [vmem:[#allocation8 + $0xb50] sm:$0xf0]  ;;  %v13251_v32 = vld [vmem:[#allocation8 + $0x924] sm:$0xf]  ;;  %v11440_v37 = vor.u32 %v13219_v29, %v11437_v30  ;;  %v12176_v16 = vor.u32 %v13403_v8, %v12173_v11 }
 0x336   : > { %v11568_v43 = vor.u32 %v13251_v32, %v11565_v34  ;;  %v12045_v62 = vld [vmem:[#allocation8 + $0xcf0] sm:$0xf0]  ;;  %v13467_v5 = vld [vmem:[#allocation8 + $0xfe4] sm:$0xf] }
 0x337   : > { %7707 = vmatpush.bf16.msra.mxu2 %v11760_v33  ;;  %7682 = vmatpush.bf16.msra.mxu0 %v11488_v48  ;;  %v11840_v33 = vor.u32 %v13319_v19, %v11837_v22  ;;  %v13279_v48 = vld [vmem:[#allocation8 + $0xa04] sm:$0xf]  ;;  %v12429_v7 = vld [vmem:[#allocation8 + $0xff0] sm:$0xf0]  ;;  %v12048_v3 = vor.u32 %v13371_v25, %v12045_v62 }
 0x338   : > { %v11680_v4 = vor.u32 %v13279_v48, %v11677_v51  ;;  %v13367_v17 = vld [vmem:[#allocation8 + $0xcc4] sm:$0xf]  ;;  %v12029_v19 = vld [vmem:[#allocation8 + $0xcd0] sm:$0xf0]  ;;  %v12432_v24 = vor.u32 %v13467_v5, %v12429_v7 }
 0x339   : > { %7720 = vmatpush.bf16.msra.mxu3 %v11888_v13  ;;  %7695 = vmatpush.bf16.msra.mxu1 %v11616_v56  ;;  %v13315_v13 = vld [vmem:[#allocation8 + $0xb24] sm:$0xf]  ;;  %v12413_v30 = vld [vmem:[#allocation8 + $0xfd0] sm:$0xf0]  ;;  %v12032_v32 = vor.u32 %v13367_v17, %v12029_v19 }
 0x33a   : > { %v11824_v56 = vor.u32 %v13315_v13, %v11821_v53  ;;  %v13399_v22 = vld [vmem:[#allocation8 + $0xdc4] sm:$0xf]  ;;  %v12013_v36 = vld [vmem:[#allocation8 + $0xcb0] sm:$0xf0] }
 0x33b   : > { %7708 = vmatpush.bf16.msra.mxu2 %v11744_v49  ;;  %7683 = vmatpush.bf16.msra.mxu0 %v11472_v10  ;;  %v7456_v49 = vpop.f32.mrf.mxu2  ;;  %v13435_v10 = vld [vmem:[#allocation8 + $0xee4] sm:$0xf]  ;;  %v12269_v40 = vld [vmem:[#allocation8 + $0xeb0] sm:$0xf0] }
 0x33c   : > { %v13463_v29 = vld [vmem:[#allocation8 + $0xfc4] sm:$0xf]  ;;  %v11997_v49 = vld [vmem:[#allocation8 + $0xc90] sm:$0xf0] }
 0x33d   : > { %7721 = vmatpush.bf16.msra.mxu3 %v11872_v57  ;;  %7696 = vmatpush.bf16.msra.mxu1 %v11600_v23  ;;  %v7469_v57 = vpop.f32.mrf.mxu3  ;;  %v12301_v23 = vld [vmem:[#allocation8 + $0xef0] sm:$0xf0]  ;;  %v13363_v35 = vld [vmem:[#allocation8 + $0xca4] sm:$0xf]  ;;  %v12416_v53 = vor.u32 %v13463_v29, %v12413_v30 }
 0x33e   : > { %v12304_v31 = vor.u32 %v13435_v10, %v12301_v23  ;;  %v13395_v13 = vld [vmem:[#allocation8 + $0xda4] sm:$0xf]  ;;  %v12253_v25 = vld [vmem:[#allocation8 + $0xe90] sm:$0xf0] }
 0x33f   : > { %7709 = vmatpush.bf16.msra.mxu2 %v11728_v1  ;;  %7684 = vmatpush.bf16.msra.mxu0 %v11456_v26  ;;  %v11552_v1 = vor.u32 %v13247_v46, %v11549_v47  ;;  %v12157_v26 = vld [vmem:[#allocation8 + $0xdd0] sm:$0xf0]  ;;  %v13427_v39 = vld [vmem:[#allocation8 + $0xea4] sm:$0xf]  ;;  %v12016_v46 = vor.u32 %v13363_v35, %v12013_v36 }
 0x340   : > { %v12272_v48 = vor.u32 %v13427_v39, %v12269_v40  ;;  %v13391_v51 = vld [vmem:[#allocation8 + $0xd84] sm:$0xf]  ;;  %v11981_v5 = vld [vmem:[#allocation8 + $0xc70] sm:$0xf0] }
 0x341   : > { %7722 = vmatpush.bf16.msra.mxu3 %v11856_v15  ;;  %7697 = vmatpush.bf16.msra.mxu1 %v11584_v27  ;;  %v11808_v15 = vor.u32 %v13311_v54, %v11805_v18  ;;  %v13431_v27 = vld [vmem:[#allocation8 + $0xec4] sm:$0xf]  ;;  %v12125_v18 = vld [vmem:[#allocation8 + $0xd90] sm:$0xf0] }
 0x342   : > { %v13423_v57 = vld [vmem:[#allocation8 + $0xe84] sm:$0xf]  ;;  %v12128_v23 = vor.u32 %v13391_v51, %v12125_v18  ;;  %v12365_v19 = vld [vmem:[#allocation8 + $0xf70] sm:$0xf0] }
 0x343   : > { %7710 = vmatpush.bf16.msra.mxu2 %v11712_v28  ;;  %7685 = vmatpush.bf16.msra.mxu0 %v11440_v37  ;;  %v12285_v28 = vld [vmem:[#allocation8 + $0xed0] sm:$0xf0]  ;;  %v13455_v8 = vld [vmem:[#allocation8 + $0xf84] sm:$0xf] }
 0x344   : > { %v12288_v34 = vor.u32 %v13431_v27, %v12285_v28  ;;  %v12141_v37 = vld [vmem:[#allocation8 + $0xdb0] sm:$0xf0]  ;;  %v13387_v7 = vld [vmem:[#allocation8 + $0xd64] sm:$0xf] }
 0x345   : > { %7723 = vmatpush.bf16.msra.mxu3 %v11840_v33  ;;  %7698 = vmatpush.bf16.msra.mxu1 %v11568_v43  ;;  %v12160_v33 = vor.u32 %v13399_v22, %v12157_v26  ;;  %v13459_v43 = vld [vmem:[#allocation8 + $0xfa4] sm:$0xf]  ;;  %v12144_v47 = vor.u32 %v13395_v13, %v12141_v37  ;;  %v11965_v28 = vld [vmem:[#allocation8 + $0xc50] sm:$0xf0] }
 0x346   : > { %v13451_v17 = vld [vmem:[#allocation8 + $0xf64] sm:$0xf]  ;;  %v12221_v35 = vld [vmem:[#allocation8 + $0xe50] sm:$0xf0] }
 0x347   : > { %7711 = vmatpush.bf16.msra.mxu2 %v11696_v44  ;;  %7686 = vmatpush.bf16.msra.mxu0 %v11424_v63  ;;  %v12397_v44 = vld [vmem:[#allocation8 + $0xfb0] sm:$0xf0]  ;;  %v14189_v62 = vpop.f32.mrf.mxu0  ;;  %v13351_v27 = vld [vmem:[#allocation8 + $0xc44] sm:$0xf]  ;;  %v12368_v30 = vor.u32 %v13451_v17, %v12365_v19  ;;  %v10515_v19 = vld [vmem:[#allocation8 + $0xe8] sm:$0xf] }
 0x348   : > { %v12400_v54 = vor.u32 %v13459_v43, %v12397_v44  ;;  %v12381_v63 = vld [vmem:[#allocation8 + $0xf90] sm:$0xf0]  ;;  %v13383_v29 = vld [vmem:[#allocation8 + $0xd44] sm:$0xf]  ;;  %v11968_v40 = vor.u32 %v13351_v27, %v11965_v28  ;;  %v13022_v27 = vld [vmem:[#allocation8 + $0x1f4] sm:$0xf0] }
 0x349   : > { %7724 = vmatpush.bf16.msra.mxu3 %v11824_v56  ;;  %7699 = vmatpush.bf16.msra.mxu1 %v11552_v1  ;;  %v13359_v56 = vld [vmem:[#allocation8 + $0xc84] sm:$0xf]  ;;  %v14191_v11 = vpop.f32.mrf.mxu1  ;;  %v12256_v1 = vor.u32 %v13423_v57, %v12253_v25  ;;  %v12349_v37 = vld [vmem:[#allocation8 + $0xf50] sm:$0xf0]  ;;  %v10771_v28 = vld [vmem:[#allocation8 + $0x2e8] sm:$0xf] }
 0x34a   : > { %7687 = vmatmul.bf16.vlgmr.msra.gmra.mxu0 %v14136_v50  ;;  %v12000_v10 = vor.u32 %v13359_v56, %v11997_v49  ;;  %v12077_v49 = vld [vmem:[#allocation8 + $0xd30] sm:$0xf0]  ;;  %v13411_v51 = vld [vmem:[#allocation8 + $0xe24] sm:$0xf] }
 0x34b   : > { %7712 = vmatpush.bf16.msra.mxu2 %v11680_v4  ;;  %7731 = vmatpush.bf16.msrb.mxu0 %v12048_v3  ;;  %v13355_v4 = vld [vmem:[#allocation8 + $0xc64] sm:$0xf]  ;;  %v12109_v3 = vld [vmem:[#allocation8 + $0xd70] sm:$0xf0] }
 0x34c   : > { %7700 = vmatmul.bf16.vlgmr.msra.gmra.mxu1 %v14138_v42  ;;  %v11984_v22 = vor.u32 %v13355_v4, %v11981_v5  ;;  %v13443_v18 = vld [vmem:[#allocation8 + $0xf24] sm:$0xf]  ;;  %v12333_v57 = vld [vmem:[#allocation8 + $0xf30] sm:$0xf0] }
 0x34d   : > { %7725 = vmatpush.bf16.msra.mxu3 %v11808_v15  ;;  %7744 = vmatpush.bf16.msrb.mxu1 %v12176_v16  ;;  %v12384_v15 = vor.u32 %v13455_v8, %v12381_v63  ;;  %v13419_v16 = vld [vmem:[#allocation8 + $0xe64] sm:$0xf]  ;;  %v11933_v63 = vld [vmem:[#allocation8 + $0xc10] sm:$0xf0] }
 0x34e   : > { %7713 = vmatmul.bf16.vlgmr.msra.gmra.mxu2 %v14140_v14  ;;  %v13343_v8 = vld [vmem:[#allocation8 + $0xc04] sm:$0xf]  ;;  %v12061_v4 = vld [vmem:[#allocation8 + $0xd10] sm:$0xf0] }
 0x34f   : > { %7757 = vmatpush.bf16.msrb.mxu2 %v12304_v31  ;;  %7732 = vmatpush.bf16.msrb.mxu0 %v12032_v32  ;;  %v12237_v31 = vld [vmem:[#allocation8 + $0xe70] sm:$0xf0]  ;;  %v7482_v13 = vpop.f32.mrf.mxu0  ;;  %v13407_v5 = vld [vmem:[#allocation8 + $0xe04] sm:$0xf] }
 0x350   : > { %7726 = vmatmul.bf16.vlgmr.msra.gmra.mxu3 %v14142_v20  ;;  %v12240_v26 = vor.u32 %v13419_v16, %v12237_v31  ;;  %v13439_v16 = vld [vmem:[#allocation8 + $0xf04] sm:$0xf]  ;;  %v12317_v31 = vld [vmem:[#allocation8 + $0xf10] sm:$0xf0] }
 0x351   : > { %7770 = vmatpush.bf16.msrb.mxu3 %v12432_v24  ;;  %7745 = vmatpush.bf16.msrb.mxu1 %v12160_v33  ;;  %v12112_v24 = vor.u32 %v13387_v7, %v12109_v3  ;;  %v14193_v32 = vpop.f32.mrf.mxu2  ;;  %v12093_v33 = vld [vmem:[#allocation8 + $0xd50] sm:$0xf0]  ;;  %v7495_v39 = vpop.f32.mrf.mxu1  ;;  %v12336_v7 = vor.u32 %v13443_v18, %v12333_v57  ;;  %v12320_v13 = vor.u32 %v13439_v16, %v12317_v31  ;;  %v10467_v31 = vld [vmem:[#allocation8 + $0x88] sm:$0xf] }
 0x352   : > { %v12096_v43 = vor.u32 %v13383_v29, %v12093_v33  ;;  %v12189_v3 = vld [vmem:[#allocation8 + $0xe10] sm:$0xf0]  ;;  %v13054_v29 = vld [vmem:[#allocation8 + $0x2f4] sm:$0xf0] }
 0x353   : > { %7758 = vmatpush.bf16.msrb.mxu2 %v12288_v34  ;;  %7733 = vmatpush.bf16.msrb.mxu0 %v12016_v46  ;;  %v13415_v34 = vld [vmem:[#allocation8 + $0xe44] sm:$0xf]  ;;  %v14195_v36 = vpop.f32.mrf.mxu3  ;;  %v12192_v33 = vor.u32 %v13407_v5, %v12189_v3  ;;  %v10772_v39 = vor.u32 %v13054_v29, %v10771_v28  ;;  %v10867_v5 = vld [vmem:[#allocation8 + $0x3a8] sm:$0xf] }
 0x354   : > { %v12224_v44 = vor.u32 %v13415_v34, %v12221_v35  ;;  %v13347_v46 = vld [vmem:[#allocation8 + $0xc24] sm:$0xf]  ;;  %v10899_v34 = vld [vmem:[#allocation8 + $0x3e8] sm:$0xf]  ;;  %v13086_v35 = vld [vmem:[#allocation8 + $0x3f4] sm:$0xf0] }
 0x355   : > { %7771 = vmatpush.bf16.msrb.mxu3 %v12416_v53  ;;  %7746 = vmatpush.bf16.msrb.mxu1 %v12144_v47  ;;  %v13447_v53 = vld [vmem:[#allocation8 + $0xf44] sm:$0xf]  ;;  %v11949_v47 = vld [vmem:[#allocation8 + $0xc30] sm:$0xf0]  ;;  %v10851_v29 = vld [vmem:[#allocation8 + $0x388] sm:$0xf] }
 0x356   : > { %v12352_v56 = vor.u32 %v13447_v53, %v12349_v37  ;;  %v11952_v25 = vor.u32 %v13347_v46, %v11949_v47  ;;  %v10900_v46 = vor.u32 %v13086_v35, %v10899_v34  ;;  %v13018_v47 = vld [vmem:[#allocation8 + $0x1d4] sm:$0xf0]  ;;  %v7455_v35 = vadd.f32 %v14181_v21, %v14179_v58 }
 0x357   : > { %7759 = vmatpush.bf16.msrb.mxu2 %v12272_v48  ;;  %7734 = vmatpush.bf16.msrb.mxu0 %v12000_v10  ;;  %v13379_v48 = vld [vmem:[#allocation8 + $0xd24] sm:$0xf] }
 0x358   : > { %v12080_v10 = vor.u32 %v13379_v48, %v12077_v49  ;;  %v10755_v48 = vld [vmem:[#allocation8 + $0x2c8] sm:$0xf] }
 0x359   : > { %7772 = vmatpush.bf16.msrb.mxu3 %v12400_v54  ;;  %7747 = vmatpush.bf16.msrb.mxu1 %v12128_v23  ;;  %v12205_v54 = vld [vmem:[#allocation8 + $0xe30] sm:$0xf0]  ;;  %v10883_v49 = vld [vmem:[#allocation8 + $0x3c8] sm:$0xf] }
 0x35a   : > { %v12208_v23 = vor.u32 %v13411_v51, %v12205_v54  ;;  %v13082_v51 = vld [vmem:[#allocation8 + $0x3d4] sm:$0xf0] }
 0x35b   : > { %7760 = vmatpush.bf16.msrb.mxu2 %v12256_v1  ;;  %7735 = vmatpush.bf16.msrb.mxu0 %v11984_v22  ;;  %v13375_v1 = vld [vmem:[#allocation8 + $0xd04] sm:$0xf]  ;;  %v7521_v17 = vpop.f32.mrf.mxu3  ;;  %v12990_v22 = vld [vmem:[#allocation8 + $0xf4] sm:$0xf0] }
 0x35c   : > { %v10516_v53 = vor.u32 %v12990_v22, %v10515_v19  ;;  %v12978_v17 = vld [vmem:[#allocation8 + $0x94] sm:$0xf0]  ;;  %v10595_v19 = vld [vmem:[#allocation8 + $0x188] sm:$0xf] }
 0x35d   : > { %7773 = vmatpush.bf16.msrb.mxu3 %v12384_v15  ;;  %7748 = vmatpush.bf16.msrb.mxu1 %v12112_v24  ;;  %v7508_v15 = vpop.f32.mrf.mxu2  ;;  %v10643_v24 = vld [vmem:[#allocation8 + $0x1e8] sm:$0xf]  ;;  %v10468_v34 = vor.u32 %v12978_v17, %v10467_v31  ;;  %v12966_v17 = vld [vmem:[#allocation8 + $0x34] sm:$0xf0] }
 0x35e   : > { %v10644_v37 = vor.u32 %v13022_v27, %v10643_v24  ;;  %v13010_v24 = vld [vmem:[#allocation8 + $0x194] sm:$0xf0]  ;;  %v10419_v31 = vld [vmem:[#allocation8 + $0x28] sm:$0xf] }
 0x35f   : > { %7761 = vmatpush.bf16.msrb.mxu2 %v12240_v26  ;;  %7736 = vmatpush.bf16.msrb.mxu0 %v11968_v40  ;;  %v11936_v26 = vor.u32 %v13343_v8, %v11933_v63  ;;  %v10499_v40 = vld [vmem:[#allocation8 + $0xc8] sm:$0xf]  ;;  %v12982_v8 = vld [vmem:[#allocation8 + $0xb4] sm:$0xf0] }
 0x360   : > { %v10611_v63 = vld [vmem:[#allocation8 + $0x1a8] sm:$0xf]  ;;  %v13042_v27 = vld [vmem:[#allocation8 + $0x294] sm:$0xf0] }
 0x361   : > { %7774 = vmatpush.bf16.msrb.mxu3 %v12368_v30  ;;  %7749 = vmatpush.bf16.msrb.mxu1 %v12096_v43  ;;  %v12064_v30 = vor.u32 %v13375_v1, %v12061_v4  ;;  %v12986_v43 = vld [vmem:[#allocation8 + $0xd4] sm:$0xf0]  ;;  %v10739_v1 = vld [vmem:[#allocation8 + $0x2a8] sm:$0xf] }
 0x362   : > { %v10500_v54 = vor.u32 %v12986_v43, %v10499_v40  ;;  %v13046_v4 = vld [vmem:[#allocation8 + $0x2b4] sm:$0xf0]  ;;  %v10579_v40 = vld [vmem:[#allocation8 + $0x168] sm:$0xf] }
 0x363   : > { %7762 = vmatpush.bf16.msrb.mxu2 %v12224_v44  ;;  %7737 = vmatpush.bf16.msrb.mxu0 %v11952_v25  ;;  %v10627_v44 = vld [vmem:[#allocation8 + $0x1c8] sm:$0xf]  ;;  %v10740_v16 = vor.u32 %v13046_v4, %v10739_v1 }
 0x364   : > { %v10628_v18 = vor.u32 %v13018_v47, %v10627_v44  ;;  %v10483_v25 = vld [vmem:[#allocation8 + $0xa8] sm:$0xf]  ;;  %v13006_v44 = vld [vmem:[#allocation8 + $0x174] sm:$0xf0] }
 0x365   : > { %7775 = vmatpush.bf16.msrb.mxu3 %v12352_v56  ;;  %7750 = vmatpush.bf16.msrb.mxu1 %v12080_v10  ;;  %v13050_v56 = vld [vmem:[#allocation8 + $0x2d4] sm:$0xf0]  ;;  %v10884_v10 = vor.u32 %v13082_v51, %v10883_v49  ;;  %v10484_v15 = vor.u32 %v12982_v8, %v10483_v25  ;;  %v7468_v51 = vadd.f32 %v14183_v55, %v7455_v35  ;;  %v10403_v35 = vld [vmem:[#allocation8 + $0x8] sm:$0xf] }
 0x366   : > { %v10756_v57 = vor.u32 %v13050_v56, %v10755_v48  ;;  %v13038_v47 = vld [vmem:[#allocation8 + $0x274] sm:$0xf0]  ;;  %v10835_v48 = vld [vmem:[#allocation8 + $0x368] sm:$0xf]  ;;  %v10580_v58 = vor.u32 %v13006_v44, %v10579_v40 }
 0x367   : > { %7763 = vmatpush.bf16.msrb.mxu2 %v12208_v23  ;;  %7738 = vmatpush.bf16.msrb.mxu0 %v11936_v26  ;;  %v13014_v23 = vld [vmem:[#allocation8 + $0x1b4] sm:$0xf0]  ;;  %v10723_v26 = vld [vmem:[#allocation8 + $0x288] sm:$0xf]  ;;  %v14201_v28 = vpop.f32.mrf.mxu0  ;;  %v7481_v1 = vadd.f32 %v14189_v62, %v7468_v51 }
 0x368   : > { %v10612_v3 = vor.u32 %v13014_v23, %v10611_v63  ;;  %v13070_v56 = vld [vmem:[#allocation8 + $0x374] sm:$0xf0]  ;;  %v10531_v40 = vld [vmem:[#allocation8 + $0x108] sm:$0xf] }
 0x369   : > { %7776 = vmatpush.bf16.msrb.mxu3 %v12336_v7  ;;  %7751 = vmatpush.bf16.msrb.mxu1 %v12064_v30  ;;  %v13078_v7 = vld [vmem:[#allocation8 + $0x3b4] sm:$0xf0]  ;;  %v10836_v25 = vor.u32 %v13070_v56, %v10835_v48  ;;  %v7494_v62 = vadd.f32 %v14191_v11, %v7481_v1  ;;  %v10659_v44 = vld [vmem:[#allocation8 + $0x208] sm:$0xf] }
 0x36a   : > { %7739 = vmatmul.bf16.vlgmr.msrb.gmra.mxu0 %v14157_v6  ;;  %v10868_v22 = vor.u32 %v13078_v7, %v10867_v5  ;;  %v13074_v30 = vld [vmem:[#allocation8 + $0x394] sm:$0xf0]  ;;  %v10819_v5 = vld [vmem:[#allocation8 + $0x348] sm:$0xf] }
 0x36b   : > { %7764 = vmatpush.bf16.msrb.mxu2 %v12192_v33  ;;  %7783 = vmatpush.bf16.msra.mxu0 %v10516_v53  ;;  %v14203_v33 = vpop.f32.mrf.mxu1  ;;  %v10724_v53 = vor.u32 %v13042_v27, %v10723_v26  ;;  %v10852_v43 = vor.u32 %v13074_v30, %v10851_v29  ;;  %v13002_v63 = vld [vmem:[#allocation8 + $0x154] sm:$0xf0]  ;;  %v10675_v26 = vld [vmem:[#allocation8 + $0x228] sm:$0xf] }
 0x36c   : > { %7752 = vmatmul.bf16.vlgmr.msrb.gmra.mxu1 %v14159_v38  ;;  %v13034_v23 = vld [vmem:[#allocation8 + $0x254] sm:$0xf0]  ;;  %v10803_v29 = vld [vmem:[#allocation8 + $0x328] sm:$0xf] }
 0x36d   : > { %7777 = vmatpush.bf16.msrb.mxu3 %v12320_v13  ;;  %7796 = vmatpush.bf16.msra.mxu1 %v10644_v37  ;;  %v10596_v13 = vor.u32 %v13010_v24, %v10595_v19  ;;  %v10451_v37 = vld [vmem:[#allocation8 + $0x68] sm:$0xf]  ;;  %v13066_v7 = vld [vmem:[#allocation8 + $0x354] sm:$0xf0] }
 0x36e   : > { %7765 = vmatmul.bf16.vlgmr.msrb.gmra.mxu2 %v14155_v41  ;;  %v10547_v19 = vld [vmem:[#allocation8 + $0x128] sm:$0xf]  ;;  %v12998_v24 = vld [vmem:[#allocation8 + $0x134] sm:$0xf0] }
 0x36f   : > { %7809 = vmatpush.bf16.msra.mxu2 %v10772_v39  ;;  %7784 = vmatpush.bf16.msra.mxu0 %v10500_v54  ;;  %v12974_v39 = vld [vmem:[#allocation8 + $0x74] sm:$0xf0]  ;;  %v10435_v54 = vld [vmem:[#allocation8 + $0x48] sm:$0xf]  ;;  %v7534_v4 = vpop.f32.mrf.mxu0 }
 0x370   : > { %7778 = vmatmul.bf16.vlgmr.msrb.gmra.mxu3 %v14165_v12  ;;  %v10452_v49 = vor.u32 %v12974_v39, %v10451_v37  ;;  %v13030_v27 = vld [vmem:[#allocation8 + $0x234] sm:$0xf0]  ;;  %v10548_v37 = vor.u32 %v12998_v24, %v10547_v19  ;;  %v10787_v11 = vld [vmem:[#allocation8 + $0x308] sm:$0xf] }
 0x371   : > { %7822 = vmatpush.bf16.msra.mxu3 %v10900_v46  ;;  %7797 = vmatpush.bf16.msra.mxu1 %v10628_v18  ;;  %v10707_v46 = vld [vmem:[#allocation8 + $0x268] sm:$0xf]  ;;  %v12970_v18 = vld [vmem:[#allocation8 + $0x54] sm:$0xf0]  ;;  %v14208_v8 = vpop.f32.mrf.mxu2  ;;  %v10676_v39 = vor.u32 %v13030_v27, %v10675_v26 }
 0x372   : > { %v10708_v21 = vor.u32 %v13038_v47, %v10707_v46  ;;  %v13062_v30 = vld [vmem:[#allocation8 + $0x334] sm:$0xf0] }
 0x373   : > { %7810 = vmatpush.bf16.msra.mxu2 %v10756_v57  ;;  %7785 = vmatpush.bf16.msra.mxu0 %v10484_v15  ;;  %v10563_v57 = vld [vmem:[#allocation8 + $0x148] sm:$0xf]  ;;  %v7547_v55 = vpop.f32.mrf.mxu1  ;;  %v10436_v15 = vor.u32 %v12970_v18, %v10435_v54  ;;  %v10804_v46 = vor.u32 %v13062_v30, %v10803_v29  ;;  %v13026_v48 = vld [vmem:[#allocation8 + $0x214] sm:$0xf0] }
 0x374   : > { %v13058_v56 = vld [vmem:[#allocation8 + $0x314] sm:$0xf0]  ;;  %v10995_v29 = vld [vmem:[#allocation8 + $0x4a8] sm:$0xf] }
 0x375   : > { %7823 = vmatpush.bf16.msra.mxu3 %v10884_v10  ;;  %7798 = vmatpush.bf16.msra.mxu1 %v10612_v3  ;;  %v10691_v10 = vld [vmem:[#allocation8 + $0x248] sm:$0xf]  ;;  %v10564_v3 = vor.u32 %v13002_v63, %v10563_v57  ;;  %v13118_v51 = vld [vmem:[#allocation8 + $0x4f4] sm:$0xf0]  ;;  %v10660_v63 = vor.u32 %v13026_v48, %v10659_v44  ;;  %v10788_v1 = vor.u32 %v13058_v56, %v10787_v11  ;;  %v13565_v44 = vld [vmem:[#allocation10] sm:$0xf] }
 0x376   : > { %v13150_v54 = vld [vmem:[#allocation8 + $0x5f4] sm:$0xf0] }
 0x377   : > { %7811 = vmatpush.bf16.msra.mxu2 %v10740_v16  ;;  %7786 = vmatpush.bf16.msra.mxu0 %v10468_v34  ;;  %v10692_v16 = vor.u32 %v13034_v23, %v10691_v10  ;;  %v10420_v34 = vor.u32 %v12966_v17, %v10419_v31  ;;  %v13182_v18 = vld [vmem:[#allocation8 + $0x6f4] sm:$0xf0]  ;;  %v11411_v10 = vld [vmem:[#allocation8 + $0x7e8] sm:$0xf] }
 0x378   : > { %v13214_v23 = vld [vmem:[#allocation8 + $0x7f4] sm:$0xf0] }
 0x379   : > { %7824 = vmatpush.bf16.msra.mxu3 %v10868_v22  ;;  %7799 = vmatpush.bf16.msra.mxu1 %v10596_v13  ;;  %v10820_v22 = vor.u32 %v13066_v7, %v10819_v5  ;;  %v12962_v13 = vld [vmem:[#allocation8 + $0x14] sm:$0xf0]  ;;  %v7560_v47 = vpop.f32.mrf.mxu2  ;;  %v11412_v31 = vor.u32 %v13214_v23, %v11411_v10 }
 0x37a   : > { %v13146_v17 = vld [vmem:[#allocation8 + $0x5d4] sm:$0xf0] }
 0x37b   : > { %7812 = vmatpush.bf16.msra.mxu2 %v10724_v53  ;;  %7787 = vmatpush.bf16.msra.mxu0 %v10452_v49  ;;  %v7507_v53 = vadd.f32 %v14193_v32, %v7494_v62  ;;  %v11027_v49 = vld [vmem:[#allocation8 + $0x4e8] sm:$0xf]  ;;  %v13178_v19 = vld [vmem:[#allocation8 + $0x6d4] sm:$0xf0] }
 0x37c   : > { %v11283_v32 = vld [vmem:[#allocation8 + $0x6e8] sm:$0xf]  ;;  %v11028_v4 = vor.u32 %v13118_v51, %v11027_v49  ;;  %v13210_v24 = vld [vmem:[#allocation8 + $0x7d4] sm:$0xf0] }
 0x37d   : > { %7825 = vmatpush.bf16.msra.mxu3 %v10852_v43  ;;  %7800 = vmatpush.bf16.msra.mxu1 %v10580_v58  ;;  %v12994_v43 = vld [vmem:[#allocation8 + $0x114] sm:$0xf0]  ;;  %v11155_v58 = vld [vmem:[#allocation8 + $0x5e8] sm:$0xf]  ;;  %v7520_v57 = vadd.f32 %v14195_v36, %v7507_v53  ;;  %v11284_v55 = vor.u32 %v13182_v18, %v11283_v32  ;;  %v7571_v47 = vpop.f32.mrf.mxu3 }
 0x37e   : > { %v11156_v7 = vor.u32 %v13150_v54, %v11155_v58  ;;  %v11267_v36 = vld [vmem:[#allocation8 + $0x6c8] sm:$0xf]  ;;  %v13110_v30 = vld [vmem:[#allocation8 + $0x4b4] sm:$0xf0] }
 0x37f   : > { %7813 = vmatpush.bf16.msra.mxu2 %v10708_v21  ;;  %7788 = vmatpush.bf16.msra.mxu0 %v10436_v15  ;;  %v10404_v21 = vor.u32 %v12962_v13, %v10403_v35  ;;  %v7533_v5 = vadd.f32 %v14201_v28, %v7520_v57  ;;  %v11011_v15 = vld [vmem:[#allocation8 + $0x4c8] sm:$0xf]  ;;  %v11268_v62 = vor.u32 %v13178_v19, %v11267_v36  ;;  %v13142_v13 = vld [vmem:[#allocation8 + $0x5b4] sm:$0xf0] }
 0x380   : > { %v11251_v53 = vld [vmem:[#allocation8 + $0x6a8] sm:$0xf]  ;;  %v13106_v49 = vld [vmem:[#allocation8 + $0x494] sm:$0xf0] }
 0x381   : > { %7826 = vmatpush.bf16.msra.mxu3 %v10836_v25  ;;  %7801 = vmatpush.bf16.msra.mxu1 %v10564_v3  ;;  %v10532_v25 = vor.u32 %v12994_v43, %v10531_v40  ;;  %v13114_v3 = vld [vmem:[#allocation8 + $0x4d4] sm:$0xf0]  ;;  %v7546_v27 = vadd.f32 %v14203_v33, %v7533_v5  ;;  %v11379_v33 = vld [vmem:[#allocation8 + $0x7a8] sm:$0xf]  ;;  %v10996_v43 = vor.u32 %v13110_v30, %v10995_v29 }
 0x382   : > { %v11012_v26 = vor.u32 %v13114_v3, %v11011_v15  ;;  %v13206_v40 = vld [vmem:[#allocation8 + $0x7b4] sm:$0xf0]  ;;  %v11107_v51 = vld [vmem:[#allocation8 + $0x588] sm:$0xf] }
 0x383   : > { %7814 = vmatpush.bf16.msra.mxu2 %v10692_v16  ;;  %7789 = vmatpush.bf16.msra.mxu0 %v10420_v34  ;;  %v11139_v16 = vld [vmem:[#allocation8 + $0x5c8] sm:$0xf]  ;;  %v11380_v58 = vor.u32 %v13206_v40, %v11379_v33  ;;  %v13170_v32 = vld [vmem:[#allocation8 + $0x694] sm:$0xf0] }
 0x384   : > { %v11140_v28 = vor.u32 %v13146_v17, %v11139_v16  ;;  %v11123_v34 = vld [vmem:[#allocation8 + $0x5a8] sm:$0xf]  ;;  %v13134_v16 = vld [vmem:[#allocation8 + $0x574] sm:$0xf0] }
 0x385   : > { %7827 = vmatpush.bf16.msra.mxu3 %v10820_v22  ;;  %7802 = vmatpush.bf16.msra.mxu1 %v10548_v37  ;;  %v11395_v22 = vld [vmem:[#allocation8 + $0x7c8] sm:$0xf]  ;;  %v13174_v37 = vld [vmem:[#allocation8 + $0x6b4] sm:$0xf0]  ;;  %v11124_v48 = vor.u32 %v13142_v13, %v11123_v34 }
 0x386   : > { %v11396_v35 = vor.u32 %v13210_v24, %v11395_v22  ;;  %v11252_v11 = vor.u32 %v13174_v37, %v11251_v53  ;;  %v11235_v54 = vld [vmem:[#allocation8 + $0x688] sm:$0xf]  ;;  %v13166_v17 = vld [vmem:[#allocation8 + $0x674] sm:$0xf0]  ;;  %v7573_v24 = vpop.f32.mrf.mxu3 }
 0x387   : > { %7815 = vmatpush.bf16.msra.mxu2 %v10676_v39  ;;  %7790 = vmatpush.bf16.msra.mxu0 %v10404_v21  ;;  %v7559_v39 = vadd.f32 %v14208_v8, %v7546_v27  ;;  %v10979_v8 = vld [vmem:[#allocation8 + $0x488] sm:$0xf]  ;;  %v13138_v21 = vld [vmem:[#allocation8 + $0x594] sm:$0xf0]  ;;  %v7584_v18 = vpop.f32.mrf.mxu0 }
 0x388   : > { %v11363_v57 = vld [vmem:[#allocation8 + $0x788] sm:$0xf]  ;;  %v10980_v23 = vor.u32 %v13106_v49, %v10979_v8  ;;  %v13198_v19 = vld [vmem:[#allocation8 + $0x774] sm:$0xf0] }
 0x389   : > { %7828 = vmatpush.bf16.msra.mxu3 %v10804_v46  ;;  %7803 = vmatpush.bf16.msra.mxu1 %v10532_v25  ;;  %v4800_v46 = vperm.slane %v13565_v44, 1  ;;  %v7572_v56 = vadd.f32 %v7571_v47, %v7559_v39  ;;  %v13202_v25 = vld [vmem:[#allocation8 + $0x794] sm:$0xf0]  ;;  %v7597_v10 = vpop.f32.mrf.mxu1  ;;  %v10963_v5 = vld [vmem:[#allocation8 + $0x468] sm:$0xf] }
 0x38a   : > { %7791 = vmatmul.bf16.vlgmr.msra.gmra.mxu0 %v14091_v0  ;;  %v11364_v3 = vor.u32 %v13202_v25, %v11363_v57  ;;  %v11347_v36 = vld [vmem:[#allocation8 + $0x768] sm:$0xf]  ;;  %v13162_v53 = vld [vmem:[#allocation8 + $0x654] sm:$0xf0] }
 0x38b   : > { %7816 = vmatpush.bf16.msra.mxu2 %v10660_v63  ;;  %7835 = vmatpush.bf16.msrb.mxu0 %v11028_v4  ;;  %8199 = vst [vmem:[%s14223_s26] sm:$0xff] %v7572_v56  ;;  %v7585_v63 = vadd.f32 %v7584_v18, %v4800_v46  ;;  %v11236_v4 = vor.u32 %v13170_v32, %v11235_v54  ;;  %v11075_v29 = vld [vmem:[#allocation8 + $0x548] sm:$0xf]  ;;  %v13194_v40 = vld [vmem:[#allocation8 + $0x754] sm:$0xf0] }
 0x38c   : > { %7804 = vmatmul.bf16.vlgmr.msra.gmra.mxu1 %v14093_v59  ;;  %v11348_v30 = vor.u32 %v13198_v19, %v11347_v36  ;;  %v11203_v13 = vld [vmem:[#allocation8 + $0x648] sm:$0xf]  ;;  %v13126_v49 = vld [vmem:[#allocation8 + $0x534] sm:$0xf0] }
 0x38d   : > { %7829 = vmatpush.bf16.msra.mxu3 %v10788_v1  ;;  %7848 = vmatpush.bf16.msrb.mxu1 %v11156_v7  ;;  %v11108_v1 = vor.u32 %v13138_v21, %v11107_v51  ;;  %v13102_v7 = vld [vmem:[#allocation8 + $0x474] sm:$0xf0]  ;;  %v7598_v15 = vadd.f32 %v7597_v10, %v7585_v63  ;;  %v11331_v33 = vld [vmem:[#allocation8 + $0x748] sm:$0xf]  ;;  %v11204_v47 = vor.u32 %v13162_v53, %v11203_v13 }
 0x38e   : > { %7817 = vmatmul.bf16.vlgmr.msra.gmra.mxu2 %v14095_v45  ;;  %v10964_v22 = vor.u32 %v13102_v7, %v10963_v5  ;;  %v11059_v56 = vld [vmem:[#allocation8 + $0x528] sm:$0xf]  ;;  %v11332_v8 = vor.u32 %v13194_v40, %v11331_v33  ;;  %v13190_v54 = vld [vmem:[#allocation8 + $0x734] sm:$0xf0] }
 0x38f   : > { %7861 = vmatpush.bf16.msrb.mxu2 %v11284_v55  ;;  %7836 = vmatpush.bf16.msrb.mxu0 %v11012_v26  ;;  %v11091_v55 = vld [vmem:[#allocation8 + $0x568] sm:$0xf]  ;;  %v7586_v39 = vpop.f32.mrf.mxu0  ;;  %v13090_v57 = vld [vmem:[#allocation8 + $0x414] sm:$0xf0]  ;;  %v11060_v25 = vor.u32 %v13126_v49, %v11059_v56 }
 0x390   : > { %7830 = vmatmul.bf16.vlgmr.msra.gmra.mxu3 %v14097_v52  ;;  %v11092_v26 = vor.u32 %v13134_v16, %v11091_v55  ;;  %v11187_v51 = vld [vmem:[#allocation8 + $0x628] sm:$0xf]  ;;  %v13154_v55 = vld [vmem:[#allocation8 + $0x614] sm:$0xf0] }
 0x391   : > { %7874 = vmatpush.bf16.msrb.mxu3 %v11412_v31  ;;  %7849 = vmatpush.bf16.msrb.mxu1 %v11140_v28  ;;  %v11219_v31 = vld [vmem:[#allocation8 + $0x668] sm:$0xf]  ;;  %v7610_v34 = vpop.f32.mrf.mxu2  ;;  %v13278_v19 = vld [vmem:[#allocation8 + $0x9f4] sm:$0xf0] }
 0x392   : > { %v11220_v27 = vor.u32 %v13166_v17, %v11219_v31  ;;  %v10947_v28 = vld [vmem:[#allocation8 + $0x448] sm:$0xf]  ;;  %v14226_v37 = vadd.f32 %v7610_v34, %v7598_v15  ;;  %v13246_v31 = vld [vmem:[#allocation8 + $0x8f4] sm:$0xf0] }
 0x393   : > { %7862 = vmatpush.bf16.msrb.mxu2 %v11268_v62  ;;  %7837 = vmatpush.bf16.msrb.mxu0 %v10996_v43  ;;  %v13098_v62 = vld [vmem:[#allocation8 + $0x454] sm:$0xf0]  ;;  %v7599_v43 = vpop.f32.mrf.mxu1  ;;  %v11315_v21 = vld [vmem:[#allocation8 + $0x728] sm:$0xf]  ;;  %v14228_v7 = vpop.f32.mrf.mxu3 }
 0x394   : > { %v10948_v44 = vor.u32 %v13098_v62, %v10947_v28  ;;  %v10915_v18 = vld [vmem:[#allocation8 + $0x408] sm:$0xf]  ;;  %v13310_v24 = vld [vmem:[#allocation8 + $0xaf4] sm:$0xf0] }
 0x395   : > { %7875 = vmatpush.bf16.msrb.mxu3 %v11396_v35  ;;  %7850 = vmatpush.bf16.msrb.mxu1 %v11124_v48  ;;  %v13130_v35 = vld [vmem:[#allocation8 + $0x554] sm:$0xf0]  ;;  %v10931_v48 = vld [vmem:[#allocation8 + $0x428] sm:$0xf]  ;;  %v10916_v36 = vor.u32 %v13090_v57, %v10915_v18 }
 0x396   : > { %v11076_v46 = vor.u32 %v13130_v35, %v11075_v29  ;;  %v11043_v10 = vld [vmem:[#allocation8 + $0x508] sm:$0xf]  ;;  %v13342_v62 = vld [vmem:[#allocation8 + $0xbf4] sm:$0xf0] }
 0x397   : > { %7863 = vmatpush.bf16.msrb.mxu2 %v11252_v11  ;;  %7838 = vmatpush.bf16.msrb.mxu0 %v10980_v23  ;;  %v13094_v11 = vld [vmem:[#allocation8 + $0x434] sm:$0xf0]  ;;  %v11299_v15 = vld [vmem:[#allocation8 + $0x708] sm:$0xf] }
 0x398   : > { %v10932_v32 = vor.u32 %v13094_v11, %v10931_v48  ;;  %v13122_v23 = vld [vmem:[#allocation8 + $0x514] sm:$0xf0]  ;;  %v11539_v16 = vld [vmem:[#allocation8 + $0x8e8] sm:$0xf] }
 0x399   : > { %7876 = vmatpush.bf16.msrb.mxu3 %v11380_v58  ;;  %7851 = vmatpush.bf16.msrb.mxu1 %v11108_v1  ;;  %v13158_v58 = vld [vmem:[#allocation8 + $0x634] sm:$0xf0]  ;;  %v11171_v1 = vld [vmem:[#allocation8 + $0x608] sm:$0xf]  ;;  %v7612_v5 = vpop.f32.mrf.mxu2 }
 0x39a   : > { %v11188_v63 = vor.u32 %v13158_v58, %v11187_v51  ;;  %v11667_v17 = vld [vmem:[#allocation8 + $0x9e8] sm:$0xf]  ;;  %v13242_v53 = vld [vmem:[#allocation8 + $0x8d4] sm:$0xf0] }
 0x39b   : > { %7864 = vmatpush.bf16.msrb.mxu2 %v11236_v4  ;;  %7839 = vmatpush.bf16.msrb.mxu0 %v10964_v22  ;;  %v11316_v4 = vor.u32 %v13190_v54, %v11315_v21  ;;  %v11795_v22 = vld [vmem:[#allocation8 + $0xae8] sm:$0xf]  ;;  %v11668_v34 = vor.u32 %v13278_v19, %v11667_v17  ;;  %v13274_v40 = vld [vmem:[#allocation8 + $0x9d4] sm:$0xf0]  ;;  %v7625_v11 = vpop.f32.mrf.mxu3 }
 0x39c   : > { %v11923_v28 = vld [vmem:[#allocation8 + $0xbe8] sm:$0xf]  ;;  %v11796_v35 = vor.u32 %v13310_v24, %v11795_v22  ;;  %v13238_v51 = vld [vmem:[#allocation8 + $0x8b4] sm:$0xf0] }
 0x39d   : > { %7877 = vmatpush.bf16.msrb.mxu3 %v11364_v3  ;;  %7852 = vmatpush.bf16.msrb.mxu1 %v11092_v26  ;;  %v13186_v3 = vld [vmem:[#allocation8 + $0x714] sm:$0xf0]  ;;  %v11044_v26 = vor.u32 %v13122_v23, %v11043_v10  ;;  %v11523_v13 = vld [vmem:[#allocation8 + $0x8c8] sm:$0xf]  ;;  %v11924_v33 = vor.u32 %v13342_v62, %v11923_v28 }
 0x39e   : > { %v11300_v29 = vor.u32 %v13186_v3, %v11299_v15  ;;  %v11651_v39 = vld [vmem:[#allocation8 + $0x9c8] sm:$0xf]  ;;  %v11524_v48 = vor.u32 %v13242_v53, %v11523_v13  ;;  %v13270_v54 = vld [vmem:[#allocation8 + $0x9b4] sm:$0xf0] }
 0x39f   : > { %7865 = vmatpush.bf16.msrb.mxu2 %v11220_v27  ;;  %7840 = vmatpush.bf16.msrb.mxu0 %v10948_v44  ;;  %v11172_v27 = vor.u32 %v13154_v55, %v11171_v1  ;;  %v11779_v43 = vld [vmem:[#allocation8 + $0xac8] sm:$0xf]  ;;  %v13306_v44 = vld [vmem:[#allocation8 + $0xad4] sm:$0xf0]  ;;  %v11652_v56 = vor.u32 %v13274_v40, %v11651_v39 }
 0x3a0   : > { %v11507_v49 = vld [vmem:[#allocation8 + $0x8a8] sm:$0xf]  ;;  %v13302_v18 = vld [vmem:[#allocation8 + $0xab4] sm:$0xf0] }
 0x3a1   : > { %7878 = vmatpush.bf16.msrb.mxu3 %v11348_v30  ;;  %7853 = vmatpush.bf16.msrb.mxu1 %v11076_v46  ;;  %v11540_v30 = vor.u32 %v13246_v31, %v11539_v16  ;;  %v11907_v46 = vld [vmem:[#allocation8 + $0xbc8] sm:$0xf]  ;;  %v13266_v15 = vld [vmem:[#allocation8 + $0x994] sm:$0xf0] }
 0x3a2   : > { %v11635_v58 = vld [vmem:[#allocation8 + $0x9a8] sm:$0xf]  ;;  %v13298_v16 = vld [vmem:[#allocation8 + $0xa94] sm:$0xf0] }
 0x3a3   : > { %7866 = vmatpush.bf16.msrb.mxu2 %v11204_v47  ;;  %7841 = vmatpush.bf16.msrb.mxu0 %v10932_v32  ;;  %v13338_v47 = vld [vmem:[#allocation8 + $0xbd4] sm:$0xf0]  ;;  %v11763_v32 = vld [vmem:[#allocation8 + $0xaa8] sm:$0xf]  ;;  %v11636_v10 = vor.u32 %v13270_v54, %v11635_v58 }
 0x3a4   : > { %v11908_v21 = vor.u32 %v13338_v47, %v11907_v46  ;;  %v11891_v57 = vld [vmem:[#allocation8 + $0xba8] sm:$0xf]  ;;  %v11764_v23 = vor.u32 %v13302_v18, %v11763_v32  ;;  %v13230_v28 = vld [vmem:[#allocation8 + $0x874] sm:$0xf0] }
 0x3a5   : > { %7879 = vmatpush.bf16.msrb.mxu3 %v11332_v8  ;;  %7854 = vmatpush.bf16.msrb.mxu1 %v11060_v25  ;;  %v11780_v8 = vor.u32 %v13306_v44, %v11779_v43  ;;  %v13334_v25 = vld [vmem:[#allocation8 + $0xbb4] sm:$0xf0]  ;;  %v11491_v1 = vld [vmem:[#allocation8 + $0x888] sm:$0xf] }
 0x3a6   : > { %v11619_v5 = vld [vmem:[#allocation8 + $0x988] sm:$0xf]  ;;  %v11892_v55 = vor.u32 %v13334_v25, %v11891_v57  ;;  %v13326_v53 = vld [vmem:[#allocation8 + $0xb74] sm:$0xf0] }
 0x3a7   : > { %7867 = vmatpush.bf16.msrb.mxu2 %v11188_v63  ;;  %7842 = vmatpush.bf16.msrb.mxu0 %v10916_v36  ;;  %v11508_v63 = vor.u32 %v13238_v51, %v11507_v49  ;;  %v11747_v3 = vld [vmem:[#allocation8 + $0xa88] sm:$0xf]  ;;  %v14234_v31 = vpop.f32.mrf.mxu0  ;;  %v13330_v36 = vld [vmem:[#allocation8 + $0xb94] sm:$0xf0]  ;;  %v11620_v24 = vor.u32 %v13266_v15, %v11619_v5 }
 0x3a8   : > { %v11875_v17 = vld [vmem:[#allocation8 + $0xb88] sm:$0xf]  ;;  %v13226_v44 = vld [vmem:[#allocation8 + $0x854] sm:$0xf0] }
 0x3a9   : > { %7880 = vmatpush.bf16.msrb.mxu3 %v11316_v4  ;;  %7855 = vmatpush.bf16.msrb.mxu1 %v11044_v26  ;;  %v13234_v4 = vld [vmem:[#allocation8 + $0x894] sm:$0xf0]  ;;  %v14236_v19 = vpop.f32.mrf.mxu1  ;;  %v11748_v26 = vor.u32 %v13298_v16, %v11747_v3  ;;  %v11603_v62 = vld [vmem:[#allocation8 + $0x968] sm:$0xf] }
 0x3aa   : > { %7843 = vmatmul.bf16.vlgmr.msrb.gmra.mxu0 %v14112_v61  ;;  %v11492_v22 = vor.u32 %v13234_v4, %v11491_v1  ;;  %v11859_v13 = vld [vmem:[#allocation8 + $0xb68] sm:$0xf]  ;;  %v13258_v11 = vld [vmem:[#allocation8 + $0x954] sm:$0xf0] }
 0x3ab   : > { %7868 = vmatpush.bf16.msrb.mxu2 %v11172_v27  ;;  %7887 = vmatpush.bf16.msra.mxu0 %v11540_v30  ;;  %v11475_v27 = vld [vmem:[#allocation8 + $0x868] sm:$0xf]  ;;  %v13262_v30 = vld [vmem:[#allocation8 + $0x974] sm:$0xf0]  ;;  %v11860_v47 = vor.u32 %v13326_v53, %v11859_v13 }
 0x3ac   : > { %7856 = vmatmul.bf16.vlgmr.msrb.gmra.mxu1 %v14114_v2  ;;  %v11476_v39 = vor.u32 %v13230_v28, %v11475_v27  ;;  %v11459_v43 = vld [vmem:[#allocation8 + $0x848] sm:$0xf]  ;;  %v13254_v1 = vld [vmem:[#allocation8 + $0x934] sm:$0xf0] }
 0x3ad   : > { %7881 = vmatpush.bf16.msrb.mxu3 %v11300_v29  ;;  %7900 = vmatpush.bf16.msra.mxu1 %v11668_v34  ;;  %v11876_v29 = vor.u32 %v13330_v36, %v11875_v17  ;;  %v11731_v34 = vld [vmem:[#allocation8 + $0xa68] sm:$0xf]  ;;  %v11460_v32 = vor.u32 %v13226_v44, %v11459_v43  ;;  %v13286_v5 = vld [vmem:[#allocation8 + $0xa34] sm:$0xf0] }
 0x3ae   : > { %7869 = vmatmul.bf16.vlgmr.msrb.gmra.mxu2 %v14116_v60  ;;  %v11587_v46 = vld [vmem:[#allocation8 + $0x948] sm:$0xf]  ;;  %v13318_v15 = vld [vmem:[#allocation8 + $0xb34] sm:$0xf0] }
 0x3af   : > { %7913 = vmatpush.bf16.msra.mxu2 %v11796_v35  ;;  %7888 = vmatpush.bf16.msra.mxu0 %v11524_v48  ;;  %v13294_v35 = vld [vmem:[#allocation8 + $0xa74] sm:$0xf0]  ;;  %v7638_v51 = vpop.f32.mrf.mxu0  ;;  %v11843_v58 = vld [vmem:[#allocation8 + $0xb48] sm:$0xf]  ;;  %v11588_v18 = vor.u32 %v13258_v11, %v11587_v46 }
 0x3b0   : > { %7882 = vmatmul.bf16.vlgmr.msrb.gmra.mxu3 %v14118_v9  ;;  %v11732_v40 = vor.u32 %v13294_v35, %v11731_v34  ;;  %v11443_v25 = vld [vmem:[#allocation8 + $0x828] sm:$0xf]  ;;  %v13218_v17 = vld [vmem:[#allocation8 + $0x814] sm:$0xf0] }
 0x3b1   : > { %7926 = vmatpush.bf16.msra.mxu3 %v11924_v33  ;;  %7901 = vmatpush.bf16.msra.mxu1 %v11652_v56  ;;  %v11604_v33 = vor.u32 %v13262_v30, %v11603_v62  ;;  %v14238_v48 = vpop.f32.mrf.mxu2  ;;  %v11715_v56 = vld [vmem:[#allocation8 + $0xa48] sm:$0xf]  ;;  %v7651_v54 = vpop.f32.mrf.mxu1  ;;  %v13314_v34 = vld [vmem:[#allocation8 + $0xb14] sm:$0xf0] }
 0x3b2   : > { %v11699_v4 = vld [vmem:[#allocation8 + $0xa28] sm:$0xf]  ;;  %v13374_v53 = vld [vmem:[#allocation8 + $0xcf4] sm:$0xf0] }
 0x3b3   : > { %7914 = vmatpush.bf16.msra.mxu2 %v11780_v8  ;;  %7889 = vmatpush.bf16.msra.mxu0 %v11508_v63  ;;  %v13290_v8 = vld [vmem:[#allocation8 + $0xa54] sm:$0xf0]  ;;  %v14240_v49 = vpop.f32.mrf.mxu3  ;;  %v11427_v16 = vld [vmem:[#allocation8 + $0x808] sm:$0xf] }
 0x3b4   : > { %v11716_v57 = vor.u32 %v13290_v8, %v11715_v56  ;;  %v13222_v63 = vld [vmem:[#allocation8 + $0x834] sm:$0xf0]  ;;  %v11683_v27 = vld [vmem:[#allocation8 + $0xa08] sm:$0xf] }
 0x3b5   : > { %7927 = vmatpush.bf16.msra.mxu3 %v11908_v21  ;;  %7902 = vmatpush.bf16.msra.mxu1 %v11636_v10  ;;  %v13322_v21 = vld [vmem:[#allocation8 + $0xb54] sm:$0xf0]  ;;  %v11571_v10 = vld [vmem:[#allocation8 + $0x928] sm:$0xf]  ;;  %v11444_v3 = vor.u32 %v13222_v63, %v11443_v25 }
 0x3b6   : > { %v11572_v36 = vor.u32 %v13254_v1, %v11571_v10  ;;  %v11811_v30 = vld [vmem:[#allocation8 + $0xb08] sm:$0xf]  ;;  %v13438_v44 = vld [vmem:[#allocation8 + $0xef4] sm:$0xf0] }
 0x3b7   : > { %7915 = vmatpush.bf16.msra.mxu2 %v11764_v23  ;;  %7890 = vmatpush.bf16.msra.mxu0 %v11492_v22  ;;  %v11844_v23 = vor.u32 %v13322_v21, %v11843_v58  ;;  %v11700_v22 = vor.u32 %v13286_v5, %v11699_v4  ;;  %v12051_v13 = vld [vmem:[#allocation8 + $0xce8] sm:$0xf]  ;;  %v13470_v56 = vld [vmem:[#allocation8 + $0xff4] sm:$0xf0]  ;;  %v11812_v8 = vor.u32 %v13314_v34, %v11811_v30 }
 0x3b8   : > { %v12307_v43 = vld [vmem:[#allocation8 + $0xee8] sm:$0xf]  ;;  %v12052_v51 = vor.u32 %v13374_v53, %v12051_v13  ;;  %v13402_v25 = vld [vmem:[#allocation8 + $0xdd4] sm:$0xf0] }
 0x3b9   : > { %7928 = vmatpush.bf16.msra.mxu3 %v11892_v55  ;;  %7903 = vmatpush.bf16.msra.mxu1 %v11620_v24  ;;  %v11827_v55 = vld [vmem:[#allocation8 + $0xb28] sm:$0xf]  ;;  %v7664_v62 = vpop.f32.mrf.mxu2  ;;  %v12308_v21 = vor.u32 %v13438_v44, %v12307_v43  ;;  %v13434_v10 = vld [vmem:[#allocation8 + $0xed4] sm:$0xf0] }
 0x3ba   : > { %v11555_v24 = vld [vmem:[#allocation8 + $0x908] sm:$0xf]  ;;  %v11828_v28 = vor.u32 %v13318_v15, %v11827_v55  ;;  %v13466_v1 = vld [vmem:[#allocation8 + $0xfd4] sm:$0xf0] }
 0x3bb   : > { %7916 = vmatpush.bf16.msra.mxu2 %v11748_v26  ;;  %7891 = vmatpush.bf16.msra.mxu0 %v11476_v39  ;;  %v13250_v26 = vld [vmem:[#allocation8 + $0x914] sm:$0xf0]  ;;  %v7677_v35 = vpop.f32.mrf.mxu3  ;;  %v12179_v39 = vld [vmem:[#allocation8 + $0xde8] sm:$0xf] }
 0x3bc   : > { %v11556_v46 = vor.u32 %v13250_v26, %v11555_v24  ;;  %v12435_v11 = vld [vmem:[#allocation8 + $0xfe8] sm:$0xf]  ;;  %v13430_v24 = vld [vmem:[#allocation8 + $0xeb4] sm:$0xf0] }
 0x3bd   : > { %7929 = vmatpush.bf16.msra.mxu3 %v11876_v29  ;;  %7904 = vmatpush.bf16.msra.mxu1 %v11604_v33  ;;  %v13282_v29 = vld [vmem:[#allocation8 + $0xa14] sm:$0xf0]  ;;  %v11428_v33 = vor.u32 %v13218_v17, %v11427_v16  ;;  %v12035_v54 = vld [vmem:[#allocation8 + $0xcc8] sm:$0xf] }
 0x3be   : > { %v12291_v63 = vld [vmem:[#allocation8 + $0xec8] sm:$0xf]  ;;  %v13362_v34 = vld [vmem:[#allocation8 + $0xc94] sm:$0xf0] }
 0x3bf   : > { %7917 = vmatpush.bf16.msra.mxu2 %v11732_v40  ;;  %7892 = vmatpush.bf16.msra.mxu0 %v11460_v32  ;;  %v13406_v40 = vld [vmem:[#allocation8 + $0xdf4] sm:$0xf0]  ;;  %v12292_v55 = vor.u32 %v13434_v10, %v12291_v63  ;;  %v12019_v15 = vld [vmem:[#allocation8 + $0xca8] sm:$0xf]  ;;  %v7624_v10 = vadd.f32 %v14228_v7, %v14226_v37 }
 0x3c0   : > { %v12180_v58 = vor.u32 %v13406_v40, %v12179_v39  ;;  %v13370_v32 = vld [vmem:[#allocation8 + $0xcd4] sm:$0xf0]  ;;  %v12147_v16 = vld [vmem:[#allocation8 + $0xda8] sm:$0xf] }
 0x3c1   : > { %7930 = vmatpush.bf16.msra.mxu3 %v11860_v47  ;;  %7905 = vmatpush.bf16.msra.mxu1 %v11588_v18  ;;  %v11684_v47 = vor.u32 %v13282_v29, %v11683_v27  ;;  %v12163_v18 = vld [vmem:[#allocation8 + $0xdc8] sm:$0xf]  ;;  %v12036_v4 = vor.u32 %v13370_v32, %v12035_v54  ;;  %v13462_v27 = vld [vmem:[#allocation8 + $0xfb4] sm:$0xf0] }
 0x3c2   : > { %v12164_v5 = vor.u32 %v13402_v25, %v12163_v18  ;;  %v12403_v26 = vld [vmem:[#allocation8 + $0xfa8] sm:$0xf]  ;;  %v13394_v53 = vld [vmem:[#allocation8 + $0xd94] sm:$0xf0] }
 0x3c3   : > { %7918 = vmatpush.bf16.msra.mxu2 %v11716_v57  ;;  %7893 = vmatpush.bf16.msra.mxu0 %v11444_v3  ;;  %v12436_v57 = vor.u32 %v13470_v56, %v12435_v11  ;;  %v13366_v3 = vld [vmem:[#allocation8 + $0xcb4] sm:$0xf0]  ;;  %v12003_v30 = vld [vmem:[#allocation8 + $0xc88] sm:$0xf]  ;;  %v12404_v13 = vor.u32 %v13462_v27, %v12403_v26 }
 0x3c4   : > { %v12131_v35 = vld [vmem:[#allocation8 + $0xd88] sm:$0xf]  ;;  %v13458_v44 = vld [vmem:[#allocation8 + $0xf94] sm:$0xf0] }
 0x3c5   : > { %7931 = vmatpush.bf16.msra.mxu3 %v11844_v23  ;;  %7906 = vmatpush.bf16.msra.mxu1 %v11572_v36  ;;  %v12419_v23 = vld [vmem:[#allocation8 + $0xfc8] sm:$0xf]  ;;  %v13398_v36 = vld [vmem:[#allocation8 + $0xdb4] sm:$0xf0]  ;;  %v12132_v11 = vor.u32 %v13394_v53, %v12131_v35 }
 0x3c6   : > { %v12420_v17 = vor.u32 %v13466_v1, %v12419_v23  ;;  %v12148_v62 = vor.u32 %v13398_v36, %v12147_v16  ;;  %v12259_v39 = vld [vmem:[#allocation8 + $0xe88] sm:$0xf]  ;;  %v13390_v54 = vld [vmem:[#allocation8 + $0xd74] sm:$0xf0] }
 0x3c7   : > { %7919 = vmatpush.bf16.msra.mxu2 %v11700_v22  ;;  %7894 = vmatpush.bf16.msra.mxu0 %v11428_v33  ;;  %v12275_v22 = vld [vmem:[#allocation8 + $0xea8] sm:$0xf]  ;;  %v13426_v33 = vld [vmem:[#allocation8 + $0xe94] sm:$0xf0]  ;;  %v14246_v40 = vpop.f32.mrf.mxu0 }
 0x3c8   : > { %v12276_v29 = vor.u32 %v13430_v24, %v12275_v22  ;;  %v12387_v43 = vld [vmem:[#allocation8 + $0xf88] sm:$0xf]  ;;  %v12260_v56 = vor.u32 %v13426_v33, %v12259_v39  ;;  %v13422_v18 = vld [vmem:[#allocation8 + $0xe74] sm:$0xf0]  ;;  %v7637_v22 = vadd.f32 %v14234_v31, %v7624_v10 }
 0x3c9   : > { %7932 = vmatpush.bf16.msra.mxu3 %v11828_v28  ;;  %7907 = vmatpush.bf16.msra.mxu1 %v11556_v46  ;;  %v12020_v28 = vor.u32 %v13366_v3, %v12019_v15  ;;  %v14248_v46 = vpop.f32.mrf.mxu1  ;;  %v12243_v32 = vld [vmem:[#allocation8 + $0xe68] sm:$0xf]  ;;  %v13454_v25 = vld [vmem:[#allocation8 + $0xf74] sm:$0xf0] }
 0x3ca   : > { %7895 = vmatmul.bf16.vlgmr.msra.gmra.mxu0 %v14136_v50  ;;  %v12244_v1 = vor.u32 %v13422_v18, %v12243_v32  ;;  %v13386_v16 = vld [vmem:[#allocation8 + $0xd54] sm:$0xf0]  ;;  %v12355_v37 = vld [vmem:[#allocation8 + $0xf48] sm:$0xf]  ;;  %v7650_v33 = vadd.f32 %v14236_v19, %v7637_v22  ;;  %v13084_v22 = vld [vmem:[#allocation8 + $0x3ec] sm:$0xf] }
 0x3cb   : > { %7920 = vmatpush.bf16.msra.mxu2 %v11684_v47  ;;  %7939 = vmatpush.bf16.msrb.mxu0 %v12052_v51  ;;  %v12004_v47 = vor.u32 %v13362_v34, %v12003_v30  ;;  %v13358_v51 = vld [vmem:[#allocation8 + $0xc74] sm:$0xf0]  ;;  %v11955_v30 = vld [vmem:[#allocation8 + $0xc28] sm:$0xf] }
 0x3cc   : > { %7908 = vmatmul.bf16.vlgmr.msra.gmra.mxu1 %v14138_v42  ;;  %v13418_v36 = vld [vmem:[#allocation8 + $0xe54] sm:$0xf0]  ;;  %v12083_v35 = vld [vmem:[#allocation8 + $0xd28] sm:$0xf] }
 0x3cd   : > { %7933 = vmatpush.bf16.msra.mxu3 %v11812_v8  ;;  %7952 = vmatpush.bf16.msrb.mxu1 %v12180_v58  ;;  %v11987_v8 = vld [vmem:[#allocation8 + $0xc68] sm:$0xf]  ;;  %v13450_v7 = vld [vmem:[#allocation8 + $0xf54] sm:$0xf0] }
 0x3ce   : > { %7921 = vmatmul.bf16.vlgmr.msra.gmra.mxu2 %v14140_v14  ;;  %v12115_v58 = vld [vmem:[#allocation8 + $0xd68] sm:$0xf]  ;;  %v11988_v63 = vor.u32 %v13358_v51, %v11987_v8  ;;  %v13350_v34 = vld [vmem:[#allocation8 + $0xc34] sm:$0xf0]  ;;  %v7663_v8 = vadd.f32 %v14238_v48, %v7650_v33  ;;  %v10645_v48 = vld [vmem:[#allocation8 + $0x1f8] sm:$0xf0] }
 0x3cf   : > { %7965 = vmatpush.bf16.msrb.mxu2 %v12308_v21  ;;  %7940 = vmatpush.bf16.msrb.mxu0 %v12036_v4  ;;  %v12388_v21 = vor.u32 %v13458_v44, %v12387_v43  ;;  %v12116_v23 = vor.u32 %v13390_v54, %v12115_v58  ;;  %v11971_v4 = vld [vmem:[#allocation8 + $0xc48] sm:$0xf]  ;;  %v7690_v26 = vpop.f32.mrf.mxu0  ;;  %v13382_v53 = vld [vmem:[#allocation8 + $0xd34] sm:$0xf0] }
 0x3d0   : > { %7934 = vmatmul.bf16.vlgmr.msra.gmra.mxu3 %v14142_v20  ;;  %v12211_v39 = vld [vmem:[#allocation8 + $0xe28] sm:$0xf]  ;;  %v13414_v31 = vld [vmem:[#allocation8 + $0xe34] sm:$0xf0]  ;;  %v12084_v51 = vor.u32 %v13382_v53, %v12083_v35  ;;  %v10901_v26 = vld [vmem:[#allocation8 + $0x3f8] sm:$0xf0] }
 0x3d1   : > { %7978 = vmatpush.bf16.msrb.mxu3 %v12436_v57  ;;  %7953 = vmatpush.bf16.msrb.mxu1 %v12164_v5  ;;  %v12371_v57 = vld [vmem:[#allocation8 + $0xf68] sm:$0xf]  ;;  %v13354_v5 = vld [vmem:[#allocation8 + $0xc54] sm:$0xf0]  ;;  %v14252_v3 = vpop.f32.mrf.mxu2  ;;  %v7703_v27 = vpop.f32.mrf.mxu1  ;;  %v12212_v58 = vor.u32 %v13414_v31, %v12211_v39  ;;  %v10904_v35 = vor.u32 %v13084_v22, %v10901_v26  ;;  %v10757_v53 = vld [vmem:[#allocation8 + $0x2d8] sm:$0xf0] }
 0x3d2   : > { %v12372_v15 = vor.u32 %v13454_v25, %v12371_v57  ;;  %v12339_v43 = vld [vmem:[#allocation8 + $0xf28] sm:$0xf]  ;;  %v13446_v44 = vld [vmem:[#allocation8 + $0xf34] sm:$0xf0]  ;;  %v13080_v39 = vld [vmem:[#allocation8 + $0x3cc] sm:$0xf] }
 0x3d3   : > { %7966 = vmatpush.bf16.msrb.mxu2 %v12292_v55  ;;  %7941 = vmatpush.bf16.msrb.mxu0 %v12020_v28  ;;  %v12099_v55 = vld [vmem:[#allocation8 + $0xd48] sm:$0xf]  ;;  %v14255_v24 = vpop.f32.mrf.mxu3  ;;  %v11972_v28 = vor.u32 %v13354_v5, %v11971_v4  ;;  %v13378_v54 = vld [vmem:[#allocation8 + $0xd14] sm:$0xf0]  ;;  %v12340_v18 = vor.u32 %v13446_v44, %v12339_v43  ;;  %v13020_v4 = vld [vmem:[#allocation8 + $0x1ec] sm:$0xf] }
 0x3d4   : > { %v12195_v32 = vld [vmem:[#allocation8 + $0xe08] sm:$0xf]  ;;  %v13410_v25 = vld [vmem:[#allocation8 + $0xe14] sm:$0xf0]  ;;  %v10885_v31 = vld [vmem:[#allocation8 + $0x3d8] sm:$0xf0] }
 0x3d5   : > { %7979 = vmatpush.bf16.msrb.mxu3 %v12420_v17  ;;  %7954 = vmatpush.bf16.msrb.mxu1 %v12148_v62  ;;  %v12227_v17 = vld [vmem:[#allocation8 + $0xe48] sm:$0xf]  ;;  %v12100_v62 = vor.u32 %v13386_v16, %v12099_v55  ;;  %v13052_v55 = vld [vmem:[#allocation8 + $0x2ec] sm:$0xf]  ;;  %v7676_v16 = vadd.f32 %v14240_v49, %v7663_v8  ;;  %v10888_v8 = vor.u32 %v13080_v39, %v10885_v31  ;;  %v10437_v31 = vld [vmem:[#allocation8 + $0x58] sm:$0xf0] }
 0x3d6   : > { %v12323_v19 = vld [vmem:[#allocation8 + $0xf08] sm:$0xf]  ;;  %v13048_v49 = vld [vmem:[#allocation8 + $0x2cc] sm:$0xf] }
 0x3d7   : > { %7967 = vmatpush.bf16.msrb.mxu2 %v12276_v29  ;;  %7942 = vmatpush.bf16.msrb.mxu0 %v12004_v47  ;;  %v12228_v29 = vor.u32 %v13418_v36, %v12227_v17  ;;  %v11956_v47 = vor.u32 %v13350_v34, %v11955_v30  ;;  %v12196_v36 = vor.u32 %v13410_v25, %v12195_v32  ;;  %v10501_v30 = vld [vmem:[#allocation8 + $0xd8] sm:$0xf0]  ;;  %v13016_v34 = vld [vmem:[#allocation8 + $0x1cc] sm:$0xf] }
 0x3d8   : > { %v7689_v27 = vadd.f32 %v14246_v40, %v7676_v16  ;;  %v10760_v44 = vor.u32 %v13048_v49, %v10757_v53  ;;  %v10869_v32 = vld [vmem:[#allocation8 + $0x3b8] sm:$0xf0]  ;;  %v12968_v39 = vld [vmem:[#allocation8 + $0x4c] sm:$0xf] }
 0x3d9   : > { %7980 = vmatpush.bf16.msrb.mxu3 %v12404_v13  ;;  %7955 = vmatpush.bf16.msrb.mxu1 %v12132_v11  ;;  %v12356_v13 = vor.u32 %v13450_v7, %v12355_v37  ;;  %v11939_v11 = vld [vmem:[#allocation8 + $0xc08] sm:$0xf]  ;;  %v7716_v57 = vpop.f32.mrf.mxu2 }
 0x3da   : > { %v7702_v43 = vadd.f32 %v14248_v46, %v7689_v27  ;;  %v13076_v46 = vld [vmem:[#allocation8 + $0x3ac] sm:$0xf] }
 0x3db   : > { %7968 = vmatpush.bf16.msrb.mxu2 %v12260_v56  ;;  %7943 = vmatpush.bf16.msrb.mxu0 %v11988_v63  ;;  %v13346_v56 = vld [vmem:[#allocation8 + $0xc14] sm:$0xf0]  ;;  %v7729_v10 = vpop.f32.mrf.mxu3  ;;  %v13004_v27 = vld [vmem:[#allocation8 + $0x16c] sm:$0xf] }
 0x3dc   : > { %v13442_v63 = vld [vmem:[#allocation8 + $0xf14] sm:$0xf0]  ;;  %v11940_v5 = vor.u32 %v13346_v56, %v11939_v11  ;;  %v10485_v11 = vld [vmem:[#allocation8 + $0xb8] sm:$0xf0]  ;;  %v13012_v56 = vld [vmem:[#allocation8 + $0x1ac] sm:$0xf] }
 0x3dd   : > { %7981 = vmatpush.bf16.msrb.mxu3 %v12388_v21  ;;  %7956 = vmatpush.bf16.msrb.mxu1 %v12116_v23  ;;  %v12067_v21 = vld [vmem:[#allocation8 + $0xd08] sm:$0xf]  ;;  %v12988_v23 = vld [vmem:[#allocation8 + $0xec] sm:$0xf]  ;;  %v12324_v37 = vor.u32 %v13442_v63, %v12323_v19  ;;  %v10469_v63 = vld [vmem:[#allocation8 + $0x98] sm:$0xf0] }
 0x3de   : > { %v12068_v17 = vor.u32 %v13378_v54, %v12067_v21  ;;  %v10741_v21 = vld [vmem:[#allocation8 + $0x2b8] sm:$0xf0]  ;;  %v7715_v54 = vadd.f32 %v14252_v3, %v7702_v43  ;;  %v12976_v19 = vld [vmem:[#allocation8 + $0x8c] sm:$0xf] }
 0x3df   : > { %7969 = vmatpush.bf16.msrb.mxu2 %v12244_v1  ;;  %7944 = vmatpush.bf16.msrb.mxu0 %v11972_v28  ;;  %v10517_v1 = vld [vmem:[#allocation8 + $0xf8] sm:$0xf0]  ;;  %v10648_v28 = vor.u32 %v13020_v4, %v10645_v48  ;;  %v13008_v10 = vld [vmem:[#allocation8 + $0x18c] sm:$0xf] }
 0x3e0   : > { %v10520_v7 = vor.u32 %v12988_v23, %v10517_v1  ;;  %v10872_v23 = vor.u32 %v13076_v46, %v10869_v32  ;;  %v10597_v3 = vld [vmem:[#allocation8 + $0x198] sm:$0xf0]  ;;  %v13040_v1 = vld [vmem:[#allocation8 + $0x28c] sm:$0xf]  ;;  %v10440_v46 = vor.u32 %v12968_v39, %v10437_v31 }
 0x3e1   : > { %7982 = vmatpush.bf16.msrb.mxu3 %v12372_v15  ;;  %7957 = vmatpush.bf16.msrb.mxu1 %v12100_v62  ;;  %v10773_v15 = vld [vmem:[#allocation8 + $0x2f8] sm:$0xf0]  ;;  %v10600_v22 = vor.u32 %v13008_v10, %v10597_v3  ;;  %v13028_v3 = vld [vmem:[#allocation8 + $0x22c] sm:$0xf] }
 0x3e2   : > { %v10776_v62 = vor.u32 %v13052_v55, %v10773_v15  ;;  %v10725_v4 = vld [vmem:[#allocation8 + $0x298] sm:$0xf0]  ;;  %v13072_v55 = vld [vmem:[#allocation8 + $0x38c] sm:$0xf] }
 0x3e3   : > { %7970 = vmatpush.bf16.msrb.mxu2 %v12228_v29  ;;  %7945 = vmatpush.bf16.msrb.mxu0 %v11956_v47  ;;  %v12984_v29 = vld [vmem:[#allocation8 + $0xcc] sm:$0xf]  ;;  %v10853_v15 = vld [vmem:[#allocation8 + $0x398] sm:$0xf0]  ;;  %v10728_v26 = vor.u32 %v13040_v1, %v10725_v4 }
 0x3e4   : > { %v10504_v33 = vor.u32 %v12984_v29, %v10501_v30  ;;  %v12980_v47 = vld [vmem:[#allocation8 + $0xac] sm:$0xf]  ;;  %v10709_v30 = vld [vmem:[#allocation8 + $0x278] sm:$0xf0] }
 0x3e5   : > { %7983 = vmatpush.bf16.msrb.mxu3 %v12356_v13  ;;  %7958 = vmatpush.bf16.msrb.mxu1 %v12084_v51  ;;  %v10629_v13 = vld [vmem:[#allocation8 + $0x1d8] sm:$0xf0]  ;;  %v13036_v29 = vld [vmem:[#allocation8 + $0x26c] sm:$0xf] }
 0x3e6   : > { %v10632_v40 = vor.u32 %v13016_v34, %v10629_v13  ;;  %v10613_v51 = vld [vmem:[#allocation8 + $0x1b8] sm:$0xf0]  ;;  %v10712_v53 = vor.u32 %v13036_v29, %v10709_v30  ;;  %v13060_v4 = vld [vmem:[#allocation8 + $0x32c] sm:$0xf] }
 0x3e7   : > { %7971 = vmatpush.bf16.msrb.mxu2 %v12212_v58  ;;  %7946 = vmatpush.bf16.msrb.mxu0 %v11940_v5  ;;  %v13044_v58 = vld [vmem:[#allocation8 + $0x2ac] sm:$0xf]  ;;  %v10616_v57 = vor.u32 %v13012_v56, %v10613_v51  ;;  %v7728_v5 = vadd.f32 %v14255_v24, %v7715_v54  ;;  %v7740_v48 = vpop.f32.mrf.mxu0  ;;  %v10837_v34 = vld [vmem:[#allocation8 + $0x378] sm:$0xf0] }
 0x3e8   : > { %v10744_v25 = vor.u32 %v13044_v58, %v10741_v21  ;;  %v13068_v24 = vld [vmem:[#allocation8 + $0x36c] sm:$0xf]  ;;  %v10821_v21 = vld [vmem:[#allocation8 + $0x358] sm:$0xf0] }
 0x3e9   : > { %7984 = vmatpush.bf16.msrb.mxu3 %v12340_v18  ;;  %7959 = vmatpush.bf16.msrb.mxu1 %v12068_v17  ;;  %v10488_v18 = vor.u32 %v12980_v47, %v10485_v11  ;;  %v7753_v16 = vpop.f32.mrf.mxu1  ;;  %v10472_v17 = vor.u32 %v12976_v19, %v10469_v63  ;;  %v10840_v43 = vor.u32 %v13068_v24, %v10837_v34  ;;  %v13032_v47 = vld [vmem:[#allocation8 + $0x24c] sm:$0xf]  ;;  %v10693_v11 = vld [vmem:[#allocation8 + $0x258] sm:$0xf0] }
 0x3ea   : > { %7947 = vmatmul.bf16.vlgmr.msrb.gmra.mxu0 %v14157_v6  ;;  %v13064_v58 = vld [vmem:[#allocation8 + $0x34c] sm:$0xf]  ;;  %v10421_v19 = vld [vmem:[#allocation8 + $0x38] sm:$0xf0] }
 0x3eb   : > { %7972 = vmatpush.bf16.msrb.mxu2 %v12196_v36  ;;  %7991 = vmatpush.bf16.msra.mxu0 %v10520_v7  ;;  %v7741_v36 = vadd.f32 %v7740_v48, %v7728_v5  ;;  %v10453_v7 = vld [vmem:[#allocation8 + $0x78] sm:$0xf0]  ;;  %v12996_v63 = vld [vmem:[#allocation8 + $0x12c] sm:$0xf]  ;;  %v10824_v10 = vor.u32 %v13064_v58, %v10821_v21 }
 0x3ec   : > { %7960 = vmatmul.bf16.vlgmr.msrb.gmra.mxu1 %v14159_v38  ;;  %v10677_v1 = vld [vmem:[#allocation8 + $0x238] sm:$0xf0]  ;;  %v13116_v30 = vld [vmem:[#allocation8 + $0x4ec] sm:$0xf] }
 0x3ed   : > { %7985 = vmatpush.bf16.msrb.mxu3 %v12324_v37  ;;  %8004 = vmatpush.bf16.msra.mxu1 %v10648_v28  ;;  %v12972_v37 = vld [vmem:[#allocation8 + $0x6c] sm:$0xf]  ;;  %v10856_v28 = vor.u32 %v13072_v55, %v10853_v15  ;;  %v7754_v13 = vadd.f32 %v7753_v16, %v7741_v36  ;;  %v10805_v5 = vld [vmem:[#allocation8 + $0x338] sm:$0xf0] }
 0x3ee   : > { %7973 = vmatmul.bf16.vlgmr.msrb.gmra.mxu2 %v14155_v41  ;;  %v12960_v55 = vld [vmem:[#allocation8 + $0xc] sm:$0xf]  ;;  %v10405_v15 = vld [vmem:[#allocation8 + $0x18] sm:$0xf0] }
 0x3ef   : > { %8017 = vmatpush.bf16.msra.mxu2 %v10776_v62  ;;  %7992 = vmatpush.bf16.msra.mxu0 %v10504_v33  ;;  %v10581_v62 = vld [vmem:[#allocation8 + $0x178] sm:$0xf0]  ;;  %v13000_v33 = vld [vmem:[#allocation8 + $0x14c] sm:$0xf]  ;;  %v7742_v51 = vpop.f32.mrf.mxu0 }
 0x3f0   : > { %7986 = vmatmul.bf16.vlgmr.msrb.gmra.mxu3 %v14165_v12  ;;  %v10584_v49 = vor.u32 %v13004_v27, %v10581_v62  ;;  %v12992_v36 = vld [vmem:[#allocation8 + $0x10c] sm:$0xf]  ;;  %v10661_v27 = vld [vmem:[#allocation8 + $0x218] sm:$0xf0] }
 0x3f1   : > { %8030 = vmatpush.bf16.msra.mxu3 %v10904_v35  ;;  %8005 = vmatpush.bf16.msra.mxu1 %v10632_v40  ;;  %v10456_v35 = vor.u32 %v12972_v37, %v10453_v7  ;;  %v7766_v40 = vpop.f32.mrf.mxu2  ;;  %v7755_v54 = vpop.f32.mrf.mxu1  ;;  %v10808_v37 = vor.u32 %v13060_v4, %v10805_v5  ;;  %v10789_v62 = vld [vmem:[#allocation8 + $0x318] sm:$0xf0]  ;;  %v13148_v34 = vld [vmem:[#allocation8 + $0x5ec] sm:$0xf] }
 0x3f2   : > { %v7767_v56 = vadd.f32 %v7766_v40, %v7754_v13  ;;  %v11029_v24 = vld [vmem:[#allocation8 + $0x4f8] sm:$0xf0]  ;;  %v13144_v51 = vld [vmem:[#allocation8 + $0x5cc] sm:$0xf] }
 0x3f3   : > { %8018 = vmatpush.bf16.msra.mxu2 %v10760_v44  ;;  %7993 = vmatpush.bf16.msra.mxu0 %v10488_v18  ;;  %v10565_v44 = vld [vmem:[#allocation8 + $0x158] sm:$0xf0]  ;;  %v13176_v54 = vld [vmem:[#allocation8 + $0x6cc] sm:$0xf] }
 0x3f4   : > { %v10568_v18 = vor.u32 %v13000_v33, %v10565_v44  ;;  %v11157_v13 = vld [vmem:[#allocation8 + $0x5f8] sm:$0xf0]  ;;  %v13212_v33 = vld [vmem:[#allocation8 + $0x7ec] sm:$0xf]  ;;  %v11032_v44 = vor.u32 %v13116_v30, %v11029_v24 }
 0x3f5   : > { %8031 = vmatpush.bf16.msra.mxu3 %v10888_v8  ;;  %8006 = vmatpush.bf16.msra.mxu1 %v10616_v57  ;;  %v7779_v8 = vpop.f32.mrf.mxu3  ;;  %v10696_v57 = vor.u32 %v13032_v47, %v10693_v11  ;;  %v11160_v47 = vor.u32 %v13148_v34, %v11157_v13  ;;  %v11141_v21 = vld [vmem:[#allocation8 + $0x5d8] sm:$0xf0]  ;;  %v13172_v4 = vld [vmem:[#allocation8 + $0x6ac] sm:$0xf] }
 0x3f6   : > { %v7780_v32 = vadd.f32 %v7779_v8, %v7767_v56  ;;  %v13112_v56 = vld [vmem:[#allocation8 + $0x4cc] sm:$0xf]  ;;  %v11013_v8 = vld [vmem:[#allocation8 + $0x4d8] sm:$0xf0] }
 0x3f7   : > { %8019 = vmatpush.bf16.msra.mxu2 %v10744_v25  ;;  %7994 = vmatpush.bf16.msra.mxu0 %v10472_v17  ;;  %v12964_v25 = vld [vmem:[#allocation8 + $0x2c] sm:$0xf]  ;;  %v10680_v17 = vor.u32 %v13028_v3, %v10677_v1  ;;  %v11125_v1 = vld [vmem:[#allocation8 + $0x5b8] sm:$0xf0] }
 0x3f8   : > { %8200 = vst [vmem:[%s14223_s26 + $0x8] sm:$0xff] %v7780_v32  ;;  %v10424_v48 = vor.u32 %v12964_v25, %v10421_v19  ;;  %v13208_v32 = vld [vmem:[#allocation8 + $0x7cc] sm:$0xf]  ;;  %v11144_v25 = vor.u32 %v13144_v51, %v11141_v21  ;;  %v11253_v5 = vld [vmem:[#allocation8 + $0x6b8] sm:$0xf0] }
 0x3f9   : > { %8032 = vmatpush.bf16.msra.mxu3 %v10872_v23  ;;  %8007 = vmatpush.bf16.msra.mxu1 %v10600_v22  ;;  %v10549_v23 = vld [vmem:[#allocation8 + $0x138] sm:$0xf0]  ;;  %v7768_v7 = vpop.f32.mrf.mxu2  ;;  %v13100_v13 = vld [vmem:[#allocation8 + $0x46c] sm:$0xf] }
 0x3fa   : > { %v10552_v16 = vor.u32 %v12996_v63, %v10549_v23  ;;  %v10533_v22 = vld [vmem:[#allocation8 + $0x118] sm:$0xf0]  ;;  %v13108_v63 = vld [vmem:[#allocation8 + $0x4ac] sm:$0xf] }
 0x3fb   : > { %8020 = vmatpush.bf16.msra.mxu2 %v10728_v26  ;;  %7995 = vmatpush.bf16.msra.mxu0 %v10456_v35  ;;  %v13024_v26 = vld [vmem:[#allocation8 + $0x20c] sm:$0xf]  ;;  %v10408_v35 = vor.u32 %v12960_v55, %v10405_v15  ;;  %v10536_v39 = vor.u32 %v12992_v36, %v10533_v22  ;;  %v11381_v55 = vld [vmem:[#allocation8 + $0x7b8] sm:$0xf0]  ;;  %v11256_v36 = vor.u32 %v13172_v4, %v11253_v5 }
 0x3fc   : > { %v10664_v31 = vor.u32 %v13024_v26, %v10661_v27  ;;  %v13140_v23 = vld [vmem:[#allocation8 + $0x5ac] sm:$0xf]  ;;  %v10981_v26 = vld [vmem:[#allocation8 + $0x498] sm:$0xf0] }
 0x3fd   : > { %8033 = vmatpush.bf16.msra.mxu3 %v10856_v28  ;;  %8008 = vmatpush.bf16.msra.mxu1 %v10584_v49  ;;  %v13056_v28 = vld [vmem:[#allocation8 + $0x30c] sm:$0xf]  ;;  %v7781_v29 = vpop.f32.mrf.mxu3  ;;  %v11237_v27 = vld [vmem:[#allocation8 + $0x698] sm:$0xf0] }
 0x3fe   : > { %v13180_v49 = vld [vmem:[#allocation8 + $0x6ec] sm:$0xf]  ;;  %v10792_v40 = vor.u32 %v13056_v28, %v10789_v62  ;;  %v11365_v62 = vld [vmem:[#allocation8 + $0x798] sm:$0xf0] }
 0x3ff   : > { %8021 = vmatpush.bf16.msra.mxu2 %v10712_v53  ;;  %7996 = vmatpush.bf16.msra.mxu0 %v10440_v46  ;;  %v11285_v53 = vld [vmem:[#allocation8 + $0x6f8] sm:$0xf0]  ;;  %v13104_v22 = vld [vmem:[#allocation8 + $0x48c] sm:$0xf] }
 0x400   : > { %v11288_v11 = vor.u32 %v13180_v49, %v11285_v53  ;;  %v11269_v46 = vld [vmem:[#allocation8 + $0x6d8] sm:$0xf0]  ;;  %v13168_v7 = vld [vmem:[#allocation8 + $0x68c] sm:$0xf]  ;;  %v10984_v24 = vor.u32 %v13104_v22, %v10981_v26 }
 0x401   : > { %8034 = vmatpush.bf16.msra.mxu3 %v10840_v43  ;;  %8009 = vmatpush.bf16.msra.mxu1 %v10568_v18  ;;  %v11413_v43 = vld [vmem:[#allocation8 + $0x7f8] sm:$0xf0]  ;;  %v11272_v19 = vor.u32 %v13176_v54, %v11269_v46  ;;  %v13132_v53 = vld [vmem:[#allocation8 + $0x56c] sm:$0xf] }
 0x402   : > { %v11416_v58 = vor.u32 %v13212_v33, %v11413_v43  ;;  %v11397_v18 = vld [vmem:[#allocation8 + $0x7d8] sm:$0xf0]  ;;  %v13164_v43 = vld [vmem:[#allocation8 + $0x66c] sm:$0xf] }
 0x403   : > { %8022 = vmatpush.bf16.msra.mxu2 %v10696_v57  ;;  %7997 = vmatpush.bf16.msra.mxu0 %v10424_v48  ;;  %v11016_v57 = vor.u32 %v13112_v56, %v11013_v8  ;;  %v11400_v3 = vor.u32 %v13208_v32, %v11397_v18  ;;  %v13204_v48 = vld [vmem:[#allocation8 + $0x7ac] sm:$0xf]  ;;  %v10965_v49 = vld [vmem:[#allocation8 + $0x478] sm:$0xf0] }
 0x404   : > { %v11093_v33 = vld [vmem:[#allocation8 + $0x578] sm:$0xf0]  ;;  %v13096_v51 = vld [vmem:[#allocation8 + $0x44c] sm:$0xf] }
 0x405   : > { %8035 = vmatpush.bf16.msra.mxu3 %v10824_v10  ;;  %8010 = vmatpush.bf16.msra.mxu1 %v10552_v16  ;;  %v10997_v10 = vld [vmem:[#allocation8 + $0x4b8] sm:$0xf0]  ;;  %v14273_v16 = vld [vmem:[#allocation10] sm:$0xf]  ;;  %v11096_v56 = vor.u32 %v13132_v53, %v11093_v33  ;;  %v13128_v21 = vld [vmem:[#allocation8 + $0x54c] sm:$0xf] }
 0x406   : > { %v11000_v15 = vor.u32 %v13108_v63, %v10997_v10  ;;  %v11077_v32 = vld [vmem:[#allocation8 + $0x558] sm:$0xf0]  ;;  %v13160_v18 = vld [vmem:[#allocation8 + $0x64c] sm:$0xf] }
 0x407   : > { %8023 = vmatpush.bf16.msra.mxu2 %v10680_v17  ;;  %7998 = vmatpush.bf16.msra.mxu0 %v10408_v35  ;;  %v4801_v17 = vperm.slane %v14273_v16, 2  ;;  %v7792_v28 = vpop.f32.mrf.mxu0  ;;  %v11240_v35 = vor.u32 %v13168_v7, %v11237_v27  ;;  %v13192_v10 = vld [vmem:[#allocation8 + $0x74c] sm:$0xf]  ;;  %v11080_v5 = vor.u32 %v13128_v21, %v11077_v32  ;;  %v11189_v26 = vld [vmem:[#allocation8 + $0x638] sm:$0xf0] }
 0x408   : > { %v13156_v22 = vld [vmem:[#allocation8 + $0x62c] sm:$0xf]  ;;  %v10917_v27 = vld [vmem:[#allocation8 + $0x418] sm:$0xf0] }
 0x409   : > { %8036 = vmatpush.bf16.msra.mxu3 %v10808_v37  ;;  %8011 = vmatpush.bf16.msra.mxu1 %v10536_v39  ;;  %v13136_v37 = vld [vmem:[#allocation8 + $0x58c] sm:$0xf]  ;;  %v7793_v29 = vadd.f32 %v7792_v28, %v4801_v17  ;;  %v7805_v30 = vpop.f32.mrf.mxu1 }
 0x40a   : > { %7999 = vmatmul.bf16.vlgmr.msra.gmra.mxu0 %v14091_v0  ;;  %v11128_v0 = vor.u32 %v13140_v23, %v11125_v1  ;;  %v11333_v23 = vld [vmem:[#allocation8 + $0x758] sm:$0xf0]  ;;  %v13124_v17 = vld [vmem:[#allocation8 + $0x52c] sm:$0xf] }
 0x40b   : > { %8024 = vmatpush.bf16.msra.mxu2 %v10664_v31  ;;  %8043 = vmatpush.bf16.msrb.mxu0 %v11032_v44  ;;  %v7806_v39 = vadd.f32 %v7805_v30, %v7793_v29  ;;  %v13196_v44 = vld [vmem:[#allocation8 + $0x76c] sm:$0xf]  ;;  %v11045_v29 = vld [vmem:[#allocation8 + $0x518] sm:$0xf0] }
 0x40c   : > { %8012 = vmatmul.bf16.vlgmr.msra.gmra.mxu1 %v14093_v59  ;;  %v11384_v59 = vor.u32 %v13204_v48, %v11381_v55  ;;  %v13092_v55 = vld [vmem:[#allocation8 + $0x42c] sm:$0xf] }
 0x40d   : > { %8037 = vmatpush.bf16.msra.mxu3 %v10792_v40  ;;  %8056 = vmatpush.bf16.msrb.mxu1 %v11160_v47  ;;  %v11221_v40 = vld [vmem:[#allocation8 + $0x678] sm:$0xf0]  ;;  %v13088_v7 = vld [vmem:[#allocation8 + $0x40c] sm:$0xf] }
 0x40e   : > { %8025 = vmatmul.bf16.vlgmr.msra.gmra.mxu2 %v14095_v45  ;;  %v11109_v45 = vld [vmem:[#allocation8 + $0x598] sm:$0xf0]  ;;  %v11224_v8 = vor.u32 %v13164_v43, %v11221_v40  ;;  %v13152_v30 = vld [vmem:[#allocation8 + $0x60c] sm:$0xf]  ;;  %v10920_v43 = vor.u32 %v13088_v7, %v10917_v27 }
 0x40f   : > { %8069 = vmatpush.bf16.msrb.mxu2 %v11288_v11  ;;  %8044 = vmatpush.bf16.msrb.mxu0 %v11016_v57  ;;  %v11112_v34 = vor.u32 %v13136_v37, %v11109_v45  ;;  %v11349_v47 = vld [vmem:[#allocation8 + $0x778] sm:$0xf0]  ;;  %v10968_v11 = vor.u32 %v13100_v13, %v10965_v49  ;;  %v7794_v63 = vpop.f32.mrf.mxu0  ;;  %v13188_v37 = vld [vmem:[#allocation8 + $0x72c] sm:$0xf] }
 0x410   : > { %8038 = vmatmul.bf16.vlgmr.msra.gmra.mxu3 %v14097_v52  ;;  %v13200_v52 = vld [vmem:[#allocation8 + $0x78c] sm:$0xf]  ;;  %v11352_v54 = vor.u32 %v13196_v44, %v11349_v47  ;;  %v11205_v57 = vld [vmem:[#allocation8 + $0x658] sm:$0xf0] }
 0x411   : > { %8082 = vmatpush.bf16.msrb.mxu3 %v11416_v58  ;;  %8057 = vmatpush.bf16.msrb.mxu1 %v11144_v25  ;;  %v11368_v31 = vor.u32 %v13200_v52, %v11365_v62  ;;  %v10949_v58 = vld [vmem:[#allocation8 + $0x458] sm:$0xf0]  ;;  %v7818_v46 = vpop.f32.mrf.mxu2  ;;  %v11208_v48 = vor.u32 %v13160_v18, %v11205_v57  ;;  %v11192_v52 = vor.u32 %v13156_v22, %v11189_v26  ;;  %v13120_v62 = vld [vmem:[#allocation8 + $0x50c] sm:$0xf] }
 0x412   : > { %v7819_v25 = vadd.f32 %v7818_v46, %v7806_v39  ;;  %v10952_v1 = vor.u32 %v13096_v51, %v10949_v58  ;;  %v13184_v13 = vld [vmem:[#allocation8 + $0x70c] sm:$0xf]  ;;  %v11301_v49 = vld [vmem:[#allocation8 + $0x718] sm:$0xf0] }
 0x413   : > { %8070 = vmatpush.bf16.msrb.mxu2 %v11272_v19  ;;  %8045 = vmatpush.bf16.msrb.mxu0 %v11000_v15  ;;  %v7831_v19 = vpop.f32.mrf.mxu3  ;;  %v10933_v15 = vld [vmem:[#allocation8 + $0x438] sm:$0xf0]  ;;  %v13244_v39 = vld [vmem:[#allocation8 + $0x8ec] sm:$0xf]  ;;  %v11304_v58 = vor.u32 %v13184_v13, %v11301_v49 }
 0x414   : > { %v14276_v4 = vadd.f32 %v7831_v19, %v7819_v25  ;;  %v10936_v45 = vor.u32 %v13092_v55, %v10933_v15  ;;  %v13276_v33 = vld [vmem:[#allocation8 + $0x9ec] sm:$0xf]  ;;  %v11669_v40 = vld [vmem:[#allocation8 + $0x9f8] sm:$0xf0] }
 0x415   : > { %8083 = vmatpush.bf16.msrb.mxu3 %v11400_v3  ;;  %8058 = vmatpush.bf16.msrb.mxu1 %v11128_v0  ;;  %v7807_v3 = vpop.f32.mrf.mxu1  ;;  %v11336_v0 = vor.u32 %v13192_v10, %v11333_v23  ;;  %v13308_v44 = vld [vmem:[#allocation8 + $0xaec] sm:$0xf]  ;;  %v11797_v47 = vld [vmem:[#allocation8 + $0xaf8] sm:$0xf0] }
 0x416   : > { %v11925_v51 = vld [vmem:[#allocation8 + $0xbf8] sm:$0xf0]  ;;  %v11800_v46 = vor.u32 %v13308_v44, %v11797_v47  ;;  %v13240_v32 = vld [vmem:[#allocation8 + $0x8cc] sm:$0xf] }
 0x417   : > { %8071 = vmatpush.bf16.msrb.mxu2 %v11256_v36  ;;  %8046 = vmatpush.bf16.msrb.mxu0 %v10984_v24  ;;  %v11061_v36 = vld [vmem:[#allocation8 + $0x538] sm:$0xf0]  ;;  %v13272_v57 = vld [vmem:[#allocation8 + $0x9cc] sm:$0xf] }
 0x418   : > { %v11064_v28 = vor.u32 %v13124_v17, %v11061_v36  ;;  %v11525_v18 = vld [vmem:[#allocation8 + $0x8d8] sm:$0xf0]  ;;  %v13304_v63 = vld [vmem:[#allocation8 + $0xacc] sm:$0xf] }
 0x419   : > { %8084 = vmatpush.bf16.msrb.mxu3 %v11384_v59  ;;  %8059 = vmatpush.bf16.msrb.mxu1 %v11112_v34  ;;  %v11317_v59 = vld [vmem:[#allocation8 + $0x738] sm:$0xf0]  ;;  %v7820_v34 = vpop.f32.mrf.mxu2  ;;  %v13336_v23 = vld [vmem:[#allocation8 + $0xbcc] sm:$0xf] }
 0x41a   : > { %v11320_v24 = vor.u32 %v13188_v37, %v11317_v59  ;;  %v11653_v19 = vld [vmem:[#allocation8 + $0x9d8] sm:$0xf0]  ;;  %v13236_v55 = vld [vmem:[#allocation8 + $0x8ac] sm:$0xf] }
 0x41b   : > { %8072 = vmatpush.bf16.msrb.mxu2 %v11240_v35  ;;  %8047 = vmatpush.bf16.msrb.mxu0 %v10968_v11  ;;  %v11173_v35 = vld [vmem:[#allocation8 + $0x618] sm:$0xf0]  ;;  %v7833_v53 = vpop.f32.mrf.mxu3  ;;  %v11048_v11 = vor.u32 %v13120_v62, %v11045_v29  ;;  %v13268_v17 = vld [vmem:[#allocation8 + $0x9ac] sm:$0xf] }
 0x41c   : > { %v11781_v10 = vld [vmem:[#allocation8 + $0xad8] sm:$0xf0]  ;;  %v13300_v22 = vld [vmem:[#allocation8 + $0xaac] sm:$0xf] }
 0x41d   : > { %8085 = vmatpush.bf16.msrb.mxu3 %v11368_v31  ;;  %8060 = vmatpush.bf16.msrb.mxu1 %v11096_v56  ;;  %v11541_v31 = vld [vmem:[#allocation8 + $0x8f8] sm:$0xf0]  ;;  %v11176_v56 = vor.u32 %v13152_v30, %v11173_v35  ;;  %v13332_v37 = vld [vmem:[#allocation8 + $0xbac] sm:$0xf] }
 0x41e   : > { %v11544_v21 = vor.u32 %v13244_v39, %v11541_v31  ;;  %v11909_v3 = vld [vmem:[#allocation8 + $0xbd8] sm:$0xf0]  ;;  %v13296_v30 = vld [vmem:[#allocation8 + $0xa8c] sm:$0xf] }
 0x41f   : > { %8073 = vmatpush.bf16.msrb.mxu2 %v11224_v8  ;;  %8048 = vmatpush.bf16.msrb.mxu0 %v10952_v1  ;;  %v13340_v8 = vld [vmem:[#allocation8 + $0xbec] sm:$0xf]  ;;  %v11528_v1 = vor.u32 %v13240_v32, %v11525_v18  ;;  %v11509_v15 = vld [vmem:[#allocation8 + $0x8b8] sm:$0xf0] }
 0x420   : > { %v11928_v25 = vor.u32 %v13340_v8, %v11925_v51  ;;  %v11637_v36 = vld [vmem:[#allocation8 + $0x9b8] sm:$0xf0]  ;;  %v13228_v53 = vld [vmem:[#allocation8 + $0x86c] sm:$0xf] }
 0x421   : > { %8086 = vmatpush.bf16.msrb.mxu3 %v11352_v54  ;;  %8061 = vmatpush.bf16.msrb.mxu1 %v11080_v5  ;;  %v11672_v54 = vor.u32 %v13276_v33, %v11669_v40  ;;  %v11656_v5 = vor.u32 %v13272_v57, %v11653_v19  ;;  %v11765_v26 = vld [vmem:[#allocation8 + $0xab8] sm:$0xf0]  ;;  %v11640_v7 = vor.u32 %v13268_v17, %v11637_v36  ;;  %v13260_v31 = vld [vmem:[#allocation8 + $0x96c] sm:$0xf] }
 0x422   : > { %v11893_v59 = vld [vmem:[#allocation8 + $0xbb8] sm:$0xf0]  ;;  %v11768_v27 = vor.u32 %v13300_v22, %v11765_v26  ;;  %v13292_v40 = vld [vmem:[#allocation8 + $0xa6c] sm:$0xf] }
 0x423   : > { %8074 = vmatpush.bf16.msrb.mxu2 %v11208_v48  ;;  %8049 = vmatpush.bf16.msrb.mxu0 %v10936_v45  ;;  %v11784_v48 = vor.u32 %v13304_v63, %v11781_v10  ;;  %v11512_v45 = vor.u32 %v13236_v55, %v11509_v15  ;;  %v11896_v62 = vor.u32 %v13332_v37, %v11893_v59  ;;  %v11621_v29 = vld [vmem:[#allocation8 + $0x998] sm:$0xf0]  ;;  %v13324_v47 = vld [vmem:[#allocation8 + $0xb6c] sm:$0xf] }
 0x424   : > { %v11877_v34 = vld [vmem:[#allocation8 + $0xb98] sm:$0xf0]  ;;  %v13288_v57 = vld [vmem:[#allocation8 + $0xa4c] sm:$0xf] }
 0x425   : > { %8087 = vmatpush.bf16.msrb.mxu3 %v11336_v0  ;;  %8062 = vmatpush.bf16.msrb.mxu1 %v11064_v28  ;;  %v11912_v0 = vor.u32 %v13336_v23, %v11909_v3  ;;  %v13232_v28 = vld [vmem:[#allocation8 + $0x88c] sm:$0xf]  ;;  %v11477_v39 = vld [vmem:[#allocation8 + $0x878] sm:$0xf0] }
 0x426   : > { %v11733_v44 = vld [vmem:[#allocation8 + $0xa78] sm:$0xf0]  ;;  %v13320_v10 = vld [vmem:[#allocation8 + $0xb4c] sm:$0xf] }
 0x427   : > { %8075 = vmatpush.bf16.msrb.mxu2 %v11192_v52  ;;  %8050 = vmatpush.bf16.msrb.mxu0 %v10920_v43  ;;  %v13264_v52 = vld [vmem:[#allocation8 + $0x98c] sm:$0xf]  ;;  %v11605_v43 = vld [vmem:[#allocation8 + $0x978] sm:$0xf0]  ;;  %v11736_v51 = vor.u32 %v13292_v40, %v11733_v44 }
 0x428   : > { %v11624_v13 = vor.u32 %v13264_v52, %v11621_v29  ;;  %v11608_v8 = vor.u32 %v13260_v31, %v11605_v43  ;;  %v11589_v18 = vld [vmem:[#allocation8 + $0x958] sm:$0xf0]  ;;  %v13220_v55 = vld [vmem:[#allocation8 + $0x82c] sm:$0xf] }
 0x429   : > { %8088 = vmatpush.bf16.msrb.mxu3 %v11320_v24  ;;  %8063 = vmatpush.bf16.msrb.mxu1 %v11048_v11  ;;  %v14282_v24 = vpop.f32.mrf.mxu0  ;;  %v11861_v11 = vld [vmem:[#allocation8 + $0xb78] sm:$0xf0]  ;;  %v13252_v17 = vld [vmem:[#allocation8 + $0x92c] sm:$0xf] }
 0x42a   : > { %8051 = vmatmul.bf16.vlgmr.msrb.gmra.mxu0 %v14112_v61  ;;  %v11493_v61 = vld [vmem:[#allocation8 + $0x898] sm:$0xf0]  ;;  %v13284_v22 = vld [vmem:[#allocation8 + $0xa2c] sm:$0xf] }
 0x42b   : > { %8076 = vmatpush.bf16.msrb.mxu2 %v11176_v56  ;;  %8095 = vmatpush.bf16.msra.mxu0 %v11544_v21  ;;  %v11496_v35 = vor.u32 %v13232_v28, %v11493_v61  ;;  %v11480_v56 = vor.u32 %v13228_v53, %v11477_v39  ;;  %v11461_v21 = vld [vmem:[#allocation8 + $0x858] sm:$0xf0]  ;;  %v13316_v37 = vld [vmem:[#allocation8 + $0xb2c] sm:$0xf] }
 0x42c   : > { %8064 = vmatmul.bf16.vlgmr.msrb.gmra.mxu1 %v14114_v2  ;;  %v11749_v2 = vld [vmem:[#allocation8 + $0xa98] sm:$0xf0]  ;;  %v13248_v52 = vld [vmem:[#allocation8 + $0x90c] sm:$0xf] }
 0x42d   : > { %8089 = vmatpush.bf16.msrb.mxu3 %v11304_v58  ;;  %8108 = vmatpush.bf16.msra.mxu1 %v11672_v54  ;;  %v11752_v49 = vor.u32 %v13296_v30, %v11749_v2  ;;  %v13224_v58 = vld [vmem:[#allocation8 + $0x84c] sm:$0xf]  ;;  %v11845_v23 = vld [vmem:[#allocation8 + $0xb58] sm:$0xf0] }
 0x42e   : > { %8077 = vmatmul.bf16.vlgmr.msrb.gmra.mxu2 %v14116_v60  ;;  %v13328_v60 = vld [vmem:[#allocation8 + $0xb8c] sm:$0xf]  ;;  %v11445_v15 = vld [vmem:[#allocation8 + $0x838] sm:$0xf0] }
 0x42f   : > { %8121 = vmatpush.bf16.msra.mxu2 %v11800_v46  ;;  %8096 = vmatpush.bf16.msra.mxu0 %v11528_v1  ;;  %v11880_v33 = vor.u32 %v13328_v60, %v11877_v34  ;;  %v13256_v54 = vld [vmem:[#allocation8 + $0x94c] sm:$0xf]  ;;  %v11864_v46 = vor.u32 %v13324_v47, %v11861_v11  ;;  %v11464_v1 = vor.u32 %v13224_v58, %v11461_v21  ;;  %v11573_v36 = vld [vmem:[#allocation8 + $0x938] sm:$0xf0] }
 0x430   : > { %8090 = vmatmul.bf16.vlgmr.msrb.gmra.mxu3 %v14118_v9  ;;  %v14284_v9 = vpop.f32.mrf.mxu1  ;;  %v11701_v26 = vld [vmem:[#allocation8 + $0xa38] sm:$0xf0]  ;;  %v11576_v28 = vor.u32 %v13252_v17, %v11573_v36  ;;  %v13280_v29 = vld [vmem:[#allocation8 + $0xa0c] sm:$0xf] }
 0x431   : > { %8134 = vmatpush.bf16.msra.mxu3 %v11928_v25  ;;  %8109 = vmatpush.bf16.msra.mxu1 %v11656_v5  ;;  %v14286_v32 = vpop.f32.mrf.mxu2  ;;  %v11717_v25 = vld [vmem:[#allocation8 + $0xa58] sm:$0xf0]  ;;  %v7846_v63 = vpop.f32.mrf.mxu0  ;;  %v11592_v5 = vor.u32 %v13256_v54, %v11589_v18  ;;  %v11704_v61 = vor.u32 %v13284_v22, %v11701_v26  ;;  %v13312_v34 = vld [vmem:[#allocation8 + $0xb0c] sm:$0xf] }
 0x432   : > { %v11829_v59 = vld [vmem:[#allocation8 + $0xb38] sm:$0xf0]  ;;  %v13404_v39 = vld [vmem:[#allocation8 + $0xdec] sm:$0xf] }
 0x433   : > { %8122 = vmatpush.bf16.msra.mxu2 %v11784_v48  ;;  %8097 = vmatpush.bf16.msra.mxu0 %v11512_v45  ;;  %v14288_v19 = vpop.f32.mrf.mxu3  ;;  %v11720_v48 = vor.u32 %v13288_v57, %v11717_v25  ;;  %v11448_v45 = vor.u32 %v13220_v55, %v11445_v15  ;;  %v11832_v30 = vor.u32 %v13316_v37, %v11829_v59  ;;  %v11685_v60 = vld [vmem:[#allocation8 + $0xa18] sm:$0xf0]  ;;  %v13436_v43 = vld [vmem:[#allocation8 + $0xeec] sm:$0xf] }
 0x434   : > { %v12053_v53 = vld [vmem:[#allocation8 + $0xcf8] sm:$0xf0]  ;;  %v11688_v47 = vor.u32 %v13280_v29, %v11685_v60  ;;  %v13468_v11 = vld [vmem:[#allocation8 + $0xfec] sm:$0xf] }
 0x435   : > { %8135 = vmatpush.bf16.msra.mxu3 %v11912_v0  ;;  %8110 = vmatpush.bf16.msra.mxu1 %v11640_v7  ;;  %v11848_v0 = vor.u32 %v13320_v10, %v11845_v23  ;;  %v13216_v7 = vld [vmem:[#allocation8 + $0x80c] sm:$0xf]  ;;  %v12309_v40 = vld [vmem:[#allocation8 + $0xef8] sm:$0xf0] }
 0x436   : > { %v12312_v21 = vor.u32 %v13436_v43, %v12309_v40  ;;  %v13368_v54 = vld [vmem:[#allocation8 + $0xccc] sm:$0xf]  ;;  %v12165_v25 = vld [vmem:[#allocation8 + $0xdd8] sm:$0xf0] }
 0x437   : > { %8123 = vmatpush.bf16.msra.mxu2 %v11768_v27  ;;  %8098 = vmatpush.bf16.msra.mxu0 %v11496_v35  ;;  %v11429_v27 = vld [vmem:[#allocation8 + $0x818] sm:$0xf0]  ;;  %v13400_v18 = vld [vmem:[#allocation8 + $0xdcc] sm:$0xf] }
 0x438   : > { %v7859_v3 = vpop.f32.mrf.mxu1  ;;  %v11813_v35 = vld [vmem:[#allocation8 + $0xb18] sm:$0xf0]  ;;  %v11432_v31 = vor.u32 %v13216_v7, %v11429_v27  ;;  %v13432_v63 = vld [vmem:[#allocation8 + $0xecc] sm:$0xf] }
 0x439   : > { %8136 = vmatpush.bf16.msra.mxu3 %v11896_v62  ;;  %8111 = vmatpush.bf16.msra.mxu1 %v11624_v13  ;;  %v11557_v62 = vld [vmem:[#allocation8 + $0x918] sm:$0xf0]  ;;  %v7872_v2 = vpop.f32.mrf.mxu2  ;;  %v13464_v23 = vld [vmem:[#allocation8 + $0xfcc] sm:$0xf] }
 0x43a   : > { %v11560_v44 = vor.u32 %v13248_v52, %v11557_v62  ;;  %v12293_v10 = vld [vmem:[#allocation8 + $0xed8] sm:$0xf0]  ;;  %v13364_v55 = vld [vmem:[#allocation8 + $0xcac] sm:$0xf] }
 0x43b   : > { %8124 = vmatpush.bf16.msra.mxu2 %v11752_v49  ;;  %8099 = vmatpush.bf16.msra.mxu0 %v11480_v56  ;;  %v7885_v13 = vpop.f32.mrf.mxu3  ;;  %v13372_v49 = vld [vmem:[#allocation8 + $0xcec] sm:$0xf]  ;;  %v12437_v56 = vld [vmem:[#allocation8 + $0xff8] sm:$0xf0] }
 0x43c   : > { %v12440_v57 = vor.u32 %v13468_v11, %v12437_v56  ;;  %v12421_v3 = vld [vmem:[#allocation8 + $0xfd8] sm:$0xf0]  ;;  %v13396_v17 = vld [vmem:[#allocation8 + $0xdac] sm:$0xf] }
 0x43d   : > { %8137 = vmatpush.bf16.msra.mxu3 %v11880_v33  ;;  %8112 = vmatpush.bf16.msra.mxu1 %v11608_v8  ;;  %v12181_v33 = vld [vmem:[#allocation8 + $0xdf8] sm:$0xf0]  ;;  %v11816_v8 = vor.u32 %v13312_v34, %v11813_v35  ;;  %v13428_v22 = vld [vmem:[#allocation8 + $0xeac] sm:$0xf] }
 0x43e   : > { %v12184_v58 = vor.u32 %v13404_v39, %v12181_v33  ;;  %v12021_v15 = vld [vmem:[#allocation8 + $0xcb8] sm:$0xf0]  ;;  %v13460_v37 = vld [vmem:[#allocation8 + $0xfac] sm:$0xf] }
 0x43f   : > { %8125 = vmatpush.bf16.msra.mxu2 %v11736_v51  ;;  %8100 = vmatpush.bf16.msra.mxu0 %v11464_v1  ;;  %v12056_v51 = vor.u32 %v13372_v49, %v12053_v53  ;;  %v12149_v36 = vld [vmem:[#allocation8 + $0xdb8] sm:$0xf0]  ;;  %v13424_v29 = vld [vmem:[#allocation8 + $0xe8c] sm:$0xf] }
 0x440   : > { %v12277_v26 = vld [vmem:[#allocation8 + $0xeb8] sm:$0xf0]  ;;  %v12152_v7 = vor.u32 %v13396_v17, %v12149_v36  ;;  %v13356_v13 = vld [vmem:[#allocation8 + $0xc6c] sm:$0xf] }
 0x441   : > { %8138 = vmatpush.bf16.msra.mxu3 %v11864_v46  ;;  %8113 = vmatpush.bf16.msra.mxu1 %v11592_v5  ;;  %v12037_v46 = vld [vmem:[#allocation8 + $0xcd8] sm:$0xf0]  ;;  %v12168_v5 = vor.u32 %v13400_v18, %v12165_v25  ;;  %v12280_v27 = vor.u32 %v13428_v22, %v12277_v26  ;;  %v13388_v53 = vld [vmem:[#allocation8 + $0xd6c] sm:$0xf]  ;;  %v7845_v25 = vadd.f32 %v14282_v24, %v14276_v4 }
 0x442   : > { %v12040_v1 = vor.u32 %v13368_v54, %v12037_v46  ;;  %v12405_v59 = vld [vmem:[#allocation8 + $0xfb8] sm:$0xf0]  ;;  %v13420_v33 = vld [vmem:[#allocation8 + $0xe6c] sm:$0xf] }
 0x443   : > { %8126 = vmatpush.bf16.msra.mxu2 %v11720_v48  ;;  %8101 = vmatpush.bf16.msra.mxu0 %v11448_v45  ;;  %v12296_v48 = vor.u32 %v13432_v63, %v12293_v10  ;;  %v12024_v45 = vor.u32 %v13364_v55, %v12021_v15  ;;  %v12408_v52 = vor.u32 %v13460_v37, %v12405_v59  ;;  %v12133_v62 = vld [vmem:[#allocation8 + $0xd98] sm:$0xf0]  ;;  %v13452_v40 = vld [vmem:[#allocation8 + $0xf6c] sm:$0xf] }
 0x444   : > { %v12389_v2 = vld [vmem:[#allocation8 + $0xf98] sm:$0xf0]  ;;  %v13416_v18 = vld [vmem:[#allocation8 + $0xe4c] sm:$0xf]  ;;  %v7858_v4 = vadd.f32 %v14284_v9, %v7845_v25 }
 0x445   : > { %8139 = vmatpush.bf16.msra.mxu3 %v11848_v0  ;;  %8114 = vmatpush.bf16.msra.mxu1 %v11576_v28  ;;  %v12424_v0 = vor.u32 %v13464_v23, %v12421_v3  ;;  %v13360_v28 = vld [vmem:[#allocation8 + $0xc8c] sm:$0xf]  ;;  %v11989_v49 = vld [vmem:[#allocation8 + $0xc78] sm:$0xf0] }
 0x446   : > { %v12245_v43 = vld [vmem:[#allocation8 + $0xe78] sm:$0xf0]  ;;  %v13448_v23 = vld [vmem:[#allocation8 + $0xf4c] sm:$0xf] }
 0x447   : > { %8127 = vmatpush.bf16.msra.mxu2 %v11704_v61  ;;  %8102 = vmatpush.bf16.msra.mxu0 %v11432_v31  ;;  %v13392_v61 = vld [vmem:[#allocation8 + $0xd8c] sm:$0xf]  ;;  %v12117_v31 = vld [vmem:[#allocation8 + $0xd78] sm:$0xf0]  ;;  %v12248_v56 = vor.u32 %v13420_v33, %v12245_v43 }
 0x448   : > { %v12136_v34 = vor.u32 %v13392_v61, %v12133_v62  ;;  %v12120_v11 = vor.u32 %v13388_v53, %v12117_v31  ;;  %v12101_v46 = vld [vmem:[#allocation8 + $0xd58] sm:$0xf0]  ;;  %v13348_v15 = vld [vmem:[#allocation8 + $0xc2c] sm:$0xf] }
 0x449   : > { %8140 = vmatpush.bf16.msra.mxu3 %v11832_v30  ;;  %8115 = vmatpush.bf16.msra.mxu1 %v11560_v44  ;;  %v14294_v30 = vpop.f32.mrf.mxu0  ;;  %v12373_v44 = vld [vmem:[#allocation8 + $0xf78] sm:$0xf0]  ;;  %v13412_v26 = vld [vmem:[#allocation8 + $0xe2c] sm:$0xf] }
 0x44a   : > { %8103 = vmatmul.bf16.vlgmr.msra.gmra.mxu0 %v14136_v50  ;;  %v12005_v50 = vld [vmem:[#allocation8 + $0xc98] sm:$0xf0]  ;;  %v13444_v24 = vld [vmem:[#allocation8 + $0xf2c] sm:$0xf] }
 0x44b   : > { %8128 = vmatpush.bf16.msra.mxu2 %v11688_v47  ;;  %8147 = vmatpush.bf16.msrb.mxu0 %v12056_v51  ;;  %v12008_v60 = vor.u32 %v13360_v28, %v12005_v50  ;;  %v11992_v47 = vor.u32 %v13356_v13, %v11989_v49  ;;  %v11973_v51 = vld [vmem:[#allocation8 + $0xc58] sm:$0xf0]  ;;  %v13344_v50 = vld [vmem:[#allocation8 + $0xc0c] sm:$0xf] }
 0x44c   : > { %8116 = vmatmul.bf16.vlgmr.msra.gmra.mxu1 %v14138_v42  ;;  %v12261_v42 = vld [vmem:[#allocation8 + $0xe98] sm:$0xf0] }
 0x44d   : > { %8141 = vmatpush.bf16.msra.mxu3 %v11816_v8  ;;  %8160 = vmatpush.bf16.msrb.mxu1 %v12184_v58  ;;  %v12264_v35 = vor.u32 %v13424_v29, %v12261_v42  ;;  %v13352_v8 = vld [vmem:[#allocation8 + $0xc4c] sm:$0xf]  ;;  %v12357_v3 = vld [vmem:[#allocation8 + $0xf58] sm:$0xf0] }
 0x44e   : > { %8129 = vmatmul.bf16.vlgmr.msra.gmra.mxu2 %v14140_v14  ;;  %v13456_v14 = vld [vmem:[#allocation8 + $0xf8c] sm:$0xf]  ;;  %v11957_v17 = vld [vmem:[#allocation8 + $0xc38] sm:$0xf0]  ;;  %v12360_v36 = vor.u32 %v13448_v23, %v12357_v3 }
 0x44f   : > { %8173 = vmatpush.bf16.msrb.mxu2 %v12312_v21  ;;  %8148 = vmatpush.bf16.msrb.mxu0 %v12040_v1  ;;  %v12392_v39 = vor.u32 %v13456_v14, %v12389_v2  ;;  %v13384_v58 = vld [vmem:[#allocation8 + $0xd4c] sm:$0xf]  ;;  %v12376_v21 = vor.u32 %v13452_v40, %v12373_v44  ;;  %v12085_v22 = vld [vmem:[#allocation8 + $0xd38] sm:$0xf0] }
 0x450   : > { %8142 = vmatmul.bf16.vlgmr.msra.gmra.mxu3 %v14142_v20  ;;  %v14296_v20 = vpop.f32.mrf.mxu1  ;;  %v12213_v37 = vld [vmem:[#allocation8 + $0xe38] sm:$0xf0]  ;;  %v13408_v14 = vld [vmem:[#allocation8 + $0xe0c] sm:$0xf] }
 0x451   : > { %8186 = vmatpush.bf16.msrb.mxu3 %v12440_v57  ;;  %8161 = vmatpush.bf16.msrb.mxu1 %v12168_v5  ;;  %v14298_v54 = vpop.f32.mrf.mxu2  ;;  %v12229_v57 = vld [vmem:[#allocation8 + $0xe58] sm:$0xf0]  ;;  %v7898_v10 = vpop.f32.mrf.mxu0  ;;  %v11976_v5 = vor.u32 %v13352_v8, %v11973_v51  ;;  %v12216_v28 = vor.u32 %v13412_v26, %v12213_v37 }
 0x452   : > { %v12232_v55 = vor.u32 %v13416_v18, %v12229_v57  ;;  %v12341_v59 = vld [vmem:[#allocation8 + $0xf38] sm:$0xf0] }
 0x453   : > { %8174 = vmatpush.bf16.msrb.mxu2 %v12296_v48  ;;  %8149 = vmatpush.bf16.msrb.mxu0 %v12024_v45  ;;  %v7935_v63 = vpop.f32.mrf.mxu3  ;;  %v12104_v48 = vor.u32 %v13384_v58, %v12101_v46  ;;  %v11960_v45 = vor.u32 %v13348_v15, %v11957_v17  ;;  %v11941_v61 = vld [vmem:[#allocation8 + $0xc18] sm:$0xf0]  ;;  %v12344_v62 = vor.u32 %v13444_v24, %v12341_v59 }
 0x454   : > { %v12069_v42 = vld [vmem:[#allocation8 + $0xd18] sm:$0xf0] }
 0x455   : > { %8187 = vmatpush.bf16.msrb.mxu3 %v12424_v0  ;;  %8162 = vmatpush.bf16.msrb.mxu1 %v12152_v7  ;;  %v13380_v0 = vld [vmem:[#allocation8 + $0xd2c] sm:$0xf]  ;;  %v7871_v7 = vadd.f32 %v14286_v32, %v7858_v4  ;;  %v12197_v2 = vld [vmem:[#allocation8 + $0xe18] sm:$0xf0] }
 0x456   : > { %v12200_v49 = vor.u32 %v13408_v14, %v12197_v2 }
 0x457   : > { %8175 = vmatpush.bf16.msrb.mxu2 %v12280_v27  ;;  %8150 = vmatpush.bf16.msrb.mxu0 %v12008_v60  ;;  %v12088_v27 = vor.u32 %v13380_v0, %v12085_v22  ;;  %v13440_v60 = vld [vmem:[#allocation8 + $0xf0c] sm:$0xf]  ;;  %v7884_v32 = vadd.f32 %v14288_v19, %v7871_v7 }
 0x458   : > { %v7911_v1 = vpop.f32.mrf.mxu1 }
 0x459   : > { %8188 = vmatpush.bf16.msrb.mxu3 %v12408_v52  ;;  %8163 = vmatpush.bf16.msrb.mxu1 %v12136_v34  ;;  %v13376_v52 = vld [vmem:[#allocation8 + $0xd0c] sm:$0xf]  ;;  %v7924_v29 = vpop.f32.mrf.mxu2  ;;  %v12325_v34 = vld [vmem:[#allocation8 + $0xf18] sm:$0xf0] }
 0x45a   : > { %v12072_v13 = vor.u32 %v13376_v52, %v12069_v42  ;;  %v12328_v53 = vor.u32 %v13440_v60, %v12325_v34 }
 0x45b   : > { %8176 = vmatpush.bf16.msrb.mxu2 %v12264_v35  ;;  %8151 = vmatpush.bf16.msrb.mxu0 %v11992_v47  ;;  %v7937_v9 = vpop.f32.mrf.mxu3  ;;  %v11944_v35 = vor.u32 %v13344_v50, %v11941_v61 }
 0x45d   : > { %8189 = vmatpush.bf16.msrb.mxu3 %v12392_v39  ;;  %8164 = vmatpush.bf16.msrb.mxu1 %v12120_v11  ;;  %v7897_v39 = vadd.f32 %v14294_v30, %v7884_v32 }
 0x45f   : > { %8177 = vmatpush.bf16.msrb.mxu2 %v12248_v56  ;;  %8152 = vmatpush.bf16.msrb.mxu0 %v11976_v5  ;;  %v7910_v31 = vadd.f32 %v14296_v20, %v7897_v39 }
 0x461   : > { %8190 = vmatpush.bf16.msrb.mxu3 %v12376_v21  ;;  %8165 = vmatpush.bf16.msrb.mxu1 %v12104_v48  ;;  %v7923_v19 = vadd.f32 %v14298_v54, %v7910_v31 }
 0x463   : > { %8178 = vmatpush.bf16.msrb.mxu2 %v12232_v55  ;;  %8153 = vmatpush.bf16.msrb.mxu0 %v11960_v45  ;;  %v7936_v33 = vadd.f32 %v7935_v63, %v7923_v19 }
 0x465   : > { %8191 = vmatpush.bf16.msrb.mxu3 %v12360_v36  ;;  %8166 = vmatpush.bf16.msrb.mxu1 %v12088_v27 }
 0x467   : > { %8179 = vmatpush.bf16.msrb.mxu2 %v12216_v28  ;;  %8154 = vmatpush.bf16.msrb.mxu0 %v11944_v35  ;;  %v7948_v43 = vpop.f32.mrf.mxu0 }
 0x468   : > { %v7949_v40 = vadd.f32 %v7948_v43, %v7936_v33 }
 0x469   : > { %8192 = vmatpush.bf16.msrb.mxu3 %v12344_v62  ;;  %8167 = vmatpush.bf16.msrb.mxu1 %v12072_v13  ;;  %v7961_v30 = vpop.f32.mrf.mxu1 }
 0x46a   : > { %8155 = vmatmul.bf16.vlgmr.msrb.gmra.mxu0 %v14157_v6  ;;  %v7962_v44 = vadd.f32 %v7961_v30, %v7949_v40 }
 0x46b   : > { %8180 = vmatpush.bf16.msrb.mxu2 %v12200_v49 }
 0x46c   : > { %8168 = vmatmul.bf16.vlgmr.msrb.gmra.mxu1 %v14159_v38 }
 0x46d   : > { %8193 = vmatpush.bf16.msrb.mxu3 %v12328_v53 }
 0x46e   : > { %8181 = vmatmul.bf16.vlgmr.msrb.gmra.mxu2 %v14155_v41  ;;  %v4802_v41 = vperm.slane %v14273_v16, 3 }
 0x46f   : > { %v7950_v20 = vpop.f32.mrf.mxu0 }
 0x470   : > { %8194 = vmatmul.bf16.vlgmr.msrb.gmra.mxu3 %v14165_v12 }
 0x471   : > { %v7974_v47 = vpop.f32.mrf.mxu2  ;;  %v7963_v8 = vpop.f32.mrf.mxu1 }
 0x472   : > { %v7975_v11 = vadd.f32 %v7974_v47, %v7962_v44 }
 0x473   : > { %v7987_v56 = vpop.f32.mrf.mxu3 }
 0x474   : > { %v7988_v6 = vadd.f32 %v7987_v56, %v7975_v11 }
 0x476   : > { %8201 = vst [vmem:[%s14223_s26 + $0x10] sm:$0xff] %v7988_v6 }
 0x479   : > { %v7976_v51 = vpop.f32.mrf.mxu2 }
 0x47b   : > { %v7989_v38 = vpop.f32.mrf.mxu3 }
 0x487   : > { %v8000_v58 = vpop.f32.mrf.mxu0 }
 0x488   : > { %v8001_v21 = vadd.f32 %v8000_v58, %v4802_v41 }
 0x489   : > { %v8013_v54 = vpop.f32.mrf.mxu1 }
 0x48a   : > { %v8014_v12 = vadd.f32 %v8013_v54, %v8001_v21 }
 0x48f   : > { %v8002_v25 = vpop.f32.mrf.mxu0 }
 0x491   : > { %v8026_v46 = vpop.f32.mrf.mxu2  ;;  %v8015_v63 = vpop.f32.mrf.mxu1 }
 0x492   : > { %v8027_v18 = vadd.f32 %v8026_v46, %v8014_v12 }
 0x493   : > { %v8039_v57 = vpop.f32.mrf.mxu3 }
 0x494   : > { %v8040_v10 = vadd.f32 %v8039_v57, %v8027_v18 }
 0x499   : > { %v8028_v23 = vpop.f32.mrf.mxu2 }
 0x49b   : > { %v8041_v3 = vpop.f32.mrf.mxu3 }
 0x4a7   : > { %v8052_v1 = vpop.f32.mrf.mxu0 }
 0x4a8   : > { %v8053_v26 = vadd.f32 %v8052_v1, %v8040_v10 }
 0x4a9   : > { %v8065_v5 = vpop.f32.mrf.mxu1 }
 0x4aa   : > { %v8066_v45 = vadd.f32 %v8065_v5, %v8053_v26 }
 0x4af   : > { %v8054_v15 = vpop.f32.mrf.mxu0 }
 0x4b1   : > { %v8078_v48 = vpop.f32.mrf.mxu2  ;;  %v8067_v17 = vpop.f32.mrf.mxu1 }
 0x4b2   : > { %v8079_v7 = vadd.f32 %v8078_v48, %v8066_v45 }
 0x4b3   : > { %v8091_v55 = vpop.f32.mrf.mxu3 }
 0x4b4   : > { %v8092_v50 = vadd.f32 %v8091_v55, %v8079_v7 }
 0x4b9   : > { %v8080_v0 = vpop.f32.mrf.mxu2 }
 0x4bb   : > { %v8093_v16 = vpop.f32.mrf.mxu3 }
 0x4c7   : > { %v8104_v36 = vpop.f32.mrf.mxu0 }
 0x4c8   : > { %v8105_v61 = vadd.f32 %v8104_v36, %v8092_v50 }
 0x4c9   : > { %v8117_v22 = vpop.f32.mrf.mxu1 }
 0x4ca   : > { %v8118_v52 = vadd.f32 %v8117_v22, %v8105_v61 }
 0x4cf   : > { %v8106_v24 = vpop.f32.mrf.mxu0 }
 0x4d1   : > { %v8130_v37 = vpop.f32.mrf.mxu2  ;;  %v8119_v59 = vpop.f32.mrf.mxu1 }
 0x4d2   : > { %v8131_v62 = vadd.f32 %v8130_v37, %v8118_v52 }
 0x4d3   : > { %v8143_v4 = vpop.f32.mrf.mxu3 }
 0x4d4   : > { %v8144_v29 = vadd.f32 %v8143_v4, %v8131_v62 }
 0x4d9   : > { %v8132_v27 = vpop.f32.mrf.mxu2 }
 0x4db   : > { %v8145_v28 = vpop.f32.mrf.mxu3 }
 0x4e7   : > { %v8156_v42 = vpop.f32.mrf.mxu0 }
 0x4e8   : > { %v8157_v2 = vadd.f32 %v8156_v42, %v8144_v29 }
 0x4e9   : > { %v8169_v14 = vpop.f32.mrf.mxu1 }
 0x4ea   : > { %v8170_v9 = vadd.f32 %v8169_v14, %v8157_v2 }
 0x4ef   : > { %v8158_v32 = vpop.f32.mrf.mxu0 }
 0x4f1   : > { %v8182_v60 = vpop.f32.mrf.mxu2  ;;  %v8171_v13 = vpop.f32.mrf.mxu1 }
 0x4f2   : > { %v8183_v34 = vadd.f32 %v8182_v60, %v8170_v9 }
 0x4f3   : > { %v8195_v35 = vpop.f32.mrf.mxu3 }
 0x4f4   : > { %v8196_v49 = vadd.f32 %v8195_v35, %v8183_v34 }
 0x4f6   : > { %8202 = vst [vmem:[%s14223_s26 + $0x18] sm:$0xff] %v8196_v49 }
 0x4f7   : > { %13744 = shalt.err (!%p13741_p9)
}
 0x4f8   : > { %13490 = dma.vmem_to_hbm [thread:$0]  (%p13918_p4), %s8218_s30, 512, %s8220_s9, %s8204_s15  }
 0x4f9   : > { %v8184_v53 = vpop.f32.mrf.mxu2 }
 0x4fb   : > { %v8197_v39 = vpop.f32.mrf.mxu3 }
 0x4fc PF: > { %s8231_s12 = sand.u32 1, %s13779_s18   ;;  %p14362_p10 = scmp.ge.s32.totalorder %s13791_s21, 2 }
 0x4fd   : > { %s8232_s8 = scalar_lea.sflag [#allocation4], %s8231_s12 }
 0x4fe   : > { %p13510_p13 = pnand %p14362_p10, %p13922_p6 }
 0x500   : > { %p13511_p11 = pneg %p13510_p13 }
 0x502   : > { %13774 = dma.done.wait (%p13511_p11), %s8232_s8, 512  }
 0x503   : > { %13776 = vsyncadd (%p13511_p11), %s8232_s8, 4294966784  ;;  %p20_p4 = scmp.ge.s32.totalorder %s13892_s6, 4   ;;  %s14363_s18 = smov %s13783_s19 }
 0x504   : > { %s14364_s19 = smov %s13787_s20  ;;  %s14365_s20 = smov %s13903_s10 }
 0x505   : > { %s14366_s21 = smov %s13892_s6  ;;  %22 = sbr.rel (!%p20_p4) target bundleno = 7 (0x7), region = 101 }
 0x50a   :  { %8238 = vsyncpa [#allocation3], 1 }
 0x50b   :  { %8240 = vsyncpa [#allocation3 + $0x1], 1 }
 0x50c   :  { %8241 = vsyncpa [#allocation6], 1 }
 0x50d   :  { %8242 = vsyncpa [#allocation9], 1 }
 0x50e   :  { %8243 = vsyncpa [#allocation4], 1 }
 0x50f   :  { %8245 = vsyncpa [#allocation4 + $0x1], 1 }

</bundles_post_ra>
